<compile_context>
chip_gen: v6e
topology: v6e:2x2x1
jax: 0.10.0
libtpu: 0.0.40
codegen_flags: <defaults>
</compile_context>

<pallas_src>
import functools

import numpy as np

import jax
import jax.numpy as jnp
from jax import lax
from jax.experimental import pallas as pl
from jax.experimental.pallas import tpu as pltpu

# --------------------------------------------------------------------------
# config (mirrors the nn.Module constructor arguments)
# --------------------------------------------------------------------------
TRANSITION_DIM = 4
BLOCK_OUT_CHANNELS = (8, 32)
SEQ_LEN = 16
BATCH = 2
NUM_GROUPS = 8          # Conv1dBlock default n_groups
GN_EPS = 1e-5

_BUCKETS = (8, 32, 64, 128, 256)     # row buckets for the packed weight slabs
_BF16_BUCKETS = (64, 128, 256)       # big conv-Toeplitz slabs stored as bf16


# --------------------------------------------------------------------------
# static network plan (stage kind, name, Cin, Cout, L_in, L_out)
# --------------------------------------------------------------------------
def _down_len(L):
    # Downsample1D: Conv1d(C, C, 3, stride=2, padding=1)
    return (L + 2 - 3) // 2 + 1


def _make_plan():
    c0, c1 = BLOCK_OUT_CHANNELS
    L = SEQ_LEN
    plan = []
    # down block 0 (transition_dim -> c0), add_downsample=True
    plan.append(("res", "d0r0", TRANSITION_DIM, c0, L, L))
    plan.append(("res", "d0r1", c0, c0, L, L))
    plan.append(("down", "d0dn", c0, c0, L, _down_len(L))); L = _down_len(L)
    # down block 1 (c0 -> c1), final block -> no downsample
    plan.append(("res", "d1r0", c0, c1, L, L))
    plan.append(("res", "d1r1", c1, c1, L, L))
    # ValueFunctionMidBlock1D (c1 -> c1//2 -> c1//4, downsample x2)
    plan.append(("res", "m1r1", c1, c1 // 2, L, L))
    plan.append(("down", "m1dn", c1 // 2, c1 // 2, L, _down_len(L))); L = _down_len(L)
    plan.append(("res", "m2r2", c1 // 2, c1 // 4, L, L))
    plan.append(("down", "m2dn", c1 // 4, c1 // 4, L, _down_len(L))); L = _down_len(L)
    return plan, c1 // 4, L          # plan, final channels, final length


# --------------------------------------------------------------------------
# host-side (numpy) weight folding helpers
# --------------------------------------------------------------------------
def _round_up(n, m):
    return ((n + m - 1) // m) * m


def _conv_matrix_np(w, L_in, stride, padding):
    """Fold Conv1d weights (Cout, Cin, K) into a (Cin*L_in, Cout*L_out) banded
    matrix acting on the channel-major flattened activation: y = x_flat @ M."""
    w = np.asarray(w, np.float32)
    Cout, Cin, K = w.shape
    L_out = (L_in + 2 * padding - K) // stride + 1
    M = np.zeros((Cin * L_in, Cout * L_out), np.float32)
    for k in range(K):
        S = np.zeros((L_in, L_out), np.float32)
        for lo in range(L_out):
            li = lo * stride + k - padding
            if 0 <= li < L_in:
                S[li, lo] = 1.0
        M += np.kron(w[:, :, k].T, S)      # block (ci, co) += w[co, ci, k] * S
    return M


# --------------------------------------------------------------------------
# static layout: where every matrix / vector lives inside the packed operands
# (depends only on the static config, never on parameter values)
# --------------------------------------------------------------------------
class _Layout:
    pass


def _build_layout():
    lay = _Layout()
    plan, c_fin, l_fin = _make_plan()
    c0 = BLOCK_OUT_CHANNELS[0]
    lay.plan = tuple(plan)
    lay.c0, lay.c_fin, lay.l_fin = c0, c_fin, l_fin

    # per-res-block segments of the fused (pre-broadcast over L) time projection
    lay.time_segs, off = {}, 0
    for kind, name, _cin, cout, L_in, _L_out in plan:
        if kind == "res":
            lay.time_segs[name] = (off, cout * L_in)
            off += cout * L_in
    lay.time_cols = off

    mats = [("tm1_w", c0, 4 * c0), ("tm2_w", 4 * c0, c0),
            ("texp_w", c0, lay.time_cols)]
    vecs = [("tm1_b", 4 * c0), ("tm2_b", c0), ("texp_b", lay.time_cols)]
    for kind, name, cin, cout, L_in, L_out in plan:
        if kind == "res":
            mats.append((name + "_ci", cin * L_in, cout * L_in))
            vecs += [(name + "_ci_b", cout * L_in), (name + "_ci_g", cout * L_in),
                     (name + "_ci_beta", cout * L_in)]
            mats.append((name + "_co", cout * L_in, cout * L_in))
            vecs += [(name + "_co_b", cout * L_in), (name + "_co_g", cout * L_in),
                     (name + "_co_beta", cout * L_in)]
            if cin != cout:
                mats.append((name + "_res", cin * L_in, cout * L_in))
                vecs.append((name + "_res_b", cout * L_in))
        else:
            mats.append((name, cin * L_in, cout * L_out))
            vecs.append((name + "_b", cout * L_out))
    fc_in = c_fin * l_fin + c0
    mats += [("fc1_wa", c_fin * l_fin, fc_in // 2), ("fc1_wb", c0, fc_in // 2),
             ("fc2_w", fc_in // 2, 1)]
    vecs += [("fc1_b", fc_in // 2), ("fc2_b", 1)]

    # shape-grouped packing: row bucket + 128-aligned column offsets
    lay.mat_segs, bucket_cols = {}, {}
    for name, r, c in mats:
        b = next(bb for bb in _BUCKETS if bb >= r)
        coff = bucket_cols.get(b, 0)
        lay.mat_segs[name] = (b, r, coff, c)
        bucket_cols[b] = coff + _round_up(c, 128)
    lay.bucket_cols = bucket_cols
    lay.bucket_order = tuple(sorted(bucket_cols))
    lay.bucket_dtype = {b: (jnp.bfloat16 if b in _BF16_BUCKETS else jnp.float32)
                        for b in lay.bucket_order}

    # one packed (1, V) row for all per-channel vectors (128-aligned offsets)
    lay.vec_segs, voff = {}, 0
    for name, n in vecs:
        lay.vec_segs[name] = (voff, n)
        voff += _round_up(n, 128)
    lay.vec_total = voff

    lay.mats = tuple(mats)          # kept for the CostEstimate
    return lay


LAYOUT = _build_layout()


# --------------------------------------------------------------------------
# parameter init (deterministic, synthetic) - same module structure as torch
# --------------------------------------------------------------------------
class KeyGen:
    def __init__(self, seed):
        self.key = jax.random.PRNGKey(seed)

    def __call__(self):
        self.key, sub = jax.random.split(self.key)
        return sub


def _init(kg, shape, scale=0.2):
    return scale * jax.random.normal(kg(), shape, dtype=jnp.float32)


def init_params(seed=0):
    kg = KeyGen(seed)
    c0, _c1 = BLOCK_OUT_CHANNELS
    plan, c_fin, l_fin = _make_plan()
    p = {
        # TimestepEmbedding(8 -> 32 -> 8), act = Mish
        "tm1": {"w": _init(kg, (c0, 4 * c0)), "b": _init(kg, (4 * c0,))},
        "tm2": {"w": _init(kg, (4 * c0, c0)), "b": _init(kg, (c0,))},
    }
    for kind, name, cin, cout, _L_in, _L_out in plan:
        if kind == "res":
            blk = {
                # Conv1dBlock: Conv1d(k=5, pad=2) -> GroupNorm(8) -> Mish
                "ci_w": _init(kg, (cout, cin, 5)), "ci_b": _init(kg, (cout,)),
                "ci_g": jnp.ones((cout,), jnp.float32),
                "ci_beta": jnp.zeros((cout,), jnp.float32),
                "co_w": _init(kg, (cout, cout, 5)), "co_b": _init(kg, (cout,)),
                "co_g": jnp.ones((cout,), jnp.float32),
                "co_beta": jnp.zeros((cout,), jnp.float32),
                # time_emb: Linear(embed_dim=8 -> cout)
                "time_w": _init(kg, (c0, cout)), "time_b": _init(kg, (cout,)),
            }
            if cin != cout:          # residual 1x1 conv
                blk["res_w"] = _init(kg, (cout, cin, 1))
                blk["res_b"] = _init(kg, (cout,))
            p[name] = blk
        else:                        # Downsample1D conv (k=3, stride=2, pad=1)
            p[name] = {"w": _init(kg, (cout, cin, 3)), "b": _init(kg, (cout,))}
    fc_dim = c_fin * l_fin + c0      # = 8*2 + 8 = 24
    p["fc1"] = {"w": _init(kg, (fc_dim, fc_dim // 2)), "b": _init(kg, (fc_dim // 2,))}
    p["fc2"] = {"w": _init(kg, (fc_dim // 2, 1)), "b": _init(kg, (1,))}
    return p


# --------------------------------------------------------------------------
# weight preparation: pure numpy, runs ONCE per parameter set, outside jit
# --------------------------------------------------------------------------
def prepare_operands(params):
    lay = LAYOUT
    slabs = {b: np.zeros((b, lay.bucket_cols[b]), np.float32) for b in lay.bucket_order}
    vec = np.zeros((1, lay.vec_total), np.float32)

    def put_mat(name, m):
        b, r, coff, c = lay.mat_segs[name]
        m = np.asarray(m, np.float32)
        assert m.shape == (r, c), (name, m.shape, (r, c))
        slabs[b][:r, coff:coff + c] = m

    def put_vec(name, v):
        off, n = lay.vec_segs[name]
        v = np.asarray(v, np.float32).reshape(-1)
        assert v.shape[0] == n, (name, v.shape, n)
        vec[0, off:off + n] = v

    put_mat("tm1_w", params["tm1"]["w"]); put_vec("tm1_b", params["tm1"]["b"])
    put_mat("tm2_w", params["tm2"]["w"]); put_vec("tm2_b", params["tm2"]["b"])

    # all per-block time Linear layers, fused and pre-broadcast over L
    texp_w = np.zeros((lay.c0, lay.time_cols), np.float32)
    texp_b = np.zeros((lay.time_cols,), np.float32)
    for kind, name, _cin, _cout, L_in, _L_out in lay.plan:
        if kind != "res":
            continue
        off, n = lay.time_segs[name]
        texp_w[:, off:off + n] = np.repeat(
            np.asarray(params[name]["time_w"], np.float32), L_in, axis=1)
        texp_b[off:off + n] = np.repeat(
            np.asarray(params[name]["time_b"], np.float32), L_in)
    put_mat("texp_w", texp_w); put_vec("texp_b", texp_b)

    for kind, name, cin, cout, L_in, L_out in lay.plan:
        pp = params[name]
        if kind == "res":
            put_mat(name + "_ci", _conv_matrix_np(pp["ci_w"], L_in, 1, 2))
            put_vec(name + "_ci_b", np.repeat(np.asarray(pp["ci_b"], np.float32), L_in))
            put_vec(name + "_ci_g", np.repeat(np.asarray(pp["ci_g"], np.float32), L_in))
            put_vec(name + "_ci_beta", np.repeat(np.asarray(pp["ci_beta"], np.float32), L_in))
            put_mat(name + "_co", _conv_matrix_np(pp["co_w"], L_in, 1, 2))
            put_vec(name + "_co_b", np.repeat(np.asarray(pp["co_b"], np.float32), L_in))
            put_vec(name + "_co_g", np.repeat(np.asarray(pp["co_g"], np.float32), L_in))
            put_vec(name + "_co_beta", np.repeat(np.asarray(pp["co_beta"], np.float32), L_in))
            if cin != cout:
                put_mat(name + "_res", _conv_matrix_np(pp["res_w"], L_in, 1, 0))
                put_vec(name + "_res_b", np.repeat(np.asarray(pp["res_b"], np.float32), L_in))
        else:
            put_mat(name, _conv_matrix_np(pp["w"], L_in, 2, 1))
            put_vec(name + "_b", np.repeat(np.asarray(pp["b"], np.float32), L_out))

    split = lay.c_fin * lay.l_fin
    fc1_w = np.asarray(params["fc1"]["w"], np.float32)
    put_mat("fc1_wa", fc1_w[:split]); put_mat("fc1_wb", fc1_w[split:])
    put_vec("fc1_b", params["fc1"]["b"])
    put_mat("fc2_w", params["fc2"]["w"]); put_vec("fc2_b", params["fc2"]["b"])

    weights = {"vec": jnp.asarray(vec)}
    for b in lay.bucket_order:
        weights["b%d" % b] = jnp.asarray(slabs[b], dtype=lay.bucket_dtype[b])
    return weights


def timestep_sin_embedding(timesteps, dim, max_period=10000.0, shift=1.0):
    """diffusers get_timestep_embedding, flip_sin_to_cos=False, freq_shift=1."""
    half = dim // 2
    exponent = -jnp.log(max_period) * jnp.arange(half, dtype=jnp.float32) / (half - shift)
    freqs = jnp.exp(exponent)
    emb = timesteps.astype(jnp.float32)[:, None] * freqs[None, :]
    return jnp.concatenate([jnp.sin(emb), jnp.cos(emb)], axis=-1)


# --------------------------------------------------------------------------
# the single fused Pallas kernel
# --------------------------------------------------------------------------
def _forward_kernel(*refs, lay):
    nb = len(lay.bucket_order)
    x_ref, sin_ref, vec_ref = refs[0], refs[1], refs[2]
    bucket_refs = dict(zip(lay.bucket_order, refs[3:3 + nb]))
    o_ref = refs[3 + nb]

    def mat(name):
        b, r, coff, c = lay.mat_segs[name]
        return bucket_refs[b][0:r, coff:coff + c]         # static, 128-aligned cols

    def vec(name):
        off, n = lay.vec_segs[name]
        return vec_ref[:, off:off + n]                    # (1, n) static slice

    def mm(a, w):
        if a.dtype != w.dtype:
            a = a.astype(w.dtype)                         # bf16 only at the MXU input
        return jnp.dot(a, w, preferred_element_type=jnp.float32)

    def mish(y):
        # torch.nn.Mish: y * tanh(softplus(y)), softplus threshold 20
        sp = jnp.log(1.0 + jnp.exp(jnp.minimum(y, 20.0)))
        sp = jnp.where(y > 20.0, y, sp)
        return y * jnp.tanh(sp)

    def groupnorm(y, pfx, C, L):
        # channel-major layout => each group is a contiguous cpg*L lane segment;
        # centered mean/var via lane reductions (no constant matrices, no reshapes)
        segw = (C // NUM_GROUPS) * L
        parts = []
        for g in range(NUM_GROUPS):
            seg = y[:, g * segw:(g + 1) * segw]
            mu = jnp.mean(seg, axis=-1, keepdims=True)
            d = seg - mu
            var = jnp.mean(d * d, axis=-1, keepdims=True)
            parts.append(d * lax.rsqrt(var + GN_EPS))
        yn = jnp.concatenate(parts, axis=-1)
        return yn * vec(pfx + "_g") + vec(pfx + "_beta")

    def conv_gn_mish(h, pfx, C, L):
        y = mm(h, mat(pfx)) + vec(pfx + "_b")             # Conv1d as one Toeplitz matmul
        return mish(groupnorm(y, pfx, C, L))

    # ---- time embedding MLP: Linear(8->32) -> Mish -> Linear(32->8) ----
    temb = mm(sin_ref[...], mat("tm1_w")) + vec("tm1_b")
    temb = mm(mish(temb), mat("tm2_w")) + vec("tm2_b")
    # all six per-block time terms (already broadcast over L) in ONE matmul
    t_all = mm(mish(temb), mat("texp_w")) + vec("texp_b")

    # ---- backbone: activations stay as a (B, C*L) f32 slab in vregs/VMEM ----
    h = x_ref[...]
    for kind, name, cin, cout, L_in, _L_out in lay.plan:
        if kind == "res":
            toff, tn = lay.time_segs[name]
            hi = conv_gn_mish(h, name + "_ci", cout, L_in) + t_all[:, toff:toff + tn]
            ho = conv_gn_mish(hi, name + "_co", cout, L_in)
            if cin != cout:
                res = mm(h, mat(name + "_res")) + vec(name + "_res_b")
            else:
                res = h
            h = ho + res
        else:                                              # strided Downsample1D conv
            h = mm(h, mat(name)) + vec(name + "_b")

    # ---- head: concat([h_flat, temb]) folded into two matmuls ----
    z = mish(mm(h, mat("fc1_wa")) + mm(temb, mat("fc1_wb")) + vec("fc1_b"))
    o_ref[...] = mm(z, mat("fc2_w")) + vec("fc2_b")


# --------------------------------------------------------------------------
# full forward (one pallas_call); weights are the pre-packed slabs
# --------------------------------------------------------------------------
@jax.jit
def gap_predictor_forward(weights, x, timesteps):
    lay = LAYOUT
    timesteps = jnp.atleast_1d(timesteps)
    B = x.shape[0]

    sin_emb = timestep_sin_embedding(timesteps, lay.c0).astype(jnp.float32)
    x_flat = x.reshape(B, -1).astype(jnp.float32)          # NCL channel-major flatten

    operands = [x_flat, sin_emb, weights["vec"]] + \
               [weights["b%d" % b] for b in lay.bucket_order]

    flops = int(sum(2 * B * r * c for _n, r, c in lay.mats))
    mish_cols = 4 * lay.c0 + lay.c0 + (lay.c_fin * lay.l_fin + lay.c0) // 2
    mish_cols += sum(2 * cout * L_in for kind, _n, _ci, cout, L_in, _Lo in lay.plan
                     if kind == "res")
    transcendentals = int(3 * B * mish_cols)
    bytes_accessed = int(sum(int(np.prod(o.shape)) * o.dtype.itemsize for o in operands)
                         + B * 4)

    kernel = functools.partial(_forward_kernel, lay=lay)
    return pl.pallas_call(
        kernel,
        out_shape=jax.ShapeDtypeStruct((B, 1), jnp.float32),
        in_specs=[pl.BlockSpec(memory_space=pltpu.MemorySpace.VMEM)] * len(operands),
        out_specs=pl.BlockSpec(memory_space=pltpu.MemorySpace.VMEM),
        cost_estimate=pl.CostEstimate(flops=flops, transcendentals=transcendentals,
                                      bytes_accessed=bytes_accessed),
    )(*operands)


# --------------------------------------------------------------------------
# pure-JAX reference (for correctness check only)
# --------------------------------------------------------------------------
def _reference_forward(params, x, timesteps):
    c0, _ = BLOCK_OUT_CHANNELS
    plan, _, _ = _make_plan()
    timesteps = jnp.atleast_1d(timesteps)
    sin_emb = timestep_sin_embedding(timesteps, c0)

    def mish(y):
        sp = jnp.log(1.0 + jnp.exp(jnp.minimum(y, 20.0)))
        sp = jnp.where(y > 20.0, y, sp)
        return y * jnp.tanh(sp)

    def mm(a, b):
        return jnp.dot(a, b, precision=lax.Precision.HIGHEST)

    def conv1d(h, w, b, stride, padding):
        y = lax.conv_general_dilated(h, w, (stride,), [(padding, padding)],
                                     dimension_numbers=("NCH", "OIH", "NCH"),
                                     precision=lax.Precision.HIGHEST)
        return y + b[None, :, None]

    def groupnorm(h, g, beta):
        B, C, L = h.shape
        hg = h.reshape(B, NUM_GROUPS, (C // NUM_GROUPS) * L)
        mu = hg.mean(-1, keepdims=True)
        var = ((hg - mu) ** 2).mean(-1, keepdims=True)
        hn = ((hg - mu) / jnp.sqrt(var + GN_EPS)).reshape(B, C, L)
        return hn * g[None, :, None] + beta[None, :, None]

    temb = mm(sin_emb, params["tm1"]["w"]) + params["tm1"]["b"]
    temb = mm(mish(temb), params["tm2"]["w"]) + params["tm2"]["b"]

    h = x
    for kind, name, cin, cout, _L_in, _L_out in plan:
        pp = params[name]
        if kind == "res":
            k = pp["ci_w"].shape[2]
            t = mm(mish(temb), pp["time_w"]) + pp["time_b"]
            hi = mish(groupnorm(conv1d(h, pp["ci_w"], pp["ci_b"], 1, k // 2),
                                pp["ci_g"], pp["ci_beta"])) + t[:, :, None]
            ho = mish(groupnorm(conv1d(hi, pp["co_w"], pp["co_b"], 1, k // 2),
                                pp["co_g"], pp["co_beta"]))
            res = conv1d(h, pp["res_w"], pp["res_b"], 1, 0) if cin != cout else h
            h = ho + res
        else:
            h = conv1d(h, pp["w"], pp["b"], 2, 1)

    out = h.reshape(h.shape[0], -1)
    out = jnp.concatenate([out, temb], axis=-1)
    out = mish(mm(out, params["fc1"]["w"]) + params["fc1"]["b"])
    return mm(out, params["fc2"]["w"]) + params["fc2"]["b"]


if __name__ == "__main__":
    key = jax.random.PRNGKey(0)
    kx, _ = jax.random.split(key)
    x = jax.random.normal(kx, (BATCH, TRANSITION_DIM, SEQ_LEN), dtype=jnp.float32)
    timesteps = jnp.array([3, 11], dtype=jnp.int32)
    params = init_params(seed=0)

    # Host-side weight folding/packing: once per parameter set, outside jit.
    weights = prepare_operands(params)

    out = jax.block_until_ready(gap_predictor_forward(weights, x, timesteps))
    assert out.shape == (BATCH, 1)
    assert bool(jnp.all(jnp.isfinite(out)))

    ref = jax.block_until_ready(jax.jit(_reference_forward)(params, x, timesteps))
    # Tolerance accounts for bf16 storage of the large conv-Toeplitz slabs
    # (all accumulation / GroupNorm / Mish / head math is still f32).
    assert bool(jnp.allclose(out, ref, atol=3e-2, rtol=5e-2)), (out, ref)

    print("KERNEL_OK")
</pallas_src>

<mosaic_0001>
module attributes {stable_mosaic.version = 11 : i64} {
  func.func @_forward_kernel(%arg0: memref<2x64xf32, #tpu.memory_space<vmem>>, %arg1: memref<2x8xf32, #tpu.memory_space<vmem>>, %arg2: memref<1x8704xf32, #tpu.memory_space<vmem>>, %arg3: memref<8x1280xf32, #tpu.memory_space<vmem>>, %arg4: memref<32x640xf32, #tpu.memory_space<vmem>>, %arg5: memref<64x1024xbf16, #tpu.memory_space<vmem>>, %arg6: memref<128x768xbf16, #tpu.memory_space<vmem>>, %arg7: memref<256x1024xbf16, #tpu.memory_space<vmem>>, %arg8: memref<2x1xf32, #tpu.memory_space<vmem>>) attributes {dimension_semantics = [], scalar_prefetch = 0 : i64, scratch_operands = 0 : i64, tpu.core_type = #tpu.core_type<tc>} {
    %c0 = arith.constant 0 : index
    %c0_0 = arith.constant 0 : index
    %0 = vector.load %arg1[%c0, %c0_0] : memref<2x8xf32, #tpu.memory_space<vmem>>, vector<2x8xf32>
    %c0_1 = arith.constant 0 : index
    %c0_2 = arith.constant 0 : index
    %1 = vector.load %arg3[%c0_1, %c0_2] : memref<8x1280xf32, #tpu.memory_space<vmem>>, vector<8x32xf32>
    %cst = arith.constant dense<0.000000e+00> : vector<2x32xf32>
    %2 = tpu.matmul %0, %1, %cst {dimension_numbers = #tpu.dot_dimension_numbers<[1], [0], [0], [1], [0, 0, 1, 1], [], []>} : vector<2x8xf32>, vector<8x32xf32>, vector<2x32xf32> -> vector<2x32xf32>
    %c0_3 = arith.constant 0 : index
    %c0_4 = arith.constant 0 : index
    %3 = vector.load %arg2[%c0_3, %c0_4] : memref<1x8704xf32, #tpu.memory_space<vmem>>, vector<1x32xf32>
    %4 = vector.broadcast %3 : vector<1x32xf32> to vector<2x32xf32>
    %5 = arith.addf %2, %4 : vector<2x32xf32>
    %cst_5 = arith.constant 2.000000e+01 : f32
    %6 = vector.broadcast %cst_5 : f32 to vector<2x32xf32>
    %7 = arith.minimumf %5, %6 : vector<2x32xf32>
    %8 = math.exp %7 : vector<2x32xf32>
    %cst_6 = arith.constant 1.000000e+00 : f32
    %9 = vector.broadcast %cst_6 : f32 to vector<2x32xf32>
    %10 = arith.addf %9, %8 : vector<2x32xf32>
    %11 = math.log %10 : vector<2x32xf32>
    %cst_7 = arith.constant 2.000000e+01 : f32
    %12 = vector.broadcast %cst_7 : f32 to vector<2x32xf32>
    %13 = arith.cmpf ogt, %5, %12 : vector<2x32xf32>
    %14 = arith.select %13, %5, %11 : vector<2x32xi1>, vector<2x32xf32>
    %15 = math.tanh %14 : vector<2x32xf32>
    %16 = arith.mulf %5, %15 : vector<2x32xf32>
    %c0_8 = arith.constant 0 : index
    %c0_9 = arith.constant 0 : index
    %17 = vector.load %arg4[%c0_8, %c0_9] : memref<32x640xf32, #tpu.memory_space<vmem>>, vector<32x8xf32>
    %cst_10 = arith.constant dense<0.000000e+00> : vector<2x8xf32>
    %18 = tpu.matmul %16, %17, %cst_10 {dimension_numbers = #tpu.dot_dimension_numbers<[1], [0], [0], [1], [0, 0, 1, 1], [], []>} : vector<2x32xf32>, vector<32x8xf32>, vector<2x8xf32> -> vector<2x8xf32>
    %c0_11 = arith.constant 0 : index
    %c128 = arith.constant 128 : index
    %19 = vector.load %arg2[%c0_11, %c128] : memref<1x8704xf32, #tpu.memory_space<vmem>>, vector<1x8xf32>
    %20 = vector.broadcast %19 : vector<1x8xf32> to vector<2x8xf32>
    %21 = arith.addf %18, %20 : vector<2x8xf32>
    %cst_12 = arith.constant 2.000000e+01 : f32
    %22 = vector.broadcast %cst_12 : f32 to vector<2x8xf32>
    %23 = arith.minimumf %21, %22 : vector<2x8xf32>
    %24 = math.exp %23 : vector<2x8xf32>
    %cst_13 = arith.constant 1.000000e+00 : f32
    %25 = vector.broadcast %cst_13 : f32 to vector<2x8xf32>
    %26 = arith.addf %25, %24 : vector<2x8xf32>
    %27 = math.log %26 : vector<2x8xf32>
    %cst_14 = arith.constant 2.000000e+01 : f32
    %28 = vector.broadcast %cst_14 : f32 to vector<2x8xf32>
    %29 = arith.cmpf ogt, %21, %28 : vector<2x8xf32>
    %30 = arith.select %29, %21, %27 : vector<2x8xi1>, vector<2x8xf32>
    %31 = math.tanh %30 : vector<2x8xf32>
    %32 = arith.mulf %21, %31 : vector<2x8xf32>
    %c0_15 = arith.constant 0 : index
    %c128_16 = arith.constant 128 : index
    %33 = vector.load %arg3[%c0_15, %c128_16] : memref<8x1280xf32, #tpu.memory_space<vmem>>, vector<8x928xf32>
    %cst_17 = arith.constant dense<0.000000e+00> : vector<2x928xf32>
    %34 = tpu.matmul %32, %33, %cst_17 {dimension_numbers = #tpu.dot_dimension_numbers<[1], [0], [0], [1], [0, 0, 1, 1], [], []>} : vector<2x8xf32>, vector<8x928xf32>, vector<2x928xf32> -> vector<2x928xf32>
    %c0_18 = arith.constant 0 : index
    %c256 = arith.constant 256 : index
    %35 = vector.load %arg2[%c0_18, %c256] : memref<1x8704xf32, #tpu.memory_space<vmem>>, vector<1x928xf32>
    %36 = vector.broadcast %35 : vector<1x928xf32> to vector<2x928xf32>
    %37 = arith.addf %34, %36 : vector<2x928xf32>
    %c0_19 = arith.constant 0 : index
    %c0_20 = arith.constant 0 : index
    %38 = vector.load %arg0[%c0_19, %c0_20] : memref<2x64xf32, #tpu.memory_space<vmem>>, vector<2x64xf32>
    %c0_21 = arith.constant 0 : index
    %c0_22 = arith.constant 0 : index
    %39 = vector.load %arg5[%c0_21, %c0_22] : memref<64x1024xbf16, #tpu.memory_space<vmem>>, vector<64x128xbf16>
    %40 = arith.truncf %38 : vector<2x64xf32> to vector<2x64xbf16>
    %cst_23 = arith.constant dense<0.000000e+00> : vector<2x128xf32>
    %41 = tpu.matmul %40, %39, %cst_23 {dimension_numbers = #tpu.dot_dimension_numbers<[1], [0], [0], [1], [0, 0, 1, 1], [], []>} : vector<2x64xbf16>, vector<64x128xbf16>, vector<2x128xf32> -> vector<2x128xf32>
    %c0_24 = arith.constant 0 : index
    %c1280 = arith.constant 1280 : index
    %42 = vector.load %arg2[%c0_24, %c1280] : memref<1x8704xf32, #tpu.memory_space<vmem>>, vector<1x128xf32>
    %43 = vector.broadcast %42 : vector<1x128xf32> to vector<2x128xf32>
    %44 = arith.addf %41, %43 : vector<2x128xf32>
    %45 = vector.extract_strided_slice %44 {offsets = [0, 0], sizes = [2, 16], strides = [1, 1]} : vector<2x128xf32> to vector<2x16xf32>
    %cst_25 = arith.constant dense<0.000000e+00> : vector<2xf32>
    %46 = vector.multi_reduction <add>, %45, %cst_25 [1] : vector<2x16xf32> to vector<2xf32>
    %47 = vector.shape_cast %46 : vector<2xf32> to vector<2x1xf32>
    %cst_26 = arith.constant 1.600000e+01 : f32
    %48 = vector.broadcast %cst_26 : f32 to vector<2x1xf32>
    %49 = arith.divf %47, %48 : vector<2x1xf32>
    %50 = vector.broadcast %49 : vector<2x1xf32> to vector<2x16xf32>
    %51 = arith.subf %45, %50 : vector<2x16xf32>
    %52 = arith.mulf %51, %51 : vector<2x16xf32>
    %cst_27 = arith.constant dense<0.000000e+00> : vector<2xf32>
    %53 = vector.multi_reduction <add>, %52, %cst_27 [1] : vector<2x16xf32> to vector<2xf32>
    %54 = vector.shape_cast %53 : vector<2xf32> to vector<2x1xf32>
    %cst_28 = arith.constant 1.600000e+01 : f32
    %55 = vector.broadcast %cst_28 : f32 to vector<2x1xf32>
    %56 = arith.divf %54, %55 : vector<2x1xf32>
    %cst_29 = arith.constant 9.99999974E-6 : f32
    %57 = vector.broadcast %cst_29 : f32 to vector<2x1xf32>
    %58 = arith.addf %56, %57 : vector<2x1xf32>
    %59 = math.rsqrt %58 : vector<2x1xf32>
    %60 = vector.broadcast %59 : vector<2x1xf32> to vector<2x16xf32>
    %61 = arith.mulf %51, %60 : vector<2x16xf32>
    %62 = vector.extract_strided_slice %44 {offsets = [0, 16], sizes = [2, 16], strides = [1, 1]} : vector<2x128xf32> to vector<2x16xf32>
    %cst_30 = arith.constant dense<0.000000e+00> : vector<2xf32>
    %63 = vector.multi_reduction <add>, %62, %cst_30 [1] : vector<2x16xf32> to vector<2xf32>
    %64 = vector.shape_cast %63 : vector<2xf32> to vector<2x1xf32>
    %cst_31 = arith.constant 1.600000e+01 : f32
    %65 = vector.broadcast %cst_31 : f32 to vector<2x1xf32>
    %66 = arith.divf %64, %65 : vector<2x1xf32>
    %67 = vector.broadcast %66 : vector<2x1xf32> to vector<2x16xf32>
    %68 = arith.subf %62, %67 : vector<2x16xf32>
    %69 = arith.mulf %68, %68 : vector<2x16xf32>
    %cst_32 = arith.constant dense<0.000000e+00> : vector<2xf32>
    %70 = vector.multi_reduction <add>, %69, %cst_32 [1] : vector<2x16xf32> to vector<2xf32>
    %71 = vector.shape_cast %70 : vector<2xf32> to vector<2x1xf32>
    %cst_33 = arith.constant 1.600000e+01 : f32
    %72 = vector.broadcast %cst_33 : f32 to vector<2x1xf32>
    %73 = arith.divf %71, %72 : vector<2x1xf32>
    %cst_34 = arith.constant 9.99999974E-6 : f32
    %74 = vector.broadcast %cst_34 : f32 to vector<2x1xf32>
    %75 = arith.addf %73, %74 : vector<2x1xf32>
    %76 = math.rsqrt %75 : vector<2x1xf32>
    %77 = vector.broadcast %76 : vector<2x1xf32> to vector<2x16xf32>
    %78 = arith.mulf %68, %77 : vector<2x16xf32>
    %79 = vector.extract_strided_slice %44 {offsets = [0, 32], sizes = [2, 16], strides = [1, 1]} : vector<2x128xf32> to vector<2x16xf32>
    %cst_35 = arith.constant dense<0.000000e+00> : vector<2xf32>
    %80 = vector.multi_reduction <add>, %79, %cst_35 [1] : vector<2x16xf32> to vector<2xf32>
    %81 = vector.shape_cast %80 : vector<2xf32> to vector<2x1xf32>
    %cst_36 = arith.constant 1.600000e+01 : f32
    %82 = vector.broadcast %cst_36 : f32 to vector<2x1xf32>
    %83 = arith.divf %81, %82 : vector<2x1xf32>
    %84 = vector.broadcast %83 : vector<2x1xf32> to vector<2x16xf32>
    %85 = arith.subf %79, %84 : vector<2x16xf32>
    %86 = arith.mulf %85, %85 : vector<2x16xf32>
    %cst_37 = arith.constant dense<0.000000e+00> : vector<2xf32>
    %87 = vector.multi_reduction <add>, %86, %cst_37 [1] : vector<2x16xf32> to vector<2xf32>
    %88 = vector.shape_cast %87 : vector<2xf32> to vector<2x1xf32>
    %cst_38 = arith.constant 1.600000e+01 : f32
    %89 = vector.broadcast %cst_38 : f32 to vector<2x1xf32>
    %90 = arith.divf %88, %89 : vector<2x1xf32>
    %cst_39 = arith.constant 9.99999974E-6 : f32
    %91 = vector.broadcast %cst_39 : f32 to vector<2x1xf32>
    %92 = arith.addf %90, %91 : vector<2x1xf32>
    %93 = math.rsqrt %92 : vector<2x1xf32>
    %94 = vector.broadcast %93 : vector<2x1xf32> to vector<2x16xf32>
    %95 = arith.mulf %85, %94 : vector<2x16xf32>
    %96 = vector.extract_strided_slice %44 {offsets = [0, 48], sizes = [2, 16], strides = [1, 1]} : vector<2x128xf32> to vector<2x16xf32>
    %cst_40 = arith.constant dense<0.000000e+00> : vector<2xf32>
    %97 = vector.multi_reduction <add>, %96, %cst_40 [1] : vector<2x16xf32> to vector<2xf32>
    %98 = vector.shape_cast %97 : vector<2xf32> to vector<2x1xf32>
    %cst_41 = arith.constant 1.600000e+01 : f32
    %99 = vector.broadcast %cst_41 : f32 to vector<2x1xf32>
    %100 = arith.divf %98, %99 : vector<2x1xf32>
    %101 = vector.broadcast %100 : vector<2x1xf32> to vector<2x16xf32>
    %102 = arith.subf %96, %101 : vector<2x16xf32>
    %103 = arith.mulf %102, %102 : vector<2x16xf32>
    %cst_42 = arith.constant dense<0.000000e+00> : vector<2xf32>
    %104 = vector.multi_reduction <add>, %103, %cst_42 [1] : vector<2x16xf32> to vector<2xf32>
    %105 = vector.shape_cast %104 : vector<2xf32> to vector<2x1xf32>
    %cst_43 = arith.constant 1.600000e+01 : f32
    %106 = vector.broadcast %cst_43 : f32 to vector<2x1xf32>
    %107 = arith.divf %105, %106 : vector<2x1xf32>
    %cst_44 = arith.constant 9.99999974E-6 : f32
    %108 = vector.broadcast %cst_44 : f32 to vector<2x1xf32>
    %109 = arith.addf %107, %108 : vector<2x1xf32>
    %110 = math.rsqrt %109 : vector<2x1xf32>
    %111 = vector.broadcast %110 : vector<2x1xf32> to vector<2x16xf32>
    %112 = arith.mulf %102, %111 : vector<2x16xf32>
    %113 = vector.extract_strided_slice %44 {offsets = [0, 64], sizes = [2, 16], strides = [1, 1]} : vector<2x128xf32> to vector<2x16xf32>
    %cst_45 = arith.constant dense<0.000000e+00> : vector<2xf32>
    %114 = vector.multi_reduction <add>, %113, %cst_45 [1] : vector<2x16xf32> to vector<2xf32>
    %115 = vector.shape_cast %114 : vector<2xf32> to vector<2x1xf32>
    %cst_46 = arith.constant 1.600000e+01 : f32
    %116 = vector.broadcast %cst_46 : f32 to vector<2x1xf32>
    %117 = arith.divf %115, %116 : vector<2x1xf32>
    %118 = vector.broadcast %117 : vector<2x1xf32> to vector<2x16xf32>
    %119 = arith.subf %113, %118 : vector<2x16xf32>
    %120 = arith.mulf %119, %119 : vector<2x16xf32>
    %cst_47 = arith.constant dense<0.000000e+00> : vector<2xf32>
    %121 = vector.multi_reduction <add>, %120, %cst_47 [1] : vector<2x16xf32> to vector<2xf32>
    %122 = vector.shape_cast %121 : vector<2xf32> to vector<2x1xf32>
    %cst_48 = arith.constant 1.600000e+01 : f32
    %123 = vector.broadcast %cst_48 : f32 to vector<2x1xf32>
    %124 = arith.divf %122, %123 : vector<2x1xf32>
    %cst_49 = arith.constant 9.99999974E-6 : f32
    %125 = vector.broadcast %cst_49 : f32 to vector<2x1xf32>
    %126 = arith.addf %124, %125 : vector<2x1xf32>
    %127 = math.rsqrt %126 : vector<2x1xf32>
    %128 = vector.broadcast %127 : vector<2x1xf32> to vector<2x16xf32>
    %129 = arith.mulf %119, %128 : vector<2x16xf32>
    %130 = vector.extract_strided_slice %44 {offsets = [0, 80], sizes = [2, 16], strides = [1, 1]} : vector<2x128xf32> to vector<2x16xf32>
    %cst_50 = arith.constant dense<0.000000e+00> : vector<2xf32>
    %131 = vector.multi_reduction <add>, %130, %cst_50 [1] : vector<2x16xf32> to vector<2xf32>
    %132 = vector.shape_cast %131 : vector<2xf32> to vector<2x1xf32>
    %cst_51 = arith.constant 1.600000e+01 : f32
    %133 = vector.broadcast %cst_51 : f32 to vector<2x1xf32>
    %134 = arith.divf %132, %133 : vector<2x1xf32>
    %135 = vector.broadcast %134 : vector<2x1xf32> to vector<2x16xf32>
    %136 = arith.subf %130, %135 : vector<2x16xf32>
    %137 = arith.mulf %136, %136 : vector<2x16xf32>
    %cst_52 = arith.constant dense<0.000000e+00> : vector<2xf32>
    %138 = vector.multi_reduction <add>, %137, %cst_52 [1] : vector<2x16xf32> to vector<2xf32>
    %139 = vector.shape_cast %138 : vector<2xf32> to vector<2x1xf32>
    %cst_53 = arith.constant 1.600000e+01 : f32
    %140 = vector.broadcast %cst_53 : f32 to vector<2x1xf32>
    %141 = arith.divf %139, %140 : vector<2x1xf32>
    %cst_54 = arith.constant 9.99999974E-6 : f32
    %142 = vector.broadcast %cst_54 : f32 to vector<2x1xf32>
    %143 = arith.addf %141, %142 : vector<2x1xf32>
    %144 = math.rsqrt %143 : vector<2x1xf32>
    %145 = vector.broadcast %144 : vector<2x1xf32> to vector<2x16xf32>
    %146 = arith.mulf %136, %145 : vector<2x16xf32>
    %147 = vector.extract_strided_slice %44 {offsets = [0, 96], sizes = [2, 16], strides = [1, 1]} : vector<2x128xf32> to vector<2x16xf32>
    %cst_55 = arith.constant dense<0.000000e+00> : vector<2xf32>
    %148 = vector.multi_reduction <add>, %147, %cst_55 [1] : vector<2x16xf32> to vector<2xf32>
    %149 = vector.shape_cast %148 : vector<2xf32> to vector<2x1xf32>
    %cst_56 = arith.constant 1.600000e+01 : f32
    %150 = vector.broadcast %cst_56 : f32 to vector<2x1xf32>
    %151 = arith.divf %149, %150 : vector<2x1xf32>
    %152 = vector.broadcast %151 : vector<2x1xf32> to vector<2x16xf32>
    %153 = arith.subf %147, %152 : vector<2x16xf32>
    %154 = arith.mulf %153, %153 : vector<2x16xf32>
    %cst_57 = arith.constant dense<0.000000e+00> : vector<2xf32>
    %155 = vector.multi_reduction <add>, %154, %cst_57 [1] : vector<2x16xf32> to vector<2xf32>
    %156 = vector.shape_cast %155 : vector<2xf32> to vector<2x1xf32>
    %cst_58 = arith.constant 1.600000e+01 : f32
    %157 = vector.broadcast %cst_58 : f32 to vector<2x1xf32>
    %158 = arith.divf %156, %157 : vector<2x1xf32>
    %cst_59 = arith.constant 9.99999974E-6 : f32
    %159 = vector.broadcast %cst_59 : f32 to vector<2x1xf32>
    %160 = arith.addf %158, %159 : vector<2x1xf32>
    %161 = math.rsqrt %160 : vector<2x1xf32>
    %162 = vector.broadcast %161 : vector<2x1xf32> to vector<2x16xf32>
    %163 = arith.mulf %153, %162 : vector<2x16xf32>
    %164 = vector.extract_strided_slice %44 {offsets = [0, 112], sizes = [2, 16], strides = [1, 1]} : vector<2x128xf32> to vector<2x16xf32>
    %cst_60 = arith.constant dense<0.000000e+00> : vector<2xf32>
    %165 = vector.multi_reduction <add>, %164, %cst_60 [1] : vector<2x16xf32> to vector<2xf32>
    %166 = vector.shape_cast %165 : vector<2xf32> to vector<2x1xf32>
    %cst_61 = arith.constant 1.600000e+01 : f32
    %167 = vector.broadcast %cst_61 : f32 to vector<2x1xf32>
    %168 = arith.divf %166, %167 : vector<2x1xf32>
    %169 = vector.broadcast %168 : vector<2x1xf32> to vector<2x16xf32>
    %170 = arith.subf %164, %169 : vector<2x16xf32>
    %171 = arith.mulf %170, %170 : vector<2x16xf32>
    %cst_62 = arith.constant dense<0.000000e+00> : vector<2xf32>
    %172 = vector.multi_reduction <add>, %171, %cst_62 [1] : vector<2x16xf32> to vector<2xf32>
    %173 = vector.shape_cast %172 : vector<2xf32> to vector<2x1xf32>
    %cst_63 = arith.constant 1.600000e+01 : f32
    %174 = vector.broadcast %cst_63 : f32 to vector<2x1xf32>
    %175 = arith.divf %173, %174 : vector<2x1xf32>
    %cst_64 = arith.constant 9.99999974E-6 : f32
    %176 = vector.broadcast %cst_64 : f32 to vector<2x1xf32>
    %177 = arith.addf %175, %176 : vector<2x1xf32>
    %178 = math.rsqrt %177 : vector<2x1xf32>
    %179 = vector.broadcast %178 : vector<2x1xf32> to vector<2x16xf32>
    %180 = arith.mulf %170, %179 : vector<2x16xf32>
    %181 = tpu.concatenate %61, %78, %95, %112, %129, %146, %163, %180 in 1 : vector<2x16xf32>, vector<2x16xf32>, vector<2x16xf32>, vector<2x16xf32>, vector<2x16xf32>, vector<2x16xf32>, vector<2x16xf32>, vector<2x16xf32> -> vector<2x128xf32>
    %c0_65 = arith.constant 0 : index
    %c1408 = arith.constant 1408 : index
    %182 = vector.load %arg2[%c0_65, %c1408] : memref<1x8704xf32, #tpu.memory_space<vmem>>, vector<1x128xf32>
    %183 = vector.broadcast %182 : vector<1x128xf32> to vector<2x128xf32>
    %184 = arith.mulf %181, %183 : vector<2x128xf32>
    %c0_66 = arith.constant 0 : index
    %c1536 = arith.constant 1536 : index
    %185 = vector.load %arg2[%c0_66, %c1536] : memref<1x8704xf32, #tpu.memory_space<vmem>>, vector<1x128xf32>
    %186 = vector.broadcast %185 : vector<1x128xf32> to vector<2x128xf32>
    %187 = arith.addf %184, %186 : vector<2x128xf32>
    %cst_67 = arith.constant 2.000000e+01 : f32
    %188 = vector.broadcast %cst_67 : f32 to vector<2x128xf32>
    %189 = arith.minimumf %187, %188 : vector<2x128xf32>
    %190 = math.exp %189 : vector<2x128xf32>
    %cst_68 = arith.constant 1.000000e+00 : f32
    %191 = vector.broadcast %cst_68 : f32 to vector<2x128xf32>
    %192 = arith.addf %191, %190 : vector<2x128xf32>
    %193 = math.log %192 : vector<2x128xf32>
    %cst_69 = arith.constant 2.000000e+01 : f32
    %194 = vector.broadcast %cst_69 : f32 to vector<2x128xf32>
    %195 = arith.cmpf ogt, %187, %194 : vector<2x128xf32>
    %196 = arith.select %195, %187, %193 : vector<2x128xi1>, vector<2x128xf32>
    %197 = math.tanh %196 : vector<2x128xf32>
    %198 = arith.mulf %187, %197 : vector<2x128xf32>
    %199 = vector.extract_strided_slice %37 {offsets = [0, 0], sizes = [2, 128], strides = [1, 1]} : vector<2x928xf32> to vector<2x128xf32>
    %200 = arith.addf %198, %199 : vector<2x128xf32>
    %c0_70 = arith.constant 0 : index
    %c0_71 = arith.constant 0 : index
    %201 = vector.load %arg6[%c0_70, %c0_71] : memref<128x768xbf16, #tpu.memory_space<vmem>>, vector<128x128xbf16>
    %202 = arith.truncf %200 : vector<2x128xf32> to vector<2x128xbf16>
    %cst_72 = arith.constant dense<0.000000e+00> : vector<2x128xf32>
    %203 = tpu.matmul %202, %201, %cst_72 {dimension_numbers = #tpu.dot_dimension_numbers<[1], [0], [0], [1], [0, 0, 1, 1], [], []>} : vector<2x128xbf16>, vector<128x128xbf16>, vector<2x128xf32> -> vector<2x128xf32>
    %c0_73 = arith.constant 0 : index
    %c1664 = arith.constant 1664 : index
    %204 = vector.load %arg2[%c0_73, %c1664] : memref<1x8704xf32, #tpu.memory_space<vmem>>, vector<1x128xf32>
    %205 = vector.broadcast %204 : vector<1x128xf32> to vector<2x128xf32>
    %206 = arith.addf %203, %205 : vector<2x128xf32>
    %207 = vector.extract_strided_slice %206 {offsets = [0, 0], sizes = [2, 16], strides = [1, 1]} : vector<2x128xf32> to vector<2x16xf32>
    %cst_74 = arith.constant dense<0.000000e+00> : vector<2xf32>
    %208 = vector.multi_reduction <add>, %207, %cst_74 [1] : vector<2x16xf32> to vector<2xf32>
    %209 = vector.shape_cast %208 : vector<2xf32> to vector<2x1xf32>
    %cst_75 = arith.constant 1.600000e+01 : f32
    %210 = vector.broadcast %cst_75 : f32 to vector<2x1xf32>
    %211 = arith.divf %209, %210 : vector<2x1xf32>
    %212 = vector.broadcast %211 : vector<2x1xf32> to vector<2x16xf32>
    %213 = arith.subf %207, %212 : vector<2x16xf32>
    %214 = arith.mulf %213, %213 : vector<2x16xf32>
    %cst_76 = arith.constant dense<0.000000e+00> : vector<2xf32>
    %215 = vector.multi_reduction <add>, %214, %cst_76 [1] : vector<2x16xf32> to vector<2xf32>
    %216 = vector.shape_cast %215 : vector<2xf32> to vector<2x1xf32>
    %cst_77 = arith.constant 1.600000e+01 : f32
    %217 = vector.broadcast %cst_77 : f32 to vector<2x1xf32>
    %218 = arith.divf %216, %217 : vector<2x1xf32>
    %cst_78 = arith.constant 9.99999974E-6 : f32
    %219 = vector.broadcast %cst_78 : f32 to vector<2x1xf32>
    %220 = arith.addf %218, %219 : vector<2x1xf32>
    %221 = math.rsqrt %220 : vector<2x1xf32>
    %222 = vector.broadcast %221 : vector<2x1xf32> to vector<2x16xf32>
    %223 = arith.mulf %213, %222 : vector<2x16xf32>
    %224 = vector.extract_strided_slice %206 {offsets = [0, 16], sizes = [2, 16], strides = [1, 1]} : vector<2x128xf32> to vector<2x16xf32>
    %cst_79 = arith.constant dense<0.000000e+00> : vector<2xf32>
    %225 = vector.multi_reduction <add>, %224, %cst_79 [1] : vector<2x16xf32> to vector<2xf32>
    %226 = vector.shape_cast %225 : vector<2xf32> to vector<2x1xf32>
    %cst_80 = arith.constant 1.600000e+01 : f32
    %227 = vector.broadcast %cst_80 : f32 to vector<2x1xf32>
    %228 = arith.divf %226, %227 : vector<2x1xf32>
    %229 = vector.broadcast %228 : vector<2x1xf32> to vector<2x16xf32>
    %230 = arith.subf %224, %229 : vector<2x16xf32>
    %231 = arith.mulf %230, %230 : vector<2x16xf32>
    %cst_81 = arith.constant dense<0.000000e+00> : vector<2xf32>
    %232 = vector.multi_reduction <add>, %231, %cst_81 [1] : vector<2x16xf32> to vector<2xf32>
    %233 = vector.shape_cast %232 : vector<2xf32> to vector<2x1xf32>
    %cst_82 = arith.constant 1.600000e+01 : f32
    %234 = vector.broadcast %cst_82 : f32 to vector<2x1xf32>
    %235 = arith.divf %233, %234 : vector<2x1xf32>
    %cst_83 = arith.constant 9.99999974E-6 : f32
    %236 = vector.broadcast %cst_83 : f32 to vector<2x1xf32>
    %237 = arith.addf %235, %236 : vector<2x1xf32>
    %238 = math.rsqrt %237 : vector<2x1xf32>
    %239 = vector.broadcast %238 : vector<2x1xf32> to vector<2x16xf32>
    %240 = arith.mulf %230, %239 : vector<2x16xf32>
    %241 = vector.extract_strided_slice %206 {offsets = [0, 32], sizes = [2, 16], strides = [1, 1]} : vector<2x128xf32> to vector<2x16xf32>
    %cst_84 = arith.constant dense<0.000000e+00> : vector<2xf32>
    %242 = vector.multi_reduction <add>, %241, %cst_84 [1] : vector<2x16xf32> to vector<2xf32>
    %243 = vector.shape_cast %242 : vector<2xf32> to vector<2x1xf32>
    %cst_85 = arith.constant 1.600000e+01 : f32
    %244 = vector.broadcast %cst_85 : f32 to vector<2x1xf32>
    %245 = arith.divf %243, %244 : vector<2x1xf32>
    %246 = vector.broadcast %245 : vector<2x1xf32> to vector<2x16xf32>
    %247 = arith.subf %241, %246 : vector<2x16xf32>
    %248 = arith.mulf %247, %247 : vector<2x16xf32>
    %cst_86 = arith.constant dense<0.000000e+00> : vector<2xf32>
    %249 = vector.multi_reduction <add>, %248, %cst_86 [1] : vector<2x16xf32> to vector<2xf32>
    %250 = vector.shape_cast %249 : vector<2xf32> to vector<2x1xf32>
    %cst_87 = arith.constant 1.600000e+01 : f32
    %251 = vector.broadcast %cst_87 : f32 to vector<2x1xf32>
    %252 = arith.divf %250, %251 : vector<2x1xf32>
    %cst_88 = arith.constant 9.99999974E-6 : f32
    %253 = vector.broadcast %cst_88 : f32 to vector<2x1xf32>
    %254 = arith.addf %252, %253 : vector<2x1xf32>
    %255 = math.rsqrt %254 : vector<2x1xf32>
    %256 = vector.broadcast %255 : vector<2x1xf32> to vector<2x16xf32>
    %257 = arith.mulf %247, %256 : vector<2x16xf32>
    %258 = vector.extract_strided_slice %206 {offsets = [0, 48], sizes = [2, 16], strides = [1, 1]} : vector<2x128xf32> to vector<2x16xf32>
    %cst_89 = arith.constant dense<0.000000e+00> : vector<2xf32>
    %259 = vector.multi_reduction <add>, %258, %cst_89 [1] : vector<2x16xf32> to vector<2xf32>
    %260 = vector.shape_cast %259 : vector<2xf32> to vector<2x1xf32>
    %cst_90 = arith.constant 1.600000e+01 : f32
    %261 = vector.broadcast %cst_90 : f32 to vector<2x1xf32>
    %262 = arith.divf %260, %261 : vector<2x1xf32>
    %263 = vector.broadcast %262 : vector<2x1xf32> to vector<2x16xf32>
    %264 = arith.subf %258, %263 : vector<2x16xf32>
    %265 = arith.mulf %264, %264 : vector<2x16xf32>
    %cst_91 = arith.constant dense<0.000000e+00> : vector<2xf32>
    %266 = vector.multi_reduction <add>, %265, %cst_91 [1] : vector<2x16xf32> to vector<2xf32>
    %267 = vector.shape_cast %266 : vector<2xf32> to vector<2x1xf32>
    %cst_92 = arith.constant 1.600000e+01 : f32
    %268 = vector.broadcast %cst_92 : f32 to vector<2x1xf32>
    %269 = arith.divf %267, %268 : vector<2x1xf32>
    %cst_93 = arith.constant 9.99999974E-6 : f32
    %270 = vector.broadcast %cst_93 : f32 to vector<2x1xf32>
    %271 = arith.addf %269, %270 : vector<2x1xf32>
    %272 = math.rsqrt %271 : vector<2x1xf32>
    %273 = vector.broadcast %272 : vector<2x1xf32> to vector<2x16xf32>
    %274 = arith.mulf %264, %273 : vector<2x16xf32>
    %275 = vector.extract_strided_slice %206 {offsets = [0, 64], sizes = [2, 16], strides = [1, 1]} : vector<2x128xf32> to vector<2x16xf32>
    %cst_94 = arith.constant dense<0.000000e+00> : vector<2xf32>
    %276 = vector.multi_reduction <add>, %275, %cst_94 [1] : vector<2x16xf32> to vector<2xf32>
    %277 = vector.shape_cast %276 : vector<2xf32> to vector<2x1xf32>
    %cst_95 = arith.constant 1.600000e+01 : f32
    %278 = vector.broadcast %cst_95 : f32 to vector<2x1xf32>
    %279 = arith.divf %277, %278 : vector<2x1xf32>
    %280 = vector.broadcast %279 : vector<2x1xf32> to vector<2x16xf32>
    %281 = arith.subf %275, %280 : vector<2x16xf32>
    %282 = arith.mulf %281, %281 : vector<2x16xf32>
    %cst_96 = arith.constant dense<0.000000e+00> : vector<2xf32>
    %283 = vector.multi_reduction <add>, %282, %cst_96 [1] : vector<2x16xf32> to vector<2xf32>
    %284 = vector.shape_cast %283 : vector<2xf32> to vector<2x1xf32>
    %cst_97 = arith.constant 1.600000e+01 : f32
    %285 = vector.broadcast %cst_97 : f32 to vector<2x1xf32>
    %286 = arith.divf %284, %285 : vector<2x1xf32>
    %cst_98 = arith.constant 9.99999974E-6 : f32
    %287 = vector.broadcast %cst_98 : f32 to vector<2x1xf32>
    %288 = arith.addf %286, %287 : vector<2x1xf32>
    %289 = math.rsqrt %288 : vector<2x1xf32>
    %290 = vector.broadcast %289 : vector<2x1xf32> to vector<2x16xf32>
    %291 = arith.mulf %281, %290 : vector<2x16xf32>
    %292 = vector.extract_strided_slice %206 {offsets = [0, 80], sizes = [2, 16], strides = [1, 1]} : vector<2x128xf32> to vector<2x16xf32>
    %cst_99 = arith.constant dense<0.000000e+00> : vector<2xf32>
    %293 = vector.multi_reduction <add>, %292, %cst_99 [1] : vector<2x16xf32> to vector<2xf32>
    %294 = vector.shape_cast %293 : vector<2xf32> to vector<2x1xf32>
    %cst_100 = arith.constant 1.600000e+01 : f32
    %295 = vector.broadcast %cst_100 : f32 to vector<2x1xf32>
    %296 = arith.divf %294, %295 : vector<2x1xf32>
    %297 = vector.broadcast %296 : vector<2x1xf32> to vector<2x16xf32>
    %298 = arith.subf %292, %297 : vector<2x16xf32>
    %299 = arith.mulf %298, %298 : vector<2x16xf32>
    %cst_101 = arith.constant dense<0.000000e+00> : vector<2xf32>
    %300 = vector.multi_reduction <add>, %299, %cst_101 [1] : vector<2x16xf32> to vector<2xf32>
    %301 = vector.shape_cast %300 : vector<2xf32> to vector<2x1xf32>
    %cst_102 = arith.constant 1.600000e+01 : f32
    %302 = vector.broadcast %cst_102 : f32 to vector<2x1xf32>
    %303 = arith.divf %301, %302 : vector<2x1xf32>
    %cst_103 = arith.constant 9.99999974E-6 : f32
    %304 = vector.broadcast %cst_103 : f32 to vector<2x1xf32>
    %305 = arith.addf %303, %304 : vector<2x1xf32>
    %306 = math.rsqrt %305 : vector<2x1xf32>
    %307 = vector.broadcast %306 : vector<2x1xf32> to vector<2x16xf32>
    %308 = arith.mulf %298, %307 : vector<2x16xf32>
    %309 = vector.extract_strided_slice %206 {offsets = [0, 96], sizes = [2, 16], strides = [1, 1]} : vector<2x128xf32> to vector<2x16xf32>
    %cst_104 = arith.constant dense<0.000000e+00> : vector<2xf32>
    %310 = vector.multi_reduction <add>, %309, %cst_104 [1] : vector<2x16xf32> to vector<2xf32>
    %311 = vector.shape_cast %310 : vector<2xf32> to vector<2x1xf32>
    %cst_105 = arith.constant 1.600000e+01 : f32
    %312 = vector.broadcast %cst_105 : f32 to vector<2x1xf32>
    %313 = arith.divf %311, %312 : vector<2x1xf32>
    %314 = vector.broadcast %313 : vector<2x1xf32> to vector<2x16xf32>
    %315 = arith.subf %309, %314 : vector<2x16xf32>
    %316 = arith.mulf %315, %315 : vector<2x16xf32>
    %cst_106 = arith.constant dense<0.000000e+00> : vector<2xf32>
    %317 = vector.multi_reduction <add>, %316, %cst_106 [1] : vector<2x16xf32> to vector<2xf32>
    %318 = vector.shape_cast %317 : vector<2xf32> to vector<2x1xf32>
    %cst_107 = arith.constant 1.600000e+01 : f32
    %319 = vector.broadcast %cst_107 : f32 to vector<2x1xf32>
    %320 = arith.divf %318, %319 : vector<2x1xf32>
    %cst_108 = arith.constant 9.99999974E-6 : f32
    %321 = vector.broadcast %cst_108 : f32 to vector<2x1xf32>
    %322 = arith.addf %320, %321 : vector<2x1xf32>
    %323 = math.rsqrt %322 : vector<2x1xf32>
    %324 = vector.broadcast %323 : vector<2x1xf32> to vector<2x16xf32>
    %325 = arith.mulf %315, %324 : vector<2x16xf32>
    %326 = vector.extract_strided_slice %206 {offsets = [0, 112], sizes = [2, 16], strides = [1, 1]} : vector<2x128xf32> to vector<2x16xf32>
    %cst_109 = arith.constant dense<0.000000e+00> : vector<2xf32>
    %327 = vector.multi_reduction <add>, %326, %cst_109 [1] : vector<2x16xf32> to vector<2xf32>
    %328 = vector.shape_cast %327 : vector<2xf32> to vector<2x1xf32>
    %cst_110 = arith.constant 1.600000e+01 : f32
    %329 = vector.broadcast %cst_110 : f32 to vector<2x1xf32>
    %330 = arith.divf %328, %329 : vector<2x1xf32>
    %331 = vector.broadcast %330 : vector<2x1xf32> to vector<2x16xf32>
    %332 = arith.subf %326, %331 : vector<2x16xf32>
    %333 = arith.mulf %332, %332 : vector<2x16xf32>
    %cst_111 = arith.constant dense<0.000000e+00> : vector<2xf32>
    %334 = vector.multi_reduction <add>, %333, %cst_111 [1] : vector<2x16xf32> to vector<2xf32>
    %335 = vector.shape_cast %334 : vector<2xf32> to vector<2x1xf32>
    %cst_112 = arith.constant 1.600000e+01 : f32
    %336 = vector.broadcast %cst_112 : f32 to vector<2x1xf32>
    %337 = arith.divf %335, %336 : vector<2x1xf32>
    %cst_113 = arith.constant 9.99999974E-6 : f32
    %338 = vector.broadcast %cst_113 : f32 to vector<2x1xf32>
    %339 = arith.addf %337, %338 : vector<2x1xf32>
    %340 = math.rsqrt %339 : vector<2x1xf32>
    %341 = vector.broadcast %340 : vector<2x1xf32> to vector<2x16xf32>
    %342 = arith.mulf %332, %341 : vector<2x16xf32>
    %343 = tpu.concatenate %223, %240, %257, %274, %291, %308, %325, %342 in 1 : vector<2x16xf32>, vector<2x16xf32>, vector<2x16xf32>, vector<2x16xf32>, vector<2x16xf32>, vector<2x16xf32>, vector<2x16xf32>, vector<2x16xf32> -> vector<2x128xf32>
    %c0_114 = arith.constant 0 : index
    %c1792 = arith.constant 1792 : index
    %344 = vector.load %arg2[%c0_114, %c1792] : memref<1x8704xf32, #tpu.memory_space<vmem>>, vector<1x128xf32>
    %345 = vector.broadcast %344 : vector<1x128xf32> to vector<2x128xf32>
    %346 = arith.mulf %343, %345 : vector<2x128xf32>
    %c0_115 = arith.constant 0 : index
    %c1920 = arith.constant 1920 : index
    %347 = vector.load %arg2[%c0_115, %c1920] : memref<1x8704xf32, #tpu.memory_space<vmem>>, vector<1x128xf32>
    %348 = vector.broadcast %347 : vector<1x128xf32> to vector<2x128xf32>
    %349 = arith.addf %346, %348 : vector<2x128xf32>
    %cst_116 = arith.constant 2.000000e+01 : f32
    %350 = vector.broadcast %cst_116 : f32 to vector<2x128xf32>
    %351 = arith.minimumf %349, %350 : vector<2x128xf32>
    %352 = math.exp %351 : vector<2x128xf32>
    %cst_117 = arith.constant 1.000000e+00 : f32
    %353 = vector.broadcast %cst_117 : f32 to vector<2x128xf32>
    %354 = arith.addf %353, %352 : vector<2x128xf32>
    %355 = math.log %354 : vector<2x128xf32>
    %cst_118 = arith.constant 2.000000e+01 : f32
    %356 = vector.broadcast %cst_118 : f32 to vector<2x128xf32>
    %357 = arith.cmpf ogt, %349, %356 : vector<2x128xf32>
    %358 = arith.select %357, %349, %355 : vector<2x128xi1>, vector<2x128xf32>
    %359 = math.tanh %358 : vector<2x128xf32>
    %360 = arith.mulf %349, %359 : vector<2x128xf32>
    %c0_119 = arith.constant 0 : index
    %c128_120 = arith.constant 128 : index
    %361 = vector.load %arg5[%c0_119, %c128_120] : memref<64x1024xbf16, #tpu.memory_space<vmem>>, vector<64x128xbf16>
    %362 = arith.truncf %38 : vector<2x64xf32> to vector<2x64xbf16>
    %cst_121 = arith.constant dense<0.000000e+00> : vector<2x128xf32>
    %363 = tpu.matmul %362, %361, %cst_121 {dimension_numbers = #tpu.dot_dimension_numbers<[1], [0], [0], [1], [0, 0, 1, 1], [], []>} : vector<2x64xbf16>, vector<64x128xbf16>, vector<2x128xf32> -> vector<2x128xf32>
    %c0_122 = arith.constant 0 : index
    %c2048 = arith.constant 2048 : index
    %364 = vector.load %arg2[%c0_122, %c2048] : memref<1x8704xf32, #tpu.memory_space<vmem>>, vector<1x128xf32>
    %365 = vector.broadcast %364 : vector<1x128xf32> to vector<2x128xf32>
    %366 = arith.addf %363, %365 : vector<2x128xf32>
    %367 = arith.addf %360, %366 : vector<2x128xf32>
    %c0_123 = arith.constant 0 : index
    %c128_124 = arith.constant 128 : index
    %368 = vector.load %arg6[%c0_123, %c128_124] : memref<128x768xbf16, #tpu.memory_space<vmem>>, vector<128x128xbf16>
    %369 = arith.truncf %367 : vector<2x128xf32> to vector<2x128xbf16>
    %cst_125 = arith.constant dense<0.000000e+00> : vector<2x128xf32>
    %370 = tpu.matmul %369, %368, %cst_125 {dimension_numbers = #tpu.dot_dimension_numbers<[1], [0], [0], [1], [0, 0, 1, 1], [], []>} : vector<2x128xbf16>, vector<128x128xbf16>, vector<2x128xf32> -> vector<2x128xf32>
    %c0_126 = arith.constant 0 : index
    %c2176 = arith.constant 2176 : index
    %371 = vector.load %arg2[%c0_126, %c2176] : memref<1x8704xf32, #tpu.memory_space<vmem>>, vector<1x128xf32>
    %372 = vector.broadcast %371 : vector<1x128xf32> to vector<2x128xf32>
    %373 = arith.addf %370, %372 : vector<2x128xf32>
    %374 = vector.extract_strided_slice %373 {offsets = [0, 0], sizes = [2, 16], strides = [1, 1]} : vector<2x128xf32> to vector<2x16xf32>
    %cst_127 = arith.constant dense<0.000000e+00> : vector<2xf32>
    %375 = vector.multi_reduction <add>, %374, %cst_127 [1] : vector<2x16xf32> to vector<2xf32>
    %376 = vector.shape_cast %375 : vector<2xf32> to vector<2x1xf32>
    %cst_128 = arith.constant 1.600000e+01 : f32
    %377 = vector.broadcast %cst_128 : f32 to vector<2x1xf32>
    %378 = arith.divf %376, %377 : vector<2x1xf32>
    %379 = vector.broadcast %378 : vector<2x1xf32> to vector<2x16xf32>
    %380 = arith.subf %374, %379 : vector<2x16xf32>
    %381 = arith.mulf %380, %380 : vector<2x16xf32>
    %cst_129 = arith.constant dense<0.000000e+00> : vector<2xf32>
    %382 = vector.multi_reduction <add>, %381, %cst_129 [1] : vector<2x16xf32> to vector<2xf32>
    %383 = vector.shape_cast %382 : vector<2xf32> to vector<2x1xf32>
    %cst_130 = arith.constant 1.600000e+01 : f32
    %384 = vector.broadcast %cst_130 : f32 to vector<2x1xf32>
    %385 = arith.divf %383, %384 : vector<2x1xf32>
    %cst_131 = arith.constant 9.99999974E-6 : f32
    %386 = vector.broadcast %cst_131 : f32 to vector<2x1xf32>
    %387 = arith.addf %385, %386 : vector<2x1xf32>
    %388 = math.rsqrt %387 : vector<2x1xf32>
    %389 = vector.broadcast %388 : vector<2x1xf32> to vector<2x16xf32>
    %390 = arith.mulf %380, %389 : vector<2x16xf32>
    %391 = vector.extract_strided_slice %373 {offsets = [0, 16], sizes = [2, 16], strides = [1, 1]} : vector<2x128xf32> to vector<2x16xf32>
    %cst_132 = arith.constant dense<0.000000e+00> : vector<2xf32>
    %392 = vector.multi_reduction <add>, %391, %cst_132 [1] : vector<2x16xf32> to vector<2xf32>
    %393 = vector.shape_cast %392 : vector<2xf32> to vector<2x1xf32>
    %cst_133 = arith.constant 1.600000e+01 : f32
    %394 = vector.broadcast %cst_133 : f32 to vector<2x1xf32>
    %395 = arith.divf %393, %394 : vector<2x1xf32>
    %396 = vector.broadcast %395 : vector<2x1xf32> to vector<2x16xf32>
    %397 = arith.subf %391, %396 : vector<2x16xf32>
    %398 = arith.mulf %397, %397 : vector<2x16xf32>
    %cst_134 = arith.constant dense<0.000000e+00> : vector<2xf32>
    %399 = vector.multi_reduction <add>, %398, %cst_134 [1] : vector<2x16xf32> to vector<2xf32>
    %400 = vector.shape_cast %399 : vector<2xf32> to vector<2x1xf32>
    %cst_135 = arith.constant 1.600000e+01 : f32
    %401 = vector.broadcast %cst_135 : f32 to vector<2x1xf32>
    %402 = arith.divf %400, %401 : vector<2x1xf32>
    %cst_136 = arith.constant 9.99999974E-6 : f32
    %403 = vector.broadcast %cst_136 : f32 to vector<2x1xf32>
    %404 = arith.addf %402, %403 : vector<2x1xf32>
    %405 = math.rsqrt %404 : vector<2x1xf32>
    %406 = vector.broadcast %405 : vector<2x1xf32> to vector<2x16xf32>
    %407 = arith.mulf %397, %406 : vector<2x16xf32>
    %408 = vector.extract_strided_slice %373 {offsets = [0, 32], sizes = [2, 16], strides = [1, 1]} : vector<2x128xf32> to vector<2x16xf32>
    %cst_137 = arith.constant dense<0.000000e+00> : vector<2xf32>
    %409 = vector.multi_reduction <add>, %408, %cst_137 [1] : vector<2x16xf32> to vector<2xf32>
    %410 = vector.shape_cast %409 : vector<2xf32> to vector<2x1xf32>
    %cst_138 = arith.constant 1.600000e+01 : f32
    %411 = vector.broadcast %cst_138 : f32 to vector<2x1xf32>
    %412 = arith.divf %410, %411 : vector<2x1xf32>
    %413 = vector.broadcast %412 : vector<2x1xf32> to vector<2x16xf32>
    %414 = arith.subf %408, %413 : vector<2x16xf32>
    %415 = arith.mulf %414, %414 : vector<2x16xf32>
    %cst_139 = arith.constant dense<0.000000e+00> : vector<2xf32>
    %416 = vector.multi_reduction <add>, %415, %cst_139 [1] : vector<2x16xf32> to vector<2xf32>
    %417 = vector.shape_cast %416 : vector<2xf32> to vector<2x1xf32>
    %cst_140 = arith.constant 1.600000e+01 : f32
    %418 = vector.broadcast %cst_140 : f32 to vector<2x1xf32>
    %419 = arith.divf %417, %418 : vector<2x1xf32>
    %cst_141 = arith.constant 9.99999974E-6 : f32
    %420 = vector.broadcast %cst_141 : f32 to vector<2x1xf32>
    %421 = arith.addf %419, %420 : vector<2x1xf32>
    %422 = math.rsqrt %421 : vector<2x1xf32>
    %423 = vector.broadcast %422 : vector<2x1xf32> to vector<2x16xf32>
    %424 = arith.mulf %414, %423 : vector<2x16xf32>
    %425 = vector.extract_strided_slice %373 {offsets = [0, 48], sizes = [2, 16], strides = [1, 1]} : vector<2x128xf32> to vector<2x16xf32>
    %cst_142 = arith.constant dense<0.000000e+00> : vector<2xf32>
    %426 = vector.multi_reduction <add>, %425, %cst_142 [1] : vector<2x16xf32> to vector<2xf32>
    %427 = vector.shape_cast %426 : vector<2xf32> to vector<2x1xf32>
    %cst_143 = arith.constant 1.600000e+01 : f32
    %428 = vector.broadcast %cst_143 : f32 to vector<2x1xf32>
    %429 = arith.divf %427, %428 : vector<2x1xf32>
    %430 = vector.broadcast %429 : vector<2x1xf32> to vector<2x16xf32>
    %431 = arith.subf %425, %430 : vector<2x16xf32>
    %432 = arith.mulf %431, %431 : vector<2x16xf32>
    %cst_144 = arith.constant dense<0.000000e+00> : vector<2xf32>
    %433 = vector.multi_reduction <add>, %432, %cst_144 [1] : vector<2x16xf32> to vector<2xf32>
    %434 = vector.shape_cast %433 : vector<2xf32> to vector<2x1xf32>
    %cst_145 = arith.constant 1.600000e+01 : f32
    %435 = vector.broadcast %cst_145 : f32 to vector<2x1xf32>
    %436 = arith.divf %434, %435 : vector<2x1xf32>
    %cst_146 = arith.constant 9.99999974E-6 : f32
    %437 = vector.broadcast %cst_146 : f32 to vector<2x1xf32>
    %438 = arith.addf %436, %437 : vector<2x1xf32>
    %439 = math.rsqrt %438 : vector<2x1xf32>
    %440 = vector.broadcast %439 : vector<2x1xf32> to vector<2x16xf32>
    %441 = arith.mulf %431, %440 : vector<2x16xf32>
    %442 = vector.extract_strided_slice %373 {offsets = [0, 64], sizes = [2, 16], strides = [1, 1]} : vector<2x128xf32> to vector<2x16xf32>
    %cst_147 = arith.constant dense<0.000000e+00> : vector<2xf32>
    %443 = vector.multi_reduction <add>, %442, %cst_147 [1] : vector<2x16xf32> to vector<2xf32>
    %444 = vector.shape_cast %443 : vector<2xf32> to vector<2x1xf32>
    %cst_148 = arith.constant 1.600000e+01 : f32
    %445 = vector.broadcast %cst_148 : f32 to vector<2x1xf32>
    %446 = arith.divf %444, %445 : vector<2x1xf32>
    %447 = vector.broadcast %446 : vector<2x1xf32> to vector<2x16xf32>
    %448 = arith.subf %442, %447 : vector<2x16xf32>
    %449 = arith.mulf %448, %448 : vector<2x16xf32>
    %cst_149 = arith.constant dense<0.000000e+00> : vector<2xf32>
    %450 = vector.multi_reduction <add>, %449, %cst_149 [1] : vector<2x16xf32> to vector<2xf32>
    %451 = vector.shape_cast %450 : vector<2xf32> to vector<2x1xf32>
    %cst_150 = arith.constant 1.600000e+01 : f32
    %452 = vector.broadcast %cst_150 : f32 to vector<2x1xf32>
    %453 = arith.divf %451, %452 : vector<2x1xf32>
    %cst_151 = arith.constant 9.99999974E-6 : f32
    %454 = vector.broadcast %cst_151 : f32 to vector<2x1xf32>
    %455 = arith.addf %453, %454 : vector<2x1xf32>
    %456 = math.rsqrt %455 : vector<2x1xf32>
    %457 = vector.broadcast %456 : vector<2x1xf32> to vector<2x16xf32>
    %458 = arith.mulf %448, %457 : vector<2x16xf32>
    %459 = vector.extract_strided_slice %373 {offsets = [0, 80], sizes = [2, 16], strides = [1, 1]} : vector<2x128xf32> to vector<2x16xf32>
    %cst_152 = arith.constant dense<0.000000e+00> : vector<2xf32>
    %460 = vector.multi_reduction <add>, %459, %cst_152 [1] : vector<2x16xf32> to vector<2xf32>
    %461 = vector.shape_cast %460 : vector<2xf32> to vector<2x1xf32>
    %cst_153 = arith.constant 1.600000e+01 : f32
    %462 = vector.broadcast %cst_153 : f32 to vector<2x1xf32>
    %463 = arith.divf %461, %462 : vector<2x1xf32>
    %464 = vector.broadcast %463 : vector<2x1xf32> to vector<2x16xf32>
    %465 = arith.subf %459, %464 : vector<2x16xf32>
    %466 = arith.mulf %465, %465 : vector<2x16xf32>
    %cst_154 = arith.constant dense<0.000000e+00> : vector<2xf32>
    %467 = vector.multi_reduction <add>, %466, %cst_154 [1] : vector<2x16xf32> to vector<2xf32>
    %468 = vector.shape_cast %467 : vector<2xf32> to vector<2x1xf32>
    %cst_155 = arith.constant 1.600000e+01 : f32
    %469 = vector.broadcast %cst_155 : f32 to vector<2x1xf32>
    %470 = arith.divf %468, %469 : vector<2x1xf32>
    %cst_156 = arith.constant 9.99999974E-6 : f32
    %471 = vector.broadcast %cst_156 : f32 to vector<2x1xf32>
    %472 = arith.addf %470, %471 : vector<2x1xf32>
    %473 = math.rsqrt %472 : vector<2x1xf32>
    %474 = vector.broadcast %473 : vector<2x1xf32> to vector<2x16xf32>
    %475 = arith.mulf %465, %474 : vector<2x16xf32>
    %476 = vector.extract_strided_slice %373 {offsets = [0, 96], sizes = [2, 16], strides = [1, 1]} : vector<2x128xf32> to vector<2x16xf32>
    %cst_157 = arith.constant dense<0.000000e+00> : vector<2xf32>
    %477 = vector.multi_reduction <add>, %476, %cst_157 [1] : vector<2x16xf32> to vector<2xf32>
    %478 = vector.shape_cast %477 : vector<2xf32> to vector<2x1xf32>
    %cst_158 = arith.constant 1.600000e+01 : f32
    %479 = vector.broadcast %cst_158 : f32 to vector<2x1xf32>
    %480 = arith.divf %478, %479 : vector<2x1xf32>
    %481 = vector.broadcast %480 : vector<2x1xf32> to vector<2x16xf32>
    %482 = arith.subf %476, %481 : vector<2x16xf32>
    %483 = arith.mulf %482, %482 : vector<2x16xf32>
    %cst_159 = arith.constant dense<0.000000e+00> : vector<2xf32>
    %484 = vector.multi_reduction <add>, %483, %cst_159 [1] : vector<2x16xf32> to vector<2xf32>
    %485 = vector.shape_cast %484 : vector<2xf32> to vector<2x1xf32>
    %cst_160 = arith.constant 1.600000e+01 : f32
    %486 = vector.broadcast %cst_160 : f32 to vector<2x1xf32>
    %487 = arith.divf %485, %486 : vector<2x1xf32>
    %cst_161 = arith.constant 9.99999974E-6 : f32
    %488 = vector.broadcast %cst_161 : f32 to vector<2x1xf32>
    %489 = arith.addf %487, %488 : vector<2x1xf32>
    %490 = math.rsqrt %489 : vector<2x1xf32>
    %491 = vector.broadcast %490 : vector<2x1xf32> to vector<2x16xf32>
    %492 = arith.mulf %482, %491 : vector<2x16xf32>
    %493 = vector.extract_strided_slice %373 {offsets = [0, 112], sizes = [2, 16], strides = [1, 1]} : vector<2x128xf32> to vector<2x16xf32>
    %cst_162 = arith.constant dense<0.000000e+00> : vector<2xf32>
    %494 = vector.multi_reduction <add>, %493, %cst_162 [1] : vector<2x16xf32> to vector<2xf32>
    %495 = vector.shape_cast %494 : vector<2xf32> to vector<2x1xf32>
    %cst_163 = arith.constant 1.600000e+01 : f32
    %496 = vector.broadcast %cst_163 : f32 to vector<2x1xf32>
    %497 = arith.divf %495, %496 : vector<2x1xf32>
    %498 = vector.broadcast %497 : vector<2x1xf32> to vector<2x16xf32>
    %499 = arith.subf %493, %498 : vector<2x16xf32>
    %500 = arith.mulf %499, %499 : vector<2x16xf32>
    %cst_164 = arith.constant dense<0.000000e+00> : vector<2xf32>
    %501 = vector.multi_reduction <add>, %500, %cst_164 [1] : vector<2x16xf32> to vector<2xf32>
    %502 = vector.shape_cast %501 : vector<2xf32> to vector<2x1xf32>
    %cst_165 = arith.constant 1.600000e+01 : f32
    %503 = vector.broadcast %cst_165 : f32 to vector<2x1xf32>
    %504 = arith.divf %502, %503 : vector<2x1xf32>
    %cst_166 = arith.constant 9.99999974E-6 : f32
    %505 = vector.broadcast %cst_166 : f32 to vector<2x1xf32>
    %506 = arith.addf %504, %505 : vector<2x1xf32>
    %507 = math.rsqrt %506 : vector<2x1xf32>
    %508 = vector.broadcast %507 : vector<2x1xf32> to vector<2x16xf32>
    %509 = arith.mulf %499, %508 : vector<2x16xf32>
    %510 = tpu.concatenate %390, %407, %424, %441, %458, %475, %492, %509 in 1 : vector<2x16xf32>, vector<2x16xf32>, vector<2x16xf32>, vector<2x16xf32>, vector<2x16xf32>, vector<2x16xf32>, vector<2x16xf32>, vector<2x16xf32> -> vector<2x128xf32>
    %c0_167 = arith.constant 0 : index
    %c2304 = arith.constant 2304 : index
    %511 = vector.load %arg2[%c0_167, %c2304] : memref<1x8704xf32, #tpu.memory_space<vmem>>, vector<1x128xf32>
    %512 = vector.broadcast %511 : vector<1x128xf32> to vector<2x128xf32>
    %513 = arith.mulf %510, %512 : vector<2x128xf32>
    %c0_168 = arith.constant 0 : index
    %c2432 = arith.constant 2432 : index
    %514 = vector.load %arg2[%c0_168, %c2432] : memref<1x8704xf32, #tpu.memory_space<vmem>>, vector<1x128xf32>
    %515 = vector.broadcast %514 : vector<1x128xf32> to vector<2x128xf32>
    %516 = arith.addf %513, %515 : vector<2x128xf32>
    %cst_169 = arith.constant 2.000000e+01 : f32
    %517 = vector.broadcast %cst_169 : f32 to vector<2x128xf32>
    %518 = arith.minimumf %516, %517 : vector<2x128xf32>
    %519 = math.exp %518 : vector<2x128xf32>
    %cst_170 = arith.constant 1.000000e+00 : f32
    %520 = vector.broadcast %cst_170 : f32 to vector<2x128xf32>
    %521 = arith.addf %520, %519 : vector<2x128xf32>
    %522 = math.log %521 : vector<2x128xf32>
    %cst_171 = arith.constant 2.000000e+01 : f32
    %523 = vector.broadcast %cst_171 : f32 to vector<2x128xf32>
    %524 = arith.cmpf ogt, %516, %523 : vector<2x128xf32>
    %525 = arith.select %524, %516, %522 : vector<2x128xi1>, vector<2x128xf32>
    %526 = math.tanh %525 : vector<2x128xf32>
    %527 = arith.mulf %516, %526 : vector<2x128xf32>
    %528 = vector.extract_strided_slice %37 {offsets = [0, 128], sizes = [2, 128], strides = [1, 1]} : vector<2x928xf32> to vector<2x128xf32>
    %529 = arith.addf %527, %528 : vector<2x128xf32>
    %c0_172 = arith.constant 0 : index
    %c256_173 = arith.constant 256 : index
    %530 = vector.load %arg6[%c0_172, %c256_173] : memref<128x768xbf16, #tpu.memory_space<vmem>>, vector<128x128xbf16>
    %531 = arith.truncf %529 : vector<2x128xf32> to vector<2x128xbf16>
    %cst_174 = arith.constant dense<0.000000e+00> : vector<2x128xf32>
    %532 = tpu.matmul %531, %530, %cst_174 {dimension_numbers = #tpu.dot_dimension_numbers<[1], [0], [0], [1], [0, 0, 1, 1], [], []>} : vector<2x128xbf16>, vector<128x128xbf16>, vector<2x128xf32> -> vector<2x128xf32>
    %c0_175 = arith.constant 0 : index
    %c2560 = arith.constant 2560 : index
    %533 = vector.load %arg2[%c0_175, %c2560] : memref<1x8704xf32, #tpu.memory_space<vmem>>, vector<1x128xf32>
    %534 = vector.broadcast %533 : vector<1x128xf32> to vector<2x128xf32>
    %535 = arith.addf %532, %534 : vector<2x128xf32>
    %536 = vector.extract_strided_slice %535 {offsets = [0, 0], sizes = [2, 16], strides = [1, 1]} : vector<2x128xf32> to vector<2x16xf32>
    %cst_176 = arith.constant dense<0.000000e+00> : vector<2xf32>
    %537 = vector.multi_reduction <add>, %536, %cst_176 [1] : vector<2x16xf32> to vector<2xf32>
    %538 = vector.shape_cast %537 : vector<2xf32> to vector<2x1xf32>
    %cst_177 = arith.constant 1.600000e+01 : f32
    %539 = vector.broadcast %cst_177 : f32 to vector<2x1xf32>
    %540 = arith.divf %538, %539 : vector<2x1xf32>
    %541 = vector.broadcast %540 : vector<2x1xf32> to vector<2x16xf32>
    %542 = arith.subf %536, %541 : vector<2x16xf32>
    %543 = arith.mulf %542, %542 : vector<2x16xf32>
    %cst_178 = arith.constant dense<0.000000e+00> : vector<2xf32>
    %544 = vector.multi_reduction <add>, %543, %cst_178 [1] : vector<2x16xf32> to vector<2xf32>
    %545 = vector.shape_cast %544 : vector<2xf32> to vector<2x1xf32>
    %cst_179 = arith.constant 1.600000e+01 : f32
    %546 = vector.broadcast %cst_179 : f32 to vector<2x1xf32>
    %547 = arith.divf %545, %546 : vector<2x1xf32>
    %cst_180 = arith.constant 9.99999974E-6 : f32
    %548 = vector.broadcast %cst_180 : f32 to vector<2x1xf32>
    %549 = arith.addf %547, %548 : vector<2x1xf32>
    %550 = math.rsqrt %549 : vector<2x1xf32>
    %551 = vector.broadcast %550 : vector<2x1xf32> to vector<2x16xf32>
    %552 = arith.mulf %542, %551 : vector<2x16xf32>
    %553 = vector.extract_strided_slice %535 {offsets = [0, 16], sizes = [2, 16], strides = [1, 1]} : vector<2x128xf32> to vector<2x16xf32>
    %cst_181 = arith.constant dense<0.000000e+00> : vector<2xf32>
    %554 = vector.multi_reduction <add>, %553, %cst_181 [1] : vector<2x16xf32> to vector<2xf32>
    %555 = vector.shape_cast %554 : vector<2xf32> to vector<2x1xf32>
    %cst_182 = arith.constant 1.600000e+01 : f32
    %556 = vector.broadcast %cst_182 : f32 to vector<2x1xf32>
    %557 = arith.divf %555, %556 : vector<2x1xf32>
    %558 = vector.broadcast %557 : vector<2x1xf32> to vector<2x16xf32>
    %559 = arith.subf %553, %558 : vector<2x16xf32>
    %560 = arith.mulf %559, %559 : vector<2x16xf32>
    %cst_183 = arith.constant dense<0.000000e+00> : vector<2xf32>
    %561 = vector.multi_reduction <add>, %560, %cst_183 [1] : vector<2x16xf32> to vector<2xf32>
    %562 = vector.shape_cast %561 : vector<2xf32> to vector<2x1xf32>
    %cst_184 = arith.constant 1.600000e+01 : f32
    %563 = vector.broadcast %cst_184 : f32 to vector<2x1xf32>
    %564 = arith.divf %562, %563 : vector<2x1xf32>
    %cst_185 = arith.constant 9.99999974E-6 : f32
    %565 = vector.broadcast %cst_185 : f32 to vector<2x1xf32>
    %566 = arith.addf %564, %565 : vector<2x1xf32>
    %567 = math.rsqrt %566 : vector<2x1xf32>
    %568 = vector.broadcast %567 : vector<2x1xf32> to vector<2x16xf32>
    %569 = arith.mulf %559, %568 : vector<2x16xf32>
    %570 = vector.extract_strided_slice %535 {offsets = [0, 32], sizes = [2, 16], strides = [1, 1]} : vector<2x128xf32> to vector<2x16xf32>
    %cst_186 = arith.constant dense<0.000000e+00> : vector<2xf32>
    %571 = vector.multi_reduction <add>, %570, %cst_186 [1] : vector<2x16xf32> to vector<2xf32>
    %572 = vector.shape_cast %571 : vector<2xf32> to vector<2x1xf32>
    %cst_187 = arith.constant 1.600000e+01 : f32
    %573 = vector.broadcast %cst_187 : f32 to vector<2x1xf32>
    %574 = arith.divf %572, %573 : vector<2x1xf32>
    %575 = vector.broadcast %574 : vector<2x1xf32> to vector<2x16xf32>
    %576 = arith.subf %570, %575 : vector<2x16xf32>
    %577 = arith.mulf %576, %576 : vector<2x16xf32>
    %cst_188 = arith.constant dense<0.000000e+00> : vector<2xf32>
    %578 = vector.multi_reduction <add>, %577, %cst_188 [1] : vector<2x16xf32> to vector<2xf32>
    %579 = vector.shape_cast %578 : vector<2xf32> to vector<2x1xf32>
    %cst_189 = arith.constant 1.600000e+01 : f32
    %580 = vector.broadcast %cst_189 : f32 to vector<2x1xf32>
    %581 = arith.divf %579, %580 : vector<2x1xf32>
    %cst_190 = arith.constant 9.99999974E-6 : f32
    %582 = vector.broadcast %cst_190 : f32 to vector<2x1xf32>
    %583 = arith.addf %581, %582 : vector<2x1xf32>
    %584 = math.rsqrt %583 : vector<2x1xf32>
    %585 = vector.broadcast %584 : vector<2x1xf32> to vector<2x16xf32>
    %586 = arith.mulf %576, %585 : vector<2x16xf32>
    %587 = vector.extract_strided_slice %535 {offsets = [0, 48], sizes = [2, 16], strides = [1, 1]} : vector<2x128xf32> to vector<2x16xf32>
    %cst_191 = arith.constant dense<0.000000e+00> : vector<2xf32>
    %588 = vector.multi_reduction <add>, %587, %cst_191 [1] : vector<2x16xf32> to vector<2xf32>
    %589 = vector.shape_cast %588 : vector<2xf32> to vector<2x1xf32>
    %cst_192 = arith.constant 1.600000e+01 : f32
    %590 = vector.broadcast %cst_192 : f32 to vector<2x1xf32>
    %591 = arith.divf %589, %590 : vector<2x1xf32>
    %592 = vector.broadcast %591 : vector<2x1xf32> to vector<2x16xf32>
    %593 = arith.subf %587, %592 : vector<2x16xf32>
    %594 = arith.mulf %593, %593 : vector<2x16xf32>
    %cst_193 = arith.constant dense<0.000000e+00> : vector<2xf32>
    %595 = vector.multi_reduction <add>, %594, %cst_193 [1] : vector<2x16xf32> to vector<2xf32>
    %596 = vector.shape_cast %595 : vector<2xf32> to vector<2x1xf32>
    %cst_194 = arith.constant 1.600000e+01 : f32
    %597 = vector.broadcast %cst_194 : f32 to vector<2x1xf32>
    %598 = arith.divf %596, %597 : vector<2x1xf32>
    %cst_195 = arith.constant 9.99999974E-6 : f32
    %599 = vector.broadcast %cst_195 : f32 to vector<2x1xf32>
    %600 = arith.addf %598, %599 : vector<2x1xf32>
    %601 = math.rsqrt %600 : vector<2x1xf32>
    %602 = vector.broadcast %601 : vector<2x1xf32> to vector<2x16xf32>
    %603 = arith.mulf %593, %602 : vector<2x16xf32>
    %604 = vector.extract_strided_slice %535 {offsets = [0, 64], sizes = [2, 16], strides = [1, 1]} : vector<2x128xf32> to vector<2x16xf32>
    %cst_196 = arith.constant dense<0.000000e+00> : vector<2xf32>
    %605 = vector.multi_reduction <add>, %604, %cst_196 [1] : vector<2x16xf32> to vector<2xf32>
    %606 = vector.shape_cast %605 : vector<2xf32> to vector<2x1xf32>
    %cst_197 = arith.constant 1.600000e+01 : f32
    %607 = vector.broadcast %cst_197 : f32 to vector<2x1xf32>
    %608 = arith.divf %606, %607 : vector<2x1xf32>
    %609 = vector.broadcast %608 : vector<2x1xf32> to vector<2x16xf32>
    %610 = arith.subf %604, %609 : vector<2x16xf32>
    %611 = arith.mulf %610, %610 : vector<2x16xf32>
    %cst_198 = arith.constant dense<0.000000e+00> : vector<2xf32>
    %612 = vector.multi_reduction <add>, %611, %cst_198 [1] : vector<2x16xf32> to vector<2xf32>
    %613 = vector.shape_cast %612 : vector<2xf32> to vector<2x1xf32>
    %cst_199 = arith.constant 1.600000e+01 : f32
    %614 = vector.broadcast %cst_199 : f32 to vector<2x1xf32>
    %615 = arith.divf %613, %614 : vector<2x1xf32>
    %cst_200 = arith.constant 9.99999974E-6 : f32
    %616 = vector.broadcast %cst_200 : f32 to vector<2x1xf32>
    %617 = arith.addf %615, %616 : vector<2x1xf32>
    %618 = math.rsqrt %617 : vector<2x1xf32>
    %619 = vector.broadcast %618 : vector<2x1xf32> to vector<2x16xf32>
    %620 = arith.mulf %610, %619 : vector<2x16xf32>
    %621 = vector.extract_strided_slice %535 {offsets = [0, 80], sizes = [2, 16], strides = [1, 1]} : vector<2x128xf32> to vector<2x16xf32>
    %cst_201 = arith.constant dense<0.000000e+00> : vector<2xf32>
    %622 = vector.multi_reduction <add>, %621, %cst_201 [1] : vector<2x16xf32> to vector<2xf32>
    %623 = vector.shape_cast %622 : vector<2xf32> to vector<2x1xf32>
    %cst_202 = arith.constant 1.600000e+01 : f32
    %624 = vector.broadcast %cst_202 : f32 to vector<2x1xf32>
    %625 = arith.divf %623, %624 : vector<2x1xf32>
    %626 = vector.broadcast %625 : vector<2x1xf32> to vector<2x16xf32>
    %627 = arith.subf %621, %626 : vector<2x16xf32>
    %628 = arith.mulf %627, %627 : vector<2x16xf32>
    %cst_203 = arith.constant dense<0.000000e+00> : vector<2xf32>
    %629 = vector.multi_reduction <add>, %628, %cst_203 [1] : vector<2x16xf32> to vector<2xf32>
    %630 = vector.shape_cast %629 : vector<2xf32> to vector<2x1xf32>
    %cst_204 = arith.constant 1.600000e+01 : f32
    %631 = vector.broadcast %cst_204 : f32 to vector<2x1xf32>
    %632 = arith.divf %630, %631 : vector<2x1xf32>
    %cst_205 = arith.constant 9.99999974E-6 : f32
    %633 = vector.broadcast %cst_205 : f32 to vector<2x1xf32>
    %634 = arith.addf %632, %633 : vector<2x1xf32>
    %635 = math.rsqrt %634 : vector<2x1xf32>
    %636 = vector.broadcast %635 : vector<2x1xf32> to vector<2x16xf32>
    %637 = arith.mulf %627, %636 : vector<2x16xf32>
    %638 = vector.extract_strided_slice %535 {offsets = [0, 96], sizes = [2, 16], strides = [1, 1]} : vector<2x128xf32> to vector<2x16xf32>
    %cst_206 = arith.constant dense<0.000000e+00> : vector<2xf32>
    %639 = vector.multi_reduction <add>, %638, %cst_206 [1] : vector<2x16xf32> to vector<2xf32>
    %640 = vector.shape_cast %639 : vector<2xf32> to vector<2x1xf32>
    %cst_207 = arith.constant 1.600000e+01 : f32
    %641 = vector.broadcast %cst_207 : f32 to vector<2x1xf32>
    %642 = arith.divf %640, %641 : vector<2x1xf32>
    %643 = vector.broadcast %642 : vector<2x1xf32> to vector<2x16xf32>
    %644 = arith.subf %638, %643 : vector<2x16xf32>
    %645 = arith.mulf %644, %644 : vector<2x16xf32>
    %cst_208 = arith.constant dense<0.000000e+00> : vector<2xf32>
    %646 = vector.multi_reduction <add>, %645, %cst_208 [1] : vector<2x16xf32> to vector<2xf32>
    %647 = vector.shape_cast %646 : vector<2xf32> to vector<2x1xf32>
    %cst_209 = arith.constant 1.600000e+01 : f32
    %648 = vector.broadcast %cst_209 : f32 to vector<2x1xf32>
    %649 = arith.divf %647, %648 : vector<2x1xf32>
    %cst_210 = arith.constant 9.99999974E-6 : f32
    %650 = vector.broadcast %cst_210 : f32 to vector<2x1xf32>
    %651 = arith.addf %649, %650 : vector<2x1xf32>
    %652 = math.rsqrt %651 : vector<2x1xf32>
    %653 = vector.broadcast %652 : vector<2x1xf32> to vector<2x16xf32>
    %654 = arith.mulf %644, %653 : vector<2x16xf32>
    %655 = vector.extract_strided_slice %535 {offsets = [0, 112], sizes = [2, 16], strides = [1, 1]} : vector<2x128xf32> to vector<2x16xf32>
    %cst_211 = arith.constant dense<0.000000e+00> : vector<2xf32>
    %656 = vector.multi_reduction <add>, %655, %cst_211 [1] : vector<2x16xf32> to vector<2xf32>
    %657 = vector.shape_cast %656 : vector<2xf32> to vector<2x1xf32>
    %cst_212 = arith.constant 1.600000e+01 : f32
    %658 = vector.broadcast %cst_212 : f32 to vector<2x1xf32>
    %659 = arith.divf %657, %658 : vector<2x1xf32>
    %660 = vector.broadcast %659 : vector<2x1xf32> to vector<2x16xf32>
    %661 = arith.subf %655, %660 : vector<2x16xf32>
    %662 = arith.mulf %661, %661 : vector<2x16xf32>
    %cst_213 = arith.constant dense<0.000000e+00> : vector<2xf32>
    %663 = vector.multi_reduction <add>, %662, %cst_213 [1] : vector<2x16xf32> to vector<2xf32>
    %664 = vector.shape_cast %663 : vector<2xf32> to vector<2x1xf32>
    %cst_214 = arith.constant 1.600000e+01 : f32
    %665 = vector.broadcast %cst_214 : f32 to vector<2x1xf32>
    %666 = arith.divf %664, %665 : vector<2x1xf32>
    %cst_215 = arith.constant 9.99999974E-6 : f32
    %667 = vector.broadcast %cst_215 : f32 to vector<2x1xf32>
    %668 = arith.addf %666, %667 : vector<2x1xf32>
    %669 = math.rsqrt %668 : vector<2x1xf32>
    %670 = vector.broadcast %669 : vector<2x1xf32> to vector<2x16xf32>
    %671 = arith.mulf %661, %670 : vector<2x16xf32>
    %672 = tpu.concatenate %552, %569, %586, %603, %620, %637, %654, %671 in 1 : vector<2x16xf32>, vector<2x16xf32>, vector<2x16xf32>, vector<2x16xf32>, vector<2x16xf32>, vector<2x16xf32>, vector<2x16xf32>, vector<2x16xf32> -> vector<2x128xf32>
    %c0_216 = arith.constant 0 : index
    %c2688 = arith.constant 2688 : index
    %673 = vector.load %arg2[%c0_216, %c2688] : memref<1x8704xf32, #tpu.memory_space<vmem>>, vector<1x128xf32>
    %674 = vector.broadcast %673 : vector<1x128xf32> to vector<2x128xf32>
    %675 = arith.mulf %672, %674 : vector<2x128xf32>
    %c0_217 = arith.constant 0 : index
    %c2816 = arith.constant 2816 : index
    %676 = vector.load %arg2[%c0_217, %c2816] : memref<1x8704xf32, #tpu.memory_space<vmem>>, vector<1x128xf32>
    %677 = vector.broadcast %676 : vector<1x128xf32> to vector<2x128xf32>
    %678 = arith.addf %675, %677 : vector<2x128xf32>
    %cst_218 = arith.constant 2.000000e+01 : f32
    %679 = vector.broadcast %cst_218 : f32 to vector<2x128xf32>
    %680 = arith.minimumf %678, %679 : vector<2x128xf32>
    %681 = math.exp %680 : vector<2x128xf32>
    %cst_219 = arith.constant 1.000000e+00 : f32
    %682 = vector.broadcast %cst_219 : f32 to vector<2x128xf32>
    %683 = arith.addf %682, %681 : vector<2x128xf32>
    %684 = math.log %683 : vector<2x128xf32>
    %cst_220 = arith.constant 2.000000e+01 : f32
    %685 = vector.broadcast %cst_220 : f32 to vector<2x128xf32>
    %686 = arith.cmpf ogt, %678, %685 : vector<2x128xf32>
    %687 = arith.select %686, %678, %684 : vector<2x128xi1>, vector<2x128xf32>
    %688 = math.tanh %687 : vector<2x128xf32>
    %689 = arith.mulf %678, %688 : vector<2x128xf32>
    %690 = arith.addf %689, %367 : vector<2x128xf32>
    %c0_221 = arith.constant 0 : index
    %c384 = arith.constant 384 : index
    %691 = vector.load %arg6[%c0_221, %c384] : memref<128x768xbf16, #tpu.memory_space<vmem>>, vector<128x64xbf16>
    %692 = arith.truncf %690 : vector<2x128xf32> to vector<2x128xbf16>
    %cst_222 = arith.constant dense<0.000000e+00> : vector<2x64xf32>
    %693 = tpu.matmul %692, %691, %cst_222 {dimension_numbers = #tpu.dot_dimension_numbers<[1], [0], [0], [1], [0, 0, 1, 1], [], []>} : vector<2x128xbf16>, vector<128x64xbf16>, vector<2x64xf32> -> vector<2x64xf32>
    %c0_223 = arith.constant 0 : index
    %c2944 = arith.constant 2944 : index
    %694 = vector.load %arg2[%c0_223, %c2944] : memref<1x8704xf32, #tpu.memory_space<vmem>>, vector<1x64xf32>
    %695 = vector.broadcast %694 : vector<1x64xf32> to vector<2x64xf32>
    %696 = arith.addf %693, %695 : vector<2x64xf32>
    %c0_224 = arith.constant 0 : index
    %c256_225 = arith.constant 256 : index
    %697 = vector.load %arg5[%c0_224, %c256_225] : memref<64x1024xbf16, #tpu.memory_space<vmem>>, vector<64x256xbf16>
    %698 = arith.truncf %696 : vector<2x64xf32> to vector<2x64xbf16>
    %cst_226 = arith.constant dense<0.000000e+00> : vector<2x256xf32>
    %699 = tpu.matmul %698, %697, %cst_226 {dimension_numbers = #tpu.dot_dimension_numbers<[1], [0], [0], [1], [0, 0, 1, 1], [], []>} : vector<2x64xbf16>, vector<64x256xbf16>, vector<2x256xf32> -> vector<2x256xf32>
    %c0_227 = arith.constant 0 : index
    %c3072 = arith.constant 3072 : index
    %700 = vector.load %arg2[%c0_227, %c3072] : memref<1x8704xf32, #tpu.memory_space<vmem>>, vector<1x256xf32>
    %701 = vector.broadcast %700 : vector<1x256xf32> to vector<2x256xf32>
    %702 = arith.addf %699, %701 : vector<2x256xf32>
    %703 = vector.extract_strided_slice %702 {offsets = [0, 0], sizes = [2, 32], strides = [1, 1]} : vector<2x256xf32> to vector<2x32xf32>
    %cst_228 = arith.constant dense<0.000000e+00> : vector<2xf32>
    %704 = vector.multi_reduction <add>, %703, %cst_228 [1] : vector<2x32xf32> to vector<2xf32>
    %705 = vector.shape_cast %704 : vector<2xf32> to vector<2x1xf32>
    %cst_229 = arith.constant 3.200000e+01 : f32
    %706 = vector.broadcast %cst_229 : f32 to vector<2x1xf32>
    %707 = arith.divf %705, %706 : vector<2x1xf32>
    %708 = vector.broadcast %707 : vector<2x1xf32> to vector<2x32xf32>
    %709 = arith.subf %703, %708 : vector<2x32xf32>
    %710 = arith.mulf %709, %709 : vector<2x32xf32>
    %cst_230 = arith.constant dense<0.000000e+00> : vector<2xf32>
    %711 = vector.multi_reduction <add>, %710, %cst_230 [1] : vector<2x32xf32> to vector<2xf32>
    %712 = vector.shape_cast %711 : vector<2xf32> to vector<2x1xf32>
    %cst_231 = arith.constant 3.200000e+01 : f32
    %713 = vector.broadcast %cst_231 : f32 to vector<2x1xf32>
    %714 = arith.divf %712, %713 : vector<2x1xf32>
    %cst_232 = arith.constant 9.99999974E-6 : f32
    %715 = vector.broadcast %cst_232 : f32 to vector<2x1xf32>
    %716 = arith.addf %714, %715 : vector<2x1xf32>
    %717 = math.rsqrt %716 : vector<2x1xf32>
    %718 = vector.broadcast %717 : vector<2x1xf32> to vector<2x32xf32>
    %719 = arith.mulf %709, %718 : vector<2x32xf32>
    %720 = vector.extract_strided_slice %702 {offsets = [0, 32], sizes = [2, 32], strides = [1, 1]} : vector<2x256xf32> to vector<2x32xf32>
    %cst_233 = arith.constant dense<0.000000e+00> : vector<2xf32>
    %721 = vector.multi_reduction <add>, %720, %cst_233 [1] : vector<2x32xf32> to vector<2xf32>
    %722 = vector.shape_cast %721 : vector<2xf32> to vector<2x1xf32>
    %cst_234 = arith.constant 3.200000e+01 : f32
    %723 = vector.broadcast %cst_234 : f32 to vector<2x1xf32>
    %724 = arith.divf %722, %723 : vector<2x1xf32>
    %725 = vector.broadcast %724 : vector<2x1xf32> to vector<2x32xf32>
    %726 = arith.subf %720, %725 : vector<2x32xf32>
    %727 = arith.mulf %726, %726 : vector<2x32xf32>
    %cst_235 = arith.constant dense<0.000000e+00> : vector<2xf32>
    %728 = vector.multi_reduction <add>, %727, %cst_235 [1] : vector<2x32xf32> to vector<2xf32>
    %729 = vector.shape_cast %728 : vector<2xf32> to vector<2x1xf32>
    %cst_236 = arith.constant 3.200000e+01 : f32
    %730 = vector.broadcast %cst_236 : f32 to vector<2x1xf32>
    %731 = arith.divf %729, %730 : vector<2x1xf32>
    %cst_237 = arith.constant 9.99999974E-6 : f32
    %732 = vector.broadcast %cst_237 : f32 to vector<2x1xf32>
    %733 = arith.addf %731, %732 : vector<2x1xf32>
    %734 = math.rsqrt %733 : vector<2x1xf32>
    %735 = vector.broadcast %734 : vector<2x1xf32> to vector<2x32xf32>
    %736 = arith.mulf %726, %735 : vector<2x32xf32>
    %737 = vector.extract_strided_slice %702 {offsets = [0, 64], sizes = [2, 32], strides = [1, 1]} : vector<2x256xf32> to vector<2x32xf32>
    %cst_238 = arith.constant dense<0.000000e+00> : vector<2xf32>
    %738 = vector.multi_reduction <add>, %737, %cst_238 [1] : vector<2x32xf32> to vector<2xf32>
    %739 = vector.shape_cast %738 : vector<2xf32> to vector<2x1xf32>
    %cst_239 = arith.constant 3.200000e+01 : f32
    %740 = vector.broadcast %cst_239 : f32 to vector<2x1xf32>
    %741 = arith.divf %739, %740 : vector<2x1xf32>
    %742 = vector.broadcast %741 : vector<2x1xf32> to vector<2x32xf32>
    %743 = arith.subf %737, %742 : vector<2x32xf32>
    %744 = arith.mulf %743, %743 : vector<2x32xf32>
    %cst_240 = arith.constant dense<0.000000e+00> : vector<2xf32>
    %745 = vector.multi_reduction <add>, %744, %cst_240 [1] : vector<2x32xf32> to vector<2xf32>
    %746 = vector.shape_cast %745 : vector<2xf32> to vector<2x1xf32>
    %cst_241 = arith.constant 3.200000e+01 : f32
    %747 = vector.broadcast %cst_241 : f32 to vector<2x1xf32>
    %748 = arith.divf %746, %747 : vector<2x1xf32>
    %cst_242 = arith.constant 9.99999974E-6 : f32
    %749 = vector.broadcast %cst_242 : f32 to vector<2x1xf32>
    %750 = arith.addf %748, %749 : vector<2x1xf32>
    %751 = math.rsqrt %750 : vector<2x1xf32>
    %752 = vector.broadcast %751 : vector<2x1xf32> to vector<2x32xf32>
    %753 = arith.mulf %743, %752 : vector<2x32xf32>
    %754 = vector.extract_strided_slice %702 {offsets = [0, 96], sizes = [2, 32], strides = [1, 1]} : vector<2x256xf32> to vector<2x32xf32>
    %cst_243 = arith.constant dense<0.000000e+00> : vector<2xf32>
    %755 = vector.multi_reduction <add>, %754, %cst_243 [1] : vector<2x32xf32> to vector<2xf32>
    %756 = vector.shape_cast %755 : vector<2xf32> to vector<2x1xf32>
    %cst_244 = arith.constant 3.200000e+01 : f32
    %757 = vector.broadcast %cst_244 : f32 to vector<2x1xf32>
    %758 = arith.divf %756, %757 : vector<2x1xf32>
    %759 = vector.broadcast %758 : vector<2x1xf32> to vector<2x32xf32>
    %760 = arith.subf %754, %759 : vector<2x32xf32>
    %761 = arith.mulf %760, %760 : vector<2x32xf32>
    %cst_245 = arith.constant dense<0.000000e+00> : vector<2xf32>
    %762 = vector.multi_reduction <add>, %761, %cst_245 [1] : vector<2x32xf32> to vector<2xf32>
    %763 = vector.shape_cast %762 : vector<2xf32> to vector<2x1xf32>
    %cst_246 = arith.constant 3.200000e+01 : f32
    %764 = vector.broadcast %cst_246 : f32 to vector<2x1xf32>
    %765 = arith.divf %763, %764 : vector<2x1xf32>
    %cst_247 = arith.constant 9.99999974E-6 : f32
    %766 = vector.broadcast %cst_247 : f32 to vector<2x1xf32>
    %767 = arith.addf %765, %766 : vector<2x1xf32>
    %768 = math.rsqrt %767 : vector<2x1xf32>
    %769 = vector.broadcast %768 : vector<2x1xf32> to vector<2x32xf32>
    %770 = arith.mulf %760, %769 : vector<2x32xf32>
    %771 = vector.extract_strided_slice %702 {offsets = [0, 128], sizes = [2, 32], strides = [1, 1]} : vector<2x256xf32> to vector<2x32xf32>
    %cst_248 = arith.constant dense<0.000000e+00> : vector<2xf32>
    %772 = vector.multi_reduction <add>, %771, %cst_248 [1] : vector<2x32xf32> to vector<2xf32>
    %773 = vector.shape_cast %772 : vector<2xf32> to vector<2x1xf32>
    %cst_249 = arith.constant 3.200000e+01 : f32
    %774 = vector.broadcast %cst_249 : f32 to vector<2x1xf32>
    %775 = arith.divf %773, %774 : vector<2x1xf32>
    %776 = vector.broadcast %775 : vector<2x1xf32> to vector<2x32xf32>
    %777 = arith.subf %771, %776 : vector<2x32xf32>
    %778 = arith.mulf %777, %777 : vector<2x32xf32>
    %cst_250 = arith.constant dense<0.000000e+00> : vector<2xf32>
    %779 = vector.multi_reduction <add>, %778, %cst_250 [1] : vector<2x32xf32> to vector<2xf32>
    %780 = vector.shape_cast %779 : vector<2xf32> to vector<2x1xf32>
    %cst_251 = arith.constant 3.200000e+01 : f32
    %781 = vector.broadcast %cst_251 : f32 to vector<2x1xf32>
    %782 = arith.divf %780, %781 : vector<2x1xf32>
    %cst_252 = arith.constant 9.99999974E-6 : f32
    %783 = vector.broadcast %cst_252 : f32 to vector<2x1xf32>
    %784 = arith.addf %782, %783 : vector<2x1xf32>
    %785 = math.rsqrt %784 : vector<2x1xf32>
    %786 = vector.broadcast %785 : vector<2x1xf32> to vector<2x32xf32>
    %787 = arith.mulf %777, %786 : vector<2x32xf32>
    %788 = vector.extract_strided_slice %702 {offsets = [0, 160], sizes = [2, 32], strides = [1, 1]} : vector<2x256xf32> to vector<2x32xf32>
    %cst_253 = arith.constant dense<0.000000e+00> : vector<2xf32>
    %789 = vector.multi_reduction <add>, %788, %cst_253 [1] : vector<2x32xf32> to vector<2xf32>
    %790 = vector.shape_cast %789 : vector<2xf32> to vector<2x1xf32>
    %cst_254 = arith.constant 3.200000e+01 : f32
    %791 = vector.broadcast %cst_254 : f32 to vector<2x1xf32>
    %792 = arith.divf %790, %791 : vector<2x1xf32>
    %793 = vector.broadcast %792 : vector<2x1xf32> to vector<2x32xf32>
    %794 = arith.subf %788, %793 : vector<2x32xf32>
    %795 = arith.mulf %794, %794 : vector<2x32xf32>
    %cst_255 = arith.constant dense<0.000000e+00> : vector<2xf32>
    %796 = vector.multi_reduction <add>, %795, %cst_255 [1] : vector<2x32xf32> to vector<2xf32>
    %797 = vector.shape_cast %796 : vector<2xf32> to vector<2x1xf32>
    %cst_256 = arith.constant 3.200000e+01 : f32
    %798 = vector.broadcast %cst_256 : f32 to vector<2x1xf32>
    %799 = arith.divf %797, %798 : vector<2x1xf32>
    %cst_257 = arith.constant 9.99999974E-6 : f32
    %800 = vector.broadcast %cst_257 : f32 to vector<2x1xf32>
    %801 = arith.addf %799, %800 : vector<2x1xf32>
    %802 = math.rsqrt %801 : vector<2x1xf32>
    %803 = vector.broadcast %802 : vector<2x1xf32> to vector<2x32xf32>
    %804 = arith.mulf %794, %803 : vector<2x32xf32>
    %805 = vector.extract_strided_slice %702 {offsets = [0, 192], sizes = [2, 32], strides = [1, 1]} : vector<2x256xf32> to vector<2x32xf32>
    %cst_258 = arith.constant dense<0.000000e+00> : vector<2xf32>
    %806 = vector.multi_reduction <add>, %805, %cst_258 [1] : vector<2x32xf32> to vector<2xf32>
    %807 = vector.shape_cast %806 : vector<2xf32> to vector<2x1xf32>
    %cst_259 = arith.constant 3.200000e+01 : f32
    %808 = vector.broadcast %cst_259 : f32 to vector<2x1xf32>
    %809 = arith.divf %807, %808 : vector<2x1xf32>
    %810 = vector.broadcast %809 : vector<2x1xf32> to vector<2x32xf32>
    %811 = arith.subf %805, %810 : vector<2x32xf32>
    %812 = arith.mulf %811, %811 : vector<2x32xf32>
    %cst_260 = arith.constant dense<0.000000e+00> : vector<2xf32>
    %813 = vector.multi_reduction <add>, %812, %cst_260 [1] : vector<2x32xf32> to vector<2xf32>
    %814 = vector.shape_cast %813 : vector<2xf32> to vector<2x1xf32>
    %cst_261 = arith.constant 3.200000e+01 : f32
    %815 = vector.broadcast %cst_261 : f32 to vector<2x1xf32>
    %816 = arith.divf %814, %815 : vector<2x1xf32>
    %cst_262 = arith.constant 9.99999974E-6 : f32
    %817 = vector.broadcast %cst_262 : f32 to vector<2x1xf32>
    %818 = arith.addf %816, %817 : vector<2x1xf32>
    %819 = math.rsqrt %818 : vector<2x1xf32>
    %820 = vector.broadcast %819 : vector<2x1xf32> to vector<2x32xf32>
    %821 = arith.mulf %811, %820 : vector<2x32xf32>
    %822 = vector.extract_strided_slice %702 {offsets = [0, 224], sizes = [2, 32], strides = [1, 1]} : vector<2x256xf32> to vector<2x32xf32>
    %cst_263 = arith.constant dense<0.000000e+00> : vector<2xf32>
    %823 = vector.multi_reduction <add>, %822, %cst_263 [1] : vector<2x32xf32> to vector<2xf32>
    %824 = vector.shape_cast %823 : vector<2xf32> to vector<2x1xf32>
    %cst_264 = arith.constant 3.200000e+01 : f32
    %825 = vector.broadcast %cst_264 : f32 to vector<2x1xf32>
    %826 = arith.divf %824, %825 : vector<2x1xf32>
    %827 = vector.broadcast %826 : vector<2x1xf32> to vector<2x32xf32>
    %828 = arith.subf %822, %827 : vector<2x32xf32>
    %829 = arith.mulf %828, %828 : vector<2x32xf32>
    %cst_265 = arith.constant dense<0.000000e+00> : vector<2xf32>
    %830 = vector.multi_reduction <add>, %829, %cst_265 [1] : vector<2x32xf32> to vector<2xf32>
    %831 = vector.shape_cast %830 : vector<2xf32> to vector<2x1xf32>
    %cst_266 = arith.constant 3.200000e+01 : f32
    %832 = vector.broadcast %cst_266 : f32 to vector<2x1xf32>
    %833 = arith.divf %831, %832 : vector<2x1xf32>
    %cst_267 = arith.constant 9.99999974E-6 : f32
    %834 = vector.broadcast %cst_267 : f32 to vector<2x1xf32>
    %835 = arith.addf %833, %834 : vector<2x1xf32>
    %836 = math.rsqrt %835 : vector<2x1xf32>
    %837 = vector.broadcast %836 : vector<2x1xf32> to vector<2x32xf32>
    %838 = arith.mulf %828, %837 : vector<2x32xf32>
    %839 = tpu.concatenate %719, %736, %753, %770, %787, %804, %821, %838 in 1 : vector<2x32xf32>, vector<2x32xf32>, vector<2x32xf32>, vector<2x32xf32>, vector<2x32xf32>, vector<2x32xf32>, vector<2x32xf32>, vector<2x32xf32> -> vector<2x256xf32>
    %c0_268 = arith.constant 0 : index
    %c3328 = arith.constant 3328 : index
    %840 = vector.load %arg2[%c0_268, %c3328] : memref<1x8704xf32, #tpu.memory_space<vmem>>, vector<1x256xf32>
    %841 = vector.broadcast %840 : vector<1x256xf32> to vector<2x256xf32>
    %842 = arith.mulf %839, %841 : vector<2x256xf32>
    %c0_269 = arith.constant 0 : index
    %c3584 = arith.constant 3584 : index
    %843 = vector.load %arg2[%c0_269, %c3584] : memref<1x8704xf32, #tpu.memory_space<vmem>>, vector<1x256xf32>
    %844 = vector.broadcast %843 : vector<1x256xf32> to vector<2x256xf32>
    %845 = arith.addf %842, %844 : vector<2x256xf32>
    %cst_270 = arith.constant 2.000000e+01 : f32
    %846 = vector.broadcast %cst_270 : f32 to vector<2x256xf32>
    %847 = arith.minimumf %845, %846 : vector<2x256xf32>
    %848 = math.exp %847 : vector<2x256xf32>
    %cst_271 = arith.constant 1.000000e+00 : f32
    %849 = vector.broadcast %cst_271 : f32 to vector<2x256xf32>
    %850 = arith.addf %849, %848 : vector<2x256xf32>
    %851 = math.log %850 : vector<2x256xf32>
    %cst_272 = arith.constant 2.000000e+01 : f32
    %852 = vector.broadcast %cst_272 : f32 to vector<2x256xf32>
    %853 = arith.cmpf ogt, %845, %852 : vector<2x256xf32>
    %854 = arith.select %853, %845, %851 : vector<2x256xi1>, vector<2x256xf32>
    %855 = math.tanh %854 : vector<2x256xf32>
    %856 = arith.mulf %845, %855 : vector<2x256xf32>
    %857 = vector.extract_strided_slice %37 {offsets = [0, 256], sizes = [2, 256], strides = [1, 1]} : vector<2x928xf32> to vector<2x256xf32>
    %858 = arith.addf %856, %857 : vector<2x256xf32>
    %c0_273 = arith.constant 0 : index
    %c0_274 = arith.constant 0 : index
    %859 = vector.load %arg7[%c0_273, %c0_274] : memref<256x1024xbf16, #tpu.memory_space<vmem>>, vector<256x256xbf16>
    %860 = arith.truncf %858 : vector<2x256xf32> to vector<2x256xbf16>
    %cst_275 = arith.constant dense<0.000000e+00> : vector<2x256xf32>
    %861 = tpu.matmul %860, %859, %cst_275 {dimension_numbers = #tpu.dot_dimension_numbers<[1], [0], [0], [1], [0, 0, 1, 1], [], []>} : vector<2x256xbf16>, vector<256x256xbf16>, vector<2x256xf32> -> vector<2x256xf32>
    %c0_276 = arith.constant 0 : index
    %c3840 = arith.constant 3840 : index
    %862 = vector.load %arg2[%c0_276, %c3840] : memref<1x8704xf32, #tpu.memory_space<vmem>>, vector<1x256xf32>
    %863 = vector.broadcast %862 : vector<1x256xf32> to vector<2x256xf32>
    %864 = arith.addf %861, %863 : vector<2x256xf32>
    %865 = vector.extract_strided_slice %864 {offsets = [0, 0], sizes = [2, 32], strides = [1, 1]} : vector<2x256xf32> to vector<2x32xf32>
    %cst_277 = arith.constant dense<0.000000e+00> : vector<2xf32>
    %866 = vector.multi_reduction <add>, %865, %cst_277 [1] : vector<2x32xf32> to vector<2xf32>
    %867 = vector.shape_cast %866 : vector<2xf32> to vector<2x1xf32>
    %cst_278 = arith.constant 3.200000e+01 : f32
    %868 = vector.broadcast %cst_278 : f32 to vector<2x1xf32>
    %869 = arith.divf %867, %868 : vector<2x1xf32>
    %870 = vector.broadcast %869 : vector<2x1xf32> to vector<2x32xf32>
    %871 = arith.subf %865, %870 : vector<2x32xf32>
    %872 = arith.mulf %871, %871 : vector<2x32xf32>
    %cst_279 = arith.constant dense<0.000000e+00> : vector<2xf32>
    %873 = vector.multi_reduction <add>, %872, %cst_279 [1] : vector<2x32xf32> to vector<2xf32>
    %874 = vector.shape_cast %873 : vector<2xf32> to vector<2x1xf32>
    %cst_280 = arith.constant 3.200000e+01 : f32
    %875 = vector.broadcast %cst_280 : f32 to vector<2x1xf32>
    %876 = arith.divf %874, %875 : vector<2x1xf32>
    %cst_281 = arith.constant 9.99999974E-6 : f32
    %877 = vector.broadcast %cst_281 : f32 to vector<2x1xf32>
    %878 = arith.addf %876, %877 : vector<2x1xf32>
    %879 = math.rsqrt %878 : vector<2x1xf32>
    %880 = vector.broadcast %879 : vector<2x1xf32> to vector<2x32xf32>
    %881 = arith.mulf %871, %880 : vector<2x32xf32>
    %882 = vector.extract_strided_slice %864 {offsets = [0, 32], sizes = [2, 32], strides = [1, 1]} : vector<2x256xf32> to vector<2x32xf32>
    %cst_282 = arith.constant dense<0.000000e+00> : vector<2xf32>
    %883 = vector.multi_reduction <add>, %882, %cst_282 [1] : vector<2x32xf32> to vector<2xf32>
    %884 = vector.shape_cast %883 : vector<2xf32> to vector<2x1xf32>
    %cst_283 = arith.constant 3.200000e+01 : f32
    %885 = vector.broadcast %cst_283 : f32 to vector<2x1xf32>
    %886 = arith.divf %884, %885 : vector<2x1xf32>
    %887 = vector.broadcast %886 : vector<2x1xf32> to vector<2x32xf32>
    %888 = arith.subf %882, %887 : vector<2x32xf32>
    %889 = arith.mulf %888, %888 : vector<2x32xf32>
    %cst_284 = arith.constant dense<0.000000e+00> : vector<2xf32>
    %890 = vector.multi_reduction <add>, %889, %cst_284 [1] : vector<2x32xf32> to vector<2xf32>
    %891 = vector.shape_cast %890 : vector<2xf32> to vector<2x1xf32>
    %cst_285 = arith.constant 3.200000e+01 : f32
    %892 = vector.broadcast %cst_285 : f32 to vector<2x1xf32>
    %893 = arith.divf %891, %892 : vector<2x1xf32>
    %cst_286 = arith.constant 9.99999974E-6 : f32
    %894 = vector.broadcast %cst_286 : f32 to vector<2x1xf32>
    %895 = arith.addf %893, %894 : vector<2x1xf32>
    %896 = math.rsqrt %895 : vector<2x1xf32>
    %897 = vector.broadcast %896 : vector<2x1xf32> to vector<2x32xf32>
    %898 = arith.mulf %888, %897 : vector<2x32xf32>
    %899 = vector.extract_strided_slice %864 {offsets = [0, 64], sizes = [2, 32], strides = [1, 1]} : vector<2x256xf32> to vector<2x32xf32>
    %cst_287 = arith.constant dense<0.000000e+00> : vector<2xf32>
    %900 = vector.multi_reduction <add>, %899, %cst_287 [1] : vector<2x32xf32> to vector<2xf32>
    %901 = vector.shape_cast %900 : vector<2xf32> to vector<2x1xf32>
    %cst_288 = arith.constant 3.200000e+01 : f32
    %902 = vector.broadcast %cst_288 : f32 to vector<2x1xf32>
    %903 = arith.divf %901, %902 : vector<2x1xf32>
    %904 = vector.broadcast %903 : vector<2x1xf32> to vector<2x32xf32>
    %905 = arith.subf %899, %904 : vector<2x32xf32>
    %906 = arith.mulf %905, %905 : vector<2x32xf32>
    %cst_289 = arith.constant dense<0.000000e+00> : vector<2xf32>
    %907 = vector.multi_reduction <add>, %906, %cst_289 [1] : vector<2x32xf32> to vector<2xf32>
    %908 = vector.shape_cast %907 : vector<2xf32> to vector<2x1xf32>
    %cst_290 = arith.constant 3.200000e+01 : f32
    %909 = vector.broadcast %cst_290 : f32 to vector<2x1xf32>
    %910 = arith.divf %908, %909 : vector<2x1xf32>
    %cst_291 = arith.constant 9.99999974E-6 : f32
    %911 = vector.broadcast %cst_291 : f32 to vector<2x1xf32>
    %912 = arith.addf %910, %911 : vector<2x1xf32>
    %913 = math.rsqrt %912 : vector<2x1xf32>
    %914 = vector.broadcast %913 : vector<2x1xf32> to vector<2x32xf32>
    %915 = arith.mulf %905, %914 : vector<2x32xf32>
    %916 = vector.extract_strided_slice %864 {offsets = [0, 96], sizes = [2, 32], strides = [1, 1]} : vector<2x256xf32> to vector<2x32xf32>
    %cst_292 = arith.constant dense<0.000000e+00> : vector<2xf32>
    %917 = vector.multi_reduction <add>, %916, %cst_292 [1] : vector<2x32xf32> to vector<2xf32>
    %918 = vector.shape_cast %917 : vector<2xf32> to vector<2x1xf32>
    %cst_293 = arith.constant 3.200000e+01 : f32
    %919 = vector.broadcast %cst_293 : f32 to vector<2x1xf32>
    %920 = arith.divf %918, %919 : vector<2x1xf32>
    %921 = vector.broadcast %920 : vector<2x1xf32> to vector<2x32xf32>
    %922 = arith.subf %916, %921 : vector<2x32xf32>
    %923 = arith.mulf %922, %922 : vector<2x32xf32>
    %cst_294 = arith.constant dense<0.000000e+00> : vector<2xf32>
    %924 = vector.multi_reduction <add>, %923, %cst_294 [1] : vector<2x32xf32> to vector<2xf32>
    %925 = vector.shape_cast %924 : vector<2xf32> to vector<2x1xf32>
    %cst_295 = arith.constant 3.200000e+01 : f32
    %926 = vector.broadcast %cst_295 : f32 to vector<2x1xf32>
    %927 = arith.divf %925, %926 : vector<2x1xf32>
    %cst_296 = arith.constant 9.99999974E-6 : f32
    %928 = vector.broadcast %cst_296 : f32 to vector<2x1xf32>
    %929 = arith.addf %927, %928 : vector<2x1xf32>
    %930 = math.rsqrt %929 : vector<2x1xf32>
    %931 = vector.broadcast %930 : vector<2x1xf32> to vector<2x32xf32>
    %932 = arith.mulf %922, %931 : vector<2x32xf32>
    %933 = vector.extract_strided_slice %864 {offsets = [0, 128], sizes = [2, 32], strides = [1, 1]} : vector<2x256xf32> to vector<2x32xf32>
    %cst_297 = arith.constant dense<0.000000e+00> : vector<2xf32>
    %934 = vector.multi_reduction <add>, %933, %cst_297 [1] : vector<2x32xf32> to vector<2xf32>
    %935 = vector.shape_cast %934 : vector<2xf32> to vector<2x1xf32>
    %cst_298 = arith.constant 3.200000e+01 : f32
    %936 = vector.broadcast %cst_298 : f32 to vector<2x1xf32>
    %937 = arith.divf %935, %936 : vector<2x1xf32>
    %938 = vector.broadcast %937 : vector<2x1xf32> to vector<2x32xf32>
    %939 = arith.subf %933, %938 : vector<2x32xf32>
    %940 = arith.mulf %939, %939 : vector<2x32xf32>
    %cst_299 = arith.constant dense<0.000000e+00> : vector<2xf32>
    %941 = vector.multi_reduction <add>, %940, %cst_299 [1] : vector<2x32xf32> to vector<2xf32>
    %942 = vector.shape_cast %941 : vector<2xf32> to vector<2x1xf32>
    %cst_300 = arith.constant 3.200000e+01 : f32
    %943 = vector.broadcast %cst_300 : f32 to vector<2x1xf32>
    %944 = arith.divf %942, %943 : vector<2x1xf32>
    %cst_301 = arith.constant 9.99999974E-6 : f32
    %945 = vector.broadcast %cst_301 : f32 to vector<2x1xf32>
    %946 = arith.addf %944, %945 : vector<2x1xf32>
    %947 = math.rsqrt %946 : vector<2x1xf32>
    %948 = vector.broadcast %947 : vector<2x1xf32> to vector<2x32xf32>
    %949 = arith.mulf %939, %948 : vector<2x32xf32>
    %950 = vector.extract_strided_slice %864 {offsets = [0, 160], sizes = [2, 32], strides = [1, 1]} : vector<2x256xf32> to vector<2x32xf32>
    %cst_302 = arith.constant dense<0.000000e+00> : vector<2xf32>
    %951 = vector.multi_reduction <add>, %950, %cst_302 [1] : vector<2x32xf32> to vector<2xf32>
    %952 = vector.shape_cast %951 : vector<2xf32> to vector<2x1xf32>
    %cst_303 = arith.constant 3.200000e+01 : f32
    %953 = vector.broadcast %cst_303 : f32 to vector<2x1xf32>
    %954 = arith.divf %952, %953 : vector<2x1xf32>
    %955 = vector.broadcast %954 : vector<2x1xf32> to vector<2x32xf32>
    %956 = arith.subf %950, %955 : vector<2x32xf32>
    %957 = arith.mulf %956, %956 : vector<2x32xf32>
    %cst_304 = arith.constant dense<0.000000e+00> : vector<2xf32>
    %958 = vector.multi_reduction <add>, %957, %cst_304 [1] : vector<2x32xf32> to vector<2xf32>
    %959 = vector.shape_cast %958 : vector<2xf32> to vector<2x1xf32>
    %cst_305 = arith.constant 3.200000e+01 : f32
    %960 = vector.broadcast %cst_305 : f32 to vector<2x1xf32>
    %961 = arith.divf %959, %960 : vector<2x1xf32>
    %cst_306 = arith.constant 9.99999974E-6 : f32
    %962 = vector.broadcast %cst_306 : f32 to vector<2x1xf32>
    %963 = arith.addf %961, %962 : vector<2x1xf32>
    %964 = math.rsqrt %963 : vector<2x1xf32>
    %965 = vector.broadcast %964 : vector<2x1xf32> to vector<2x32xf32>
    %966 = arith.mulf %956, %965 : vector<2x32xf32>
    %967 = vector.extract_strided_slice %864 {offsets = [0, 192], sizes = [2, 32], strides = [1, 1]} : vector<2x256xf32> to vector<2x32xf32>
    %cst_307 = arith.constant dense<0.000000e+00> : vector<2xf32>
    %968 = vector.multi_reduction <add>, %967, %cst_307 [1] : vector<2x32xf32> to vector<2xf32>
    %969 = vector.shape_cast %968 : vector<2xf32> to vector<2x1xf32>
    %cst_308 = arith.constant 3.200000e+01 : f32
    %970 = vector.broadcast %cst_308 : f32 to vector<2x1xf32>
    %971 = arith.divf %969, %970 : vector<2x1xf32>
    %972 = vector.broadcast %971 : vector<2x1xf32> to vector<2x32xf32>
    %973 = arith.subf %967, %972 : vector<2x32xf32>
    %974 = arith.mulf %973, %973 : vector<2x32xf32>
    %cst_309 = arith.constant dense<0.000000e+00> : vector<2xf32>
    %975 = vector.multi_reduction <add>, %974, %cst_309 [1] : vector<2x32xf32> to vector<2xf32>
    %976 = vector.shape_cast %975 : vector<2xf32> to vector<2x1xf32>
    %cst_310 = arith.constant 3.200000e+01 : f32
    %977 = vector.broadcast %cst_310 : f32 to vector<2x1xf32>
    %978 = arith.divf %976, %977 : vector<2x1xf32>
    %cst_311 = arith.constant 9.99999974E-6 : f32
    %979 = vector.broadcast %cst_311 : f32 to vector<2x1xf32>
    %980 = arith.addf %978, %979 : vector<2x1xf32>
    %981 = math.rsqrt %980 : vector<2x1xf32>
    %982 = vector.broadcast %981 : vector<2x1xf32> to vector<2x32xf32>
    %983 = arith.mulf %973, %982 : vector<2x32xf32>
    %984 = vector.extract_strided_slice %864 {offsets = [0, 224], sizes = [2, 32], strides = [1, 1]} : vector<2x256xf32> to vector<2x32xf32>
    %cst_312 = arith.constant dense<0.000000e+00> : vector<2xf32>
    %985 = vector.multi_reduction <add>, %984, %cst_312 [1] : vector<2x32xf32> to vector<2xf32>
    %986 = vector.shape_cast %985 : vector<2xf32> to vector<2x1xf32>
    %cst_313 = arith.constant 3.200000e+01 : f32
    %987 = vector.broadcast %cst_313 : f32 to vector<2x1xf32>
    %988 = arith.divf %986, %987 : vector<2x1xf32>
    %989 = vector.broadcast %988 : vector<2x1xf32> to vector<2x32xf32>
    %990 = arith.subf %984, %989 : vector<2x32xf32>
    %991 = arith.mulf %990, %990 : vector<2x32xf32>
    %cst_314 = arith.constant dense<0.000000e+00> : vector<2xf32>
    %992 = vector.multi_reduction <add>, %991, %cst_314 [1] : vector<2x32xf32> to vector<2xf32>
    %993 = vector.shape_cast %992 : vector<2xf32> to vector<2x1xf32>
    %cst_315 = arith.constant 3.200000e+01 : f32
    %994 = vector.broadcast %cst_315 : f32 to vector<2x1xf32>
    %995 = arith.divf %993, %994 : vector<2x1xf32>
    %cst_316 = arith.constant 9.99999974E-6 : f32
    %996 = vector.broadcast %cst_316 : f32 to vector<2x1xf32>
    %997 = arith.addf %995, %996 : vector<2x1xf32>
    %998 = math.rsqrt %997 : vector<2x1xf32>
    %999 = vector.broadcast %998 : vector<2x1xf32> to vector<2x32xf32>
    %1000 = arith.mulf %990, %999 : vector<2x32xf32>
    %1001 = tpu.concatenate %881, %898, %915, %932, %949, %966, %983, %1000 in 1 : vector<2x32xf32>, vector<2x32xf32>, vector<2x32xf32>, vector<2x32xf32>, vector<2x32xf32>, vector<2x32xf32>, vector<2x32xf32>, vector<2x32xf32> -> vector<2x256xf32>
    %c0_317 = arith.constant 0 : index
    %c4096 = arith.constant 4096 : index
    %1002 = vector.load %arg2[%c0_317, %c4096] : memref<1x8704xf32, #tpu.memory_space<vmem>>, vector<1x256xf32>
    %1003 = vector.broadcast %1002 : vector<1x256xf32> to vector<2x256xf32>
    %1004 = arith.mulf %1001, %1003 : vector<2x256xf32>
    %c0_318 = arith.constant 0 : index
    %c4352 = arith.constant 4352 : index
    %1005 = vector.load %arg2[%c0_318, %c4352] : memref<1x8704xf32, #tpu.memory_space<vmem>>, vector<1x256xf32>
    %1006 = vector.broadcast %1005 : vector<1x256xf32> to vector<2x256xf32>
    %1007 = arith.addf %1004, %1006 : vector<2x256xf32>
    %cst_319 = arith.constant 2.000000e+01 : f32
    %1008 = vector.broadcast %cst_319 : f32 to vector<2x256xf32>
    %1009 = arith.minimumf %1007, %1008 : vector<2x256xf32>
    %1010 = math.exp %1009 : vector<2x256xf32>
    %cst_320 = arith.constant 1.000000e+00 : f32
    %1011 = vector.broadcast %cst_320 : f32 to vector<2x256xf32>
    %1012 = arith.addf %1011, %1010 : vector<2x256xf32>
    %1013 = math.log %1012 : vector<2x256xf32>
    %cst_321 = arith.constant 2.000000e+01 : f32
    %1014 = vector.broadcast %cst_321 : f32 to vector<2x256xf32>
    %1015 = arith.cmpf ogt, %1007, %1014 : vector<2x256xf32>
    %1016 = arith.select %1015, %1007, %1013 : vector<2x256xi1>, vector<2x256xf32>
    %1017 = math.tanh %1016 : vector<2x256xf32>
    %1018 = arith.mulf %1007, %1017 : vector<2x256xf32>
    %c0_322 = arith.constant 0 : index
    %c512 = arith.constant 512 : index
    %1019 = vector.load %arg5[%c0_322, %c512] : memref<64x1024xbf16, #tpu.memory_space<vmem>>, vector<64x256xbf16>
    %1020 = arith.truncf %696 : vector<2x64xf32> to vector<2x64xbf16>
    %cst_323 = arith.constant dense<0.000000e+00> : vector<2x256xf32>
    %1021 = tpu.matmul %1020, %1019, %cst_323 {dimension_numbers = #tpu.dot_dimension_numbers<[1], [0], [0], [1], [0, 0, 1, 1], [], []>} : vector<2x64xbf16>, vector<64x256xbf16>, vector<2x256xf32> -> vector<2x256xf32>
    %c0_324 = arith.constant 0 : index
    %c4608 = arith.constant 4608 : index
    %1022 = vector.load %arg2[%c0_324, %c4608] : memref<1x8704xf32, #tpu.memory_space<vmem>>, vector<1x256xf32>
    %1023 = vector.broadcast %1022 : vector<1x256xf32> to vector<2x256xf32>
    %1024 = arith.addf %1021, %1023 : vector<2x256xf32>
    %1025 = arith.addf %1018, %1024 : vector<2x256xf32>
    %c0_325 = arith.constant 0 : index
    %c256_326 = arith.constant 256 : index
    %1026 = vector.load %arg7[%c0_325, %c256_326] : memref<256x1024xbf16, #tpu.memory_space<vmem>>, vector<256x256xbf16>
    %1027 = arith.truncf %1025 : vector<2x256xf32> to vector<2x256xbf16>
    %cst_327 = arith.constant dense<0.000000e+00> : vector<2x256xf32>
    %1028 = tpu.matmul %1027, %1026, %cst_327 {dimension_numbers = #tpu.dot_dimension_numbers<[1], [0], [0], [1], [0, 0, 1, 1], [], []>} : vector<2x256xbf16>, vector<256x256xbf16>, vector<2x256xf32> -> vector<2x256xf32>
    %c0_328 = arith.constant 0 : index
    %c4864 = arith.constant 4864 : index
    %1029 = vector.load %arg2[%c0_328, %c4864] : memref<1x8704xf32, #tpu.memory_space<vmem>>, vector<1x256xf32>
    %1030 = vector.broadcast %1029 : vector<1x256xf32> to vector<2x256xf32>
    %1031 = arith.addf %1028, %1030 : vector<2x256xf32>
    %1032 = vector.extract_strided_slice %1031 {offsets = [0, 0], sizes = [2, 32], strides = [1, 1]} : vector<2x256xf32> to vector<2x32xf32>
    %cst_329 = arith.constant dense<0.000000e+00> : vector<2xf32>
    %1033 = vector.multi_reduction <add>, %1032, %cst_329 [1] : vector<2x32xf32> to vector<2xf32>
    %1034 = vector.shape_cast %1033 : vector<2xf32> to vector<2x1xf32>
    %cst_330 = arith.constant 3.200000e+01 : f32
    %1035 = vector.broadcast %cst_330 : f32 to vector<2x1xf32>
    %1036 = arith.divf %1034, %1035 : vector<2x1xf32>
    %1037 = vector.broadcast %1036 : vector<2x1xf32> to vector<2x32xf32>
    %1038 = arith.subf %1032, %1037 : vector<2x32xf32>
    %1039 = arith.mulf %1038, %1038 : vector<2x32xf32>
    %cst_331 = arith.constant dense<0.000000e+00> : vector<2xf32>
    %1040 = vector.multi_reduction <add>, %1039, %cst_331 [1] : vector<2x32xf32> to vector<2xf32>
    %1041 = vector.shape_cast %1040 : vector<2xf32> to vector<2x1xf32>
    %cst_332 = arith.constant 3.200000e+01 : f32
    %1042 = vector.broadcast %cst_332 : f32 to vector<2x1xf32>
    %1043 = arith.divf %1041, %1042 : vector<2x1xf32>
    %cst_333 = arith.constant 9.99999974E-6 : f32
    %1044 = vector.broadcast %cst_333 : f32 to vector<2x1xf32>
    %1045 = arith.addf %1043, %1044 : vector<2x1xf32>
    %1046 = math.rsqrt %1045 : vector<2x1xf32>
    %1047 = vector.broadcast %1046 : vector<2x1xf32> to vector<2x32xf32>
    %1048 = arith.mulf %1038, %1047 : vector<2x32xf32>
    %1049 = vector.extract_strided_slice %1031 {offsets = [0, 32], sizes = [2, 32], strides = [1, 1]} : vector<2x256xf32> to vector<2x32xf32>
    %cst_334 = arith.constant dense<0.000000e+00> : vector<2xf32>
    %1050 = vector.multi_reduction <add>, %1049, %cst_334 [1] : vector<2x32xf32> to vector<2xf32>
    %1051 = vector.shape_cast %1050 : vector<2xf32> to vector<2x1xf32>
    %cst_335 = arith.constant 3.200000e+01 : f32
    %1052 = vector.broadcast %cst_335 : f32 to vector<2x1xf32>
    %1053 = arith.divf %1051, %1052 : vector<2x1xf32>
    %1054 = vector.broadcast %1053 : vector<2x1xf32> to vector<2x32xf32>
    %1055 = arith.subf %1049, %1054 : vector<2x32xf32>
    %1056 = arith.mulf %1055, %1055 : vector<2x32xf32>
    %cst_336 = arith.constant dense<0.000000e+00> : vector<2xf32>
    %1057 = vector.multi_reduction <add>, %1056, %cst_336 [1] : vector<2x32xf32> to vector<2xf32>
    %1058 = vector.shape_cast %1057 : vector<2xf32> to vector<2x1xf32>
    %cst_337 = arith.constant 3.200000e+01 : f32
    %1059 = vector.broadcast %cst_337 : f32 to vector<2x1xf32>
    %1060 = arith.divf %1058, %1059 : vector<2x1xf32>
    %cst_338 = arith.constant 9.99999974E-6 : f32
    %1061 = vector.broadcast %cst_338 : f32 to vector<2x1xf32>
    %1062 = arith.addf %1060, %1061 : vector<2x1xf32>
    %1063 = math.rsqrt %1062 : vector<2x1xf32>
    %1064 = vector.broadcast %1063 : vector<2x1xf32> to vector<2x32xf32>
    %1065 = arith.mulf %1055, %1064 : vector<2x32xf32>
    %1066 = vector.extract_strided_slice %1031 {offsets = [0, 64], sizes = [2, 32], strides = [1, 1]} : vector<2x256xf32> to vector<2x32xf32>
    %cst_339 = arith.constant dense<0.000000e+00> : vector<2xf32>
    %1067 = vector.multi_reduction <add>, %1066, %cst_339 [1] : vector<2x32xf32> to vector<2xf32>
    %1068 = vector.shape_cast %1067 : vector<2xf32> to vector<2x1xf32>
    %cst_340 = arith.constant 3.200000e+01 : f32
    %1069 = vector.broadcast %cst_340 : f32 to vector<2x1xf32>
    %1070 = arith.divf %1068, %1069 : vector<2x1xf32>
    %1071 = vector.broadcast %1070 : vector<2x1xf32> to vector<2x32xf32>
    %1072 = arith.subf %1066, %1071 : vector<2x32xf32>
    %1073 = arith.mulf %1072, %1072 : vector<2x32xf32>
    %cst_341 = arith.constant dense<0.000000e+00> : vector<2xf32>
    %1074 = vector.multi_reduction <add>, %1073, %cst_341 [1] : vector<2x32xf32> to vector<2xf32>
    %1075 = vector.shape_cast %1074 : vector<2xf32> to vector<2x1xf32>
    %cst_342 = arith.constant 3.200000e+01 : f32
    %1076 = vector.broadcast %cst_342 : f32 to vector<2x1xf32>
    %1077 = arith.divf %1075, %1076 : vector<2x1xf32>
    %cst_343 = arith.constant 9.99999974E-6 : f32
    %1078 = vector.broadcast %cst_343 : f32 to vector<2x1xf32>
    %1079 = arith.addf %1077, %1078 : vector<2x1xf32>
    %1080 = math.rsqrt %1079 : vector<2x1xf32>
    %1081 = vector.broadcast %1080 : vector<2x1xf32> to vector<2x32xf32>
    %1082 = arith.mulf %1072, %1081 : vector<2x32xf32>
    %1083 = vector.extract_strided_slice %1031 {offsets = [0, 96], sizes = [2, 32], strides = [1, 1]} : vector<2x256xf32> to vector<2x32xf32>
    %cst_344 = arith.constant dense<0.000000e+00> : vector<2xf32>
    %1084 = vector.multi_reduction <add>, %1083, %cst_344 [1] : vector<2x32xf32> to vector<2xf32>
    %1085 = vector.shape_cast %1084 : vector<2xf32> to vector<2x1xf32>
    %cst_345 = arith.constant 3.200000e+01 : f32
    %1086 = vector.broadcast %cst_345 : f32 to vector<2x1xf32>
    %1087 = arith.divf %1085, %1086 : vector<2x1xf32>
    %1088 = vector.broadcast %1087 : vector<2x1xf32> to vector<2x32xf32>
    %1089 = arith.subf %1083, %1088 : vector<2x32xf32>
    %1090 = arith.mulf %1089, %1089 : vector<2x32xf32>
    %cst_346 = arith.constant dense<0.000000e+00> : vector<2xf32>
    %1091 = vector.multi_reduction <add>, %1090, %cst_346 [1] : vector<2x32xf32> to vector<2xf32>
    %1092 = vector.shape_cast %1091 : vector<2xf32> to vector<2x1xf32>
    %cst_347 = arith.constant 3.200000e+01 : f32
    %1093 = vector.broadcast %cst_347 : f32 to vector<2x1xf32>
    %1094 = arith.divf %1092, %1093 : vector<2x1xf32>
    %cst_348 = arith.constant 9.99999974E-6 : f32
    %1095 = vector.broadcast %cst_348 : f32 to vector<2x1xf32>
    %1096 = arith.addf %1094, %1095 : vector<2x1xf32>
    %1097 = math.rsqrt %1096 : vector<2x1xf32>
    %1098 = vector.broadcast %1097 : vector<2x1xf32> to vector<2x32xf32>
    %1099 = arith.mulf %1089, %1098 : vector<2x32xf32>
    %1100 = vector.extract_strided_slice %1031 {offsets = [0, 128], sizes = [2, 32], strides = [1, 1]} : vector<2x256xf32> to vector<2x32xf32>
    %cst_349 = arith.constant dense<0.000000e+00> : vector<2xf32>
    %1101 = vector.multi_reduction <add>, %1100, %cst_349 [1] : vector<2x32xf32> to vector<2xf32>
    %1102 = vector.shape_cast %1101 : vector<2xf32> to vector<2x1xf32>
    %cst_350 = arith.constant 3.200000e+01 : f32
    %1103 = vector.broadcast %cst_350 : f32 to vector<2x1xf32>
    %1104 = arith.divf %1102, %1103 : vector<2x1xf32>
    %1105 = vector.broadcast %1104 : vector<2x1xf32> to vector<2x32xf32>
    %1106 = arith.subf %1100, %1105 : vector<2x32xf32>
    %1107 = arith.mulf %1106, %1106 : vector<2x32xf32>
    %cst_351 = arith.constant dense<0.000000e+00> : vector<2xf32>
    %1108 = vector.multi_reduction <add>, %1107, %cst_351 [1] : vector<2x32xf32> to vector<2xf32>
    %1109 = vector.shape_cast %1108 : vector<2xf32> to vector<2x1xf32>
    %cst_352 = arith.constant 3.200000e+01 : f32
    %1110 = vector.broadcast %cst_352 : f32 to vector<2x1xf32>
    %1111 = arith.divf %1109, %1110 : vector<2x1xf32>
    %cst_353 = arith.constant 9.99999974E-6 : f32
    %1112 = vector.broadcast %cst_353 : f32 to vector<2x1xf32>
    %1113 = arith.addf %1111, %1112 : vector<2x1xf32>
    %1114 = math.rsqrt %1113 : vector<2x1xf32>
    %1115 = vector.broadcast %1114 : vector<2x1xf32> to vector<2x32xf32>
    %1116 = arith.mulf %1106, %1115 : vector<2x32xf32>
    %1117 = vector.extract_strided_slice %1031 {offsets = [0, 160], sizes = [2, 32], strides = [1, 1]} : vector<2x256xf32> to vector<2x32xf32>
    %cst_354 = arith.constant dense<0.000000e+00> : vector<2xf32>
    %1118 = vector.multi_reduction <add>, %1117, %cst_354 [1] : vector<2x32xf32> to vector<2xf32>
    %1119 = vector.shape_cast %1118 : vector<2xf32> to vector<2x1xf32>
    %cst_355 = arith.constant 3.200000e+01 : f32
    %1120 = vector.broadcast %cst_355 : f32 to vector<2x1xf32>
    %1121 = arith.divf %1119, %1120 : vector<2x1xf32>
    %1122 = vector.broadcast %1121 : vector<2x1xf32> to vector<2x32xf32>
    %1123 = arith.subf %1117, %1122 : vector<2x32xf32>
    %1124 = arith.mulf %1123, %1123 : vector<2x32xf32>
    %cst_356 = arith.constant dense<0.000000e+00> : vector<2xf32>
    %1125 = vector.multi_reduction <add>, %1124, %cst_356 [1] : vector<2x32xf32> to vector<2xf32>
    %1126 = vector.shape_cast %1125 : vector<2xf32> to vector<2x1xf32>
    %cst_357 = arith.constant 3.200000e+01 : f32
    %1127 = vector.broadcast %cst_357 : f32 to vector<2x1xf32>
    %1128 = arith.divf %1126, %1127 : vector<2x1xf32>
    %cst_358 = arith.constant 9.99999974E-6 : f32
    %1129 = vector.broadcast %cst_358 : f32 to vector<2x1xf32>
    %1130 = arith.addf %1128, %1129 : vector<2x1xf32>
    %1131 = math.rsqrt %1130 : vector<2x1xf32>
    %1132 = vector.broadcast %1131 : vector<2x1xf32> to vector<2x32xf32>
    %1133 = arith.mulf %1123, %1132 : vector<2x32xf32>
    %1134 = vector.extract_strided_slice %1031 {offsets = [0, 192], sizes = [2, 32], strides = [1, 1]} : vector<2x256xf32> to vector<2x32xf32>
    %cst_359 = arith.constant dense<0.000000e+00> : vector<2xf32>
    %1135 = vector.multi_reduction <add>, %1134, %cst_359 [1] : vector<2x32xf32> to vector<2xf32>
    %1136 = vector.shape_cast %1135 : vector<2xf32> to vector<2x1xf32>
    %cst_360 = arith.constant 3.200000e+01 : f32
    %1137 = vector.broadcast %cst_360 : f32 to vector<2x1xf32>
    %1138 = arith.divf %1136, %1137 : vector<2x1xf32>
    %1139 = vector.broadcast %1138 : vector<2x1xf32> to vector<2x32xf32>
    %1140 = arith.subf %1134, %1139 : vector<2x32xf32>
    %1141 = arith.mulf %1140, %1140 : vector<2x32xf32>
    %cst_361 = arith.constant dense<0.000000e+00> : vector<2xf32>
    %1142 = vector.multi_reduction <add>, %1141, %cst_361 [1] : vector<2x32xf32> to vector<2xf32>
    %1143 = vector.shape_cast %1142 : vector<2xf32> to vector<2x1xf32>
    %cst_362 = arith.constant 3.200000e+01 : f32
    %1144 = vector.broadcast %cst_362 : f32 to vector<2x1xf32>
    %1145 = arith.divf %1143, %1144 : vector<2x1xf32>
    %cst_363 = arith.constant 9.99999974E-6 : f32
    %1146 = vector.broadcast %cst_363 : f32 to vector<2x1xf32>
    %1147 = arith.addf %1145, %1146 : vector<2x1xf32>
    %1148 = math.rsqrt %1147 : vector<2x1xf32>
    %1149 = vector.broadcast %1148 : vector<2x1xf32> to vector<2x32xf32>
    %1150 = arith.mulf %1140, %1149 : vector<2x32xf32>
    %1151 = vector.extract_strided_slice %1031 {offsets = [0, 224], sizes = [2, 32], strides = [1, 1]} : vector<2x256xf32> to vector<2x32xf32>
    %cst_364 = arith.constant dense<0.000000e+00> : vector<2xf32>
    %1152 = vector.multi_reduction <add>, %1151, %cst_364 [1] : vector<2x32xf32> to vector<2xf32>
    %1153 = vector.shape_cast %1152 : vector<2xf32> to vector<2x1xf32>
    %cst_365 = arith.constant 3.200000e+01 : f32
    %1154 = vector.broadcast %cst_365 : f32 to vector<2x1xf32>
    %1155 = arith.divf %1153, %1154 : vector<2x1xf32>
    %1156 = vector.broadcast %1155 : vector<2x1xf32> to vector<2x32xf32>
    %1157 = arith.subf %1151, %1156 : vector<2x32xf32>
    %1158 = arith.mulf %1157, %1157 : vector<2x32xf32>
    %cst_366 = arith.constant dense<0.000000e+00> : vector<2xf32>
    %1159 = vector.multi_reduction <add>, %1158, %cst_366 [1] : vector<2x32xf32> to vector<2xf32>
    %1160 = vector.shape_cast %1159 : vector<2xf32> to vector<2x1xf32>
    %cst_367 = arith.constant 3.200000e+01 : f32
    %1161 = vector.broadcast %cst_367 : f32 to vector<2x1xf32>
    %1162 = arith.divf %1160, %1161 : vector<2x1xf32>
    %cst_368 = arith.constant 9.99999974E-6 : f32
    %1163 = vector.broadcast %cst_368 : f32 to vector<2x1xf32>
    %1164 = arith.addf %1162, %1163 : vector<2x1xf32>
    %1165 = math.rsqrt %1164 : vector<2x1xf32>
    %1166 = vector.broadcast %1165 : vector<2x1xf32> to vector<2x32xf32>
    %1167 = arith.mulf %1157, %1166 : vector<2x32xf32>
    %1168 = tpu.concatenate %1048, %1065, %1082, %1099, %1116, %1133, %1150, %1167 in 1 : vector<2x32xf32>, vector<2x32xf32>, vector<2x32xf32>, vector<2x32xf32>, vector<2x32xf32>, vector<2x32xf32>, vector<2x32xf32>, vector<2x32xf32> -> vector<2x256xf32>
    %c0_369 = arith.constant 0 : index
    %c5120 = arith.constant 5120 : index
    %1169 = vector.load %arg2[%c0_369, %c5120] : memref<1x8704xf32, #tpu.memory_space<vmem>>, vector<1x256xf32>
    %1170 = vector.broadcast %1169 : vector<1x256xf32> to vector<2x256xf32>
    %1171 = arith.mulf %1168, %1170 : vector<2x256xf32>
    %c0_370 = arith.constant 0 : index
    %c5376 = arith.constant 5376 : index
    %1172 = vector.load %arg2[%c0_370, %c5376] : memref<1x8704xf32, #tpu.memory_space<vmem>>, vector<1x256xf32>
    %1173 = vector.broadcast %1172 : vector<1x256xf32> to vector<2x256xf32>
    %1174 = arith.addf %1171, %1173 : vector<2x256xf32>
    %cst_371 = arith.constant 2.000000e+01 : f32
    %1175 = vector.broadcast %cst_371 : f32 to vector<2x256xf32>
    %1176 = arith.minimumf %1174, %1175 : vector<2x256xf32>
    %1177 = math.exp %1176 : vector<2x256xf32>
    %cst_372 = arith.constant 1.000000e+00 : f32
    %1178 = vector.broadcast %cst_372 : f32 to vector<2x256xf32>
    %1179 = arith.addf %1178, %1177 : vector<2x256xf32>
    %1180 = math.log %1179 : vector<2x256xf32>
    %cst_373 = arith.constant 2.000000e+01 : f32
    %1181 = vector.broadcast %cst_373 : f32 to vector<2x256xf32>
    %1182 = arith.cmpf ogt, %1174, %1181 : vector<2x256xf32>
    %1183 = arith.select %1182, %1174, %1180 : vector<2x256xi1>, vector<2x256xf32>
    %1184 = math.tanh %1183 : vector<2x256xf32>
    %1185 = arith.mulf %1174, %1184 : vector<2x256xf32>
    %1186 = vector.extract_strided_slice %37 {offsets = [0, 512], sizes = [2, 256], strides = [1, 1]} : vector<2x928xf32> to vector<2x256xf32>
    %1187 = arith.addf %1185, %1186 : vector<2x256xf32>
    %c0_374 = arith.constant 0 : index
    %c512_375 = arith.constant 512 : index
    %1188 = vector.load %arg7[%c0_374, %c512_375] : memref<256x1024xbf16, #tpu.memory_space<vmem>>, vector<256x256xbf16>
    %1189 = arith.truncf %1187 : vector<2x256xf32> to vector<2x256xbf16>
    %cst_376 = arith.constant dense<0.000000e+00> : vector<2x256xf32>
    %1190 = tpu.matmul %1189, %1188, %cst_376 {dimension_numbers = #tpu.dot_dimension_numbers<[1], [0], [0], [1], [0, 0, 1, 1], [], []>} : vector<2x256xbf16>, vector<256x256xbf16>, vector<2x256xf32> -> vector<2x256xf32>
    %c0_377 = arith.constant 0 : index
    %c5632 = arith.constant 5632 : index
    %1191 = vector.load %arg2[%c0_377, %c5632] : memref<1x8704xf32, #tpu.memory_space<vmem>>, vector<1x256xf32>
    %1192 = vector.broadcast %1191 : vector<1x256xf32> to vector<2x256xf32>
    %1193 = arith.addf %1190, %1192 : vector<2x256xf32>
    %1194 = vector.extract_strided_slice %1193 {offsets = [0, 0], sizes = [2, 32], strides = [1, 1]} : vector<2x256xf32> to vector<2x32xf32>
    %cst_378 = arith.constant dense<0.000000e+00> : vector<2xf32>
    %1195 = vector.multi_reduction <add>, %1194, %cst_378 [1] : vector<2x32xf32> to vector<2xf32>
    %1196 = vector.shape_cast %1195 : vector<2xf32> to vector<2x1xf32>
    %cst_379 = arith.constant 3.200000e+01 : f32
    %1197 = vector.broadcast %cst_379 : f32 to vector<2x1xf32>
    %1198 = arith.divf %1196, %1197 : vector<2x1xf32>
    %1199 = vector.broadcast %1198 : vector<2x1xf32> to vector<2x32xf32>
    %1200 = arith.subf %1194, %1199 : vector<2x32xf32>
    %1201 = arith.mulf %1200, %1200 : vector<2x32xf32>
    %cst_380 = arith.constant dense<0.000000e+00> : vector<2xf32>
    %1202 = vector.multi_reduction <add>, %1201, %cst_380 [1] : vector<2x32xf32> to vector<2xf32>
    %1203 = vector.shape_cast %1202 : vector<2xf32> to vector<2x1xf32>
    %cst_381 = arith.constant 3.200000e+01 : f32
    %1204 = vector.broadcast %cst_381 : f32 to vector<2x1xf32>
    %1205 = arith.divf %1203, %1204 : vector<2x1xf32>
    %cst_382 = arith.constant 9.99999974E-6 : f32
    %1206 = vector.broadcast %cst_382 : f32 to vector<2x1xf32>
    %1207 = arith.addf %1205, %1206 : vector<2x1xf32>
    %1208 = math.rsqrt %1207 : vector<2x1xf32>
    %1209 = vector.broadcast %1208 : vector<2x1xf32> to vector<2x32xf32>
    %1210 = arith.mulf %1200, %1209 : vector<2x32xf32>
    %1211 = vector.extract_strided_slice %1193 {offsets = [0, 32], sizes = [2, 32], strides = [1, 1]} : vector<2x256xf32> to vector<2x32xf32>
    %cst_383 = arith.constant dense<0.000000e+00> : vector<2xf32>
    %1212 = vector.multi_reduction <add>, %1211, %cst_383 [1] : vector<2x32xf32> to vector<2xf32>
    %1213 = vector.shape_cast %1212 : vector<2xf32> to vector<2x1xf32>
    %cst_384 = arith.constant 3.200000e+01 : f32
    %1214 = vector.broadcast %cst_384 : f32 to vector<2x1xf32>
    %1215 = arith.divf %1213, %1214 : vector<2x1xf32>
    %1216 = vector.broadcast %1215 : vector<2x1xf32> to vector<2x32xf32>
    %1217 = arith.subf %1211, %1216 : vector<2x32xf32>
    %1218 = arith.mulf %1217, %1217 : vector<2x32xf32>
    %cst_385 = arith.constant dense<0.000000e+00> : vector<2xf32>
    %1219 = vector.multi_reduction <add>, %1218, %cst_385 [1] : vector<2x32xf32> to vector<2xf32>
    %1220 = vector.shape_cast %1219 : vector<2xf32> to vector<2x1xf32>
    %cst_386 = arith.constant 3.200000e+01 : f32
    %1221 = vector.broadcast %cst_386 : f32 to vector<2x1xf32>
    %1222 = arith.divf %1220, %1221 : vector<2x1xf32>
    %cst_387 = arith.constant 9.99999974E-6 : f32
    %1223 = vector.broadcast %cst_387 : f32 to vector<2x1xf32>
    %1224 = arith.addf %1222, %1223 : vector<2x1xf32>
    %1225 = math.rsqrt %1224 : vector<2x1xf32>
    %1226 = vector.broadcast %1225 : vector<2x1xf32> to vector<2x32xf32>
    %1227 = arith.mulf %1217, %1226 : vector<2x32xf32>
    %1228 = vector.extract_strided_slice %1193 {offsets = [0, 64], sizes = [2, 32], strides = [1, 1]} : vector<2x256xf32> to vector<2x32xf32>
    %cst_388 = arith.constant dense<0.000000e+00> : vector<2xf32>
    %1229 = vector.multi_reduction <add>, %1228, %cst_388 [1] : vector<2x32xf32> to vector<2xf32>
    %1230 = vector.shape_cast %1229 : vector<2xf32> to vector<2x1xf32>
    %cst_389 = arith.constant 3.200000e+01 : f32
    %1231 = vector.broadcast %cst_389 : f32 to vector<2x1xf32>
    %1232 = arith.divf %1230, %1231 : vector<2x1xf32>
    %1233 = vector.broadcast %1232 : vector<2x1xf32> to vector<2x32xf32>
    %1234 = arith.subf %1228, %1233 : vector<2x32xf32>
    %1235 = arith.mulf %1234, %1234 : vector<2x32xf32>
    %cst_390 = arith.constant dense<0.000000e+00> : vector<2xf32>
    %1236 = vector.multi_reduction <add>, %1235, %cst_390 [1] : vector<2x32xf32> to vector<2xf32>
    %1237 = vector.shape_cast %1236 : vector<2xf32> to vector<2x1xf32>
    %cst_391 = arith.constant 3.200000e+01 : f32
    %1238 = vector.broadcast %cst_391 : f32 to vector<2x1xf32>
    %1239 = arith.divf %1237, %1238 : vector<2x1xf32>
    %cst_392 = arith.constant 9.99999974E-6 : f32
    %1240 = vector.broadcast %cst_392 : f32 to vector<2x1xf32>
    %1241 = arith.addf %1239, %1240 : vector<2x1xf32>
    %1242 = math.rsqrt %1241 : vector<2x1xf32>
    %1243 = vector.broadcast %1242 : vector<2x1xf32> to vector<2x32xf32>
    %1244 = arith.mulf %1234, %1243 : vector<2x32xf32>
    %1245 = vector.extract_strided_slice %1193 {offsets = [0, 96], sizes = [2, 32], strides = [1, 1]} : vector<2x256xf32> to vector<2x32xf32>
    %cst_393 = arith.constant dense<0.000000e+00> : vector<2xf32>
    %1246 = vector.multi_reduction <add>, %1245, %cst_393 [1] : vector<2x32xf32> to vector<2xf32>
    %1247 = vector.shape_cast %1246 : vector<2xf32> to vector<2x1xf32>
    %cst_394 = arith.constant 3.200000e+01 : f32
    %1248 = vector.broadcast %cst_394 : f32 to vector<2x1xf32>
    %1249 = arith.divf %1247, %1248 : vector<2x1xf32>
    %1250 = vector.broadcast %1249 : vector<2x1xf32> to vector<2x32xf32>
    %1251 = arith.subf %1245, %1250 : vector<2x32xf32>
    %1252 = arith.mulf %1251, %1251 : vector<2x32xf32>
    %cst_395 = arith.constant dense<0.000000e+00> : vector<2xf32>
    %1253 = vector.multi_reduction <add>, %1252, %cst_395 [1] : vector<2x32xf32> to vector<2xf32>
    %1254 = vector.shape_cast %1253 : vector<2xf32> to vector<2x1xf32>
    %cst_396 = arith.constant 3.200000e+01 : f32
    %1255 = vector.broadcast %cst_396 : f32 to vector<2x1xf32>
    %1256 = arith.divf %1254, %1255 : vector<2x1xf32>
    %cst_397 = arith.constant 9.99999974E-6 : f32
    %1257 = vector.broadcast %cst_397 : f32 to vector<2x1xf32>
    %1258 = arith.addf %1256, %1257 : vector<2x1xf32>
    %1259 = math.rsqrt %1258 : vector<2x1xf32>
    %1260 = vector.broadcast %1259 : vector<2x1xf32> to vector<2x32xf32>
    %1261 = arith.mulf %1251, %1260 : vector<2x32xf32>
    %1262 = vector.extract_strided_slice %1193 {offsets = [0, 128], sizes = [2, 32], strides = [1, 1]} : vector<2x256xf32> to vector<2x32xf32>
    %cst_398 = arith.constant dense<0.000000e+00> : vector<2xf32>
    %1263 = vector.multi_reduction <add>, %1262, %cst_398 [1] : vector<2x32xf32> to vector<2xf32>
    %1264 = vector.shape_cast %1263 : vector<2xf32> to vector<2x1xf32>
    %cst_399 = arith.constant 3.200000e+01 : f32
    %1265 = vector.broadcast %cst_399 : f32 to vector<2x1xf32>
    %1266 = arith.divf %1264, %1265 : vector<2x1xf32>
    %1267 = vector.broadcast %1266 : vector<2x1xf32> to vector<2x32xf32>
    %1268 = arith.subf %1262, %1267 : vector<2x32xf32>
    %1269 = arith.mulf %1268, %1268 : vector<2x32xf32>
    %cst_400 = arith.constant dense<0.000000e+00> : vector<2xf32>
    %1270 = vector.multi_reduction <add>, %1269, %cst_400 [1] : vector<2x32xf32> to vector<2xf32>
    %1271 = vector.shape_cast %1270 : vector<2xf32> to vector<2x1xf32>
    %cst_401 = arith.constant 3.200000e+01 : f32
    %1272 = vector.broadcast %cst_401 : f32 to vector<2x1xf32>
    %1273 = arith.divf %1271, %1272 : vector<2x1xf32>
    %cst_402 = arith.constant 9.99999974E-6 : f32
    %1274 = vector.broadcast %cst_402 : f32 to vector<2x1xf32>
    %1275 = arith.addf %1273, %1274 : vector<2x1xf32>
    %1276 = math.rsqrt %1275 : vector<2x1xf32>
    %1277 = vector.broadcast %1276 : vector<2x1xf32> to vector<2x32xf32>
    %1278 = arith.mulf %1268, %1277 : vector<2x32xf32>
    %1279 = vector.extract_strided_slice %1193 {offsets = [0, 160], sizes = [2, 32], strides = [1, 1]} : vector<2x256xf32> to vector<2x32xf32>
    %cst_403 = arith.constant dense<0.000000e+00> : vector<2xf32>
    %1280 = vector.multi_reduction <add>, %1279, %cst_403 [1] : vector<2x32xf32> to vector<2xf32>
    %1281 = vector.shape_cast %1280 : vector<2xf32> to vector<2x1xf32>
    %cst_404 = arith.constant 3.200000e+01 : f32
    %1282 = vector.broadcast %cst_404 : f32 to vector<2x1xf32>
    %1283 = arith.divf %1281, %1282 : vector<2x1xf32>
    %1284 = vector.broadcast %1283 : vector<2x1xf32> to vector<2x32xf32>
    %1285 = arith.subf %1279, %1284 : vector<2x32xf32>
    %1286 = arith.mulf %1285, %1285 : vector<2x32xf32>
    %cst_405 = arith.constant dense<0.000000e+00> : vector<2xf32>
    %1287 = vector.multi_reduction <add>, %1286, %cst_405 [1] : vector<2x32xf32> to vector<2xf32>
    %1288 = vector.shape_cast %1287 : vector<2xf32> to vector<2x1xf32>
    %cst_406 = arith.constant 3.200000e+01 : f32
    %1289 = vector.broadcast %cst_406 : f32 to vector<2x1xf32>
    %1290 = arith.divf %1288, %1289 : vector<2x1xf32>
    %cst_407 = arith.constant 9.99999974E-6 : f32
    %1291 = vector.broadcast %cst_407 : f32 to vector<2x1xf32>
    %1292 = arith.addf %1290, %1291 : vector<2x1xf32>
    %1293 = math.rsqrt %1292 : vector<2x1xf32>
    %1294 = vector.broadcast %1293 : vector<2x1xf32> to vector<2x32xf32>
    %1295 = arith.mulf %1285, %1294 : vector<2x32xf32>
    %1296 = vector.extract_strided_slice %1193 {offsets = [0, 192], sizes = [2, 32], strides = [1, 1]} : vector<2x256xf32> to vector<2x32xf32>
    %cst_408 = arith.constant dense<0.000000e+00> : vector<2xf32>
    %1297 = vector.multi_reduction <add>, %1296, %cst_408 [1] : vector<2x32xf32> to vector<2xf32>
    %1298 = vector.shape_cast %1297 : vector<2xf32> to vector<2x1xf32>
    %cst_409 = arith.constant 3.200000e+01 : f32
    %1299 = vector.broadcast %cst_409 : f32 to vector<2x1xf32>
    %1300 = arith.divf %1298, %1299 : vector<2x1xf32>
    %1301 = vector.broadcast %1300 : vector<2x1xf32> to vector<2x32xf32>
    %1302 = arith.subf %1296, %1301 : vector<2x32xf32>
    %1303 = arith.mulf %1302, %1302 : vector<2x32xf32>
    %cst_410 = arith.constant dense<0.000000e+00> : vector<2xf32>
    %1304 = vector.multi_reduction <add>, %1303, %cst_410 [1] : vector<2x32xf32> to vector<2xf32>
    %1305 = vector.shape_cast %1304 : vector<2xf32> to vector<2x1xf32>
    %cst_411 = arith.constant 3.200000e+01 : f32
    %1306 = vector.broadcast %cst_411 : f32 to vector<2x1xf32>
    %1307 = arith.divf %1305, %1306 : vector<2x1xf32>
    %cst_412 = arith.constant 9.99999974E-6 : f32
    %1308 = vector.broadcast %cst_412 : f32 to vector<2x1xf32>
    %1309 = arith.addf %1307, %1308 : vector<2x1xf32>
    %1310 = math.rsqrt %1309 : vector<2x1xf32>
    %1311 = vector.broadcast %1310 : vector<2x1xf32> to vector<2x32xf32>
    %1312 = arith.mulf %1302, %1311 : vector<2x32xf32>
    %1313 = vector.extract_strided_slice %1193 {offsets = [0, 224], sizes = [2, 32], strides = [1, 1]} : vector<2x256xf32> to vector<2x32xf32>
    %cst_413 = arith.constant dense<0.000000e+00> : vector<2xf32>
    %1314 = vector.multi_reduction <add>, %1313, %cst_413 [1] : vector<2x32xf32> to vector<2xf32>
    %1315 = vector.shape_cast %1314 : vector<2xf32> to vector<2x1xf32>
    %cst_414 = arith.constant 3.200000e+01 : f32
    %1316 = vector.broadcast %cst_414 : f32 to vector<2x1xf32>
    %1317 = arith.divf %1315, %1316 : vector<2x1xf32>
    %1318 = vector.broadcast %1317 : vector<2x1xf32> to vector<2x32xf32>
    %1319 = arith.subf %1313, %1318 : vector<2x32xf32>
    %1320 = arith.mulf %1319, %1319 : vector<2x32xf32>
    %cst_415 = arith.constant dense<0.000000e+00> : vector<2xf32>
    %1321 = vector.multi_reduction <add>, %1320, %cst_415 [1] : vector<2x32xf32> to vector<2xf32>
    %1322 = vector.shape_cast %1321 : vector<2xf32> to vector<2x1xf32>
    %cst_416 = arith.constant 3.200000e+01 : f32
    %1323 = vector.broadcast %cst_416 : f32 to vector<2x1xf32>
    %1324 = arith.divf %1322, %1323 : vector<2x1xf32>
    %cst_417 = arith.constant 9.99999974E-6 : f32
    %1325 = vector.broadcast %cst_417 : f32 to vector<2x1xf32>
    %1326 = arith.addf %1324, %1325 : vector<2x1xf32>
    %1327 = math.rsqrt %1326 : vector<2x1xf32>
    %1328 = vector.broadcast %1327 : vector<2x1xf32> to vector<2x32xf32>
    %1329 = arith.mulf %1319, %1328 : vector<2x32xf32>
    %1330 = tpu.concatenate %1210, %1227, %1244, %1261, %1278, %1295, %1312, %1329 in 1 : vector<2x32xf32>, vector<2x32xf32>, vector<2x32xf32>, vector<2x32xf32>, vector<2x32xf32>, vector<2x32xf32>, vector<2x32xf32>, vector<2x32xf32> -> vector<2x256xf32>
    %c0_418 = arith.constant 0 : index
    %c5888 = arith.constant 5888 : index
    %1331 = vector.load %arg2[%c0_418, %c5888] : memref<1x8704xf32, #tpu.memory_space<vmem>>, vector<1x256xf32>
    %1332 = vector.broadcast %1331 : vector<1x256xf32> to vector<2x256xf32>
    %1333 = arith.mulf %1330, %1332 : vector<2x256xf32>
    %c0_419 = arith.constant 0 : index
    %c6144 = arith.constant 6144 : index
    %1334 = vector.load %arg2[%c0_419, %c6144] : memref<1x8704xf32, #tpu.memory_space<vmem>>, vector<1x256xf32>
    %1335 = vector.broadcast %1334 : vector<1x256xf32> to vector<2x256xf32>
    %1336 = arith.addf %1333, %1335 : vector<2x256xf32>
    %cst_420 = arith.constant 2.000000e+01 : f32
    %1337 = vector.broadcast %cst_420 : f32 to vector<2x256xf32>
    %1338 = arith.minimumf %1336, %1337 : vector<2x256xf32>
    %1339 = math.exp %1338 : vector<2x256xf32>
    %cst_421 = arith.constant 1.000000e+00 : f32
    %1340 = vector.broadcast %cst_421 : f32 to vector<2x256xf32>
    %1341 = arith.addf %1340, %1339 : vector<2x256xf32>
    %1342 = math.log %1341 : vector<2x256xf32>
    %cst_422 = arith.constant 2.000000e+01 : f32
    %1343 = vector.broadcast %cst_422 : f32 to vector<2x256xf32>
    %1344 = arith.cmpf ogt, %1336, %1343 : vector<2x256xf32>
    %1345 = arith.select %1344, %1336, %1342 : vector<2x256xi1>, vector<2x256xf32>
    %1346 = math.tanh %1345 : vector<2x256xf32>
    %1347 = arith.mulf %1336, %1346 : vector<2x256xf32>
    %1348 = arith.addf %1347, %1025 : vector<2x256xf32>
    %c0_423 = arith.constant 0 : index
    %c768 = arith.constant 768 : index
    %1349 = vector.load %arg7[%c0_423, %c768] : memref<256x1024xbf16, #tpu.memory_space<vmem>>, vector<256x128xbf16>
    %1350 = arith.truncf %1348 : vector<2x256xf32> to vector<2x256xbf16>
    %cst_424 = arith.constant dense<0.000000e+00> : vector<2x128xf32>
    %1351 = tpu.matmul %1350, %1349, %cst_424 {dimension_numbers = #tpu.dot_dimension_numbers<[1], [0], [0], [1], [0, 0, 1, 1], [], []>} : vector<2x256xbf16>, vector<256x128xbf16>, vector<2x128xf32> -> vector<2x128xf32>
    %c0_425 = arith.constant 0 : index
    %c6400 = arith.constant 6400 : index
    %1352 = vector.load %arg2[%c0_425, %c6400] : memref<1x8704xf32, #tpu.memory_space<vmem>>, vector<1x128xf32>
    %1353 = vector.broadcast %1352 : vector<1x128xf32> to vector<2x128xf32>
    %1354 = arith.addf %1351, %1353 : vector<2x128xf32>
    %1355 = vector.extract_strided_slice %1354 {offsets = [0, 0], sizes = [2, 16], strides = [1, 1]} : vector<2x128xf32> to vector<2x16xf32>
    %cst_426 = arith.constant dense<0.000000e+00> : vector<2xf32>
    %1356 = vector.multi_reduction <add>, %1355, %cst_426 [1] : vector<2x16xf32> to vector<2xf32>
    %1357 = vector.shape_cast %1356 : vector<2xf32> to vector<2x1xf32>
    %cst_427 = arith.constant 1.600000e+01 : f32
    %1358 = vector.broadcast %cst_427 : f32 to vector<2x1xf32>
    %1359 = arith.divf %1357, %1358 : vector<2x1xf32>
    %1360 = vector.broadcast %1359 : vector<2x1xf32> to vector<2x16xf32>
    %1361 = arith.subf %1355, %1360 : vector<2x16xf32>
    %1362 = arith.mulf %1361, %1361 : vector<2x16xf32>
    %cst_428 = arith.constant dense<0.000000e+00> : vector<2xf32>
    %1363 = vector.multi_reduction <add>, %1362, %cst_428 [1] : vector<2x16xf32> to vector<2xf32>
    %1364 = vector.shape_cast %1363 : vector<2xf32> to vector<2x1xf32>
    %cst_429 = arith.constant 1.600000e+01 : f32
    %1365 = vector.broadcast %cst_429 : f32 to vector<2x1xf32>
    %1366 = arith.divf %1364, %1365 : vector<2x1xf32>
    %cst_430 = arith.constant 9.99999974E-6 : f32
    %1367 = vector.broadcast %cst_430 : f32 to vector<2x1xf32>
    %1368 = arith.addf %1366, %1367 : vector<2x1xf32>
    %1369 = math.rsqrt %1368 : vector<2x1xf32>
    %1370 = vector.broadcast %1369 : vector<2x1xf32> to vector<2x16xf32>
    %1371 = arith.mulf %1361, %1370 : vector<2x16xf32>
    %1372 = vector.extract_strided_slice %1354 {offsets = [0, 16], sizes = [2, 16], strides = [1, 1]} : vector<2x128xf32> to vector<2x16xf32>
    %cst_431 = arith.constant dense<0.000000e+00> : vector<2xf32>
    %1373 = vector.multi_reduction <add>, %1372, %cst_431 [1] : vector<2x16xf32> to vector<2xf32>
    %1374 = vector.shape_cast %1373 : vector<2xf32> to vector<2x1xf32>
    %cst_432 = arith.constant 1.600000e+01 : f32
    %1375 = vector.broadcast %cst_432 : f32 to vector<2x1xf32>
    %1376 = arith.divf %1374, %1375 : vector<2x1xf32>
    %1377 = vector.broadcast %1376 : vector<2x1xf32> to vector<2x16xf32>
    %1378 = arith.subf %1372, %1377 : vector<2x16xf32>
    %1379 = arith.mulf %1378, %1378 : vector<2x16xf32>
    %cst_433 = arith.constant dense<0.000000e+00> : vector<2xf32>
    %1380 = vector.multi_reduction <add>, %1379, %cst_433 [1] : vector<2x16xf32> to vector<2xf32>
    %1381 = vector.shape_cast %1380 : vector<2xf32> to vector<2x1xf32>
    %cst_434 = arith.constant 1.600000e+01 : f32
    %1382 = vector.broadcast %cst_434 : f32 to vector<2x1xf32>
    %1383 = arith.divf %1381, %1382 : vector<2x1xf32>
    %cst_435 = arith.constant 9.99999974E-6 : f32
    %1384 = vector.broadcast %cst_435 : f32 to vector<2x1xf32>
    %1385 = arith.addf %1383, %1384 : vector<2x1xf32>
    %1386 = math.rsqrt %1385 : vector<2x1xf32>
    %1387 = vector.broadcast %1386 : vector<2x1xf32> to vector<2x16xf32>
    %1388 = arith.mulf %1378, %1387 : vector<2x16xf32>
    %1389 = vector.extract_strided_slice %1354 {offsets = [0, 32], sizes = [2, 16], strides = [1, 1]} : vector<2x128xf32> to vector<2x16xf32>
    %cst_436 = arith.constant dense<0.000000e+00> : vector<2xf32>
    %1390 = vector.multi_reduction <add>, %1389, %cst_436 [1] : vector<2x16xf32> to vector<2xf32>
    %1391 = vector.shape_cast %1390 : vector<2xf32> to vector<2x1xf32>
    %cst_437 = arith.constant 1.600000e+01 : f32
    %1392 = vector.broadcast %cst_437 : f32 to vector<2x1xf32>
    %1393 = arith.divf %1391, %1392 : vector<2x1xf32>
    %1394 = vector.broadcast %1393 : vector<2x1xf32> to vector<2x16xf32>
    %1395 = arith.subf %1389, %1394 : vector<2x16xf32>
    %1396 = arith.mulf %1395, %1395 : vector<2x16xf32>
    %cst_438 = arith.constant dense<0.000000e+00> : vector<2xf32>
    %1397 = vector.multi_reduction <add>, %1396, %cst_438 [1] : vector<2x16xf32> to vector<2xf32>
    %1398 = vector.shape_cast %1397 : vector<2xf32> to vector<2x1xf32>
    %cst_439 = arith.constant 1.600000e+01 : f32
    %1399 = vector.broadcast %cst_439 : f32 to vector<2x1xf32>
    %1400 = arith.divf %1398, %1399 : vector<2x1xf32>
    %cst_440 = arith.constant 9.99999974E-6 : f32
    %1401 = vector.broadcast %cst_440 : f32 to vector<2x1xf32>
    %1402 = arith.addf %1400, %1401 : vector<2x1xf32>
    %1403 = math.rsqrt %1402 : vector<2x1xf32>
    %1404 = vector.broadcast %1403 : vector<2x1xf32> to vector<2x16xf32>
    %1405 = arith.mulf %1395, %1404 : vector<2x16xf32>
    %1406 = vector.extract_strided_slice %1354 {offsets = [0, 48], sizes = [2, 16], strides = [1, 1]} : vector<2x128xf32> to vector<2x16xf32>
    %cst_441 = arith.constant dense<0.000000e+00> : vector<2xf32>
    %1407 = vector.multi_reduction <add>, %1406, %cst_441 [1] : vector<2x16xf32> to vector<2xf32>
    %1408 = vector.shape_cast %1407 : vector<2xf32> to vector<2x1xf32>
    %cst_442 = arith.constant 1.600000e+01 : f32
    %1409 = vector.broadcast %cst_442 : f32 to vector<2x1xf32>
    %1410 = arith.divf %1408, %1409 : vector<2x1xf32>
    %1411 = vector.broadcast %1410 : vector<2x1xf32> to vector<2x16xf32>
    %1412 = arith.subf %1406, %1411 : vector<2x16xf32>
    %1413 = arith.mulf %1412, %1412 : vector<2x16xf32>
    %cst_443 = arith.constant dense<0.000000e+00> : vector<2xf32>
    %1414 = vector.multi_reduction <add>, %1413, %cst_443 [1] : vector<2x16xf32> to vector<2xf32>
    %1415 = vector.shape_cast %1414 : vector<2xf32> to vector<2x1xf32>
    %cst_444 = arith.constant 1.600000e+01 : f32
    %1416 = vector.broadcast %cst_444 : f32 to vector<2x1xf32>
    %1417 = arith.divf %1415, %1416 : vector<2x1xf32>
    %cst_445 = arith.constant 9.99999974E-6 : f32
    %1418 = vector.broadcast %cst_445 : f32 to vector<2x1xf32>
    %1419 = arith.addf %1417, %1418 : vector<2x1xf32>
    %1420 = math.rsqrt %1419 : vector<2x1xf32>
    %1421 = vector.broadcast %1420 : vector<2x1xf32> to vector<2x16xf32>
    %1422 = arith.mulf %1412, %1421 : vector<2x16xf32>
    %1423 = vector.extract_strided_slice %1354 {offsets = [0, 64], sizes = [2, 16], strides = [1, 1]} : vector<2x128xf32> to vector<2x16xf32>
    %cst_446 = arith.constant dense<0.000000e+00> : vector<2xf32>
    %1424 = vector.multi_reduction <add>, %1423, %cst_446 [1] : vector<2x16xf32> to vector<2xf32>
    %1425 = vector.shape_cast %1424 : vector<2xf32> to vector<2x1xf32>
    %cst_447 = arith.constant 1.600000e+01 : f32
    %1426 = vector.broadcast %cst_447 : f32 to vector<2x1xf32>
    %1427 = arith.divf %1425, %1426 : vector<2x1xf32>
    %1428 = vector.broadcast %1427 : vector<2x1xf32> to vector<2x16xf32>
    %1429 = arith.subf %1423, %1428 : vector<2x16xf32>
    %1430 = arith.mulf %1429, %1429 : vector<2x16xf32>
    %cst_448 = arith.constant dense<0.000000e+00> : vector<2xf32>
    %1431 = vector.multi_reduction <add>, %1430, %cst_448 [1] : vector<2x16xf32> to vector<2xf32>
    %1432 = vector.shape_cast %1431 : vector<2xf32> to vector<2x1xf32>
    %cst_449 = arith.constant 1.600000e+01 : f32
    %1433 = vector.broadcast %cst_449 : f32 to vector<2x1xf32>
    %1434 = arith.divf %1432, %1433 : vector<2x1xf32>
    %cst_450 = arith.constant 9.99999974E-6 : f32
    %1435 = vector.broadcast %cst_450 : f32 to vector<2x1xf32>
    %1436 = arith.addf %1434, %1435 : vector<2x1xf32>
    %1437 = math.rsqrt %1436 : vector<2x1xf32>
    %1438 = vector.broadcast %1437 : vector<2x1xf32> to vector<2x16xf32>
    %1439 = arith.mulf %1429, %1438 : vector<2x16xf32>
    %1440 = vector.extract_strided_slice %1354 {offsets = [0, 80], sizes = [2, 16], strides = [1, 1]} : vector<2x128xf32> to vector<2x16xf32>
    %cst_451 = arith.constant dense<0.000000e+00> : vector<2xf32>
    %1441 = vector.multi_reduction <add>, %1440, %cst_451 [1] : vector<2x16xf32> to vector<2xf32>
    %1442 = vector.shape_cast %1441 : vector<2xf32> to vector<2x1xf32>
    %cst_452 = arith.constant 1.600000e+01 : f32
    %1443 = vector.broadcast %cst_452 : f32 to vector<2x1xf32>
    %1444 = arith.divf %1442, %1443 : vector<2x1xf32>
    %1445 = vector.broadcast %1444 : vector<2x1xf32> to vector<2x16xf32>
    %1446 = arith.subf %1440, %1445 : vector<2x16xf32>
    %1447 = arith.mulf %1446, %1446 : vector<2x16xf32>
    %cst_453 = arith.constant dense<0.000000e+00> : vector<2xf32>
    %1448 = vector.multi_reduction <add>, %1447, %cst_453 [1] : vector<2x16xf32> to vector<2xf32>
    %1449 = vector.shape_cast %1448 : vector<2xf32> to vector<2x1xf32>
    %cst_454 = arith.constant 1.600000e+01 : f32
    %1450 = vector.broadcast %cst_454 : f32 to vector<2x1xf32>
    %1451 = arith.divf %1449, %1450 : vector<2x1xf32>
    %cst_455 = arith.constant 9.99999974E-6 : f32
    %1452 = vector.broadcast %cst_455 : f32 to vector<2x1xf32>
    %1453 = arith.addf %1451, %1452 : vector<2x1xf32>
    %1454 = math.rsqrt %1453 : vector<2x1xf32>
    %1455 = vector.broadcast %1454 : vector<2x1xf32> to vector<2x16xf32>
    %1456 = arith.mulf %1446, %1455 : vector<2x16xf32>
    %1457 = vector.extract_strided_slice %1354 {offsets = [0, 96], sizes = [2, 16], strides = [1, 1]} : vector<2x128xf32> to vector<2x16xf32>
    %cst_456 = arith.constant dense<0.000000e+00> : vector<2xf32>
    %1458 = vector.multi_reduction <add>, %1457, %cst_456 [1] : vector<2x16xf32> to vector<2xf32>
    %1459 = vector.shape_cast %1458 : vector<2xf32> to vector<2x1xf32>
    %cst_457 = arith.constant 1.600000e+01 : f32
    %1460 = vector.broadcast %cst_457 : f32 to vector<2x1xf32>
    %1461 = arith.divf %1459, %1460 : vector<2x1xf32>
    %1462 = vector.broadcast %1461 : vector<2x1xf32> to vector<2x16xf32>
    %1463 = arith.subf %1457, %1462 : vector<2x16xf32>
    %1464 = arith.mulf %1463, %1463 : vector<2x16xf32>
    %cst_458 = arith.constant dense<0.000000e+00> : vector<2xf32>
    %1465 = vector.multi_reduction <add>, %1464, %cst_458 [1] : vector<2x16xf32> to vector<2xf32>
    %1466 = vector.shape_cast %1465 : vector<2xf32> to vector<2x1xf32>
    %cst_459 = arith.constant 1.600000e+01 : f32
    %1467 = vector.broadcast %cst_459 : f32 to vector<2x1xf32>
    %1468 = arith.divf %1466, %1467 : vector<2x1xf32>
    %cst_460 = arith.constant 9.99999974E-6 : f32
    %1469 = vector.broadcast %cst_460 : f32 to vector<2x1xf32>
    %1470 = arith.addf %1468, %1469 : vector<2x1xf32>
    %1471 = math.rsqrt %1470 : vector<2x1xf32>
    %1472 = vector.broadcast %1471 : vector<2x1xf32> to vector<2x16xf32>
    %1473 = arith.mulf %1463, %1472 : vector<2x16xf32>
    %1474 = vector.extract_strided_slice %1354 {offsets = [0, 112], sizes = [2, 16], strides = [1, 1]} : vector<2x128xf32> to vector<2x16xf32>
    %cst_461 = arith.constant dense<0.000000e+00> : vector<2xf32>
    %1475 = vector.multi_reduction <add>, %1474, %cst_461 [1] : vector<2x16xf32> to vector<2xf32>
    %1476 = vector.shape_cast %1475 : vector<2xf32> to vector<2x1xf32>
    %cst_462 = arith.constant 1.600000e+01 : f32
    %1477 = vector.broadcast %cst_462 : f32 to vector<2x1xf32>
    %1478 = arith.divf %1476, %1477 : vector<2x1xf32>
    %1479 = vector.broadcast %1478 : vector<2x1xf32> to vector<2x16xf32>
    %1480 = arith.subf %1474, %1479 : vector<2x16xf32>
    %1481 = arith.mulf %1480, %1480 : vector<2x16xf32>
    %cst_463 = arith.constant dense<0.000000e+00> : vector<2xf32>
    %1482 = vector.multi_reduction <add>, %1481, %cst_463 [1] : vector<2x16xf32> to vector<2xf32>
    %1483 = vector.shape_cast %1482 : vector<2xf32> to vector<2x1xf32>
    %cst_464 = arith.constant 1.600000e+01 : f32
    %1484 = vector.broadcast %cst_464 : f32 to vector<2x1xf32>
    %1485 = arith.divf %1483, %1484 : vector<2x1xf32>
    %cst_465 = arith.constant 9.99999974E-6 : f32
    %1486 = vector.broadcast %cst_465 : f32 to vector<2x1xf32>
    %1487 = arith.addf %1485, %1486 : vector<2x1xf32>
    %1488 = math.rsqrt %1487 : vector<2x1xf32>
    %1489 = vector.broadcast %1488 : vector<2x1xf32> to vector<2x16xf32>
    %1490 = arith.mulf %1480, %1489 : vector<2x16xf32>
    %1491 = tpu.concatenate %1371, %1388, %1405, %1422, %1439, %1456, %1473, %1490 in 1 : vector<2x16xf32>, vector<2x16xf32>, vector<2x16xf32>, vector<2x16xf32>, vector<2x16xf32>, vector<2x16xf32>, vector<2x16xf32>, vector<2x16xf32> -> vector<2x128xf32>
    %c0_466 = arith.constant 0 : index
    %c6528 = arith.constant 6528 : index
    %1492 = vector.load %arg2[%c0_466, %c6528] : memref<1x8704xf32, #tpu.memory_space<vmem>>, vector<1x128xf32>
    %1493 = vector.broadcast %1492 : vector<1x128xf32> to vector<2x128xf32>
    %1494 = arith.mulf %1491, %1493 : vector<2x128xf32>
    %c0_467 = arith.constant 0 : index
    %c6656 = arith.constant 6656 : index
    %1495 = vector.load %arg2[%c0_467, %c6656] : memref<1x8704xf32, #tpu.memory_space<vmem>>, vector<1x128xf32>
    %1496 = vector.broadcast %1495 : vector<1x128xf32> to vector<2x128xf32>
    %1497 = arith.addf %1494, %1496 : vector<2x128xf32>
    %cst_468 = arith.constant 2.000000e+01 : f32
    %1498 = vector.broadcast %cst_468 : f32 to vector<2x128xf32>
    %1499 = arith.minimumf %1497, %1498 : vector<2x128xf32>
    %1500 = math.exp %1499 : vector<2x128xf32>
    %cst_469 = arith.constant 1.000000e+00 : f32
    %1501 = vector.broadcast %cst_469 : f32 to vector<2x128xf32>
    %1502 = arith.addf %1501, %1500 : vector<2x128xf32>
    %1503 = math.log %1502 : vector<2x128xf32>
    %cst_470 = arith.constant 2.000000e+01 : f32
    %1504 = vector.broadcast %cst_470 : f32 to vector<2x128xf32>
    %1505 = arith.cmpf ogt, %1497, %1504 : vector<2x128xf32>
    %1506 = arith.select %1505, %1497, %1503 : vector<2x128xi1>, vector<2x128xf32>
    %1507 = math.tanh %1506 : vector<2x128xf32>
    %1508 = arith.mulf %1497, %1507 : vector<2x128xf32>
    %1509 = vector.extract_strided_slice %37 {offsets = [0, 768], sizes = [2, 128], strides = [1, 1]} : vector<2x928xf32> to vector<2x128xf32>
    %1510 = arith.addf %1508, %1509 : vector<2x128xf32>
    %c0_471 = arith.constant 0 : index
    %c512_472 = arith.constant 512 : index
    %1511 = vector.load %arg6[%c0_471, %c512_472] : memref<128x768xbf16, #tpu.memory_space<vmem>>, vector<128x128xbf16>
    %1512 = arith.truncf %1510 : vector<2x128xf32> to vector<2x128xbf16>
    %cst_473 = arith.constant dense<0.000000e+00> : vector<2x128xf32>
    %1513 = tpu.matmul %1512, %1511, %cst_473 {dimension_numbers = #tpu.dot_dimension_numbers<[1], [0], [0], [1], [0, 0, 1, 1], [], []>} : vector<2x128xbf16>, vector<128x128xbf16>, vector<2x128xf32> -> vector<2x128xf32>
    %c0_474 = arith.constant 0 : index
    %c6784 = arith.constant 6784 : index
    %1514 = vector.load %arg2[%c0_474, %c6784] : memref<1x8704xf32, #tpu.memory_space<vmem>>, vector<1x128xf32>
    %1515 = vector.broadcast %1514 : vector<1x128xf32> to vector<2x128xf32>
    %1516 = arith.addf %1513, %1515 : vector<2x128xf32>
    %1517 = vector.extract_strided_slice %1516 {offsets = [0, 0], sizes = [2, 16], strides = [1, 1]} : vector<2x128xf32> to vector<2x16xf32>
    %cst_475 = arith.constant dense<0.000000e+00> : vector<2xf32>
    %1518 = vector.multi_reduction <add>, %1517, %cst_475 [1] : vector<2x16xf32> to vector<2xf32>
    %1519 = vector.shape_cast %1518 : vector<2xf32> to vector<2x1xf32>
    %cst_476 = arith.constant 1.600000e+01 : f32
    %1520 = vector.broadcast %cst_476 : f32 to vector<2x1xf32>
    %1521 = arith.divf %1519, %1520 : vector<2x1xf32>
    %1522 = vector.broadcast %1521 : vector<2x1xf32> to vector<2x16xf32>
    %1523 = arith.subf %1517, %1522 : vector<2x16xf32>
    %1524 = arith.mulf %1523, %1523 : vector<2x16xf32>
    %cst_477 = arith.constant dense<0.000000e+00> : vector<2xf32>
    %1525 = vector.multi_reduction <add>, %1524, %cst_477 [1] : vector<2x16xf32> to vector<2xf32>
    %1526 = vector.shape_cast %1525 : vector<2xf32> to vector<2x1xf32>
    %cst_478 = arith.constant 1.600000e+01 : f32
    %1527 = vector.broadcast %cst_478 : f32 to vector<2x1xf32>
    %1528 = arith.divf %1526, %1527 : vector<2x1xf32>
    %cst_479 = arith.constant 9.99999974E-6 : f32
    %1529 = vector.broadcast %cst_479 : f32 to vector<2x1xf32>
    %1530 = arith.addf %1528, %1529 : vector<2x1xf32>
    %1531 = math.rsqrt %1530 : vector<2x1xf32>
    %1532 = vector.broadcast %1531 : vector<2x1xf32> to vector<2x16xf32>
    %1533 = arith.mulf %1523, %1532 : vector<2x16xf32>
    %1534 = vector.extract_strided_slice %1516 {offsets = [0, 16], sizes = [2, 16], strides = [1, 1]} : vector<2x128xf32> to vector<2x16xf32>
    %cst_480 = arith.constant dense<0.000000e+00> : vector<2xf32>
    %1535 = vector.multi_reduction <add>, %1534, %cst_480 [1] : vector<2x16xf32> to vector<2xf32>
    %1536 = vector.shape_cast %1535 : vector<2xf32> to vector<2x1xf32>
    %cst_481 = arith.constant 1.600000e+01 : f32
    %1537 = vector.broadcast %cst_481 : f32 to vector<2x1xf32>
    %1538 = arith.divf %1536, %1537 : vector<2x1xf32>
    %1539 = vector.broadcast %1538 : vector<2x1xf32> to vector<2x16xf32>
    %1540 = arith.subf %1534, %1539 : vector<2x16xf32>
    %1541 = arith.mulf %1540, %1540 : vector<2x16xf32>
    %cst_482 = arith.constant dense<0.000000e+00> : vector<2xf32>
    %1542 = vector.multi_reduction <add>, %1541, %cst_482 [1] : vector<2x16xf32> to vector<2xf32>
    %1543 = vector.shape_cast %1542 : vector<2xf32> to vector<2x1xf32>
    %cst_483 = arith.constant 1.600000e+01 : f32
    %1544 = vector.broadcast %cst_483 : f32 to vector<2x1xf32>
    %1545 = arith.divf %1543, %1544 : vector<2x1xf32>
    %cst_484 = arith.constant 9.99999974E-6 : f32
    %1546 = vector.broadcast %cst_484 : f32 to vector<2x1xf32>
    %1547 = arith.addf %1545, %1546 : vector<2x1xf32>
    %1548 = math.rsqrt %1547 : vector<2x1xf32>
    %1549 = vector.broadcast %1548 : vector<2x1xf32> to vector<2x16xf32>
    %1550 = arith.mulf %1540, %1549 : vector<2x16xf32>
    %1551 = vector.extract_strided_slice %1516 {offsets = [0, 32], sizes = [2, 16], strides = [1, 1]} : vector<2x128xf32> to vector<2x16xf32>
    %cst_485 = arith.constant dense<0.000000e+00> : vector<2xf32>
    %1552 = vector.multi_reduction <add>, %1551, %cst_485 [1] : vector<2x16xf32> to vector<2xf32>
    %1553 = vector.shape_cast %1552 : vector<2xf32> to vector<2x1xf32>
    %cst_486 = arith.constant 1.600000e+01 : f32
    %1554 = vector.broadcast %cst_486 : f32 to vector<2x1xf32>
    %1555 = arith.divf %1553, %1554 : vector<2x1xf32>
    %1556 = vector.broadcast %1555 : vector<2x1xf32> to vector<2x16xf32>
    %1557 = arith.subf %1551, %1556 : vector<2x16xf32>
    %1558 = arith.mulf %1557, %1557 : vector<2x16xf32>
    %cst_487 = arith.constant dense<0.000000e+00> : vector<2xf32>
    %1559 = vector.multi_reduction <add>, %1558, %cst_487 [1] : vector<2x16xf32> to vector<2xf32>
    %1560 = vector.shape_cast %1559 : vector<2xf32> to vector<2x1xf32>
    %cst_488 = arith.constant 1.600000e+01 : f32
    %1561 = vector.broadcast %cst_488 : f32 to vector<2x1xf32>
    %1562 = arith.divf %1560, %1561 : vector<2x1xf32>
    %cst_489 = arith.constant 9.99999974E-6 : f32
    %1563 = vector.broadcast %cst_489 : f32 to vector<2x1xf32>
    %1564 = arith.addf %1562, %1563 : vector<2x1xf32>
    %1565 = math.rsqrt %1564 : vector<2x1xf32>
    %1566 = vector.broadcast %1565 : vector<2x1xf32> to vector<2x16xf32>
    %1567 = arith.mulf %1557, %1566 : vector<2x16xf32>
    %1568 = vector.extract_strided_slice %1516 {offsets = [0, 48], sizes = [2, 16], strides = [1, 1]} : vector<2x128xf32> to vector<2x16xf32>
    %cst_490 = arith.constant dense<0.000000e+00> : vector<2xf32>
    %1569 = vector.multi_reduction <add>, %1568, %cst_490 [1] : vector<2x16xf32> to vector<2xf32>
    %1570 = vector.shape_cast %1569 : vector<2xf32> to vector<2x1xf32>
    %cst_491 = arith.constant 1.600000e+01 : f32
    %1571 = vector.broadcast %cst_491 : f32 to vector<2x1xf32>
    %1572 = arith.divf %1570, %1571 : vector<2x1xf32>
    %1573 = vector.broadcast %1572 : vector<2x1xf32> to vector<2x16xf32>
    %1574 = arith.subf %1568, %1573 : vector<2x16xf32>
    %1575 = arith.mulf %1574, %1574 : vector<2x16xf32>
    %cst_492 = arith.constant dense<0.000000e+00> : vector<2xf32>
    %1576 = vector.multi_reduction <add>, %1575, %cst_492 [1] : vector<2x16xf32> to vector<2xf32>
    %1577 = vector.shape_cast %1576 : vector<2xf32> to vector<2x1xf32>
    %cst_493 = arith.constant 1.600000e+01 : f32
    %1578 = vector.broadcast %cst_493 : f32 to vector<2x1xf32>
    %1579 = arith.divf %1577, %1578 : vector<2x1xf32>
    %cst_494 = arith.constant 9.99999974E-6 : f32
    %1580 = vector.broadcast %cst_494 : f32 to vector<2x1xf32>
    %1581 = arith.addf %1579, %1580 : vector<2x1xf32>
    %1582 = math.rsqrt %1581 : vector<2x1xf32>
    %1583 = vector.broadcast %1582 : vector<2x1xf32> to vector<2x16xf32>
    %1584 = arith.mulf %1574, %1583 : vector<2x16xf32>
    %1585 = vector.extract_strided_slice %1516 {offsets = [0, 64], sizes = [2, 16], strides = [1, 1]} : vector<2x128xf32> to vector<2x16xf32>
    %cst_495 = arith.constant dense<0.000000e+00> : vector<2xf32>
    %1586 = vector.multi_reduction <add>, %1585, %cst_495 [1] : vector<2x16xf32> to vector<2xf32>
    %1587 = vector.shape_cast %1586 : vector<2xf32> to vector<2x1xf32>
    %cst_496 = arith.constant 1.600000e+01 : f32
    %1588 = vector.broadcast %cst_496 : f32 to vector<2x1xf32>
    %1589 = arith.divf %1587, %1588 : vector<2x1xf32>
    %1590 = vector.broadcast %1589 : vector<2x1xf32> to vector<2x16xf32>
    %1591 = arith.subf %1585, %1590 : vector<2x16xf32>
    %1592 = arith.mulf %1591, %1591 : vector<2x16xf32>
    %cst_497 = arith.constant dense<0.000000e+00> : vector<2xf32>
    %1593 = vector.multi_reduction <add>, %1592, %cst_497 [1] : vector<2x16xf32> to vector<2xf32>
    %1594 = vector.shape_cast %1593 : vector<2xf32> to vector<2x1xf32>
    %cst_498 = arith.constant 1.600000e+01 : f32
    %1595 = vector.broadcast %cst_498 : f32 to vector<2x1xf32>
    %1596 = arith.divf %1594, %1595 : vector<2x1xf32>
    %cst_499 = arith.constant 9.99999974E-6 : f32
    %1597 = vector.broadcast %cst_499 : f32 to vector<2x1xf32>
    %1598 = arith.addf %1596, %1597 : vector<2x1xf32>
    %1599 = math.rsqrt %1598 : vector<2x1xf32>
    %1600 = vector.broadcast %1599 : vector<2x1xf32> to vector<2x16xf32>
    %1601 = arith.mulf %1591, %1600 : vector<2x16xf32>
    %1602 = vector.extract_strided_slice %1516 {offsets = [0, 80], sizes = [2, 16], strides = [1, 1]} : vector<2x128xf32> to vector<2x16xf32>
    %cst_500 = arith.constant dense<0.000000e+00> : vector<2xf32>
    %1603 = vector.multi_reduction <add>, %1602, %cst_500 [1] : vector<2x16xf32> to vector<2xf32>
    %1604 = vector.shape_cast %1603 : vector<2xf32> to vector<2x1xf32>
    %cst_501 = arith.constant 1.600000e+01 : f32
    %1605 = vector.broadcast %cst_501 : f32 to vector<2x1xf32>
    %1606 = arith.divf %1604, %1605 : vector<2x1xf32>
    %1607 = vector.broadcast %1606 : vector<2x1xf32> to vector<2x16xf32>
    %1608 = arith.subf %1602, %1607 : vector<2x16xf32>
    %1609 = arith.mulf %1608, %1608 : vector<2x16xf32>
    %cst_502 = arith.constant dense<0.000000e+00> : vector<2xf32>
    %1610 = vector.multi_reduction <add>, %1609, %cst_502 [1] : vector<2x16xf32> to vector<2xf32>
    %1611 = vector.shape_cast %1610 : vector<2xf32> to vector<2x1xf32>
    %cst_503 = arith.constant 1.600000e+01 : f32
    %1612 = vector.broadcast %cst_503 : f32 to vector<2x1xf32>
    %1613 = arith.divf %1611, %1612 : vector<2x1xf32>
    %cst_504 = arith.constant 9.99999974E-6 : f32
    %1614 = vector.broadcast %cst_504 : f32 to vector<2x1xf32>
    %1615 = arith.addf %1613, %1614 : vector<2x1xf32>
    %1616 = math.rsqrt %1615 : vector<2x1xf32>
    %1617 = vector.broadcast %1616 : vector<2x1xf32> to vector<2x16xf32>
    %1618 = arith.mulf %1608, %1617 : vector<2x16xf32>
    %1619 = vector.extract_strided_slice %1516 {offsets = [0, 96], sizes = [2, 16], strides = [1, 1]} : vector<2x128xf32> to vector<2x16xf32>
    %cst_505 = arith.constant dense<0.000000e+00> : vector<2xf32>
    %1620 = vector.multi_reduction <add>, %1619, %cst_505 [1] : vector<2x16xf32> to vector<2xf32>
    %1621 = vector.shape_cast %1620 : vector<2xf32> to vector<2x1xf32>
    %cst_506 = arith.constant 1.600000e+01 : f32
    %1622 = vector.broadcast %cst_506 : f32 to vector<2x1xf32>
    %1623 = arith.divf %1621, %1622 : vector<2x1xf32>
    %1624 = vector.broadcast %1623 : vector<2x1xf32> to vector<2x16xf32>
    %1625 = arith.subf %1619, %1624 : vector<2x16xf32>
    %1626 = arith.mulf %1625, %1625 : vector<2x16xf32>
    %cst_507 = arith.constant dense<0.000000e+00> : vector<2xf32>
    %1627 = vector.multi_reduction <add>, %1626, %cst_507 [1] : vector<2x16xf32> to vector<2xf32>
    %1628 = vector.shape_cast %1627 : vector<2xf32> to vector<2x1xf32>
    %cst_508 = arith.constant 1.600000e+01 : f32
    %1629 = vector.broadcast %cst_508 : f32 to vector<2x1xf32>
    %1630 = arith.divf %1628, %1629 : vector<2x1xf32>
    %cst_509 = arith.constant 9.99999974E-6 : f32
    %1631 = vector.broadcast %cst_509 : f32 to vector<2x1xf32>
    %1632 = arith.addf %1630, %1631 : vector<2x1xf32>
    %1633 = math.rsqrt %1632 : vector<2x1xf32>
    %1634 = vector.broadcast %1633 : vector<2x1xf32> to vector<2x16xf32>
    %1635 = arith.mulf %1625, %1634 : vector<2x16xf32>
    %1636 = vector.extract_strided_slice %1516 {offsets = [0, 112], sizes = [2, 16], strides = [1, 1]} : vector<2x128xf32> to vector<2x16xf32>
    %cst_510 = arith.constant dense<0.000000e+00> : vector<2xf32>
    %1637 = vector.multi_reduction <add>, %1636, %cst_510 [1] : vector<2x16xf32> to vector<2xf32>
    %1638 = vector.shape_cast %1637 : vector<2xf32> to vector<2x1xf32>
    %cst_511 = arith.constant 1.600000e+01 : f32
    %1639 = vector.broadcast %cst_511 : f32 to vector<2x1xf32>
    %1640 = arith.divf %1638, %1639 : vector<2x1xf32>
    %1641 = vector.broadcast %1640 : vector<2x1xf32> to vector<2x16xf32>
    %1642 = arith.subf %1636, %1641 : vector<2x16xf32>
    %1643 = arith.mulf %1642, %1642 : vector<2x16xf32>
    %cst_512 = arith.constant dense<0.000000e+00> : vector<2xf32>
    %1644 = vector.multi_reduction <add>, %1643, %cst_512 [1] : vector<2x16xf32> to vector<2xf32>
    %1645 = vector.shape_cast %1644 : vector<2xf32> to vector<2x1xf32>
    %cst_513 = arith.constant 1.600000e+01 : f32
    %1646 = vector.broadcast %cst_513 : f32 to vector<2x1xf32>
    %1647 = arith.divf %1645, %1646 : vector<2x1xf32>
    %cst_514 = arith.constant 9.99999974E-6 : f32
    %1648 = vector.broadcast %cst_514 : f32 to vector<2x1xf32>
    %1649 = arith.addf %1647, %1648 : vector<2x1xf32>
    %1650 = math.rsqrt %1649 : vector<2x1xf32>
    %1651 = vector.broadcast %1650 : vector<2x1xf32> to vector<2x16xf32>
    %1652 = arith.mulf %1642, %1651 : vector<2x16xf32>
    %1653 = tpu.concatenate %1533, %1550, %1567, %1584, %1601, %1618, %1635, %1652 in 1 : vector<2x16xf32>, vector<2x16xf32>, vector<2x16xf32>, vector<2x16xf32>, vector<2x16xf32>, vector<2x16xf32>, vector<2x16xf32>, vector<2x16xf32> -> vector<2x128xf32>
    %c0_515 = arith.constant 0 : index
    %c6912 = arith.constant 6912 : index
    %1654 = vector.load %arg2[%c0_515, %c6912] : memref<1x8704xf32, #tpu.memory_space<vmem>>, vector<1x128xf32>
    %1655 = vector.broadcast %1654 : vector<1x128xf32> to vector<2x128xf32>
    %1656 = arith.mulf %1653, %1655 : vector<2x128xf32>
    %c0_516 = arith.constant 0 : index
    %c7040 = arith.constant 7040 : index
    %1657 = vector.load %arg2[%c0_516, %c7040] : memref<1x8704xf32, #tpu.memory_space<vmem>>, vector<1x128xf32>
    %1658 = vector.broadcast %1657 : vector<1x128xf32> to vector<2x128xf32>
    %1659 = arith.addf %1656, %1658 : vector<2x128xf32>
    %cst_517 = arith.constant 2.000000e+01 : f32
    %1660 = vector.broadcast %cst_517 : f32 to vector<2x128xf32>
    %1661 = arith.minimumf %1659, %1660 : vector<2x128xf32>
    %1662 = math.exp %1661 : vector<2x128xf32>
    %cst_518 = arith.constant 1.000000e+00 : f32
    %1663 = vector.broadcast %cst_518 : f32 to vector<2x128xf32>
    %1664 = arith.addf %1663, %1662 : vector<2x128xf32>
    %1665 = math.log %1664 : vector<2x128xf32>
    %cst_519 = arith.constant 2.000000e+01 : f32
    %1666 = vector.broadcast %cst_519 : f32 to vector<2x128xf32>
    %1667 = arith.cmpf ogt, %1659, %1666 : vector<2x128xf32>
    %1668 = arith.select %1667, %1659, %1665 : vector<2x128xi1>, vector<2x128xf32>
    %1669 = math.tanh %1668 : vector<2x128xf32>
    %1670 = arith.mulf %1659, %1669 : vector<2x128xf32>
    %c0_520 = arith.constant 0 : index
    %c896 = arith.constant 896 : index
    %1671 = vector.load %arg7[%c0_520, %c896] : memref<256x1024xbf16, #tpu.memory_space<vmem>>, vector<256x128xbf16>
    %1672 = arith.truncf %1348 : vector<2x256xf32> to vector<2x256xbf16>
    %cst_521 = arith.constant dense<0.000000e+00> : vector<2x128xf32>
    %1673 = tpu.matmul %1672, %1671, %cst_521 {dimension_numbers = #tpu.dot_dimension_numbers<[1], [0], [0], [1], [0, 0, 1, 1], [], []>} : vector<2x256xbf16>, vector<256x128xbf16>, vector<2x128xf32> -> vector<2x128xf32>
    %c0_522 = arith.constant 0 : index
    %c7168 = arith.constant 7168 : index
    %1674 = vector.load %arg2[%c0_522, %c7168] : memref<1x8704xf32, #tpu.memory_space<vmem>>, vector<1x128xf32>
    %1675 = vector.broadcast %1674 : vector<1x128xf32> to vector<2x128xf32>
    %1676 = arith.addf %1673, %1675 : vector<2x128xf32>
    %1677 = arith.addf %1670, %1676 : vector<2x128xf32>
    %c0_523 = arith.constant 0 : index
    %c640 = arith.constant 640 : index
    %1678 = vector.load %arg6[%c0_523, %c640] : memref<128x768xbf16, #tpu.memory_space<vmem>>, vector<128x64xbf16>
    %1679 = arith.truncf %1677 : vector<2x128xf32> to vector<2x128xbf16>
    %cst_524 = arith.constant dense<0.000000e+00> : vector<2x64xf32>
    %1680 = tpu.matmul %1679, %1678, %cst_524 {dimension_numbers = #tpu.dot_dimension_numbers<[1], [0], [0], [1], [0, 0, 1, 1], [], []>} : vector<2x128xbf16>, vector<128x64xbf16>, vector<2x64xf32> -> vector<2x64xf32>
    %c0_525 = arith.constant 0 : index
    %c7296 = arith.constant 7296 : index
    %1681 = vector.load %arg2[%c0_525, %c7296] : memref<1x8704xf32, #tpu.memory_space<vmem>>, vector<1x64xf32>
    %1682 = vector.broadcast %1681 : vector<1x64xf32> to vector<2x64xf32>
    %1683 = arith.addf %1680, %1682 : vector<2x64xf32>
    %c0_526 = arith.constant 0 : index
    %c768_527 = arith.constant 768 : index
    %1684 = vector.load %arg5[%c0_526, %c768_527] : memref<64x1024xbf16, #tpu.memory_space<vmem>>, vector<64x32xbf16>
    %1685 = arith.truncf %1683 : vector<2x64xf32> to vector<2x64xbf16>
    %cst_528 = arith.constant dense<0.000000e+00> : vector<2x32xf32>
    %1686 = tpu.matmul %1685, %1684, %cst_528 {dimension_numbers = #tpu.dot_dimension_numbers<[1], [0], [0], [1], [0, 0, 1, 1], [], []>} : vector<2x64xbf16>, vector<64x32xbf16>, vector<2x32xf32> -> vector<2x32xf32>
    %c0_529 = arith.constant 0 : index
    %c7424 = arith.constant 7424 : index
    %1687 = vector.load %arg2[%c0_529, %c7424] : memref<1x8704xf32, #tpu.memory_space<vmem>>, vector<1x32xf32>
    %1688 = vector.broadcast %1687 : vector<1x32xf32> to vector<2x32xf32>
    %1689 = arith.addf %1686, %1688 : vector<2x32xf32>
    %1690 = vector.extract_strided_slice %1689 {offsets = [0, 0], sizes = [2, 4], strides = [1, 1]} : vector<2x32xf32> to vector<2x4xf32>
    %cst_530 = arith.constant dense<0.000000e+00> : vector<2xf32>
    %1691 = vector.multi_reduction <add>, %1690, %cst_530 [1] : vector<2x4xf32> to vector<2xf32>
    %1692 = vector.shape_cast %1691 : vector<2xf32> to vector<2x1xf32>
    %cst_531 = arith.constant 4.000000e+00 : f32
    %1693 = vector.broadcast %cst_531 : f32 to vector<2x1xf32>
    %1694 = arith.divf %1692, %1693 : vector<2x1xf32>
    %1695 = vector.broadcast %1694 : vector<2x1xf32> to vector<2x4xf32>
    %1696 = arith.subf %1690, %1695 : vector<2x4xf32>
    %1697 = arith.mulf %1696, %1696 : vector<2x4xf32>
    %cst_532 = arith.constant dense<0.000000e+00> : vector<2xf32>
    %1698 = vector.multi_reduction <add>, %1697, %cst_532 [1] : vector<2x4xf32> to vector<2xf32>
    %1699 = vector.shape_cast %1698 : vector<2xf32> to vector<2x1xf32>
    %cst_533 = arith.constant 4.000000e+00 : f32
    %1700 = vector.broadcast %cst_533 : f32 to vector<2x1xf32>
    %1701 = arith.divf %1699, %1700 : vector<2x1xf32>
    %cst_534 = arith.constant 9.99999974E-6 : f32
    %1702 = vector.broadcast %cst_534 : f32 to vector<2x1xf32>
    %1703 = arith.addf %1701, %1702 : vector<2x1xf32>
    %1704 = math.rsqrt %1703 : vector<2x1xf32>
    %1705 = vector.broadcast %1704 : vector<2x1xf32> to vector<2x4xf32>
    %1706 = arith.mulf %1696, %1705 : vector<2x4xf32>
    %1707 = vector.extract_strided_slice %1689 {offsets = [0, 4], sizes = [2, 4], strides = [1, 1]} : vector<2x32xf32> to vector<2x4xf32>
    %cst_535 = arith.constant dense<0.000000e+00> : vector<2xf32>
    %1708 = vector.multi_reduction <add>, %1707, %cst_535 [1] : vector<2x4xf32> to vector<2xf32>
    %1709 = vector.shape_cast %1708 : vector<2xf32> to vector<2x1xf32>
    %cst_536 = arith.constant 4.000000e+00 : f32
    %1710 = vector.broadcast %cst_536 : f32 to vector<2x1xf32>
    %1711 = arith.divf %1709, %1710 : vector<2x1xf32>
    %1712 = vector.broadcast %1711 : vector<2x1xf32> to vector<2x4xf32>
    %1713 = arith.subf %1707, %1712 : vector<2x4xf32>
    %1714 = arith.mulf %1713, %1713 : vector<2x4xf32>
    %cst_537 = arith.constant dense<0.000000e+00> : vector<2xf32>
    %1715 = vector.multi_reduction <add>, %1714, %cst_537 [1] : vector<2x4xf32> to vector<2xf32>
    %1716 = vector.shape_cast %1715 : vector<2xf32> to vector<2x1xf32>
    %cst_538 = arith.constant 4.000000e+00 : f32
    %1717 = vector.broadcast %cst_538 : f32 to vector<2x1xf32>
    %1718 = arith.divf %1716, %1717 : vector<2x1xf32>
    %cst_539 = arith.constant 9.99999974E-6 : f32
    %1719 = vector.broadcast %cst_539 : f32 to vector<2x1xf32>
    %1720 = arith.addf %1718, %1719 : vector<2x1xf32>
    %1721 = math.rsqrt %1720 : vector<2x1xf32>
    %1722 = vector.broadcast %1721 : vector<2x1xf32> to vector<2x4xf32>
    %1723 = arith.mulf %1713, %1722 : vector<2x4xf32>
    %1724 = vector.extract_strided_slice %1689 {offsets = [0, 8], sizes = [2, 4], strides = [1, 1]} : vector<2x32xf32> to vector<2x4xf32>
    %cst_540 = arith.constant dense<0.000000e+00> : vector<2xf32>
    %1725 = vector.multi_reduction <add>, %1724, %cst_540 [1] : vector<2x4xf32> to vector<2xf32>
    %1726 = vector.shape_cast %1725 : vector<2xf32> to vector<2x1xf32>
    %cst_541 = arith.constant 4.000000e+00 : f32
    %1727 = vector.broadcast %cst_541 : f32 to vector<2x1xf32>
    %1728 = arith.divf %1726, %1727 : vector<2x1xf32>
    %1729 = vector.broadcast %1728 : vector<2x1xf32> to vector<2x4xf32>
    %1730 = arith.subf %1724, %1729 : vector<2x4xf32>
    %1731 = arith.mulf %1730, %1730 : vector<2x4xf32>
    %cst_542 = arith.constant dense<0.000000e+00> : vector<2xf32>
    %1732 = vector.multi_reduction <add>, %1731, %cst_542 [1] : vector<2x4xf32> to vector<2xf32>
    %1733 = vector.shape_cast %1732 : vector<2xf32> to vector<2x1xf32>
    %cst_543 = arith.constant 4.000000e+00 : f32
    %1734 = vector.broadcast %cst_543 : f32 to vector<2x1xf32>
    %1735 = arith.divf %1733, %1734 : vector<2x1xf32>
    %cst_544 = arith.constant 9.99999974E-6 : f32
    %1736 = vector.broadcast %cst_544 : f32 to vector<2x1xf32>
    %1737 = arith.addf %1735, %1736 : vector<2x1xf32>
    %1738 = math.rsqrt %1737 : vector<2x1xf32>
    %1739 = vector.broadcast %1738 : vector<2x1xf32> to vector<2x4xf32>
    %1740 = arith.mulf %1730, %1739 : vector<2x4xf32>
    %1741 = vector.extract_strided_slice %1689 {offsets = [0, 12], sizes = [2, 4], strides = [1, 1]} : vector<2x32xf32> to vector<2x4xf32>
    %cst_545 = arith.constant dense<0.000000e+00> : vector<2xf32>
    %1742 = vector.multi_reduction <add>, %1741, %cst_545 [1] : vector<2x4xf32> to vector<2xf32>
    %1743 = vector.shape_cast %1742 : vector<2xf32> to vector<2x1xf32>
    %cst_546 = arith.constant 4.000000e+00 : f32
    %1744 = vector.broadcast %cst_546 : f32 to vector<2x1xf32>
    %1745 = arith.divf %1743, %1744 : vector<2x1xf32>
    %1746 = vector.broadcast %1745 : vector<2x1xf32> to vector<2x4xf32>
    %1747 = arith.subf %1741, %1746 : vector<2x4xf32>
    %1748 = arith.mulf %1747, %1747 : vector<2x4xf32>
    %cst_547 = arith.constant dense<0.000000e+00> : vector<2xf32>
    %1749 = vector.multi_reduction <add>, %1748, %cst_547 [1] : vector<2x4xf32> to vector<2xf32>
    %1750 = vector.shape_cast %1749 : vector<2xf32> to vector<2x1xf32>
    %cst_548 = arith.constant 4.000000e+00 : f32
    %1751 = vector.broadcast %cst_548 : f32 to vector<2x1xf32>
    %1752 = arith.divf %1750, %1751 : vector<2x1xf32>
    %cst_549 = arith.constant 9.99999974E-6 : f32
    %1753 = vector.broadcast %cst_549 : f32 to vector<2x1xf32>
    %1754 = arith.addf %1752, %1753 : vector<2x1xf32>
    %1755 = math.rsqrt %1754 : vector<2x1xf32>
    %1756 = vector.broadcast %1755 : vector<2x1xf32> to vector<2x4xf32>
    %1757 = arith.mulf %1747, %1756 : vector<2x4xf32>
    %1758 = vector.extract_strided_slice %1689 {offsets = [0, 16], sizes = [2, 4], strides = [1, 1]} : vector<2x32xf32> to vector<2x4xf32>
    %cst_550 = arith.constant dense<0.000000e+00> : vector<2xf32>
    %1759 = vector.multi_reduction <add>, %1758, %cst_550 [1] : vector<2x4xf32> to vector<2xf32>
    %1760 = vector.shape_cast %1759 : vector<2xf32> to vector<2x1xf32>
    %cst_551 = arith.constant 4.000000e+00 : f32
    %1761 = vector.broadcast %cst_551 : f32 to vector<2x1xf32>
    %1762 = arith.divf %1760, %1761 : vector<2x1xf32>
    %1763 = vector.broadcast %1762 : vector<2x1xf32> to vector<2x4xf32>
    %1764 = arith.subf %1758, %1763 : vector<2x4xf32>
    %1765 = arith.mulf %1764, %1764 : vector<2x4xf32>
    %cst_552 = arith.constant dense<0.000000e+00> : vector<2xf32>
    %1766 = vector.multi_reduction <add>, %1765, %cst_552 [1] : vector<2x4xf32> to vector<2xf32>
    %1767 = vector.shape_cast %1766 : vector<2xf32> to vector<2x1xf32>
    %cst_553 = arith.constant 4.000000e+00 : f32
    %1768 = vector.broadcast %cst_553 : f32 to vector<2x1xf32>
    %1769 = arith.divf %1767, %1768 : vector<2x1xf32>
    %cst_554 = arith.constant 9.99999974E-6 : f32
    %1770 = vector.broadcast %cst_554 : f32 to vector<2x1xf32>
    %1771 = arith.addf %1769, %1770 : vector<2x1xf32>
    %1772 = math.rsqrt %1771 : vector<2x1xf32>
    %1773 = vector.broadcast %1772 : vector<2x1xf32> to vector<2x4xf32>
    %1774 = arith.mulf %1764, %1773 : vector<2x4xf32>
    %1775 = vector.extract_strided_slice %1689 {offsets = [0, 20], sizes = [2, 4], strides = [1, 1]} : vector<2x32xf32> to vector<2x4xf32>
    %cst_555 = arith.constant dense<0.000000e+00> : vector<2xf32>
    %1776 = vector.multi_reduction <add>, %1775, %cst_555 [1] : vector<2x4xf32> to vector<2xf32>
    %1777 = vector.shape_cast %1776 : vector<2xf32> to vector<2x1xf32>
    %cst_556 = arith.constant 4.000000e+00 : f32
    %1778 = vector.broadcast %cst_556 : f32 to vector<2x1xf32>
    %1779 = arith.divf %1777, %1778 : vector<2x1xf32>
    %1780 = vector.broadcast %1779 : vector<2x1xf32> to vector<2x4xf32>
    %1781 = arith.subf %1775, %1780 : vector<2x4xf32>
    %1782 = arith.mulf %1781, %1781 : vector<2x4xf32>
    %cst_557 = arith.constant dense<0.000000e+00> : vector<2xf32>
    %1783 = vector.multi_reduction <add>, %1782, %cst_557 [1] : vector<2x4xf32> to vector<2xf32>
    %1784 = vector.shape_cast %1783 : vector<2xf32> to vector<2x1xf32>
    %cst_558 = arith.constant 4.000000e+00 : f32
    %1785 = vector.broadcast %cst_558 : f32 to vector<2x1xf32>
    %1786 = arith.divf %1784, %1785 : vector<2x1xf32>
    %cst_559 = arith.constant 9.99999974E-6 : f32
    %1787 = vector.broadcast %cst_559 : f32 to vector<2x1xf32>
    %1788 = arith.addf %1786, %1787 : vector<2x1xf32>
    %1789 = math.rsqrt %1788 : vector<2x1xf32>
    %1790 = vector.broadcast %1789 : vector<2x1xf32> to vector<2x4xf32>
    %1791 = arith.mulf %1781, %1790 : vector<2x4xf32>
    %1792 = vector.extract_strided_slice %1689 {offsets = [0, 24], sizes = [2, 4], strides = [1, 1]} : vector<2x32xf32> to vector<2x4xf32>
    %cst_560 = arith.constant dense<0.000000e+00> : vector<2xf32>
    %1793 = vector.multi_reduction <add>, %1792, %cst_560 [1] : vector<2x4xf32> to vector<2xf32>
    %1794 = vector.shape_cast %1793 : vector<2xf32> to vector<2x1xf32>
    %cst_561 = arith.constant 4.000000e+00 : f32
    %1795 = vector.broadcast %cst_561 : f32 to vector<2x1xf32>
    %1796 = arith.divf %1794, %1795 : vector<2x1xf32>
    %1797 = vector.broadcast %1796 : vector<2x1xf32> to vector<2x4xf32>
    %1798 = arith.subf %1792, %1797 : vector<2x4xf32>
    %1799 = arith.mulf %1798, %1798 : vector<2x4xf32>
    %cst_562 = arith.constant dense<0.000000e+00> : vector<2xf32>
    %1800 = vector.multi_reduction <add>, %1799, %cst_562 [1] : vector<2x4xf32> to vector<2xf32>
    %1801 = vector.shape_cast %1800 : vector<2xf32> to vector<2x1xf32>
    %cst_563 = arith.constant 4.000000e+00 : f32
    %1802 = vector.broadcast %cst_563 : f32 to vector<2x1xf32>
    %1803 = arith.divf %1801, %1802 : vector<2x1xf32>
    %cst_564 = arith.constant 9.99999974E-6 : f32
    %1804 = vector.broadcast %cst_564 : f32 to vector<2x1xf32>
    %1805 = arith.addf %1803, %1804 : vector<2x1xf32>
    %1806 = math.rsqrt %1805 : vector<2x1xf32>
    %1807 = vector.broadcast %1806 : vector<2x1xf32> to vector<2x4xf32>
    %1808 = arith.mulf %1798, %1807 : vector<2x4xf32>
    %1809 = vector.extract_strided_slice %1689 {offsets = [0, 28], sizes = [2, 4], strides = [1, 1]} : vector<2x32xf32> to vector<2x4xf32>
    %cst_565 = arith.constant dense<0.000000e+00> : vector<2xf32>
    %1810 = vector.multi_reduction <add>, %1809, %cst_565 [1] : vector<2x4xf32> to vector<2xf32>
    %1811 = vector.shape_cast %1810 : vector<2xf32> to vector<2x1xf32>
    %cst_566 = arith.constant 4.000000e+00 : f32
    %1812 = vector.broadcast %cst_566 : f32 to vector<2x1xf32>
    %1813 = arith.divf %1811, %1812 : vector<2x1xf32>
    %1814 = vector.broadcast %1813 : vector<2x1xf32> to vector<2x4xf32>
    %1815 = arith.subf %1809, %1814 : vector<2x4xf32>
    %1816 = arith.mulf %1815, %1815 : vector<2x4xf32>
    %cst_567 = arith.constant dense<0.000000e+00> : vector<2xf32>
    %1817 = vector.multi_reduction <add>, %1816, %cst_567 [1] : vector<2x4xf32> to vector<2xf32>
    %1818 = vector.shape_cast %1817 : vector<2xf32> to vector<2x1xf32>
    %cst_568 = arith.constant 4.000000e+00 : f32
    %1819 = vector.broadcast %cst_568 : f32 to vector<2x1xf32>
    %1820 = arith.divf %1818, %1819 : vector<2x1xf32>
    %cst_569 = arith.constant 9.99999974E-6 : f32
    %1821 = vector.broadcast %cst_569 : f32 to vector<2x1xf32>
    %1822 = arith.addf %1820, %1821 : vector<2x1xf32>
    %1823 = math.rsqrt %1822 : vector<2x1xf32>
    %1824 = vector.broadcast %1823 : vector<2x1xf32> to vector<2x4xf32>
    %1825 = arith.mulf %1815, %1824 : vector<2x4xf32>
    %1826 = tpu.concatenate %1706, %1723, %1740, %1757, %1774, %1791, %1808, %1825 in 1 : vector<2x4xf32>, vector<2x4xf32>, vector<2x4xf32>, vector<2x4xf32>, vector<2x4xf32>, vector<2x4xf32>, vector<2x4xf32>, vector<2x4xf32> -> vector<2x32xf32>
    %c0_570 = arith.constant 0 : index
    %c7552 = arith.constant 7552 : index
    %1827 = vector.load %arg2[%c0_570, %c7552] : memref<1x8704xf32, #tpu.memory_space<vmem>>, vector<1x32xf32>
    %1828 = vector.broadcast %1827 : vector<1x32xf32> to vector<2x32xf32>
    %1829 = arith.mulf %1826, %1828 : vector<2x32xf32>
    %c0_571 = arith.constant 0 : index
    %c7680 = arith.constant 7680 : index
    %1830 = vector.load %arg2[%c0_571, %c7680] : memref<1x8704xf32, #tpu.memory_space<vmem>>, vector<1x32xf32>
    %1831 = vector.broadcast %1830 : vector<1x32xf32> to vector<2x32xf32>
    %1832 = arith.addf %1829, %1831 : vector<2x32xf32>
    %cst_572 = arith.constant 2.000000e+01 : f32
    %1833 = vector.broadcast %cst_572 : f32 to vector<2x32xf32>
    %1834 = arith.minimumf %1832, %1833 : vector<2x32xf32>
    %1835 = math.exp %1834 : vector<2x32xf32>
    %cst_573 = arith.constant 1.000000e+00 : f32
    %1836 = vector.broadcast %cst_573 : f32 to vector<2x32xf32>
    %1837 = arith.addf %1836, %1835 : vector<2x32xf32>
    %1838 = math.log %1837 : vector<2x32xf32>
    %cst_574 = arith.constant 2.000000e+01 : f32
    %1839 = vector.broadcast %cst_574 : f32 to vector<2x32xf32>
    %1840 = arith.cmpf ogt, %1832, %1839 : vector<2x32xf32>
    %1841 = arith.select %1840, %1832, %1838 : vector<2x32xi1>, vector<2x32xf32>
    %1842 = math.tanh %1841 : vector<2x32xf32>
    %1843 = arith.mulf %1832, %1842 : vector<2x32xf32>
    %1844 = vector.extract_strided_slice %37 {offsets = [0, 896], sizes = [2, 32], strides = [1, 1]} : vector<2x928xf32> to vector<2x32xf32>
    %1845 = arith.addf %1843, %1844 : vector<2x32xf32>
    %c0_575 = arith.constant 0 : index
    %c128_576 = arith.constant 128 : index
    %1846 = vector.load %arg4[%c0_575, %c128_576] : memref<32x640xf32, #tpu.memory_space<vmem>>, vector<32x32xf32>
    %cst_577 = arith.constant dense<0.000000e+00> : vector<2x32xf32>
    %1847 = tpu.matmul %1845, %1846, %cst_577 {dimension_numbers = #tpu.dot_dimension_numbers<[1], [0], [0], [1], [0, 0, 1, 1], [], []>} : vector<2x32xf32>, vector<32x32xf32>, vector<2x32xf32> -> vector<2x32xf32>
    %c0_578 = arith.constant 0 : index
    %c7808 = arith.constant 7808 : index
    %1848 = vector.load %arg2[%c0_578, %c7808] : memref<1x8704xf32, #tpu.memory_space<vmem>>, vector<1x32xf32>
    %1849 = vector.broadcast %1848 : vector<1x32xf32> to vector<2x32xf32>
    %1850 = arith.addf %1847, %1849 : vector<2x32xf32>
    %1851 = vector.extract_strided_slice %1850 {offsets = [0, 0], sizes = [2, 4], strides = [1, 1]} : vector<2x32xf32> to vector<2x4xf32>
    %cst_579 = arith.constant dense<0.000000e+00> : vector<2xf32>
    %1852 = vector.multi_reduction <add>, %1851, %cst_579 [1] : vector<2x4xf32> to vector<2xf32>
    %1853 = vector.shape_cast %1852 : vector<2xf32> to vector<2x1xf32>
    %cst_580 = arith.constant 4.000000e+00 : f32
    %1854 = vector.broadcast %cst_580 : f32 to vector<2x1xf32>
    %1855 = arith.divf %1853, %1854 : vector<2x1xf32>
    %1856 = vector.broadcast %1855 : vector<2x1xf32> to vector<2x4xf32>
    %1857 = arith.subf %1851, %1856 : vector<2x4xf32>
    %1858 = arith.mulf %1857, %1857 : vector<2x4xf32>
    %cst_581 = arith.constant dense<0.000000e+00> : vector<2xf32>
    %1859 = vector.multi_reduction <add>, %1858, %cst_581 [1] : vector<2x4xf32> to vector<2xf32>
    %1860 = vector.shape_cast %1859 : vector<2xf32> to vector<2x1xf32>
    %cst_582 = arith.constant 4.000000e+00 : f32
    %1861 = vector.broadcast %cst_582 : f32 to vector<2x1xf32>
    %1862 = arith.divf %1860, %1861 : vector<2x1xf32>
    %cst_583 = arith.constant 9.99999974E-6 : f32
    %1863 = vector.broadcast %cst_583 : f32 to vector<2x1xf32>
    %1864 = arith.addf %1862, %1863 : vector<2x1xf32>
    %1865 = math.rsqrt %1864 : vector<2x1xf32>
    %1866 = vector.broadcast %1865 : vector<2x1xf32> to vector<2x4xf32>
    %1867 = arith.mulf %1857, %1866 : vector<2x4xf32>
    %1868 = vector.extract_strided_slice %1850 {offsets = [0, 4], sizes = [2, 4], strides = [1, 1]} : vector<2x32xf32> to vector<2x4xf32>
    %cst_584 = arith.constant dense<0.000000e+00> : vector<2xf32>
    %1869 = vector.multi_reduction <add>, %1868, %cst_584 [1] : vector<2x4xf32> to vector<2xf32>
    %1870 = vector.shape_cast %1869 : vector<2xf32> to vector<2x1xf32>
    %cst_585 = arith.constant 4.000000e+00 : f32
    %1871 = vector.broadcast %cst_585 : f32 to vector<2x1xf32>
    %1872 = arith.divf %1870, %1871 : vector<2x1xf32>
    %1873 = vector.broadcast %1872 : vector<2x1xf32> to vector<2x4xf32>
    %1874 = arith.subf %1868, %1873 : vector<2x4xf32>
    %1875 = arith.mulf %1874, %1874 : vector<2x4xf32>
    %cst_586 = arith.constant dense<0.000000e+00> : vector<2xf32>
    %1876 = vector.multi_reduction <add>, %1875, %cst_586 [1] : vector<2x4xf32> to vector<2xf32>
    %1877 = vector.shape_cast %1876 : vector<2xf32> to vector<2x1xf32>
    %cst_587 = arith.constant 4.000000e+00 : f32
    %1878 = vector.broadcast %cst_587 : f32 to vector<2x1xf32>
    %1879 = arith.divf %1877, %1878 : vector<2x1xf32>
    %cst_588 = arith.constant 9.99999974E-6 : f32
    %1880 = vector.broadcast %cst_588 : f32 to vector<2x1xf32>
    %1881 = arith.addf %1879, %1880 : vector<2x1xf32>
    %1882 = math.rsqrt %1881 : vector<2x1xf32>
    %1883 = vector.broadcast %1882 : vector<2x1xf32> to vector<2x4xf32>
    %1884 = arith.mulf %1874, %1883 : vector<2x4xf32>
    %1885 = vector.extract_strided_slice %1850 {offsets = [0, 8], sizes = [2, 4], strides = [1, 1]} : vector<2x32xf32> to vector<2x4xf32>
    %cst_589 = arith.constant dense<0.000000e+00> : vector<2xf32>
    %1886 = vector.multi_reduction <add>, %1885, %cst_589 [1] : vector<2x4xf32> to vector<2xf32>
    %1887 = vector.shape_cast %1886 : vector<2xf32> to vector<2x1xf32>
    %cst_590 = arith.constant 4.000000e+00 : f32
    %1888 = vector.broadcast %cst_590 : f32 to vector<2x1xf32>
    %1889 = arith.divf %1887, %1888 : vector<2x1xf32>
    %1890 = vector.broadcast %1889 : vector<2x1xf32> to vector<2x4xf32>
    %1891 = arith.subf %1885, %1890 : vector<2x4xf32>
    %1892 = arith.mulf %1891, %1891 : vector<2x4xf32>
    %cst_591 = arith.constant dense<0.000000e+00> : vector<2xf32>
    %1893 = vector.multi_reduction <add>, %1892, %cst_591 [1] : vector<2x4xf32> to vector<2xf32>
    %1894 = vector.shape_cast %1893 : vector<2xf32> to vector<2x1xf32>
    %cst_592 = arith.constant 4.000000e+00 : f32
    %1895 = vector.broadcast %cst_592 : f32 to vector<2x1xf32>
    %1896 = arith.divf %1894, %1895 : vector<2x1xf32>
    %cst_593 = arith.constant 9.99999974E-6 : f32
    %1897 = vector.broadcast %cst_593 : f32 to vector<2x1xf32>
    %1898 = arith.addf %1896, %1897 : vector<2x1xf32>
    %1899 = math.rsqrt %1898 : vector<2x1xf32>
    %1900 = vector.broadcast %1899 : vector<2x1xf32> to vector<2x4xf32>
    %1901 = arith.mulf %1891, %1900 : vector<2x4xf32>
    %1902 = vector.extract_strided_slice %1850 {offsets = [0, 12], sizes = [2, 4], strides = [1, 1]} : vector<2x32xf32> to vector<2x4xf32>
    %cst_594 = arith.constant dense<0.000000e+00> : vector<2xf32>
    %1903 = vector.multi_reduction <add>, %1902, %cst_594 [1] : vector<2x4xf32> to vector<2xf32>
    %1904 = vector.shape_cast %1903 : vector<2xf32> to vector<2x1xf32>
    %cst_595 = arith.constant 4.000000e+00 : f32
    %1905 = vector.broadcast %cst_595 : f32 to vector<2x1xf32>
    %1906 = arith.divf %1904, %1905 : vector<2x1xf32>
    %1907 = vector.broadcast %1906 : vector<2x1xf32> to vector<2x4xf32>
    %1908 = arith.subf %1902, %1907 : vector<2x4xf32>
    %1909 = arith.mulf %1908, %1908 : vector<2x4xf32>
    %cst_596 = arith.constant dense<0.000000e+00> : vector<2xf32>
    %1910 = vector.multi_reduction <add>, %1909, %cst_596 [1] : vector<2x4xf32> to vector<2xf32>
    %1911 = vector.shape_cast %1910 : vector<2xf32> to vector<2x1xf32>
    %cst_597 = arith.constant 4.000000e+00 : f32
    %1912 = vector.broadcast %cst_597 : f32 to vector<2x1xf32>
    %1913 = arith.divf %1911, %1912 : vector<2x1xf32>
    %cst_598 = arith.constant 9.99999974E-6 : f32
    %1914 = vector.broadcast %cst_598 : f32 to vector<2x1xf32>
    %1915 = arith.addf %1913, %1914 : vector<2x1xf32>
    %1916 = math.rsqrt %1915 : vector<2x1xf32>
    %1917 = vector.broadcast %1916 : vector<2x1xf32> to vector<2x4xf32>
    %1918 = arith.mulf %1908, %1917 : vector<2x4xf32>
    %1919 = vector.extract_strided_slice %1850 {offsets = [0, 16], sizes = [2, 4], strides = [1, 1]} : vector<2x32xf32> to vector<2x4xf32>
    %cst_599 = arith.constant dense<0.000000e+00> : vector<2xf32>
    %1920 = vector.multi_reduction <add>, %1919, %cst_599 [1] : vector<2x4xf32> to vector<2xf32>
    %1921 = vector.shape_cast %1920 : vector<2xf32> to vector<2x1xf32>
    %cst_600 = arith.constant 4.000000e+00 : f32
    %1922 = vector.broadcast %cst_600 : f32 to vector<2x1xf32>
    %1923 = arith.divf %1921, %1922 : vector<2x1xf32>
    %1924 = vector.broadcast %1923 : vector<2x1xf32> to vector<2x4xf32>
    %1925 = arith.subf %1919, %1924 : vector<2x4xf32>
    %1926 = arith.mulf %1925, %1925 : vector<2x4xf32>
    %cst_601 = arith.constant dense<0.000000e+00> : vector<2xf32>
    %1927 = vector.multi_reduction <add>, %1926, %cst_601 [1] : vector<2x4xf32> to vector<2xf32>
    %1928 = vector.shape_cast %1927 : vector<2xf32> to vector<2x1xf32>
    %cst_602 = arith.constant 4.000000e+00 : f32
    %1929 = vector.broadcast %cst_602 : f32 to vector<2x1xf32>
    %1930 = arith.divf %1928, %1929 : vector<2x1xf32>
    %cst_603 = arith.constant 9.99999974E-6 : f32
    %1931 = vector.broadcast %cst_603 : f32 to vector<2x1xf32>
    %1932 = arith.addf %1930, %1931 : vector<2x1xf32>
    %1933 = math.rsqrt %1932 : vector<2x1xf32>
    %1934 = vector.broadcast %1933 : vector<2x1xf32> to vector<2x4xf32>
    %1935 = arith.mulf %1925, %1934 : vector<2x4xf32>
    %1936 = vector.extract_strided_slice %1850 {offsets = [0, 20], sizes = [2, 4], strides = [1, 1]} : vector<2x32xf32> to vector<2x4xf32>
    %cst_604 = arith.constant dense<0.000000e+00> : vector<2xf32>
    %1937 = vector.multi_reduction <add>, %1936, %cst_604 [1] : vector<2x4xf32> to vector<2xf32>
    %1938 = vector.shape_cast %1937 : vector<2xf32> to vector<2x1xf32>
    %cst_605 = arith.constant 4.000000e+00 : f32
    %1939 = vector.broadcast %cst_605 : f32 to vector<2x1xf32>
    %1940 = arith.divf %1938, %1939 : vector<2x1xf32>
    %1941 = vector.broadcast %1940 : vector<2x1xf32> to vector<2x4xf32>
    %1942 = arith.subf %1936, %1941 : vector<2x4xf32>
    %1943 = arith.mulf %1942, %1942 : vector<2x4xf32>
    %cst_606 = arith.constant dense<0.000000e+00> : vector<2xf32>
    %1944 = vector.multi_reduction <add>, %1943, %cst_606 [1] : vector<2x4xf32> to vector<2xf32>
    %1945 = vector.shape_cast %1944 : vector<2xf32> to vector<2x1xf32>
    %cst_607 = arith.constant 4.000000e+00 : f32
    %1946 = vector.broadcast %cst_607 : f32 to vector<2x1xf32>
    %1947 = arith.divf %1945, %1946 : vector<2x1xf32>
    %cst_608 = arith.constant 9.99999974E-6 : f32
    %1948 = vector.broadcast %cst_608 : f32 to vector<2x1xf32>
    %1949 = arith.addf %1947, %1948 : vector<2x1xf32>
    %1950 = math.rsqrt %1949 : vector<2x1xf32>
    %1951 = vector.broadcast %1950 : vector<2x1xf32> to vector<2x4xf32>
    %1952 = arith.mulf %1942, %1951 : vector<2x4xf32>
    %1953 = vector.extract_strided_slice %1850 {offsets = [0, 24], sizes = [2, 4], strides = [1, 1]} : vector<2x32xf32> to vector<2x4xf32>
    %cst_609 = arith.constant dense<0.000000e+00> : vector<2xf32>
    %1954 = vector.multi_reduction <add>, %1953, %cst_609 [1] : vector<2x4xf32> to vector<2xf32>
    %1955 = vector.shape_cast %1954 : vector<2xf32> to vector<2x1xf32>
    %cst_610 = arith.constant 4.000000e+00 : f32
    %1956 = vector.broadcast %cst_610 : f32 to vector<2x1xf32>
    %1957 = arith.divf %1955, %1956 : vector<2x1xf32>
    %1958 = vector.broadcast %1957 : vector<2x1xf32> to vector<2x4xf32>
    %1959 = arith.subf %1953, %1958 : vector<2x4xf32>
    %1960 = arith.mulf %1959, %1959 : vector<2x4xf32>
    %cst_611 = arith.constant dense<0.000000e+00> : vector<2xf32>
    %1961 = vector.multi_reduction <add>, %1960, %cst_611 [1] : vector<2x4xf32> to vector<2xf32>
    %1962 = vector.shape_cast %1961 : vector<2xf32> to vector<2x1xf32>
    %cst_612 = arith.constant 4.000000e+00 : f32
    %1963 = vector.broadcast %cst_612 : f32 to vector<2x1xf32>
    %1964 = arith.divf %1962, %1963 : vector<2x1xf32>
    %cst_613 = arith.constant 9.99999974E-6 : f32
    %1965 = vector.broadcast %cst_613 : f32 to vector<2x1xf32>
    %1966 = arith.addf %1964, %1965 : vector<2x1xf32>
    %1967 = math.rsqrt %1966 : vector<2x1xf32>
    %1968 = vector.broadcast %1967 : vector<2x1xf32> to vector<2x4xf32>
    %1969 = arith.mulf %1959, %1968 : vector<2x4xf32>
    %1970 = vector.extract_strided_slice %1850 {offsets = [0, 28], sizes = [2, 4], strides = [1, 1]} : vector<2x32xf32> to vector<2x4xf32>
    %cst_614 = arith.constant dense<0.000000e+00> : vector<2xf32>
    %1971 = vector.multi_reduction <add>, %1970, %cst_614 [1] : vector<2x4xf32> to vector<2xf32>
    %1972 = vector.shape_cast %1971 : vector<2xf32> to vector<2x1xf32>
    %cst_615 = arith.constant 4.000000e+00 : f32
    %1973 = vector.broadcast %cst_615 : f32 to vector<2x1xf32>
    %1974 = arith.divf %1972, %1973 : vector<2x1xf32>
    %1975 = vector.broadcast %1974 : vector<2x1xf32> to vector<2x4xf32>
    %1976 = arith.subf %1970, %1975 : vector<2x4xf32>
    %1977 = arith.mulf %1976, %1976 : vector<2x4xf32>
    %cst_616 = arith.constant dense<0.000000e+00> : vector<2xf32>
    %1978 = vector.multi_reduction <add>, %1977, %cst_616 [1] : vector<2x4xf32> to vector<2xf32>
    %1979 = vector.shape_cast %1978 : vector<2xf32> to vector<2x1xf32>
    %cst_617 = arith.constant 4.000000e+00 : f32
    %1980 = vector.broadcast %cst_617 : f32 to vector<2x1xf32>
    %1981 = arith.divf %1979, %1980 : vector<2x1xf32>
    %cst_618 = arith.constant 9.99999974E-6 : f32
    %1982 = vector.broadcast %cst_618 : f32 to vector<2x1xf32>
    %1983 = arith.addf %1981, %1982 : vector<2x1xf32>
    %1984 = math.rsqrt %1983 : vector<2x1xf32>
    %1985 = vector.broadcast %1984 : vector<2x1xf32> to vector<2x4xf32>
    %1986 = arith.mulf %1976, %1985 : vector<2x4xf32>
    %1987 = tpu.concatenate %1867, %1884, %1901, %1918, %1935, %1952, %1969, %1986 in 1 : vector<2x4xf32>, vector<2x4xf32>, vector<2x4xf32>, vector<2x4xf32>, vector<2x4xf32>, vector<2x4xf32>, vector<2x4xf32>, vector<2x4xf32> -> vector<2x32xf32>
    %c0_619 = arith.constant 0 : index
    %c7936 = arith.constant 7936 : index
    %1988 = vector.load %arg2[%c0_619, %c7936] : memref<1x8704xf32, #tpu.memory_space<vmem>>, vector<1x32xf32>
    %1989 = vector.broadcast %1988 : vector<1x32xf32> to vector<2x32xf32>
    %1990 = arith.mulf %1987, %1989 : vector<2x32xf32>
    %c0_620 = arith.constant 0 : index
    %c8064 = arith.constant 8064 : index
    %1991 = vector.load %arg2[%c0_620, %c8064] : memref<1x8704xf32, #tpu.memory_space<vmem>>, vector<1x32xf32>
    %1992 = vector.broadcast %1991 : vector<1x32xf32> to vector<2x32xf32>
    %1993 = arith.addf %1990, %1992 : vector<2x32xf32>
    %cst_621 = arith.constant 2.000000e+01 : f32
    %1994 = vector.broadcast %cst_621 : f32 to vector<2x32xf32>
    %1995 = arith.minimumf %1993, %1994 : vector<2x32xf32>
    %1996 = math.exp %1995 : vector<2x32xf32>
    %cst_622 = arith.constant 1.000000e+00 : f32
    %1997 = vector.broadcast %cst_622 : f32 to vector<2x32xf32>
    %1998 = arith.addf %1997, %1996 : vector<2x32xf32>
    %1999 = math.log %1998 : vector<2x32xf32>
    %cst_623 = arith.constant 2.000000e+01 : f32
    %2000 = vector.broadcast %cst_623 : f32 to vector<2x32xf32>
    %2001 = arith.cmpf ogt, %1993, %2000 : vector<2x32xf32>
    %2002 = arith.select %2001, %1993, %1999 : vector<2x32xi1>, vector<2x32xf32>
    %2003 = math.tanh %2002 : vector<2x32xf32>
    %2004 = arith.mulf %1993, %2003 : vector<2x32xf32>
    %c0_624 = arith.constant 0 : index
    %c896_625 = arith.constant 896 : index
    %2005 = vector.load %arg5[%c0_624, %c896_625] : memref<64x1024xbf16, #tpu.memory_space<vmem>>, vector<64x32xbf16>
    %2006 = arith.truncf %1683 : vector<2x64xf32> to vector<2x64xbf16>
    %cst_626 = arith.constant dense<0.000000e+00> : vector<2x32xf32>
    %2007 = tpu.matmul %2006, %2005, %cst_626 {dimension_numbers = #tpu.dot_dimension_numbers<[1], [0], [0], [1], [0, 0, 1, 1], [], []>} : vector<2x64xbf16>, vector<64x32xbf16>, vector<2x32xf32> -> vector<2x32xf32>
    %c0_627 = arith.constant 0 : index
    %c8192 = arith.constant 8192 : index
    %2008 = vector.load %arg2[%c0_627, %c8192] : memref<1x8704xf32, #tpu.memory_space<vmem>>, vector<1x32xf32>
    %2009 = vector.broadcast %2008 : vector<1x32xf32> to vector<2x32xf32>
    %2010 = arith.addf %2007, %2009 : vector<2x32xf32>
    %2011 = arith.addf %2004, %2010 : vector<2x32xf32>
    %c0_628 = arith.constant 0 : index
    %c256_629 = arith.constant 256 : index
    %2012 = vector.load %arg4[%c0_628, %c256_629] : memref<32x640xf32, #tpu.memory_space<vmem>>, vector<32x16xf32>
    %cst_630 = arith.constant dense<0.000000e+00> : vector<2x16xf32>
    %2013 = tpu.matmul %2011, %2012, %cst_630 {dimension_numbers = #tpu.dot_dimension_numbers<[1], [0], [0], [1], [0, 0, 1, 1], [], []>} : vector<2x32xf32>, vector<32x16xf32>, vector<2x16xf32> -> vector<2x16xf32>
    %c0_631 = arith.constant 0 : index
    %c8320 = arith.constant 8320 : index
    %2014 = vector.load %arg2[%c0_631, %c8320] : memref<1x8704xf32, #tpu.memory_space<vmem>>, vector<1x16xf32>
    %2015 = vector.broadcast %2014 : vector<1x16xf32> to vector<2x16xf32>
    %2016 = arith.addf %2013, %2015 : vector<2x16xf32>
    %c0_632 = arith.constant 0 : index
    %c384_633 = arith.constant 384 : index
    %2017 = vector.load %arg4[%c0_632, %c384_633] : memref<32x640xf32, #tpu.memory_space<vmem>>, vector<16x12xf32>
    %cst_634 = arith.constant dense<0.000000e+00> : vector<2x12xf32>
    %2018 = tpu.matmul %2016, %2017, %cst_634 {dimension_numbers = #tpu.dot_dimension_numbers<[1], [0], [0], [1], [0, 0, 1, 1], [], []>} : vector<2x16xf32>, vector<16x12xf32>, vector<2x12xf32> -> vector<2x12xf32>
    %c0_635 = arith.constant 0 : index
    %c1152 = arith.constant 1152 : index
    %2019 = vector.load %arg3[%c0_635, %c1152] : memref<8x1280xf32, #tpu.memory_space<vmem>>, vector<8x12xf32>
    %cst_636 = arith.constant dense<0.000000e+00> : vector<2x12xf32>
    %2020 = tpu.matmul %21, %2019, %cst_636 {dimension_numbers = #tpu.dot_dimension_numbers<[1], [0], [0], [1], [0, 0, 1, 1], [], []>} : vector<2x8xf32>, vector<8x12xf32>, vector<2x12xf32> -> vector<2x12xf32>
    %2021 = arith.addf %2018, %2020 : vector<2x12xf32>
    %c0_637 = arith.constant 0 : index
    %c8448 = arith.constant 8448 : index
    %2022 = vector.load %arg2[%c0_637, %c8448] : memref<1x8704xf32, #tpu.memory_space<vmem>>, vector<1x12xf32>
    %2023 = vector.broadcast %2022 : vector<1x12xf32> to vector<2x12xf32>
    %2024 = arith.addf %2021, %2023 : vector<2x12xf32>
    %cst_638 = arith.constant 2.000000e+01 : f32
    %2025 = vector.broadcast %cst_638 : f32 to vector<2x12xf32>
    %2026 = arith.minimumf %2024, %2025 : vector<2x12xf32>
    %2027 = math.exp %2026 : vector<2x12xf32>
    %cst_639 = arith.constant 1.000000e+00 : f32
    %2028 = vector.broadcast %cst_639 : f32 to vector<2x12xf32>
    %2029 = arith.addf %2028, %2027 : vector<2x12xf32>
    %2030 = math.log %2029 : vector<2x12xf32>
    %cst_640 = arith.constant 2.000000e+01 : f32
    %2031 = vector.broadcast %cst_640 : f32 to vector<2x12xf32>
    %2032 = arith.cmpf ogt, %2024, %2031 : vector<2x12xf32>
    %2033 = arith.select %2032, %2024, %2030 : vector<2x12xi1>, vector<2x12xf32>
    %2034 = math.tanh %2033 : vector<2x12xf32>
    %2035 = arith.mulf %2024, %2034 : vector<2x12xf32>
    %c0_641 = arith.constant 0 : index
    %c512_642 = arith.constant 512 : index
    %2036 = vector.load %arg4[%c0_641, %c512_642] : memref<32x640xf32, #tpu.memory_space<vmem>>, vector<12x1xf32>
    %cst_643 = arith.constant dense<0.000000e+00> : vector<2x1xf32>
    %2037 = tpu.matmul %2035, %2036, %cst_643 {dimension_numbers = #tpu.dot_dimension_numbers<[1], [0], [0], [1], [0, 0, 1, 1], [], []>} : vector<2x12xf32>, vector<12x1xf32>, vector<2x1xf32> -> vector<2x1xf32>
    %c0_644 = arith.constant 0 : index
    %c8576 = arith.constant 8576 : index
    %2038 = vector.load %arg2[%c0_644, %c8576] : memref<1x8704xf32, #tpu.memory_space<vmem>>, vector<1x1xf32>
    %2039 = vector.broadcast %2038 : vector<1x1xf32> to vector<2x1xf32>
    %2040 = arith.addf %2037, %2039 : vector<2x1xf32>
    %c0_645 = arith.constant 0 : index
    %c0_646 = arith.constant 0 : index
    %2041 = vector.load %arg8[%c0_645, %c0_646] : memref<2x1xf32, #tpu.memory_space<vmem>>, vector<2x1xf32>
    tpu.vector_store %arg8[%c0_645, %c0_646], %2040 {strides = array<i32>} : memref<2x1xf32, #tpu.memory_space<vmem>>, vector<2x1xf32>,
    return
  }
}

</mosaic_0001>

<bundles_post_ra>
// kernel: gap_predictor_forward.1
= control target key start
LH: loop header
LB: loop body
LE: loop exit
PB: predicated region body
PF: predicated region fallthrough
CT: control target
= control target key end

     0   :  { %13 = vsyncpa [#allocation3], 0  ;;  %s8330_s0 = inlined_call_operand.vmem [shape: f32[2,64], index: 0, kind: input, shape index: {}]   ;;  %s8331_s1 = inlined_call_operand.vmem [shape: f32[2,8], index: 1, kind: input, shape index: {}]   ;;  %s8332_s2 = inlined_call_operand.hbm [shape: f32[1,8704], index: 2, kind: input, shape index: {}]   ;;  %s8333_s3 = inlined_call_operand.hbm [shape: f32[8,1280], index: 3, kind: input, shape index: {}]   ;;  %s8334_s4 = inlined_call_operand.hbm [shape: f32[32,640], index: 4, kind: input, shape index: {}]   ;;  %s8335_s5 = inlined_call_operand.hbm [shape: bf16[64,1024], index: 5, kind: input, shape index: {}]   ;;  %s8336_s6 = inlined_call_operand.hbm [shape: bf16[128,768], index: 6, kind: input, shape index: {}]   ;;  %s8337_s7 = inlined_call_operand.hbm [shape: bf16[256,1024], index: 7, kind: input, shape index: {}]   ;;  %s8338_s8 = inlined_call_operand.vmem [shape: f32[2,1], index: 8, kind: output, shape index: {}]  }
   0x1   :  { %14 = vsyncpa [#allocation5], 0 }
   0x2   :  { %15 = vsyncpa [#allocation8], 0 }
   0x3   :  { %16 = vsyncpa [#allocation11], 0  ;;  %s6837_s27 = smov [#allocation4]   ;;  %s6838_s29 = smov [#allocation7]  }
   0x4   :  { %s37_s28 = sshll.u32 %s6837_s27, 4  ;;  %s58_s30 = sshll.u32 %s6838_s29, 4  ;;  %s38_s28 = int_to_ptr.vmem [resolvable:$true] %s37_s28  ;;  %s59_s30 = int_to_ptr.vmem [resolvable:$true] %s58_s30 }
   0x5   :  { %s6717_s9 = scalar_lea.vmem %s38_s28, 1280  ;;  %p6722_p1 = scmp.lt.s32.totalorder %s38_s28, %s38_s28 }
   0x6   :  { %p6718_p0 = scmp.ne.s32.totalorder %s38_s28, %s6717_s9  ;;  %p6723_p2 = scmp.lt.s32.totalorder %s6717_s9, %s6717_s9 }
   0x8   :  { %p6724_p3 = por %p6723_p2, %p6722_p1 }
   0xa   :  { %p6725_p4 = pnand %p6724_p3, %p6718_p0 }
   0xc   :  { %6728 = shalt.err (!%p6725_p4)
}
   0xd   :  { %40 = dma.hbm_to_vmem [thread:$0]  %s8333_s3, 1280, %s38_s28, [#allocation5]  }
   0xe   :  { %s6737_s12 = scalar_lea.vmem %s59_s30, 4096  ;;  %p6742_p6 = scmp.lt.s32.totalorder %s59_s30, %s59_s30 }
   0xf   :  { %p6738_p5 = scmp.ne.s32.totalorder %s59_s30, %s6737_s12  ;;  %p6743_p7 = scmp.lt.s32.totalorder %s6737_s12, %s6737_s12 }
  0x11   :  { %p6744_p8 = por %p6743_p7, %p6742_p6 }
  0x13   :  { %p6745_p9 = pnand %p6744_p8, %p6738_p5 }
  0x15   :  { %6748 = shalt.err (!%p6745_p9)
}
  0x16   :  { %s6839_s13 = smov 512   ;;  %s6840_s14 = smov 32  }
  0x17   :  { %64 = dma.hbm_to_vmem [thread:$0]  %s8335_s5, 4096, %s59_s30, [#allocation8], %s6839_s13, %s6839_s13, %s6840_s14  }
  0x18   :  { %s6841_s17 = smov [#allocation2]   ;;  %s6842_s19 = smov [#allocation6]  }
  0x19   :  { %s27_s18 = sshll.u32 %s6841_s17, 4  ;;  %s46_s3 = sshll.u32 %s6842_s19, 4  ;;  %s28_s18 = int_to_ptr.vmem [resolvable:$true] %s27_s18  ;;  %s47_s3 = int_to_ptr.vmem [resolvable:$true] %s46_s3 }
  0x1a   :  { %s6757_s20 = scalar_lea.vmem %s28_s18, 1088  ;;  %p6762_p11 = scmp.lt.s32.totalorder %s28_s18, %s28_s18 }
  0x1b   :  { %p6758_p10 = scmp.ne.s32.totalorder %s28_s18, %s6757_s20  ;;  %p6763_p12 = scmp.lt.s32.totalorder %s6757_s20, %s6757_s20 }
  0x1d   :  { %p6764_p13 = por %p6763_p12, %p6762_p11 }
  0x1f   :  { %p6765_p0 = pnand %p6764_p13, %p6758_p10 }
  0x21   :  { %6768 = shalt.err (!%p6765_p0)
}
  0x22   :  { %30 = dma.hbm_to_vmem [thread:$0]  %s8332_s2, 1088, %s28_s18, [#allocation3]  }
  0x23   :  { %s6777_s23 = scalar_lea.vmem %s47_s3, 2560  ;;  %p6782_p2 = scmp.lt.s32.totalorder %s47_s3, %s47_s3 }
  0x24   :  { %p6778_p1 = scmp.ne.s32.totalorder %s47_s3, %s6777_s23  ;;  %p6783_p3 = scmp.lt.s32.totalorder %s6777_s23, %s6777_s23 }
  0x26   :  { %p6784_p4 = por %p6783_p3, %p6782_p2 }
  0x28   :  { %p6785_p5 = pnand %p6784_p4, %p6778_p1 }
  0x2a   :  { %6788 = shalt.err (!%p6785_p5)
}
  0x2b   :  { %s6843_s5 = smov 640   ;;  %s6844_s24 = smov 40  }
  0x2c   :  { %52 = dma.hbm_to_vmem [thread:$0]  %s8334_s4, 2560, %s47_s3, [#allocation5], %s6843_s5, %s6843_s5, %s6844_s24  }
  0x2d   :  { %s6845_s27 = smov [#allocation9]  }
  0x2e   :  { %s70_s28 = sshll.u32 %s6845_s27, 4  ;;  %s71_s28 = int_to_ptr.vmem [resolvable:$true] %s70_s28 }
  0x2f   :  { %s6797_s29 = scalar_lea.vmem %s71_s28, 6144  ;;  %p6802_p7 = scmp.lt.s32.totalorder %s71_s28, %s71_s28 }
  0x30   :  { %p6798_p6 = scmp.ne.s32.totalorder %s71_s28, %s6797_s29  ;;  %p6803_p8 = scmp.lt.s32.totalorder %s6797_s29, %s6797_s29 }
  0x32   :  { %p6804_p9 = por %p6803_p8, %p6802_p7 }
  0x34   :  { %p6805_p10 = pnand %p6804_p9, %p6798_p6 }
  0x36   :  { %6808 = shalt.err (!%p6805_p10)
}
  0x37   :  { %s6846_s2 = smov 384   ;;  %s6847_s30 = smov 24  }
  0x38   :  { %76 = dma.hbm_to_vmem [thread:$0]  %s8336_s6, 6144, %s71_s28, [#allocation8], %s6846_s2, %s6846_s2, %s6847_s30  }
  0x39   :  { %s6848_s11 = smov [#allocation10]  }
  0x3a   :  { %s82_s12 = sshll.u32 %s6848_s11, 4  ;;  %s83_s12 = int_to_ptr.vmem [resolvable:$true] %s82_s12 }
  0x3b   :  { %s6817_s4 = scalar_lea.vmem %s83_s12, 16384  ;;  %p6822_p12 = scmp.lt.s32.totalorder %s83_s12, %s83_s12 }
  0x3c   :  { %p6818_p11 = scmp.ne.s32.totalorder %s83_s12, %s6817_s4  ;;  %p6823_p13 = scmp.lt.s32.totalorder %s6817_s4, %s6817_s4 }
  0x3e   :  { %p6824_p0 = por %p6823_p13, %p6822_p12 }
  0x40   :  { %p6825_p1 = pnand %p6824_p0, %p6818_p11 }
  0x42   :  { %6828 = shalt.err (!%p6825_p1)
}
  0x43   :  { %88 = dma.hbm_to_vmem [thread:$0]  %s8337_s7, 16384, %s83_s12, [#allocation11], %s6839_s13, %s6839_s13, %s6840_s14  }
  0x44   :  { %6829 = dma.done.wait [#allocation3], 1088  }
  0x45   :  { %6830 = vsyncadd [#allocation3], 4294966208 }
  0x46   :  { %6831 = dma.done.wait [#allocation5], 3840  }
  0x47   :  { %6832 = vsyncadd [#allocation5], 4294963456 }
  0x48   :  { %6833 = dma.done.wait [#allocation8], 10240  }
  0x49   :  { %6834 = vsyncadd [#allocation8], 4294957056 }
  0x4a   :  { %6835 = dma.done.wait [#allocation11], 16384  }
  0x4b   :  { %6836 = vsyncadd [#allocation11], 4294950912  ;;  %v6849_v0 = vmov 0.0   ;;  %vm6850_vm0 = vmmov 0   ;;  %vm117_vm1 = vcmask 64512   ;;  %v109_v1 = vld [vmem:[#allocation4] sm:$0xff] }
  0x4c   :  { %6100 = vmatprep.subr.mxu0 %v6849_v0  ;;  %6102 = vmatprep.mubr.msk.f32.mxu0 %vm6850_vm0, %v6849_v0  ;;  %v108_v2 = vld [vmem:[%s8331_s1] sm:$0x3]  ;;  %v204_v3 = vld [vmem:[#allocation6 + $0x78] sm:$0xff]  ;;  %v203_v4 = vld [vmem:[#allocation6 + $0x50] sm:$0xff]  ;;  %vm212_vm3 = vcmask 261120   ;;  %vm674_vm5 = vcmask 523264  }
  0x4d   :  { %6105 = vmatprep.subr.mxu1 %v6849_v0  ;;  %6113 = vmatprep.mubr.msk.f32.mxu1 %vm6850_vm0, %v6849_v0  ;;  %v202_v5 = vld [vmem:[#allocation6 + $0x28] sm:$0xff]  ;;  %v201_v6 = vld [vmem:[#allocation6] sm:$0xff]  ;;  %v300_v21 = vld [vmem:[#allocation4 + $0x28] sm:$0xff]  ;;  %s6852_s17 = smov 112   ;;  %s6853_s18 = smov 64   ;;  %vm718_vm6 = vcmask 123904  }
  0x4e   :  { %6101 = vmatpush3.msra.mxu0 %v109_v1  ;;  %6106 = vmatpush3.msra.mxu1 %v204_v3  ;;  %v5697_v7 = vld [vmem:[#allocation2] ss:$0 sm:$0xff]  ;;  %v301_v20 = vld [vmem:[#allocation4 + $0x30] sm:$0xff]  ;;  %v296_v23 = vld [vmem:[#allocation4 + $0x8] sm:$0xff]  ;;  %s6854_s19 = smov 96   ;;  %s6855_s3 = smov 48  }
  0x4f   :  { %6103 = vmatmul.mubr.msk.f32.vlgmr.msra.gmra.mxu0 %vm117_vm1, %v108_v2  ;;  %6107 = vmatprep.subr.mxu1 %v6849_v0  ;;  %v297_v22 = vld [vmem:[#allocation4 + $0x10] sm:$0xff]  ;;  %v299_v24 = vld [vmem:[#allocation4 + $0x20] sm:$0xff]  ;;  %v5699_v25 = vld [vmem:[#allocation2 + $0x1] ss:$0 sm:$0xff]  ;;  %s6856_s20 = smov 16   ;;  %vm874_vm7 = vcmask 130048  }
  0x50   :  { %413 = vmatprep.mubr.f32.mxu0 %v6849_v0  ;;  %6108 = vmatpush3.msra.mxu1 %v203_v4  ;;  %v640_v36 = vld [vmem:[#allocation7 + $0xc0] sm:$0xf]  ;;  %v298_v41 = vld [vmem:[#allocation4 + $0x18] sm:$0xff]  ;;  %v303_v44 = vld [vmem:[#allocation4 + $0x40] sm:$0xff]  ;;  %vm877_vm8 = vcmask 392192   ;;  %vm880_vm9 = vcmask 654336  }
  0x51   :  { %6109 = vmatprep.subr.mxu1 %v6849_v0  ;;  %379 = vmatprep.subr.mxu0 %v297_v22  ;;  %v641_v37 = vld [vmem:[#allocation7 + $0xe0] sm:$0xf]  ;;  %v302_v46 = vld [vmem:[#allocation4 + $0x38] sm:$0xff]  ;;  %v5705_v57 = vld [vmem:[#allocation2 + $0xa] ss:$0 sm:$0xff]  ;;  %vm882_vm10 = vcmask 785408  }
  0x52   :  { %6110 = vmatpush3.msra.mxu1 %v202_v5  ;;  %380 = vmatpush1.msra.mxu0 %v296_v23  ;;  %v5709_v39 = vcombine.low %v640_v36, %v641_v37  ;;  %v638_v42 = vld [vmem:[#allocation7 + $0x80] sm:$0xf]  ;;  %v633_v53 = vld [vmem:[%s8330_s0] sm:$0x3]  ;;  %s6851_s0 = smov 80   ;;  %vm884_vm11 = vcmask 916480  }
  0x53   :  { %6111 = vmatprep.subr.mxu1 %v6849_v0  ;;  %450 = vmatprep.subr.mxu0 %v299_v24  ;;  %v639_v43 = vld [vmem:[#allocation7 + $0xa0] sm:$0xf]  ;;  %v6973_v54 = vpack.c.bf16 %v633_v53, %v633_v53  ;;  %s6859_s21 = smov 120   ;;  %s6860_s22 = smov 116  }
  0x54   :  { %6112 = vmatpush3.msra.mxu1 %v201_v6  ;;  %v5708_v45 = vcombine.low %v638_v42, %v639_v43  ;;  %v636_v47 = vld [vmem:[#allocation7 + $0x40] sm:$0xf]  ;;  %s6861_s23 = smov 108   ;;  %s6862_s5 = smov 104  }
  0x55   :  { %521 = vmatprep.subr.mxu1 %v301_v20  ;;  %v637_v48 = vld [vmem:[#allocation7 + $0x60] sm:$0xf]  ;;  %s6863_s24 = smov 100  }
  0x56   :  { %v5707_v49 = vcombine.low %v636_v47, %v637_v48  ;;  %v634_v50 = vld [vmem:[#allocation7] sm:$0xf] }
  0x57   :  { %v635_v51 = vld [vmem:[#allocation7 + $0x20] sm:$0xf] }
  0x58   :  { %v5706_v52 = vcombine.low %v634_v50, %v635_v51 }
 0x10f   :  { %v187_v8 = vpop.f32.mrf.mxu0 }
 0x110   :  { %v188_v9 = vadd.f32 %v5697_v7, %v187_v8 }
 0x111   :  { %v6104_v10 = vpop.f32.mrf.mxu0 }
 0x112   :  { %v191_v11 = vmin.f32 %v188_v9, 20.0  ;;  %vm197_vm2 = vcmp.gt.f32.partialorder %v188_v9, 20.0 }
 0x114   :  { %v192_v12 = vmul.f32 1.442695, %v191_v11 }
 0x116   :  { %6400 = vpow2.f32 %v192_v12 }
 0x123   :  { %v6401_v13 = vpop.eup %6400 }
 0x124   :  { %v194_v14 = vadd.f32 1.0, %v6401_v13 }
 0x126   :  { %6402 = vlog2.f32 %v194_v14 }
 0x133   :  { %v6403_v15 = vpop.eup %6402 }
 0x134   :  { %v196_v16 = vmul.f32 0.6931472, %v6403_v15 }
 0x136   :  { %v198_v17 = vsel %vm197_vm2, %v188_v9, %v196_v16  ;;  %vm2109_vm2 = vcmask 254976  }
 0x137   :  { %6404 = vtanh.f32 %v198_v17 }
 0x144   :  { %v6405_v18 = vpop.eup %6404 }
 0x145   :  { %v200_v19 = vmul.f32 %v6405_v18, %v188_v9 }
 0x147   :  { %6114 = vmatmul.mubr.msk.f32.vlgmr.msra.gmra.mxu1 %vm212_vm3, %v200_v19 }
 0x148   :  { %555 = vmatprep.mubr.f32.mxu1 %v6849_v0  ;;  %522 = vmatpush1.msra.mxu1 %v300_v21 }
 0x149   :  { %6116 = vmatprep.subr.bf16.mxu1 %v6849_v0 }
 0x207   :  { %v282_v26 = vpop.f32.mrf.mxu1 }
 0x208   :  { %v6950_v27 = vadd.f32 %v5699_v25, %v282_v26 }
 0x209   :  { %v6115_v28 = vpop.f32.mrf.mxu1 }
 0x20a   :  { %v286_v29 = vmin.f32 %v6950_v27, 20.0  ;;  %vm292_vm4 = vcmp.gt.f32.partialorder %v6950_v27, 20.0 }
 0x20c   :  { %v287_v30 = vmul.f32 1.442695, %v286_v29 }
 0x20e   :  { %6406 = vpow2.f32 %v287_v30 }
 0x21b   :  { %v6407_v31 = vpop.eup %6406 }
 0x21c   :  { %v289_v32 = vadd.f32 1.0, %v6407_v31 }
 0x21e   :  { %6408 = vlog2.f32 %v289_v32 }
 0x22b   :  { %v6409_v33 = vpop.eup %6408 }
 0x22c   :  { %v291_v34 = vmul.f32 0.6931472, %v6409_v33 }
 0x22e   :  { %v293_v35 = vsel %vm292_vm4, %v6950_v27, %v291_v34 }
 0x22f   :  { %6410 = vtanh.f32 %v293_v35 }
 0x23c   :  { %v6411_v38 = vpop.eup %6410 }
 0x23d   :  { %v295_v40 = vmul.f32 %v6411_v38, %v6950_v27 }
 0x23f   :  { %5701 = vmatmul.mubr.msk.f32.vlgmr.msra.gmra.mxu0 %vm117_vm1, %v295_v40  ;;  %5703 = vmatmul.mubr.msk.f32.vlgmr.msra.gmra.mxu1 %vm117_vm1, %v295_v40 }
 0x240   :  { %6117 = vmatpush3.bf16.msra.mxu1 %v5709_v39  ;;  %451 = vmatpush1.msra.mxu0 %v298_v41 }
 0x241   :  { %484 = vmatprep.mubr.f32.mxu0 %v6849_v0  ;;  %6118 = vmatprep.subr.bf16.mxu1 %v6849_v0 }
 0x242   :  { %592 = vmatprep.subr.mxu0 %v303_v44  ;;  %6124 = vmatprep.mubr.msk.bf16.mxu1 %vm6850_vm0, %v6849_v0 }
 0x243   :  { %5702 = vmatmul.mubr.msk.f32.vlgmr.msra.gmra.mxu0 %vm117_vm1, %v295_v40 }
 0x244   :  { %6119 = vmatpush3.bf16.msra.mxu1 %v5708_v45  ;;  %593 = vmatpush1.msra.mxu0 %v302_v46 }
 0x245   :  { %626 = vmatprep.mubr.f32.mxu0 %v6849_v0  ;;  %6120 = vmatprep.subr.bf16.mxu1 %v6849_v0 }
 0x246   :  { %6128 = vmatprep.subr.bf16.mxu0 %v6849_v0 }
 0x247   :  { %5704 = vmatmul.mubr.msk.f32.vlgmr.msra.gmra.mxu0 %vm117_vm1, %v295_v40 }
 0x248   :  { %6121 = vmatpush3.bf16.msra.mxu1 %v5707_v49  ;;  %6144 = vmatprep.mubr.msk.bf16.mxu0 %vm6850_vm0, %v6849_v0 }
 0x249   :  { %6122 = vmatprep.subr.bf16.mxu1 %v6849_v0 }
 0x24c   :  { %6123 = vmatpush3.bf16.msra.mxu1 %v5706_v52 }
 0x24d   :  { %6148 = vmatprep.subr.bf16.mxu1 %v6849_v0 }
 0x24f   :  { %6125 = vmatmul.mubr.msk.bf16.vlgmr.msra.gmra.mxu1 %vm674_vm5, %v6973_v54 }
 0x250   :  { %6156 = vmatprep.mubr.msk.bf16.mxu1 %vm6850_vm0, %v6849_v0 }
 0x2ff   :  { %v6980_v55 = vpop.f32.mrf.mxu1 }
 0x301   :  { %v6982_v56 = vpop.f32.mrf.mxu1 }
 0x30f   :  { %v712_v58 = vpop.f32.mrf.mxu1 }
 0x310   :  { %v6984_v59 = vadd.f32 %v5705_v57, %v712_v58 }
 0x311   :  { %v6126_v60 = vpop.f32.mrf.mxu1 }
 0x312   :  { %774 = vrot.lane.b32.xlu1 %v6984_v59, %s6851_s0  ;;  %734 = vrot.lane.b32.xlu0 %v6984_v59, %s6852_s17  ;;  %v719_v12 = vsel %vm718_vm6, %v6984_v59, 0.0 }
 0x313   :  { %v715_v61 = vpop.f32.mrf.mxu1 }
 0x315   :  { %v6127_v62 = vpop.f32.mrf.mxu1 }
 0x316   :  { %794 = vrot.lane.b32.xlu1 %v6984_v59, %s6853_s18  ;;  %754 = vrot.lane.b32.xlu0 %v6984_v59, %s6854_s19 }
 0x31a   :  { %834 = vrot.lane.b32.xlu1 %v6984_v59, %s6840_s14  ;;  %814 = vrot.lane.b32.xlu0 %v6984_v59, %s6855_s3 }
 0x31e   :  { %854 = vrot.lane.b32.xlu0 %v6984_v59, %s6856_s20 }
 0x384   :  { %v775_v63 = vpop.permute.xlu1 %774  ;;  %v735_v1 = vpop.permute.xlu0 %734 }
 0x385   :  { %v737_v2 = vsel %vm718_vm6, %v735_v1, 0.0  ;;  %v777_v10 = vsel %vm718_vm6, %v775_v63, 0.0 }
 0x386   :  { %738 = vadd.xlane.f32.xlu1 %v737_v2 }
 0x388   :  { %v795_v3 = vpop.permute.xlu1 %794  ;;  %v755_v4 = vpop.permute.xlu0 %754 }
 0x389   :  { %v797_v5 = vsel %vm718_vm6, %v795_v3, 0.0  ;;  %v757_v6 = vsel %vm718_vm6, %v755_v4, 0.0  ;;  %v6352_v3 = vld [vmem:[#allocation9 + $0x150] ss:$24 sps:$4 sm:$0xff]   ;;  %v6353_v4 = vld [vmem:[#allocation9 + $0x120] ss:$24 sps:$4 sm:$0xff]  }
 0x38a   :  { %798 = vadd.xlane.f32.xlu1 %v797_v5  ;;  %758 = vadd.xlane.f32.xlu0 %v757_v6  ;;  %v6354_v5 = vld [vmem:[#allocation9 + $0xf0] ss:$24 sps:$4 sm:$0xff]   ;;  %v6355_v6 = vld [vmem:[#allocation9 + $0xc0] ss:$24 sps:$4 sm:$0xff]  }
 0x38b   :  { %6129 = vmatpush3.bf16.msra.mxu0 %v6352_v3  ;;  %v5712_v3 = vld [vmem:[#allocation2 + $0xc] ss:$0 sm:$0xff] }
 0x38c   :  { %v835_v7 = vpop.permute.xlu1 %834  ;;  %v815_v8 = vpop.permute.xlu0 %814  ;;  %6130 = vmatprep.subr.bf16.mxu0 %v6849_v0 }
 0x38d   :  { %v837_v9 = vsel %vm718_vm6, %v835_v7, 0.0  ;;  %v817_v11 = vsel %vm718_vm6, %v815_v8, 0.0  ;;  %v6356_v7 = vld [vmem:[#allocation9 + $0x90] ss:$24 sps:$4 sm:$0xff]   ;;  %v6357_v8 = vld [vmem:[#allocation9 + $0x60] ss:$24 sps:$4 sm:$0xff]  }
 0x38e   :  { %838 = vadd.xlane.f32.xlu1 %v837_v9  ;;  %778 = vadd.xlane.f32.xlu0 %v777_v10  ;;  %v6358_v9 = vld [vmem:[#allocation9 + $0x30] ss:$24 sps:$4 sm:$0xff]   ;;  %v6359_v10 = vld [vmem:[#allocation9] ss:$24 sps:$4 sm:$0xff]  }
 0x38f   :  { %6131 = vmatpush3.bf16.msra.mxu0 %v6353_v4 }
 0x390   :  { %v855_v13 = vpop.permute.xlu0 %854  ;;  %6132 = vmatprep.subr.bf16.mxu0 %v6849_v0 }
 0x391   :  { %v857_v14 = vsel %vm718_vm6, %v855_v13, 0.0 }
 0x392   :  { %818 = vadd.xlane.f32.xlu0 %v817_v11  ;;  %720 = vadd.xlane.f32.xlu1 %v719_v12 }
 0x393   :  { %6133 = vmatpush3.bf16.msra.mxu0 %v6354_v5 }
 0x394   :  { %6134 = vmatprep.subr.bf16.mxu0 %v6849_v0 }
 0x396   :  { %858 = vadd.xlane.f32.xlu0 %v857_v14 }
 0x397   :  { %6135 = vmatpush3.bf16.msra.mxu0 %v6355_v6 }
 0x398   :  { %6136 = vmatprep.subr.bf16.mxu0 %v6849_v0 }
 0x39b   :  { %6137 = vmatpush3.bf16.msra.mxu0 %v6356_v7 }
 0x39c   :  { %6138 = vmatprep.subr.bf16.mxu0 %v6849_v0 }
 0x39f   :  { %6139 = vmatpush3.bf16.msra.mxu0 %v6357_v8 }
 0x3a0   :  { %6140 = vmatprep.subr.bf16.mxu0 %v6849_v0 }
 0x3a3   :  { %6141 = vmatpush3.bf16.msra.mxu0 %v6358_v9 }
 0x3a4   :  { %6142 = vmatprep.subr.bf16.mxu0 %v6849_v0 }
 0x3a7   :  { %6143 = vmatpush3.bf16.msra.mxu0 %v6359_v10 }
 0x3a8   :  { %6180 = vmatprep.subr.bf16.mxu0 %v6849_v0 }
 0x40f   :  { %v739_v15 = vpop.xlane.xlu1 %738 }
 0x410   :  { %v740_v16 = vmul.f32 0.0625, %v739_v15 }
 0x412   :  { %v7010_v17 = vsub.f32 %v6984_v59, %v740_v16 }
 0x413   :  { %v799_v18 = vpop.xlane.xlu1 %798  ;;  %v759_v19 = vpop.xlane.xlu0 %758 }
 0x414   :  { %v800_v20 = vmul.f32 0.0625, %v799_v18  ;;  %v760_v21 = vmul.f32 0.0625, %v759_v19  ;;  %v742_v22 = vmul.f32 %v7010_v17, %v7010_v17 }
 0x416   :  { %v7015_v23 = vsub.f32 %v6984_v59, %v800_v20  ;;  %v7018_v24 = vsub.f32 %v6984_v59, %v760_v21  ;;  %744 = vrot.lane.b32.xlu0 %v742_v22, %s6852_s17 }
 0x417   :  { %v839_v25 = vpop.xlane.xlu1 %838  ;;  %v779_v26 = vpop.xlane.xlu0 %778 }
 0x418   :  { %v840_v28 = vmul.f32 0.0625, %v839_v25  ;;  %v780_v29 = vmul.f32 0.0625, %v779_v26  ;;  %v802_v30 = vmul.f32 %v7015_v23, %v7015_v23  ;;  %v762_v31 = vmul.f32 %v7018_v24, %v7018_v24 }
 0x41a   :  { %v7026_v32 = vsub.f32 %v6984_v59, %v780_v29  ;;  %804 = vrot.lane.b32.xlu0 %v802_v30, %s6853_s18  ;;  %764 = vrot.lane.b32.xlu1 %v762_v31, %s6854_s19  ;;  %v7031_v33 = vsub.f32 %v6984_v59, %v840_v28 }
 0x41b   :  { %v819_v34 = vpop.xlane.xlu0 %818  ;;  %v721_v44 = vpop.xlane.xlu1 %720 }
 0x41c   :  { %v820_v35 = vmul.f32 0.0625, %v819_v34  ;;  %v842_v36 = vmul.f32 %v7031_v33, %v7031_v33  ;;  %v782_v37 = vmul.f32 %v7026_v32, %v7026_v32  ;;  %v723_v45 = vmul.f32 0.0625, %v721_v44 }
 0x41e   :  { %v7038_v38 = vsub.f32 %v6984_v59, %v820_v35  ;;  %844 = vrot.lane.b32.xlu0 %v842_v36, %s6840_s14  ;;  %784 = vrot.lane.b32.xlu1 %v782_v37, %s6851_s0  ;;  %v7052_v46 = vsub.f32 %v6984_v59, %v723_v45 }
 0x41f   :  { %v859_v39 = vpop.xlane.xlu0 %858 }
 0x420   :  { %v860_v40 = vmul.f32 0.0625, %v859_v39  ;;  %v822_v41 = vmul.f32 %v7038_v38, %v7038_v38  ;;  %v725_v47 = vmul.f32 %v7052_v46, %v7052_v46 }
 0x422   :  { %v7045_v42 = vsub.f32 %v6984_v59, %v860_v40  ;;  %824 = vrot.lane.b32.xlu1 %v822_v41, %s6855_s3  ;;  %v726_v48 = vsel %vm718_vm6, %v725_v47, 0.0 }
 0x424   :  { %v862_v43 = vmul.f32 %v7045_v42, %v7045_v42 }
 0x426   :  { %864 = vrot.lane.b32.xlu1 %v862_v43, %s6856_s20 }
 0x43d   :  { %727 = vadd.xlane.f32.xlu0 %v726_v48 }
 0x488   :  { %v745_v49 = vpop.permute.xlu0 %744 }
 0x489   :  { %v747_v50 = vsel %vm718_vm6, %v745_v49, 0.0 }
 0x48a   :  { %748 = vadd.xlane.f32.xlu1 %v747_v50 }
 0x48c   :  { %v805_v51 = vpop.permute.xlu0 %804  ;;  %v765_v52 = vpop.permute.xlu1 %764 }
 0x48d   :  { %v807_v53 = vsel %vm718_vm6, %v805_v51, 0.0  ;;  %v767_v57 = vsel %vm718_vm6, %v765_v52, 0.0 }
 0x48e   :  { %808 = vadd.xlane.f32.xlu1 %v807_v53  ;;  %768 = vadd.xlane.f32.xlu0 %v767_v57 }
 0x490   :  { %v845_v58 = vpop.permute.xlu0 %844  ;;  %v785_v59 = vpop.permute.xlu1 %784 }
 0x491   :  { %v847_v60 = vsel %vm718_vm6, %v845_v58, 0.0  ;;  %v787_v61 = vsel %vm718_vm6, %v785_v59, 0.0 }
 0x492   :  { %848 = vadd.xlane.f32.xlu1 %v847_v60  ;;  %788 = vadd.xlane.f32.xlu0 %v787_v61 }
 0x494   :  { %v825_v62 = vpop.permute.xlu1 %824 }
 0x495   :  { %v827_v63 = vsel %vm718_vm6, %v825_v62, 0.0 }
 0x496   :  { %828 = vadd.xlane.f32.xlu0 %v827_v63 }
 0x498   :  { %v865_v1 = vpop.permute.xlu1 %864 }
 0x499   :  { %v867_v2 = vsel %vm718_vm6, %v865_v1, 0.0  ;;  %v5711_v1 = vld [vmem:[#allocation2 + $0xb] ss:$0 sm:$0xff] }
 0x49a   :  { %868 = vadd.xlane.f32.xlu0 %v867_v2 }
 0x4c6   :  { %v728_v11 = vpop.xlane.xlu0 %727 }
 0x4c7   :  { %v729_v12 = vmul.f32 0.0625, %v728_v11 }
 0x4c9   :  { %v730_v16 = vadd.f32 1e-05, %v729_v12 }
 0x513   :  { %v749_v13 = vpop.xlane.xlu1 %748 }
 0x514   :  { %v750_v14 = vmul.f32 0.0625, %v749_v13  ;;  %v7092_v13 = vld [vmem:[#allocation2 + $0x2] sm:$0xff] }
 0x516   :  { %v751_v15 = vadd.f32 1e-05, %v750_v14 }
 0x517   :  { %v769_v18 = vpop.xlane.xlu0 %768  ;;  %v809_v19 = vpop.xlane.xlu1 %808 }
 0x518   :  { %v770_v20 = vmul.f32 0.0625, %v769_v18  ;;  %v810_v21 = vmul.f32 0.0625, %v809_v19  ;;  %6412 = vrsqrt.f32 %v751_v15  ;;  %v415_v15 = vpop.f32.mrf.mxu0 }
 0x519   :  { %6414 = vrsqrt.f32 %v730_v16 }
 0x51a   :  { %v771_v22 = vadd.f32 1e-05, %v770_v20  ;;  %v811_v29 = vadd.f32 1e-05, %v810_v21 }
 0x51b   :  { %v789_v25 = vpop.xlane.xlu0 %788  ;;  %v849_v26 = vpop.xlane.xlu1 %848 }
 0x51c   :  { %6416 = vrsqrt.f32 %v771_v22  ;;  %v790_v28 = vmul.f32 0.0625, %v789_v25  ;;  %v850_v30 = vmul.f32 0.0625, %v849_v26  ;;  %v7098_v22 = vpop.f32.mrf.mxu0 }
 0x51e   :  { %v791_v31 = vadd.f32 1e-05, %v790_v28  ;;  %v851_v36 = vadd.f32 1e-05, %v850_v30  ;;  %v7100_v25 = vpop.f32.mrf.mxu0  ;;  %v5713_v30 = vld [vmem:[#allocation2 + $0xd] ss:$0 sm:$0xff] }
 0x51f   :  { %v829_v34 = vpop.xlane.xlu0 %828 }
 0x520   :  { %6418 = vrsqrt.f32 %v791_v31  ;;  %v830_v35 = vmul.f32 0.0625, %v829_v34  ;;  %v7102_v26 = vpop.f32.mrf.mxu0 }
 0x521   :  { %6420 = vrsqrt.f32 %v811_v29 }
 0x522   :  { %v831_v37 = vadd.f32 1e-05, %v830_v35  ;;  %v7104_v28 = vpop.f32.mrf.mxu0 }
 0x523   :  { %v869_v39 = vpop.xlane.xlu0 %868 }
 0x524   :  { %6422 = vrsqrt.f32 %v831_v37  ;;  %v870_v40 = vmul.f32 0.0625, %v869_v39  ;;  %v7106_v29 = vpop.f32.mrf.mxu0 }
 0x525   :  { %6424 = vrsqrt.f32 %v851_v36  ;;  %v6413_v43 = vpop.eup %6412 }
 0x526   :  { %v871_v41 = vadd.f32 1e-05, %v870_v40  ;;  %v6415_v44 = vpop.eup %6414  ;;  %v753_v47 = vmul.f32 %v6413_v43, %v7010_v17 }
 0x527   :  { %v732_v49 = vmul.f32 %v6415_v44, %v7052_v46 }
 0x528   :  { %6426 = vrsqrt.f32 %v871_v41 }
 0x529   :  { %v6417_v45 = vpop.eup %6416  ;;  %v875_v52 = vsel %vm874_vm7, %v732_v49, %v753_v47 }
 0x52a   :  { %v773_v48 = vmul.f32 %v6417_v45, %v7018_v24 }
 0x52c   :  { %v876_v57 = vsel %vm212_vm3, %v875_v52, %v773_v48 }
 0x52d   :  { %v6419_v50 = vpop.eup %6418 }
 0x52e   :  { %v6421_v51 = vpop.eup %6420  ;;  %v793_v53 = vmul.f32 %v6419_v50, %v7026_v32 }
 0x52f   :  { %v813_v60 = vmul.f32 %v6421_v51, %v7015_v23 }
 0x530   :  { %v878_v58 = vsel %vm877_vm8, %v876_v57, %v793_v53 }
 0x531   :  { %v6423_v59 = vpop.eup %6422  ;;  %v879_v46 = vsel %vm674_vm5, %v878_v58, %v813_v60 }
 0x532   :  { %v6425_v17 = vpop.eup %6424  ;;  %v833_v24 = vmul.f32 %v6423_v59, %v7038_v38 }
 0x533   :  { %v853_v63 = vmul.f32 %v6425_v17, %v7031_v33  ;;  %v306_v33 = vlaneseq }
 0x534   :  { %v881_v61 = vsel %vm880_vm9, %v879_v46, %v833_v24 }
 0x535   :  { %v6427_v62 = vpop.eup %6426  ;;  %v883_v2 = vsel %vm882_vm10, %v881_v61, %v853_v63 }
 0x536   :  { %v873_v32 = vmul.f32 %v6427_v62, %v7045_v42  ;;  %v7087_v42 = vshrl.u32 %v306_v33, 7 }
 0x538   :  { %v885_v23 = vsel %vm884_vm11, %v883_v2, %v873_v32  ;;  %v7090_v12 = vsub.s32 0, %v7087_v42  ;;  %v1218_v2 = vld [vmem:[#allocation7 + $0xc4] sm:$0xf] }
 0x539   :  { %v893_v4 = vmul.f32 %v5711_v1, %v885_v23  ;;  %v1219_v23 = vld [vmem:[#allocation7 + $0xe4] sm:$0xf] }
 0x53a   :  { %v309_v14 = vrot.slane %v7092_v13, %v7090_v12 }
 0x53b   :  { %v901_v5 = vadd.f32 %v5712_v3, %v893_v4  ;;  %v5728_v4 = vcombine.low %v1218_v2, %v1219_v23  ;;  %v6361_v2 = vld [vmem:[#allocation9 + $0x124] ss:$24 sps:$4 sm:$0xff]   ;;  %v6362_v23 = vld [vmem:[#allocation9 + $0xf4] ss:$24 sps:$4 sm:$0xff]  }
 0x53c   :  { %v416_v18 = vadd.f32 %v415_v15, %v309_v14  ;;  %v1215_v14 = vld [vmem:[#allocation7 + $0x64] sm:$0xf] }
 0x53d   :  { %v902_v38 = vmin.f32 %v901_v5, 20.0  ;;  %vm908_vm12 = vcmp.gt.f32.partialorder %v901_v5, 20.0  ;;  %6149 = vmatpush3.bf16.msra.mxu1 %v5728_v4  ;;  %v6363_v4 = vld [vmem:[#allocation9 + $0xc4] ss:$24 sps:$4 sm:$0xff]  }
 0x53e   :  { %6150 = vmatprep.subr.bf16.mxu1 %v6849_v0 }
 0x53f   :  { %v903_v6 = vmul.f32 1.442695, %v902_v38  ;;  %v1217_v38 = vld [vmem:[#allocation7 + $0xa4] sm:$0xf] }
 0x541   :  { %6428 = vpow2.f32 %v903_v6 }
 0x54e   :  { %v6429_v7 = vpop.eup %6428 }
 0x54f   :  { %v905_v8 = vadd.f32 1.0, %v6429_v7 }
 0x551   :  { %6430 = vlog2.f32 %v905_v8 }
 0x55e   :  { %v6431_v9 = vpop.eup %6430 }
 0x55f   :  { %v907_v10 = vmul.f32 0.6931472, %v6431_v9 }
 0x561   :  { %v909_v11 = vsel %vm908_vm12, %v901_v5, %v907_v10 }
 0x562   :  { %6432 = vtanh.f32 %v909_v11  ;;  %v1214_v11 = vld [vmem:[#allocation7 + $0x44] sm:$0xf] }
 0x56f   :  { %v6433_v16 = vpop.eup %6432 }
 0x570   :  { %v911_v19 = vmul.f32 %v6433_v16, %v901_v5  ;;  %v1216_v5 = vld [vmem:[#allocation7 + $0x84] sm:$0xf] }
 0x571   :  { %v5727_v33 = vcombine.low %v1216_v5, %v1217_v38  ;;  %v6364_v5 = vld [vmem:[#allocation9 + $0x94] ss:$24 sps:$4 sm:$0xff]  }
 0x572   :  { %v912_v20 = vadd.f32 %v911_v19, %v416_v18 }
 0x573   :  { %6151 = vmatpush3.bf16.msra.mxu1 %v5727_v33  ;;  %v6367_v33 = vld [vmem:[#allocation9 + $0x4] ss:$24 sps:$4 sm:$0xff]  }
 0x574   :  { %v929_v21 = vpack.c.bf16 %v912_v20, %v912_v20  ;;  %v5726_v20 = vcombine.low %v1214_v11, %v1215_v14  ;;  %6152 = vmatprep.subr.bf16.mxu1 %v6849_v0 }
 0x576   :  { %6145 = vmatmul.mubr.bf16.vlgmr.msra.gmra.mxu0 %v929_v21 }
 0x577   :  { %6196 = vmatprep.mubr.msk.bf16.mxu0 %vm6850_vm0, %v6849_v0  ;;  %6153 = vmatpush3.bf16.msra.mxu1 %v5726_v20 }
 0x578   :  { %6154 = vmatprep.subr.bf16.mxu1 %v6849_v0 }
 0x636   :  { %v1019_v31 = vpop.f32.mrf.mxu0 }
 0x637   :  { %v7108_v34 = vadd.f32 %v5713_v30, %v1019_v31 }
 0x638   :  { %v6146_v35 = vpop.f32.mrf.mxu0 }
 0x639   :  { %1059 = vrot.lane.b32.xlu0 %v7108_v34, %s6854_s19  ;;  %1039 = vrot.lane.b32.xlu1 %v7108_v34, %s6852_s17  ;;  %v1025_v58 = vsel %vm718_vm6, %v7108_v34, 0.0 }
 0x63a   :  { %v1022_v36 = vpop.f32.mrf.mxu0 }
 0x63b   :  { %v1212_v36 = vld [vmem:[#allocation7 + $0x4] sm:$0xf] }
 0x63c   :  { %v6147_v37 = vpop.f32.mrf.mxu0 }
 0x63d   :  { %1119 = vrot.lane.b32.xlu0 %v7108_v34, %s6855_s3  ;;  %1079 = vrot.lane.b32.xlu1 %v7108_v34, %s6851_s0  ;;  %v1213_v37 = vld [vmem:[#allocation7 + $0x24] sm:$0xf] }
 0x641   :  { %1159 = vrot.lane.b32.xlu0 %v7108_v34, %s6856_s20  ;;  %1099 = vrot.lane.b32.xlu1 %v7108_v34, %s6853_s18 }
 0x645   :  { %1139 = vrot.lane.b32.xlu1 %v7108_v34, %s6840_s14 }
 0x6ab   :  { %v1060_v39 = vpop.permute.xlu0 %1059  ;;  %v1040_v40 = vpop.permute.xlu1 %1039 }
 0x6ac   :  { %v1062_v41 = vsel %vm718_vm6, %v1060_v39, 0.0  ;;  %v1042_v43 = vsel %vm718_vm6, %v1040_v40, 0.0 }
 0x6ad   :  { %1063 = vadd.xlane.f32.xlu0 %v1062_v41  ;;  %1043 = vadd.xlane.f32.xlu1 %v1042_v43 }
 0x6af   :  { %v1120_v44 = vpop.permute.xlu0 %1119  ;;  %v1080_v45 = vpop.permute.xlu1 %1079 }
 0x6b0   :  { %v1082_v47 = vsel %vm718_vm6, %v1080_v45, 0.0  ;;  %v1122_v49 = vsel %vm718_vm6, %v1120_v44, 0.0  ;;  %v5725_v44 = vcombine.low %v1212_v36, %v1213_v37 }
 0x6b1   :  { %1083 = vadd.xlane.f32.xlu0 %v1082_v47 }
 0x6b2   :  { %6155 = vmatpush3.bf16.msra.mxu1 %v5725_v44 }
 0x6b3   :  { %v1100_v48 = vpop.permute.xlu1 %1099  ;;  %v1160_v51 = vpop.permute.xlu0 %1159  ;;  %6160 = vmatprep.subr.bf16.mxu1 %v6849_v0 }
 0x6b4   :  { %v1102_v50 = vsel %vm718_vm6, %v1100_v48, 0.0  ;;  %v1162_v53 = vsel %vm718_vm6, %v1160_v51, 0.0 }
 0x6b5   :  { %1123 = vadd.xlane.f32.xlu0 %v1122_v49  ;;  %1103 = vadd.xlane.f32.xlu1 %v1102_v50 }
 0x6b6   :  { %6157 = vmatmul.mubr.msk.bf16.vlgmr.msra.gmra.mxu1 %vm674_vm5, %v6973_v54 }
 0x6b7   :  { %v1140_v52 = vpop.permute.xlu1 %1139  ;;  %6176 = vmatprep.mubr.msk.bf16.mxu1 %vm6850_vm0, %v6849_v0 }
 0x6b8   :  { %v1142_v57 = vsel %vm718_vm6, %v1140_v52, 0.0 }
 0x6b9   :  { %1163 = vadd.xlane.f32.xlu0 %v1162_v53  ;;  %1143 = vadd.xlane.f32.xlu1 %v1142_v57 }
 0x6bd   :  { %1026 = vadd.xlane.f32.xlu1 %v1025_v58 }
 0x736   :  { %v1064_v59 = vpop.xlane.xlu0 %1063  ;;  %v1044_v60 = vpop.xlane.xlu1 %1043 }
 0x737   :  { %v1065_v17 = vmul.f32 0.0625, %v1064_v59  ;;  %v1045_v24 = vmul.f32 0.0625, %v1044_v60 }
 0x739   :  { %v7134_v46 = vsub.f32 %v7108_v34, %v1065_v17  ;;  %v7137_v61 = vsub.f32 %v7108_v34, %v1045_v24 }
 0x73a   :  { %v1084_v62 = vpop.xlane.xlu0 %1083 }
 0x73b   :  { %v1085_v63 = vmul.f32 0.0625, %v1084_v62  ;;  %v1047_v32 = vmul.f32 %v7137_v61, %v7137_v61  ;;  %v1067_v1 = vmul.f32 %v7134_v46, %v7134_v46 }
 0x73d   :  { %v7144_v3 = vsub.f32 %v7108_v34, %v1085_v63  ;;  %1049 = vrot.lane.b32.xlu0 %v1047_v32, %s6852_s17  ;;  %1069 = vrot.lane.b32.xlu1 %v1067_v1, %s6854_s19  ;;  %v6360_v1 = vld [vmem:[#allocation9 + $0x154] ss:$24 sps:$4 sm:$0xff]  }
 0x73e   :  { %v1124_v6 = vpop.xlane.xlu0 %1123  ;;  %v1104_v7 = vpop.xlane.xlu1 %1103  ;;  %6161 = vmatpush3.bf16.msra.mxu1 %v6360_v1 }
 0x73f   :  { %v1125_v8 = vmul.f32 0.0625, %v1124_v6  ;;  %v1105_v9 = vmul.f32 0.0625, %v1104_v7  ;;  %v1087_v10 = vmul.f32 %v7144_v3, %v7144_v3  ;;  %6162 = vmatprep.subr.bf16.mxu1 %v6849_v0  ;;  %v6365_v6 = vld [vmem:[#allocation9 + $0x64] ss:$24 sps:$4 sm:$0xff]  }
 0x741   :  { %v7152_v15 = vsub.f32 %v7108_v34, %v1125_v8  ;;  %v7155_v16 = vsub.f32 %v7108_v34, %v1105_v9  ;;  %1089 = vrot.lane.b32.xlu1 %v1087_v10, %s6851_s0  ;;  %v6366_v9 = vld [vmem:[#allocation9 + $0x34] ss:$24 sps:$4 sm:$0xff]  }
 0x742   :  { %v1164_v18 = vpop.xlane.xlu0 %1163  ;;  %v1144_v19 = vpop.xlane.xlu1 %1143  ;;  %6163 = vmatpush3.bf16.msra.mxu1 %v6361_v2 }
 0x743   :  { %v1165_v21 = vmul.f32 0.0625, %v1164_v18  ;;  %v1145_v30 = vmul.f32 0.0625, %v1144_v19  ;;  %v1107_v31 = vmul.f32 %v7155_v16, %v7155_v16  ;;  %v1127_v35 = vmul.f32 %v7152_v15, %v7152_v15  ;;  %6164 = vmatprep.subr.bf16.mxu1 %v6849_v0 }
 0x745   :  { %v7164_v39 = vsub.f32 %v7108_v34, %v1165_v21  ;;  %1109 = vrot.lane.b32.xlu0 %v1107_v31, %s6853_s18  ;;  %1129 = vrot.lane.b32.xlu1 %v1127_v35, %s6855_s3  ;;  %v7169_v40 = vsub.f32 %v7108_v34, %v1145_v30 }
 0x746   :  { %v1027_v45 = vpop.xlane.xlu1 %1026  ;;  %6165 = vmatpush3.bf16.msra.mxu1 %v6362_v23 }
 0x747   :  { %v1147_v41 = vmul.f32 %v7169_v40, %v7169_v40  ;;  %v1167_v43 = vmul.f32 %v7164_v39, %v7164_v39  ;;  %v1028_v47 = vmul.f32 0.0625, %v1027_v45  ;;  %6166 = vmatprep.subr.bf16.mxu1 %v6849_v0 }
 0x749   :  { %1149 = vrot.lane.b32.xlu0 %v1147_v41, %s6840_s14  ;;  %1169 = vrot.lane.b32.xlu1 %v1167_v43, %s6856_s20  ;;  %v7184_v48 = vsub.f32 %v7108_v34, %v1028_v47 }
 0x74a   :  { %6167 = vmatpush3.bf16.msra.mxu1 %v6363_v4 }
 0x74b   :  { %v1030_v49 = vmul.f32 %v7184_v48, %v7184_v48  ;;  %6168 = vmatprep.subr.bf16.mxu1 %v6849_v0 }
 0x74d   :  { %v1031_v50 = vsel %vm718_vm6, %v1030_v49, 0.0 }
 0x74e   :  { %6169 = vmatpush3.bf16.msra.mxu1 %v6364_v5 }
 0x74f   :  { %6170 = vmatprep.subr.bf16.mxu1 %v6849_v0 }
 0x752   :  { %6171 = vmatpush3.bf16.msra.mxu1 %v6365_v6 }
 0x753   :  { %6172 = vmatprep.subr.bf16.mxu1 %v6849_v0 }
 0x756   :  { %6173 = vmatpush3.bf16.msra.mxu1 %v6366_v9 }
 0x757   :  { %6174 = vmatprep.subr.bf16.mxu1 %v6849_v0 }
 0x75a   :  { %6175 = vmatpush3.bf16.msra.mxu1 %v6367_v33 }
 0x75b   :  { %6200 = vmatprep.subr.bf16.mxu1 %v6849_v0 }
 0x768   :  { %1032 = vadd.xlane.f32.xlu0 %v1031_v50 }
 0x776   :  { %v7201_v38 = vpop.f32.mrf.mxu1 }
 0x778   :  { %v6158_v7 = vpop.f32.mrf.mxu1 }
 0x77a   :  { %v1288_v8 = vpop.f32.mrf.mxu1 }
 0x77c   :  { %v6159_v10 = vpop.f32.mrf.mxu1 }
 0x77d   :  { %v5722_v10 = vld [vmem:[#allocation2 + $0xe] ss:$0 sm:$0xff] }
 0x7af   :  { %v1050_v51 = vpop.permute.xlu0 %1049  ;;  %v1070_v52 = vpop.permute.xlu1 %1069 }
 0x7b0   :  { %v1052_v53 = vsel %vm718_vm6, %v1050_v51, 0.0  ;;  %v1072_v54 = vsel %vm718_vm6, %v1070_v52, 0.0 }
 0x7b1   :  { %1053 = vadd.xlane.f32.xlu1 %v1052_v53  ;;  %1073 = vadd.xlane.f32.xlu0 %v1072_v54 }
 0x7b3   :  { %v1090_v57 = vpop.permute.xlu1 %1089 }
 0x7b4   :  { %v1092_v58 = vsel %vm718_vm6, %v1090_v57, 0.0 }
 0x7b5   :  { %1093 = vadd.xlane.f32.xlu0 %v1092_v58 }
 0x7b7   :  { %v1110_v34 = vpop.permute.xlu0 %1109  ;;  %v1130_v59 = vpop.permute.xlu1 %1129 }
 0x7b8   :  { %v1112_v60 = vsel %vm718_vm6, %v1110_v34, 0.0  ;;  %v1132_v17 = vsel %vm718_vm6, %v1130_v59, 0.0 }
 0x7b9   :  { %1113 = vadd.xlane.f32.xlu1 %v1112_v60  ;;  %1133 = vadd.xlane.f32.xlu0 %v1132_v17 }
 0x7bb   :  { %v1150_v24 = vpop.permute.xlu0 %1149  ;;  %v1170_v62 = vpop.permute.xlu1 %1169 }
 0x7bc   :  { %v1152_v63 = vsel %vm718_vm6, %v1150_v24, 0.0  ;;  %v1172_v32 = vsel %vm718_vm6, %v1170_v62, 0.0 }
 0x7bd   :  { %1153 = vadd.xlane.f32.xlu1 %v1152_v63  ;;  %1173 = vadd.xlane.f32.xlu0 %v1172_v32 }
 0x7f1   :  { %v1033_v11 = vpop.xlane.xlu0 %1032 }
 0x7f2   :  { %v1034_v14 = vmul.f32 0.0625, %v1033_v11 }
 0x7f4   :  { %v1035_v30 = vadd.f32 1e-05, %v1034_v14 }
 0x83a   :  { %v1074_v18 = vpop.xlane.xlu0 %1073  ;;  %v1054_v19 = vpop.xlane.xlu1 %1053 }
 0x83b   :  { %v1075_v20 = vmul.f32 0.0625, %v1074_v18  ;;  %v1055_v21 = vmul.f32 0.0625, %v1054_v19 }
 0x83d   :  { %v1056_v31 = vadd.f32 1e-05, %v1055_v21  ;;  %v1076_v35 = vadd.f32 1e-05, %v1075_v20 }
 0x83e   :  { %v1094_v36 = vpop.xlane.xlu0 %1093 }
 0x83f   :  { %v1095_v37 = vmul.f32 0.0625, %v1094_v36  ;;  %6434 = vrsqrt.f32 %v1056_v31  ;;  %v5724_v31 = vld [vmem:[#allocation2 + $0x10] ss:$0 sm:$0xff] }
 0x840   :  { %6436 = vrsqrt.f32 %v1035_v30 }
 0x841   :  { %v1096_v41 = vadd.f32 1e-05, %v1095_v37  ;;  %6438 = vrsqrt.f32 %v1076_v35  ;;  %v1286_v35 = vadd.f32 %v5724_v31, %v7201_v38 }
 0x842   :  { %v1134_v43 = vpop.xlane.xlu0 %1133  ;;  %v1114_v44 = vpop.xlane.xlu1 %1113 }
 0x843   :  { %6440 = vrsqrt.f32 %v1096_v41  ;;  %v1135_v45 = vmul.f32 0.0625, %v1134_v43  ;;  %v1115_v47 = vmul.f32 0.0625, %v1114_v44  ;;  %v5730_v44 = vld [vmem:[#allocation2 + $0x11] ss:$0 sm:$0xff] }
 0x845   :  { %v1136_v49 = vadd.f32 1e-05, %v1135_v45  ;;  %v1116_v50 = vadd.f32 1e-05, %v1115_v47 }
 0x846   :  { %v1174_v51 = vpop.xlane.xlu0 %1173  ;;  %v1154_v52 = vpop.xlane.xlu1 %1153 }
 0x847   :  { %6442 = vrsqrt.f32 %v1136_v49  ;;  %v1175_v53 = vmul.f32 0.0625, %v1174_v51  ;;  %v1155_v54 = vmul.f32 0.0625, %v1154_v52 }
 0x848   :  { %6444 = vrsqrt.f32 %v1116_v50 }
 0x849   :  { %v1176_v57 = vadd.f32 1e-05, %v1175_v53  ;;  %v1156_v58 = vadd.f32 1e-05, %v1155_v54 }
 0x84b   :  { %6446 = vrsqrt.f32 %v1176_v57 }
 0x84c   :  { %6448 = vrsqrt.f32 %v1156_v58  ;;  %v6435_v34 = vpop.eup %6434 }
 0x84d   :  { %v6437_v59 = vpop.eup %6436  ;;  %v1058_v17 = vmul.f32 %v6435_v34, %v7137_v61 }
 0x84e   :  { %v6439_v60 = vpop.eup %6438  ;;  %v1037_v62 = vmul.f32 %v6437_v59, %v7184_v48 }
 0x84f   :  { %v1078_v63 = vmul.f32 %v6439_v60, %v7134_v46 }
 0x850   :  { %v6441_v24 = vpop.eup %6440  ;;  %v1179_v32 = vsel %vm874_vm7, %v1037_v62, %v1058_v17 }
 0x851   :  { %v1098_v1 = vmul.f32 %v6441_v24, %v7144_v3  ;;  %v1180_v4 = vsel %vm212_vm3, %v1179_v32, %v1078_v63 }
 0x853   :  { %v1181_v6 = vsel %vm877_vm8, %v1180_v4, %v1098_v1 }
 0x854   :  { %v6443_v2 = vpop.eup %6442 }
 0x855   :  { %v6445_v23 = vpop.eup %6444  ;;  %v1138_v7 = vmul.f32 %v6443_v2, %v7152_v15 }
 0x856   :  { %v1118_v5 = vmul.f32 %v6445_v23, %v7155_v16  ;;  %v5723_v16 = vld [vmem:[#allocation2 + $0xf] ss:$0 sm:$0xff] }
 0x858   :  { %v6447_v61 = vpop.eup %6446  ;;  %v1182_v8 = vsel %vm674_vm5, %v1181_v6, %v1118_v5 }
 0x859   :  { %v6449_v48 = vpop.eup %6448  ;;  %v1178_v46 = vmul.f32 %v6447_v61, %v7164_v39  ;;  %v1183_v3 = vsel %vm880_vm9, %v1182_v8, %v1138_v7 }
 0x85a   :  { %v1158_v9 = vmul.f32 %v6449_v48, %v7169_v40 }
 0x85c   :  { %v1184_v33 = vsel %vm882_vm10, %v1183_v3, %v1158_v9 }
 0x85d   :  { %v1185_v11 = vsel %vm884_vm11, %v1184_v33, %v1178_v46 }
 0x85e   :  { %v1193_v14 = vmul.f32 %v5722_v10, %v1185_v11 }
 0x860   :  { %v1201_v18 = vadd.f32 %v5723_v16, %v1193_v14 }
 0x862   :  { %v1202_v19 = vmin.f32 %v1201_v18, 20.0  ;;  %vm1208_vm13 = vcmp.gt.f32.partialorder %v1201_v18, 20.0 }
 0x864   :  { %v1203_v15 = vmul.f32 1.442695, %v1202_v19 }
 0x866   :  { %6450 = vpow2.f32 %v1203_v15 }
 0x873   :  { %v6451_v20 = vpop.eup %6450 }
 0x874   :  { %v1205_v21 = vadd.f32 1.0, %v6451_v20 }
 0x876   :  { %6452 = vlog2.f32 %v1205_v21 }
 0x883   :  { %v6453_v30 = vpop.eup %6452 }
 0x884   :  { %v1207_v39 = vmul.f32 0.6931472, %v6453_v30 }
 0x886   :  { %v1209_v40 = vsel %vm1208_vm13, %v1201_v18, %v1207_v39 }
 0x887   :  { %6454 = vtanh.f32 %v1209_v40 }
 0x894   :  { %v6455_v36 = vpop.eup %6454 }
 0x895   :  { %v1211_v37 = vmul.f32 %v6455_v36, %v1201_v18 }
 0x897   :  { %v7222_v41 = vadd.f32 %v1286_v35, %v1211_v37 }
 0x899   :  { %v1308_v43 = vpack.c.bf16 %v7222_v41, %v7222_v41 }
 0x89b   :  { %6177 = vmatmul.mubr.bf16.vlgmr.msra.gmra.mxu1 %v1308_v43 }
 0x89c   :  { %6216 = vmatprep.mubr.msk.bf16.mxu1 %vm6850_vm0, %v6849_v0 }
 0x95b   :  { %v1398_v45 = vpop.f32.mrf.mxu1 }
 0x95c   :  { %v7228_v47 = vadd.f32 %v5730_v44, %v1398_v45 }
 0x95d   :  { %v6178_v49 = vpop.f32.mrf.mxu1 }
 0x95e   :  { %1438 = vrot.lane.b32.xlu0 %v7228_v47, %s6854_s19  ;;  %1418 = vrot.lane.b32.xlu1 %v7228_v47, %s6852_s17  ;;  %v1404_v1 = vsel %vm718_vm6, %v7228_v47, 0.0 }
 0x95f   :  { %v1401_v38 = vpop.f32.mrf.mxu1 }
 0x961   :  { %v6179_v50 = vpop.f32.mrf.mxu1 }
 0x962   :  { %1498 = vrot.lane.b32.xlu0 %v7228_v47, %s6855_s3  ;;  %1458 = vrot.lane.b32.xlu1 %v7228_v47, %s6851_s0 }
 0x966   :  { %1538 = vrot.lane.b32.xlu0 %v7228_v47, %s6856_s20  ;;  %1478 = vrot.lane.b32.xlu1 %v7228_v47, %s6853_s18 }
 0x96a   :  { %1518 = vrot.lane.b32.xlu1 %v7228_v47, %s6840_s14 }
 0x9d0   :  { %v1439_v51 = vpop.permute.xlu0 %1438  ;;  %v1419_v52 = vpop.permute.xlu1 %1418 }
 0x9d1   :  { %v1441_v53 = vsel %vm718_vm6, %v1439_v51, 0.0  ;;  %v1421_v54 = vsel %vm718_vm6, %v1419_v52, 0.0 }
 0x9d2   :  { %1442 = vadd.xlane.f32.xlu0 %v1441_v53  ;;  %1422 = vadd.xlane.f32.xlu1 %v1421_v54 }
 0x9d4   :  { %v1499_v57 = vpop.permute.xlu0 %1498  ;;  %v1459_v58 = vpop.permute.xlu1 %1458 }
 0x9d5   :  { %v1461_v34 = vsel %vm718_vm6, %v1459_v58, 0.0  ;;  %v1501_v60 = vsel %vm718_vm6, %v1499_v57, 0.0 }
 0x9d6   :  { %1462 = vadd.xlane.f32.xlu0 %v1461_v34 }
 0x9d8   :  { %v1479_v59 = vpop.permute.xlu1 %1478  ;;  %v1539_v24 = vpop.permute.xlu0 %1538 }
 0x9d9   :  { %v1481_v17 = vsel %vm718_vm6, %v1479_v59, 0.0  ;;  %v1541_v63 = vsel %vm718_vm6, %v1539_v24, 0.0 }
 0x9da   :  { %1502 = vadd.xlane.f32.xlu0 %v1501_v60  ;;  %1482 = vadd.xlane.f32.xlu1 %v1481_v17 }
 0x9dc   :  { %v1519_v62 = vpop.permute.xlu1 %1518 }
 0x9dd   :  { %v1521_v32 = vsel %vm718_vm6, %v1519_v62, 0.0  ;;  %v6368_v62 = vld [vmem:[#allocation9 + $0x158] ss:$24 sps:$4 sm:$0xff]  }
 0x9de   :  { %1542 = vadd.xlane.f32.xlu0 %v1541_v63  ;;  %1522 = vadd.xlane.f32.xlu1 %v1521_v32  ;;  %v6369_v63 = vld [vmem:[#allocation9 + $0x128] ss:$24 sps:$4 sm:$0xff]   ;;  %v6370_v32 = vld [vmem:[#allocation9 + $0xf8] ss:$24 sps:$4 sm:$0xff]  }
 0x9df   :  { %6181 = vmatpush3.bf16.msra.mxu0 %v6368_v62 }
 0x9e0   :  { %6182 = vmatprep.subr.bf16.mxu0 %v6849_v0 }
 0x9e2   :  { %1405 = vadd.xlane.f32.xlu1 %v1404_v1  ;;  %v6371_v1 = vld [vmem:[#allocation9 + $0xc8] ss:$24 sps:$4 sm:$0xff]  }
 0x9e3   :  { %6183 = vmatpush3.bf16.msra.mxu0 %v6369_v63 }
 0x9e4   :  { %6184 = vmatprep.subr.bf16.mxu0 %v6849_v0 }
 0x9e7   :  { %6185 = vmatpush3.bf16.msra.mxu0 %v6370_v32 }
 0x9e8   :  { %6186 = vmatprep.subr.bf16.mxu0 %v6849_v0 }
 0x9eb   :  { %6187 = vmatpush3.bf16.msra.mxu0 %v6371_v1 }
 0x9ec   :  { %6188 = vmatprep.subr.bf16.mxu0 %v6849_v0 }
 0xa5b   :  { %v1443_v2 = vpop.xlane.xlu0 %1442  ;;  %v1423_v23 = vpop.xlane.xlu1 %1422 }
 0xa5c   :  { %v1444_v4 = vmul.f32 0.0625, %v1443_v2  ;;  %v1424_v5 = vmul.f32 0.0625, %v1423_v23  ;;  %v6372_v2 = vld [vmem:[#allocation9 + $0x98] ss:$24 sps:$4 sm:$0xff]   ;;  %v6373_v23 = vld [vmem:[#allocation9 + $0x68] ss:$24 sps:$4 sm:$0xff]  }
 0xa5d   :  { %6189 = vmatpush3.bf16.msra.mxu0 %v6372_v2 }
 0xa5e   :  { %v7254_v6 = vsub.f32 %v7228_v47, %v1444_v4  ;;  %v7257_v7 = vsub.f32 %v7228_v47, %v1424_v5  ;;  %6190 = vmatprep.subr.bf16.mxu0 %v6849_v0  ;;  %v6374_v4 = vld [vmem:[#allocation9 + $0x38] ss:$24 sps:$4 sm:$0xff]   ;;  %v6375_v5 = vld [vmem:[#allocation9 + $0x8] ss:$24 sps:$4 sm:$0xff]  }
 0xa5f   :  { %v1463_v61 = vpop.xlane.xlu0 %1462 }
 0xa60   :  { %v1464_v8 = vmul.f32 0.0625, %v1463_v61  ;;  %v1426_v48 = vmul.f32 %v7257_v7, %v7257_v7  ;;  %v1446_v46 = vmul.f32 %v7254_v6, %v7254_v6 }
 0xa61   :  { %6191 = vmatpush3.bf16.msra.mxu0 %v6373_v23 }
 0xa62   :  { %v7264_v9 = vsub.f32 %v7228_v47, %v1464_v8  ;;  %1428 = vrot.lane.b32.xlu0 %v1426_v48, %s6852_s17  ;;  %1448 = vrot.lane.b32.xlu1 %v1446_v46, %s6854_s19 }
 0xa63   :  { %v1503_v3 = vpop.xlane.xlu0 %1502  ;;  %v1483_v10 = vpop.xlane.xlu1 %1482  ;;  %6192 = vmatprep.subr.bf16.mxu0 %v6849_v0 }
 0xa64   :  { %v1504_v33 = vmul.f32 0.0625, %v1503_v3  ;;  %v1484_v11 = vmul.f32 0.0625, %v1483_v10  ;;  %v1466_v16 = vmul.f32 %v7264_v9, %v7264_v9 }
 0xa65   :  { %6193 = vmatpush3.bf16.msra.mxu0 %v6374_v4  ;;  %v5739_v4 = vld [vmem:[#allocation2 + $0x12] ss:$0 sm:$0xff] }
 0xa66   :  { %v7271_v14 = vsub.f32 %v7228_v47, %v1504_v33  ;;  %v7274_v18 = vsub.f32 %v7228_v47, %v1484_v11  ;;  %1468 = vrot.lane.b32.xlu1 %v1466_v16, %s6851_s0  ;;  %6194 = vmatprep.subr.bf16.mxu0 %v6849_v0 }
 0xa67   :  { %v1543_v19 = vpop.xlane.xlu0 %1542  ;;  %v1523_v15 = vpop.xlane.xlu1 %1522 }
 0xa68   :  { %v1544_v20 = vmul.f32 0.0625, %v1543_v19  ;;  %v1524_v21 = vmul.f32 0.0625, %v1523_v15  ;;  %v1486_v30 = vmul.f32 %v7274_v18, %v7274_v18  ;;  %v1506_v39 = vmul.f32 %v7271_v14, %v7271_v14 }
 0xa69   :  { %6195 = vmatpush3.bf16.msra.mxu0 %v6375_v5 }
 0xa6a   :  { %v7282_v40 = vsub.f32 %v7228_v47, %v1544_v20  ;;  %1488 = vrot.lane.b32.xlu0 %v1486_v30, %s6853_s18  ;;  %1508 = vrot.lane.b32.xlu1 %v1506_v39, %s6855_s3  ;;  %v7287_v31 = vsub.f32 %v7228_v47, %v1524_v21 }
 0xa6b   :  { %v1406_v37 = vpop.xlane.xlu1 %1405 }
 0xa6c   :  { %v1526_v35 = vmul.f32 %v7287_v31, %v7287_v31  ;;  %v1546_v36 = vmul.f32 %v7282_v40, %v7282_v40  ;;  %v1407_v43 = vmul.f32 0.0625, %v1406_v37 }
 0xa6e   :  { %1528 = vrot.lane.b32.xlu0 %v1526_v35, %s6840_s14  ;;  %1548 = vrot.lane.b32.xlu1 %v1546_v36, %s6856_s20  ;;  %v7296_v44 = vsub.f32 %v7228_v47, %v1407_v43 }
 0xa70   :  { %v1409_v45 = vmul.f32 %v7296_v44, %v7296_v44 }
 0xa72   :  { %v1410_v49 = vsel %vm718_vm6, %v1409_v45, 0.0 }
 0xa8d   :  { %1411 = vadd.xlane.f32.xlu0 %v1410_v49 }
 0xad4   :  { %v1429_v38 = vpop.permute.xlu0 %1428  ;;  %v1449_v50 = vpop.permute.xlu1 %1448 }
 0xad5   :  { %v1431_v51 = vsel %vm718_vm6, %v1429_v38, 0.0  ;;  %v1451_v52 = vsel %vm718_vm6, %v1449_v50, 0.0 }
 0xad6   :  { %1432 = vadd.xlane.f32.xlu1 %v1431_v51  ;;  %1452 = vadd.xlane.f32.xlu0 %v1451_v52 }
 0xad8   :  { %v1469_v53 = vpop.permute.xlu1 %1468 }
 0xad9   :  { %v1471_v54 = vsel %vm718_vm6, %v1469_v53, 0.0 }
 0xada   :  { %1472 = vadd.xlane.f32.xlu0 %v1471_v54 }
 0xadc   :  { %v1489_v47 = vpop.permute.xlu0 %1488  ;;  %v1509_v57 = vpop.permute.xlu1 %1508 }
 0xadd   :  { %v1491_v58 = vsel %vm718_vm6, %v1489_v47, 0.0  ;;  %v1511_v34 = vsel %vm718_vm6, %v1509_v57, 0.0 }
 0xade   :  { %1492 = vadd.xlane.f32.xlu1 %v1491_v58  ;;  %1512 = vadd.xlane.f32.xlu0 %v1511_v34 }
 0xae0   :  { %v1529_v59 = vpop.permute.xlu0 %1528  ;;  %v1549_v60 = vpop.permute.xlu1 %1548 }
 0xae1   :  { %v1531_v17 = vsel %vm718_vm6, %v1529_v59, 0.0  ;;  %v1551_v24 = vsel %vm718_vm6, %v1549_v60, 0.0 }
 0xae2   :  { %1532 = vadd.xlane.f32.xlu1 %v1531_v17  ;;  %1552 = vadd.xlane.f32.xlu0 %v1551_v24 }
 0xb16   :  { %v1412_v61 = vpop.xlane.xlu0 %1411 }
 0xb17   :  { %v1413_v8 = vmul.f32 0.0625, %v1412_v61 }
 0xb19   :  { %v1414_v33 = vadd.f32 1e-05, %v1413_v8 }
 0xb5f   :  { %v1453_v48 = vpop.xlane.xlu0 %1452  ;;  %v1433_v46 = vpop.xlane.xlu1 %1432 }
 0xb60   :  { %v1454_v3 = vmul.f32 0.0625, %v1453_v48  ;;  %v1434_v10 = vmul.f32 0.0625, %v1433_v46 }
 0xb62   :  { %v1435_v11 = vadd.f32 1e-05, %v1434_v10  ;;  %v1455_v16 = vadd.f32 1e-05, %v1454_v3 }
 0xb63   :  { %v1473_v19 = vpop.xlane.xlu0 %1472 }
 0xb64   :  { %v1474_v15 = vmul.f32 0.0625, %v1473_v19  ;;  %6456 = vrsqrt.f32 %v1435_v11  ;;  %v7331_v11 = vsub.s32 1, %v7087_v42 }
 0xb65   :  { %6458 = vrsqrt.f32 %v1414_v33 }
 0xb66   :  { %v1475_v20 = vadd.f32 1e-05, %v1474_v15  ;;  %6460 = vrsqrt.f32 %v1455_v16  ;;  %v313_v16 = vrot.slane %v7092_v13, %v7331_v11 }
 0xb67   :  { %v1513_v21 = vpop.xlane.xlu0 %1512  ;;  %v1493_v30 = vpop.xlane.xlu1 %1492 }
 0xb68   :  { %6462 = vrsqrt.f32 %v1475_v20  ;;  %v1514_v39 = vmul.f32 0.0625, %v1513_v21  ;;  %v1494_v35 = vmul.f32 0.0625, %v1493_v30  ;;  %v418_v15 = vadd.f32 %v7098_v22, %v313_v16 }
 0xb6a   :  { %v1515_v36 = vadd.f32 1e-05, %v1514_v39  ;;  %v1495_v37 = vadd.f32 1e-05, %v1494_v35  ;;  %v5741_v39 = vld [vmem:[#allocation2 + $0x14] ss:$0 sm:$0xff] }
 0xb6b   :  { %v1553_v43 = vpop.xlane.xlu0 %1552  ;;  %v1533_v45 = vpop.xlane.xlu1 %1532 }
 0xb6c   :  { %6464 = vrsqrt.f32 %v1515_v36  ;;  %v1554_v49 = vmul.f32 0.0625, %v1553_v43  ;;  %v1534_v38 = vmul.f32 0.0625, %v1533_v45 }
 0xb6d   :  { %6466 = vrsqrt.f32 %v1495_v37 }
 0xb6e   :  { %v1555_v50 = vadd.f32 1e-05, %v1554_v49  ;;  %v1535_v51 = vadd.f32 1e-05, %v1534_v38 }
 0xb70   :  { %6468 = vrsqrt.f32 %v1555_v50 }
 0xb71   :  { %6470 = vrsqrt.f32 %v1535_v51  ;;  %v6457_v52 = vpop.eup %6456 }
 0xb72   :  { %v6459_v53 = vpop.eup %6458  ;;  %v1437_v47 = vmul.f32 %v6457_v52, %v7257_v7 }
 0xb73   :  { %v6461_v54 = vpop.eup %6460  ;;  %v1416_v58 = vmul.f32 %v6459_v53, %v7296_v44 }
 0xb74   :  { %v1457_v34 = vmul.f32 %v6461_v54, %v7254_v6 }
 0xb75   :  { %v6463_v57 = vpop.eup %6462  ;;  %v1558_v59 = vsel %vm874_vm7, %v1416_v58, %v1437_v47 }
 0xb76   :  { %v1477_v60 = vmul.f32 %v6463_v57, %v7264_v9  ;;  %v1559_v62 = vsel %vm212_vm3, %v1558_v59, %v1457_v34 }
 0xb78   :  { %v1560_v32 = vsel %vm877_vm8, %v1559_v62, %v1477_v60 }
 0xb79   :  { %v6465_v17 = vpop.eup %6464 }
 0xb7a   :  { %v6467_v24 = vpop.eup %6466  ;;  %v1517_v1 = vmul.f32 %v6465_v17, %v7271_v14 }
 0xb7b   :  { %v1497_v63 = vmul.f32 %v6467_v24, %v7274_v18  ;;  %v5740_v18 = vld [vmem:[#allocation2 + $0x13] ss:$0 sm:$0xff] }
 0xb7d   :  { %v6469_v7 = vpop.eup %6468  ;;  %v1561_v2 = vsel %vm674_vm5, %v1560_v32, %v1497_v63 }
 0xb7e   :  { %v6471_v44 = vpop.eup %6470  ;;  %v1557_v6 = vmul.f32 %v6469_v7, %v7282_v40  ;;  %v1562_v9 = vsel %vm880_vm9, %v1561_v2, %v1517_v1 }
 0xb7f   :  { %v1537_v23 = vmul.f32 %v6471_v44, %v7287_v31 }
 0xb81   :  { %v1563_v5 = vsel %vm882_vm10, %v1562_v9, %v1537_v23 }
 0xb82   :  { %v1564_v61 = vsel %vm884_vm11, %v1563_v5, %v1557_v6 }
 0xb83   :  { %v1572_v8 = vmul.f32 %v5739_v4, %v1564_v61 }
 0xb85   :  { %v1580_v48 = vadd.f32 %v5740_v18, %v1572_v8 }
 0xb87   :  { %v1581_v46 = vmin.f32 %v1580_v48, 20.0  ;;  %vm1587_vm14 = vcmp.gt.f32.partialorder %v1580_v48, 20.0 }
 0xb89   :  { %v1582_v14 = vmul.f32 1.442695, %v1581_v46 }
 0xb8b   :  { %6472 = vpow2.f32 %v1582_v14 }
 0xb98   :  { %v6473_v3 = vpop.eup %6472 }
 0xb99   :  { %v1584_v10 = vadd.f32 1.0, %v6473_v3 }
 0xb9b   :  { %6474 = vlog2.f32 %v1584_v10 }
 0xba8   :  { %v6475_v33 = vpop.eup %6474 }
 0xba9   :  { %v1586_v40 = vmul.f32 0.6931472, %v6475_v33 }
 0xbab   :  { %v1588_v31 = vsel %vm1587_vm14, %v1580_v48, %v1586_v40 }
 0xbac   :  { %6476 = vtanh.f32 %v1588_v31 }
 0xbb9   :  { %v6477_v19 = vpop.eup %6476 }
 0xbba   :  { %v1590_v20 = vmul.f32 %v6477_v19, %v1580_v48 }
 0xbbc   :  { %v1591_v21 = vadd.f32 %v1590_v20, %v418_v15 }
 0xbbe   :  { %v1608_v30 = vpack.c.bf16 %v1591_v21, %v1591_v21 }
 0xbc0   :  { %6197 = vmatmul.mubr.bf16.vlgmr.msra.gmra.mxu0 %v1608_v30 }
 0xc80   :  { %v1698_v35 = vpop.f32.mrf.mxu0 }
 0xc81   :  { %v7336_v36 = vadd.f32 %v5741_v39, %v1698_v35 }
 0xc82   :  { %v6198_v37 = vpop.f32.mrf.mxu0 }
 0xc83   :  { %1738 = vrot.lane.b32.xlu0 %v7336_v36, %s6854_s19  ;;  %1718 = vrot.lane.b32.xlu1 %v7336_v36, %s6852_s17  ;;  %v1704_v60 = vsel %vm718_vm6, %v7336_v36, 0.0 }
 0xc84   :  { %v1701_v43 = vpop.f32.mrf.mxu0 }
 0xc86   :  { %v6199_v13 = vpop.f32.mrf.mxu0 }
 0xc87   :  { %1798 = vrot.lane.b32.xlu0 %v7336_v36, %s6855_s3  ;;  %1758 = vrot.lane.b32.xlu1 %v7336_v36, %s6851_s0 }
 0xc8b   :  { %1838 = vrot.lane.b32.xlu0 %v7336_v36, %s6856_s20  ;;  %1778 = vrot.lane.b32.xlu1 %v7336_v36, %s6853_s18 }
 0xc8f   :  { %1818 = vrot.lane.b32.xlu1 %v7336_v36, %s6840_s14 }
 0xcf5   :  { %v1739_v22 = vpop.permute.xlu0 %1738  ;;  %v1719_v45 = vpop.permute.xlu1 %1718 }
 0xcf6   :  { %v1741_v49 = vsel %vm718_vm6, %v1739_v22, 0.0  ;;  %v1721_v38 = vsel %vm718_vm6, %v1719_v45, 0.0 }
 0xcf7   :  { %1742 = vadd.xlane.f32.xlu0 %v1741_v49  ;;  %1722 = vadd.xlane.f32.xlu1 %v1721_v38 }
 0xcf9   :  { %v1799_v50 = vpop.permute.xlu0 %1798  ;;  %v1759_v51 = vpop.permute.xlu1 %1758 }
 0xcfa   :  { %v1761_v52 = vsel %vm718_vm6, %v1759_v51, 0.0  ;;  %v1801_v54 = vsel %vm718_vm6, %v1799_v50, 0.0 }
 0xcfb   :  { %1762 = vadd.xlane.f32.xlu0 %v1761_v52 }
 0xcfd   :  { %v1779_v53 = vpop.permute.xlu1 %1778  ;;  %v1839_v57 = vpop.permute.xlu0 %1838 }
 0xcfe   :  { %v1781_v47 = vsel %vm718_vm6, %v1779_v53, 0.0  ;;  %v1841_v34 = vsel %vm718_vm6, %v1839_v57, 0.0  ;;  %v6376_v57 = vld [vmem:[#allocation9 + $0x15c] ss:$24 sps:$4 sm:$0xff]  }
 0xcff   :  { %1802 = vadd.xlane.f32.xlu0 %v1801_v54  ;;  %1782 = vadd.xlane.f32.xlu1 %v1781_v47 }
 0xd00   :  { %6201 = vmatpush3.bf16.msra.mxu1 %v6376_v57 }
 0xd01   :  { %v1819_v58 = vpop.permute.xlu1 %1818  ;;  %6202 = vmatprep.subr.bf16.mxu1 %v6849_v0 }
 0xd02   :  { %v1821_v59 = vsel %vm718_vm6, %v1819_v58, 0.0  ;;  %v6377_v58 = vld [vmem:[#allocation9 + $0x12c] ss:$24 sps:$4 sm:$0xff]  }
 0xd03   :  { %1842 = vadd.xlane.f32.xlu0 %v1841_v34  ;;  %1822 = vadd.xlane.f32.xlu1 %v1821_v59  ;;  %v6378_v34 = vld [vmem:[#allocation9 + $0xfc] ss:$24 sps:$4 sm:$0xff]   ;;  %v6379_v59 = vld [vmem:[#allocation9 + $0xcc] ss:$24 sps:$4 sm:$0xff]  }
 0xd04   :  { %6203 = vmatpush3.bf16.msra.mxu1 %v6377_v58 }
 0xd05   :  { %6204 = vmatprep.subr.bf16.mxu1 %v6849_v0 }
 0xd07   :  { %1705 = vadd.xlane.f32.xlu1 %v1704_v60  ;;  %v6380_v60 = vld [vmem:[#allocation9 + $0x9c] ss:$24 sps:$4 sm:$0xff]  }
 0xd08   :  { %6205 = vmatpush3.bf16.msra.mxu1 %v6378_v34 }
 0xd09   :  { %6206 = vmatprep.subr.bf16.mxu1 %v6849_v0 }
 0xd0c   :  { %6207 = vmatpush3.bf16.msra.mxu1 %v6379_v59 }
 0xd0d   :  { %6208 = vmatprep.subr.bf16.mxu1 %v6849_v0 }
 0xd10   :  { %6209 = vmatpush3.bf16.msra.mxu1 %v6380_v60 }
 0xd11   :  { %6210 = vmatprep.subr.bf16.mxu1 %v6849_v0 }
 0xd80   :  { %v1743_v17 = vpop.xlane.xlu0 %1742  ;;  %v1723_v24 = vpop.xlane.xlu1 %1722 }
 0xd81   :  { %v1744_v62 = vmul.f32 0.0625, %v1743_v17  ;;  %v1724_v63 = vmul.f32 0.0625, %v1723_v24  ;;  %v6381_v17 = vld [vmem:[#allocation9 + $0x6c] ss:$24 sps:$4 sm:$0xff]   ;;  %v6382_v24 = vld [vmem:[#allocation9 + $0x3c] ss:$24 sps:$4 sm:$0xff]  }
 0xd82   :  { %6211 = vmatpush3.bf16.msra.mxu1 %v6381_v17 }
 0xd83   :  { %v7362_v32 = vsub.f32 %v7336_v36, %v1744_v62  ;;  %v7365_v1 = vsub.f32 %v7336_v36, %v1724_v63  ;;  %6212 = vmatprep.subr.bf16.mxu1 %v6849_v0  ;;  %v6383_v62 = vld [vmem:[#allocation9 + $0xc] ss:$24 sps:$4 sm:$0xff]  }
 0xd84   :  { %v1763_v7 = vpop.xlane.xlu0 %1762  ;;  %v2010_v63 = vld [vmem:[#allocation7 + $0xc8] sm:$0xff] }
 0xd85   :  { %v1746_v2 = vmul.f32 %v7362_v32, %v7362_v32  ;;  %v1726_v44 = vmul.f32 %v7365_v1, %v7365_v1  ;;  %v1764_v6 = vmul.f32 0.0625, %v1763_v7  ;;  %v2011_v7 = vld [vmem:[#allocation7 + $0xe8] sm:$0xff] }
 0xd86   :  { %6213 = vmatpush3.bf16.msra.mxu1 %v6382_v24 }
 0xd87   :  { %v7372_v23 = vsub.f32 %v7336_v36, %v1764_v6  ;;  %1728 = vrot.lane.b32.xlu0 %v1726_v44, %s6852_s17  ;;  %1748 = vrot.lane.b32.xlu1 %v1746_v2, %s6854_s19  ;;  %v7423_v2 = vld [vmem:[#allocation7 + $0xd0] sm:$0xff]  ;;  %v5767_v44 = vcombine.low %v2010_v63, %v2011_v7  ;;  %v5768_v6 = vcombine.high %v2010_v63, %v2011_v7 }
 0xd88   :  { %v1803_v9 = vpop.xlane.xlu0 %1802  ;;  %v1783_v4 = vpop.xlane.xlu1 %1782  ;;  %6214 = vmatprep.subr.bf16.mxu1 %v6849_v0 }
 0xd89   :  { %v1766_v5 = vmul.f32 %v7372_v23, %v7372_v23  ;;  %v1804_v61 = vmul.f32 0.0625, %v1803_v9  ;;  %v1784_v18 = vmul.f32 0.0625, %v1783_v4  ;;  %v7425_v9 = vld [vmem:[#allocation7 + $0xf0] sm:$0xff]  ;;  %v2008_v4 = vld [vmem:[#allocation7 + $0x88] sm:$0xff]  ;;  %2076 = vmatprep.subr.bf16.mxu0 %v5768_v6 }
 0xd8a   :  { %6215 = vmatpush3.bf16.msra.mxu1 %v6383_v62  ;;  %2077 = vmatpush1.bf16.msra.mxu0 %v5767_v44 }
 0xd8b   :  { %v7379_v8 = vsub.f32 %v7336_v36, %v1804_v61  ;;  %v7382_v48 = vsub.f32 %v7336_v36, %v1784_v18  ;;  %1768 = vrot.lane.b32.xlu1 %v1766_v5, %s6851_s0  ;;  %v2009_v5 = vld [vmem:[#allocation7 + $0xa8] sm:$0xff]  ;;  %v5808_v61 = vcombine.low %v7423_v2, %v7425_v9  ;;  %v5809_v18 = vcombine.high %v7423_v2, %v7425_v9  ;;  %v5752_v9 = vld [vmem:[#allocation2 + $0x17] ss:$0 sm:$0xff] }
 0xd8c   :  { %v1843_v46 = vpop.xlane.xlu0 %1842  ;;  %v1823_v14 = vpop.xlane.xlu1 %1822  ;;  %v6857_v2 = vmov 0  }
 0xd8d   :  { %v1806_v3 = vmul.f32 %v7379_v8, %v7379_v8  ;;  %v1786_v10 = vmul.f32 %v7382_v48, %v7382_v48  ;;  %v1844_v33 = vmul.f32 0.0625, %v1843_v46  ;;  %v1824_v40 = vmul.f32 0.0625, %v1823_v14  ;;  %2832 = vmatprep.subr.bf16.mxu1 %v5809_v18  ;;  %2100 = vmatprep.mubr.bf16.mxu0 %v6857_v2 }
 0xd8e   :  { %v5766_v46 = vcombine.high %v2008_v4, %v2009_v5  ;;  %v5765_v14 = vcombine.low %v2008_v4, %v2009_v5 }
 0xd8f   :  { %v7390_v31 = vsub.f32 %v7336_v36, %v1844_v33  ;;  %v7393_v16 = vsub.f32 %v7336_v36, %v1824_v40  ;;  %1788 = vrot.lane.b32.xlu0 %v1786_v10, %s6853_s18  ;;  %1808 = vrot.lane.b32.xlu1 %v1806_v3, %s6855_s3  ;;  %v2006_v3 = vld [vmem:[#allocation7 + $0x48] sm:$0xff] }
 0xd90   :  { %v1706_v20 = vpop.xlane.xlu1 %1705  ;;  %2078 = vmatprep.subr.bf16.mxu0 %v5766_v46  ;;  %v2007_v10 = vld [vmem:[#allocation7 + $0x68] sm:$0xff] }
 0xd91   :  { %v1846_v19 = vmul.f32 %v7390_v31, %v7390_v31  ;;  %v1826_v15 = vmul.f32 %v7393_v16, %v7393_v16  ;;  %v1707_v21 = vmul.f32 0.0625, %v1706_v20  ;;  %v5764_v33 = vcombine.high %v2006_v3, %v2007_v10  ;;  %2079 = vmatpush1.bf16.msra.mxu0 %v5765_v14 }
 0xd92   :  { %v5763_v40 = vcombine.low %v2006_v3, %v2007_v10 }
 0xd93   :  { %1828 = vrot.lane.b32.xlu0 %v1826_v15, %s6840_s14  ;;  %1848 = vrot.lane.b32.xlu1 %v1846_v19, %s6856_s20  ;;  %v7404_v30 = vsub.f32 %v7336_v36, %v1707_v21 }
 0xd94   :  { %2080 = vmatprep.subr.bf16.mxu0 %v5764_v33 }
 0xd95   :  { %v1709_v39 = vmul.f32 %v7404_v30, %v7404_v30  ;;  %2081 = vmatpush1.bf16.msra.mxu0 %v5763_v40 }
 0xd97   :  { %v1710_v35 = vsel %vm718_vm6, %v1709_v39, 0.0 }
 0xdb2   :  { %1711 = vadd.xlane.f32.xlu0 %v1710_v35 }
 0xdf9   :  { %v1729_v37 = vpop.permute.xlu0 %1728  ;;  %v1749_v43 = vpop.permute.xlu1 %1748 }
 0xdfa   :  { %v1731_v13 = vsel %vm718_vm6, %v1729_v37, 0.0  ;;  %v1751_v22 = vsel %vm718_vm6, %v1749_v43, 0.0 }
 0xdfb   :  { %1732 = vadd.xlane.f32.xlu1 %v1731_v13  ;;  %1752 = vadd.xlane.f32.xlu0 %v1751_v22 }
 0xdfd   :  { %v1769_v45 = vpop.permute.xlu1 %1768 }
 0xdfe   :  { %v1771_v49 = vsel %vm718_vm6, %v1769_v45, 0.0 }
 0xdff   :  { %1772 = vadd.xlane.f32.xlu0 %v1771_v49 }
 0xe01   :  { %v1789_v36 = vpop.permute.xlu0 %1788  ;;  %v1809_v38 = vpop.permute.xlu1 %1808 }
 0xe02   :  { %v1791_v50 = vsel %vm718_vm6, %v1789_v36, 0.0  ;;  %v1811_v51 = vsel %vm718_vm6, %v1809_v38, 0.0 }
 0xe03   :  { %1792 = vadd.xlane.f32.xlu1 %v1791_v50  ;;  %1812 = vadd.xlane.f32.xlu0 %v1811_v51 }
 0xe05   :  { %v1829_v52 = vpop.permute.xlu0 %1828  ;;  %v1849_v53 = vpop.permute.xlu1 %1848 }
 0xe06   :  { %v1831_v54 = vsel %vm718_vm6, %v1829_v52, 0.0  ;;  %v1851_v47 = vsel %vm718_vm6, %v1849_v53, 0.0 }
 0xe07   :  { %1832 = vadd.xlane.f32.xlu1 %v1831_v54  ;;  %1852 = vadd.xlane.f32.xlu0 %v1851_v47 }
 0xe3b   :  { %v1712_v19 = vpop.xlane.xlu0 %1711 }
 0xe3c   :  { %v1713_v15 = vmul.f32 0.0625, %v1712_v19  ;;  %v5750_v19 = vld [vmem:[#allocation2 + $0x15] ss:$0 sm:$0xff] }
 0xe3e   :  { %v1714_v37 = vadd.f32 1e-05, %v1713_v15 }
 0xe84   :  { %v1753_v20 = vpop.xlane.xlu0 %1752  ;;  %v1733_v21 = vpop.xlane.xlu1 %1732 }
 0xe85   :  { %v1754_v39 = vmul.f32 0.0625, %v1753_v20  ;;  %v1734_v35 = vmul.f32 0.0625, %v1733_v21 }
 0xe87   :  { %v1735_v43 = vadd.f32 1e-05, %v1734_v35  ;;  %v1755_v13 = vadd.f32 1e-05, %v1754_v39 }
 0xe88   :  { %v1773_v22 = vpop.xlane.xlu0 %1772 }
 0xe89   :  { %v1774_v45 = vmul.f32 0.0625, %v1773_v22  ;;  %6478 = vrsqrt.f32 %v1735_v43 }
 0xe8a   :  { %6480 = vrsqrt.f32 %v1714_v37 }
 0xe8b   :  { %v1775_v49 = vadd.f32 1e-05, %v1774_v45  ;;  %6482 = vrsqrt.f32 %v1755_v13 }
 0xe8c   :  { %v1813_v36 = vpop.xlane.xlu0 %1812  ;;  %v1793_v38 = vpop.xlane.xlu1 %1792 }
 0xe8d   :  { %6484 = vrsqrt.f32 %v1775_v49  ;;  %v1814_v50 = vmul.f32 0.0625, %v1813_v36  ;;  %v1794_v51 = vmul.f32 0.0625, %v1793_v38  ;;  %v2768_v49 = vld [vmem:[#allocation7 + $0x90] sm:$0xff] }
 0xe8e   :  { %v2769_v36 = vld [vmem:[#allocation7 + $0xb0] sm:$0xff] }
 0xe8f   :  { %v1815_v52 = vadd.f32 1e-05, %v1814_v50  ;;  %v1795_v53 = vadd.f32 1e-05, %v1794_v51  ;;  %v5807_v51 = vcombine.high %v2768_v49, %v2769_v36 }
 0xe90   :  { %v1853_v54 = vpop.xlane.xlu0 %1852  ;;  %v1833_v47 = vpop.xlane.xlu1 %1832 }
 0xe91   :  { %6486 = vrsqrt.f32 %v1815_v52  ;;  %v1854_v57 = vmul.f32 0.0625, %v1853_v54  ;;  %v1834_v58 = vmul.f32 0.0625, %v1833_v47  ;;  %v2766_v52 = vld [vmem:[#allocation7 + $0x50] sm:$0xff]  ;;  %v5806_v54 = vcombine.low %v2768_v49, %v2769_v36 }
 0xe92   :  { %6488 = vrsqrt.f32 %v1795_v53  ;;  %v2767_v53 = vld [vmem:[#allocation7 + $0x70] sm:$0xff] }
 0xe93   :  { %v1855_v34 = vadd.f32 1e-05, %v1854_v57  ;;  %v1835_v59 = vadd.f32 1e-05, %v1834_v58  ;;  %v5805_v47 = vcombine.high %v2766_v52, %v2767_v53  ;;  %v5804_v57 = vcombine.low %v2766_v52, %v2767_v53  ;;  %v2004_v58 = vld [vmem:[#allocation7 + $0x8] sm:$0xff] }
 0xe95   :  { %6490 = vrsqrt.f32 %v1855_v34  ;;  %v2005_v34 = vld [vmem:[#allocation7 + $0x28] sm:$0xff] }
 0xe96   :  { %6492 = vrsqrt.f32 %v1835_v59  ;;  %v6479_v60 = vpop.eup %6478  ;;  %v2764_v59 = vld [vmem:[#allocation7 + $0x10] sm:$0xff] }
 0xe97   :  { %v6481_v17 = vpop.eup %6480  ;;  %v1737_v62 = vmul.f32 %v6479_v60, %v7365_v1  ;;  %v2765_v60 = vld [vmem:[#allocation7 + $0x30] sm:$0xff] }
 0xe98   :  { %v6483_v24 = vpop.eup %6482  ;;  %v1716_v7 = vmul.f32 %v6481_v17, %v7404_v30  ;;  %v5761_v17 = vcombine.low %v2004_v58, %v2005_v34 }
 0xe99   :  { %v1757_v44 = vmul.f32 %v6483_v24, %v7362_v32  ;;  %v5802_v24 = vcombine.low %v2764_v59, %v2765_v60 }
 0xe9a   :  { %v6485_v63 = vpop.eup %6484  ;;  %v1858_v6 = vsel %vm874_vm7, %v1716_v7, %v1737_v62  ;;  %v5803_v62 = vcombine.high %v2764_v59, %v2765_v60 }
 0xe9b   :  { %v1777_v4 = vmul.f32 %v6485_v63, %v7372_v23  ;;  %v1859_v46 = vsel %vm212_vm3, %v1858_v6, %v1757_v44 }
 0xe9d   :  { %v1860_v3 = vsel %vm877_vm8, %v1859_v46, %v1777_v4 }
 0xe9e   :  { %v6487_v5 = vpop.eup %6486 }
 0xe9f   :  { %v6489_v18 = vpop.eup %6488  ;;  %v1817_v10 = vmul.f32 %v6487_v5, %v7379_v8  ;;  %v2013_v5 = vld [vmem:[#allocation2 + $0x18] sm:$0x3] }
 0xea0   :  { %v1797_v14 = vmul.f32 %v6489_v18, %v7382_v48  ;;  %v5751_v48 = vld [vmem:[#allocation2 + $0x16] ss:$0 sm:$0xff]  ;;  %v2018_v18 = vrot.slane %v2013_v5, %v7090_v12 }
 0xea2   :  { %v6491_v1 = vpop.eup %6490  ;;  %v1861_v33 = vsel %vm674_vm5, %v1860_v3, %v1797_v14 }
 0xea3   :  { %v6493_v30 = vpop.eup %6492  ;;  %v1857_v32 = vmul.f32 %v6491_v1, %v7390_v31  ;;  %v1862_v23 = vsel %vm880_vm9, %v1861_v33, %v1817_v10  ;;  %v2022_v10 = vrot.slane %v2013_v5, %v7331_v11 }
 0xea4   :  { %v1837_v40 = vmul.f32 %v6493_v30, %v7393_v16 }
 0xea6   :  { %v1863_v15 = vsel %vm882_vm10, %v1862_v23, %v1837_v40 }
 0xea7   :  { %v1864_v20 = vsel %vm884_vm11, %v1863_v15, %v1857_v32 }
 0xea8   :  { %v1872_v21 = vmul.f32 %v5750_v19, %v1864_v20 }
 0xeaa   :  { %v1880_v39 = vadd.f32 %v5751_v48, %v1872_v21 }
 0xeac   :  { %v1881_v35 = vmin.f32 %v1880_v39, 20.0  ;;  %vm1887_vm15 = vcmp.gt.f32.partialorder %v1880_v39, 20.0 }
 0xeae   :  { %v1882_v8 = vmul.f32 1.442695, %v1881_v35 }
 0xeb0   :  { %6494 = vpow2.f32 %v1882_v8 }
 0xebd   :  { %v6495_v37 = vpop.eup %6494 }
 0xebe   :  { %v1884_v43 = vadd.f32 1.0, %v6495_v37 }
 0xec0   :  { %6496 = vlog2.f32 %v1884_v43 }
 0xecd   :  { %v6497_v13 = vpop.eup %6496 }
 0xece   :  { %v1886_v31 = vmul.f32 0.6931472, %v6497_v13 }
 0xed0   :  { %v1888_v16 = vsel %vm1887_vm15, %v1880_v39, %v1886_v31 }
 0xed1   :  { %6498 = vtanh.f32 %v1888_v16 }
 0xede   :  { %v6499_v22 = vpop.eup %6498 }
 0xedf   :  { %v1890_v45 = vmul.f32 %v6499_v22, %v1880_v39 }
 0xee1   :  { %v1891_v38 = vadd.f32 %v1890_v45, %v7222_v41  ;;  %v5762_v41 = vcombine.high %v2004_v58, %v2005_v34 }
 0xee3   :  { %v1908_v50 = vpack.c.bf16 %v1891_v38, %v1891_v38  ;;  %2082 = vmatprep.subr.bf16.mxu0 %v5762_v41 }
 0xee4   :  { %2083 = vmatpush1.bf16.msra.mxu0 %v5761_v17 }
 0xee5   :  { %6217 = vmatmul.mubr.bf16.vlgmr.msra.gmra.mxu1 %v1908_v50 }
 0xee6   :  { %2833 = vmatpush1.bf16.msra.mxu1 %v5808_v61  ;;  %2856 = vmatprep.mubr.bf16.mxu1 %v6857_v2 }
 0xee7   :  { %2834 = vmatprep.subr.bf16.mxu1 %v5807_v51 }
 0xeea   :  { %2835 = vmatpush1.bf16.msra.mxu1 %v5806_v54 }
 0xeeb   :  { %2836 = vmatprep.subr.bf16.mxu1 %v5805_v47 }
 0xeee   :  { %2837 = vmatpush1.bf16.msra.mxu1 %v5804_v57 }
 0xeef   :  { %2838 = vmatprep.subr.bf16.mxu1 %v5803_v62 }
 0xef2   :  { %2839 = vmatpush1.bf16.msra.mxu1 %v5802_v24 }
 0xfa5   :  { %v1998_v61 = vpop.f32.mrf.mxu1 }
 0xfa6   :  { %v1999_v63 = vadd.f32 %v5752_v9, %v1998_v61 }
 0xfa7   :  { %v6218_v7 = vpop.f32.mrf.mxu1 }
 0xfa8   :  { %v2012_v44 = vpack.c.bf16 %v1999_v63, %v1999_v63 }
 0xfa9   :  { %v2001_v6 = vpop.f32.mrf.mxu1 }
 0xfaa   :  { %5769 = vmatmul.mubr.msk.bf16.vlgmr.msra.gmra.mxu0 %vm674_vm5, %v2012_v44  ;;  %5810 = vmatmul.mubr.msk.bf16.vlgmr.msra.gmra.mxu1 %vm674_vm5, %v2012_v44 }
 0xfab   :  { %v6219_v4 = vpop.f32.mrf.mxu1 }
0x106a   :  { %v2102_v46 = vpop.f32.mrf.mxu0  ;;  %v7453_v14 = vpop.f32.mrf.mxu1 }
0x106b   :  { %v7455_v3 = vadd.f32 %v2102_v46, %v2018_v18 }
0x106c   :  { %v2104_v1 = vpop.f32.mrf.mxu0  ;;  %v7458_v33 = vpop.f32.mrf.mxu1 }
0x106d   :  { %2145 = vrot.lane.b32.xlu1 %v7455_v3, %s6853_s18  ;;  %2125 = vrot.lane.b32.xlu0 %v7455_v3, %s6854_s19  ;;  %v7464_v40 = vadd.f32 %v2104_v1, %v2022_v10  ;;  %v2110_v45 = vsel %vm2109_vm2, %v7455_v3, 0.0 }
0x106e   :  { %v2106_v30 = vpop.f32.mrf.mxu0  ;;  %v2862_v32 = vpop.f32.mrf.mxu1 }
0x106f   :  { %v2185_v31 = vsel %vm2109_vm2, %v7464_v40, 0.0 }
0x1070   :  { %v2107_v23 = vpop.f32.mrf.mxu0  ;;  %v2863_v19 = vpop.f32.mrf.mxu1 }
0x1071   :  { %2199 = vrot.lane.b32.xlu1 %v7464_v40, %s6854_s19  ;;  %2239 = vrot.lane.b32.xlu0 %v7464_v40, %s6840_s14 }
0x1075   :  { %2219 = vrot.lane.b32.xlu1 %v7464_v40, %s6853_s18 }
0x1079   :  { %2165 = vrot.lane.b32.xlu1 %v7455_v3, %s6840_s14 }
0x10df   :  { %v2146_v15 = vpop.permute.xlu1 %2145  ;;  %v2126_v20 = vpop.permute.xlu0 %2125 }
0x10e0   :  { %v2148_v48 = vsel %vm2109_vm2, %v2146_v15, 0.0  ;;  %v2128_v21 = vsel %vm2109_vm2, %v2126_v20, 0.0 }
0x10e1   :  { %2149 = vadd.xlane.f32.xlu0 %v2148_v48  ;;  %2129 = vadd.xlane.f32.xlu1 %v2128_v21 }
0x10e3   :  { %v2200_v39 = vpop.permute.xlu1 %2199  ;;  %v2240_v35 = vpop.permute.xlu0 %2239 }
0x10e4   :  { %v2202_v8 = vsel %vm2109_vm2, %v2200_v39, 0.0  ;;  %v2242_v37 = vsel %vm2109_vm2, %v2240_v35, 0.0 }
0x10e5   :  { %2203 = vadd.xlane.f32.xlu0 %v2202_v8  ;;  %2243 = vadd.xlane.f32.xlu1 %v2242_v37 }
0x10e7   :  { %v2220_v43 = vpop.permute.xlu1 %2219 }
0x10e8   :  { %v2222_v13 = vsel %vm2109_vm2, %v2220_v43, 0.0 }
0x10e9   :  { %2223 = vadd.xlane.f32.xlu0 %v2222_v13  ;;  %2186 = vadd.xlane.f32.xlu1 %v2185_v31  ;;  %v2329_v13 = vld [vmem:[#allocation10 + $0x1c0] sm:$0xff] }
0x10ea   :  { %v2330_v31 = vld [vmem:[#allocation10 + $0x1e0] sm:$0xff] }
0x10eb   :  { %v2166_v16 = vpop.permute.xlu1 %2165 }
0x10ec   :  { %v2168_v22 = vsel %vm2109_vm2, %v2166_v16, 0.0  ;;  %v5785_v16 = vcombine.high %v2329_v13, %v2330_v31 }
0x10ed   :  { %2169 = vadd.xlane.f32.xlu0 %v2168_v22  ;;  %v5784_v22 = vcombine.low %v2329_v13, %v2330_v31  ;;  %v2339_v13 = vld [vmem:[#allocation10 + $0x300] sm:$0xff] }
0x10ee   :  { %2521 = vmatprep.subr.bf16.mxu0 %v5785_v16  ;;  %v2340_v31 = vld [vmem:[#allocation10 + $0x320] sm:$0xff] }
0x10ef   :  { %2522 = vmatpush1.bf16.msra.mxu0 %v5784_v22  ;;  %v5795_v22 = vcombine.high %v2339_v13, %v2340_v31 }
0x10f1   :  { %2111 = vadd.xlane.f32.xlu0 %v2110_v45  ;;  %v2327_v45 = vld [vmem:[#allocation10 + $0x180] sm:$0xff] }
0x116a   :  { %v2130_v49 = vpop.xlane.xlu1 %2129  ;;  %v2150_v36 = vpop.xlane.xlu0 %2149 }
0x116b   :  { %v2131_v38 = vmul.f32 0.03125, %v2130_v49  ;;  %v2151_v50 = vmul.f32 0.03125, %v2150_v36  ;;  %v2328_v49 = vld [vmem:[#allocation10 + $0x1a0] sm:$0xff] }
0x116c   :  { %v2325_v36 = vld [vmem:[#allocation10 + $0x140] sm:$0xff] }
0x116d   :  { %v7485_v51 = vsub.f32 %v7455_v3, %v2131_v38  ;;  %v7488_v52 = vsub.f32 %v7455_v3, %v2151_v50  ;;  %v5783_v38 = vcombine.high %v2327_v45, %v2328_v49  ;;  %v2326_v50 = vld [vmem:[#allocation10 + $0x160] sm:$0xff] }
0x116e   :  { %v2244_v53 = vpop.xlane.xlu1 %2243  ;;  %v2204_v54 = vpop.xlane.xlu0 %2203 }
0x116f   :  { %v2133_v47 = vmul.f32 %v7485_v51, %v7485_v51  ;;  %v2153_v57 = vmul.f32 %v7488_v52, %v7488_v52  ;;  %v2245_v58 = vmul.f32 0.03125, %v2244_v53  ;;  %v2205_v34 = vmul.f32 0.03125, %v2204_v54  ;;  %2523 = vmatprep.subr.bf16.mxu0 %v5783_v38 }
0x1170   :  { %v5782_v53 = vcombine.low %v2327_v45, %v2328_v49  ;;  %v5781_v54 = vcombine.high %v2325_v36, %v2326_v50  ;;  %v2337_v45 = vld [vmem:[#allocation10 + $0x2c0] sm:$0xff] }
0x1171   :  { %v7495_v59 = vsub.f32 %v7464_v40, %v2245_v58  ;;  %v7498_v41 = vsub.f32 %v7464_v40, %v2205_v34  ;;  %2155 = vrot.lane.b32.xlu1 %v2153_v57, %s6853_s18  ;;  %2135 = vrot.lane.b32.xlu0 %v2133_v47, %s6854_s19  ;;  %v2323_v47 = vld [vmem:[#allocation10 + $0x100] sm:$0xff]  ;;  %v5780_v58 = vcombine.low %v2325_v36, %v2326_v50 }
0x1172   :  { %v2224_v60 = vpop.xlane.xlu0 %2223  ;;  %v2187_v6 = vpop.xlane.xlu1 %2186  ;;  %v2324_v57 = vld [vmem:[#allocation10 + $0x120] sm:$0xff]  ;;  %2524 = vmatpush1.bf16.msra.mxu0 %v5782_v53  ;;  %v5794_v36 = vcombine.low %v2339_v13, %v2340_v31 }
0x1173   :  { %v2207_v17 = vmul.f32 %v7498_v41, %v7498_v41  ;;  %v2225_v24 = vmul.f32 0.03125, %v2224_v60  ;;  %v2247_v62 = vmul.f32 %v7495_v59, %v7495_v59  ;;  %v2188_v4 = vmul.f32 0.03125, %v2187_v6  ;;  %2525 = vmatprep.subr.bf16.mxu0 %v5781_v54  ;;  %v2321_v60 = vld [vmem:[#allocation10 + $0xc0] sm:$0xff] }
0x1174   :  { %v5779_v34 = vcombine.high %v2323_v47, %v2324_v57  ;;  %v2317_v6 = vld [vmem:[#allocation10 + $0x40] sm:$0xff] }
0x1175   :  { %v7507_v2 = vsub.f32 %v7464_v40, %v2225_v24  ;;  %2209 = vrot.lane.b32.xlu1 %v2207_v17, %s6854_s19  ;;  %2249 = vrot.lane.b32.xlu0 %v2247_v62, %s6840_s14  ;;  %v7521_v18 = vsub.f32 %v7464_v40, %v2188_v4  ;;  %v2322_v17 = vld [vmem:[#allocation10 + $0xe0] sm:$0xff]  ;;  %v5778_v24 = vcombine.low %v2323_v47, %v2324_v57 }
0x1176   :  { %v2170_v9 = vpop.xlane.xlu0 %2169  ;;  %2526 = vmatpush1.bf16.msra.mxu0 %v5780_v58  ;;  %v5777_v62 = vcombine.high %v2321_v60, %v2322_v17  ;;  %v2318_v4 = vld [vmem:[#allocation10 + $0x60] sm:$0xff] }
0x1177   :  { %v2227_v61 = vmul.f32 %v7507_v2, %v7507_v2  ;;  %v2171_v63 = vmul.f32 0.03125, %v2170_v9  ;;  %v2190_v1 = vmul.f32 %v7521_v18, %v7521_v18  ;;  %2527 = vmatprep.subr.bf16.mxu0 %v5779_v34  ;;  %v2319_v9 = vld [vmem:[#allocation10 + $0x80] sm:$0xff] }
0x1178   :  { %v2338_v49 = vld [vmem:[#allocation10 + $0x2e0] sm:$0xff] }
0x1179   :  { %v7514_v7 = vsub.f32 %v7455_v3, %v2171_v63  ;;  %2229 = vrot.lane.b32.xlu1 %v2227_v61, %s6853_s18  ;;  %v2191_v30 = vsel %vm2109_vm2, %v2190_v1, 0.0  ;;  %v2320_v61 = vld [vmem:[#allocation10 + $0xa0] sm:$0xff]  ;;  %v5776_v63 = vcombine.low %v2321_v60, %v2322_v17  ;;  %v5793_v38 = vcombine.high %v2337_v45, %v2338_v49 }
0x117a   :  { %v2112_v5 = vpop.xlane.xlu0 %2111  ;;  %2528 = vmatpush1.bf16.msra.mxu0 %v5778_v24  ;;  %v2315_v1 = vld [vmem:[#allocation10] sm:$0xff]  ;;  %v5792_v54 = vcombine.low %v2337_v45, %v2338_v49 }
0x117b   :  { %v2173_v44 = vmul.f32 %v7514_v7, %v7514_v7  ;;  %v2114_v46 = vmul.f32 0.03125, %v2112_v5  ;;  %2529 = vmatprep.subr.bf16.mxu0 %v5777_v62  ;;  %v5774_v5 = vcombine.low %v2319_v9, %v2320_v61  ;;  %v2335_v50 = vld [vmem:[#allocation10 + $0x280] sm:$0xff] }
0x117c   :  { %v2336_v53 = vld [vmem:[#allocation10 + $0x2a0] sm:$0xff] }
0x117d   :  { %2175 = vrot.lane.b32.xlu1 %v2173_v44, %s6840_s14  ;;  %v7524_v10 = vsub.f32 %v7455_v3, %v2114_v46  ;;  %v5775_v44 = vcombine.high %v2319_v9, %v2320_v61  ;;  %v5773_v46 = vcombine.high %v2317_v6, %v2318_v4  ;;  %v5791_v47 = vcombine.high %v2335_v50, %v2336_v53  ;;  %v2333_v57 = vld [vmem:[#allocation10 + $0x240] sm:$0xff] }
0x117e   :  { %2530 = vmatpush1.bf16.msra.mxu0 %v5776_v63  ;;  %v2334_v58 = vld [vmem:[#allocation10 + $0x260] sm:$0xff]  ;;  %v5790_v34 = vcombine.low %v2335_v50, %v2336_v53 }
0x117f   :  { %v2116_v32 = vmul.f32 %v7524_v10, %v7524_v10  ;;  %2531 = vmatprep.subr.bf16.mxu0 %v5775_v44  ;;  %v5789_v60 = vcombine.high %v2333_v57, %v2334_v58  ;;  %v2331_v17 = vld [vmem:[#allocation10 + $0x200] sm:$0xff]  ;;  %v5788_v62 = vcombine.low %v2333_v57, %v2334_v58 }
0x1180   :  { %v2332_v24 = vld [vmem:[#allocation10 + $0x220] sm:$0xff] }
0x1181   :  { %v2117_v23 = vsel %vm2109_vm2, %v2116_v32, 0.0  ;;  %v5772_v32 = vcombine.low %v2317_v6, %v2318_v4  ;;  %v5787_v9 = vcombine.high %v2331_v17, %v2332_v24  ;;  %v5786_v61 = vcombine.low %v2331_v17, %v2332_v24  ;;  %v2265_v53 = vld [vmem:[#allocation2 + $0x1a] sm:$0x3] }
0x1182   :  { %2532 = vmatpush1.bf16.msra.mxu0 %v5774_v5  ;;  %v2274_v24 = vrot.slane %v2265_v53, %v7331_v11 }
0x1183   :  { %2533 = vmatprep.subr.bf16.mxu0 %v5773_v46 }
0x1186   :  { %2534 = vmatpush1.bf16.msra.mxu0 %v5772_v32 }
0x1194   :  { %2192 = vadd.xlane.f32.xlu0 %v2191_v30  ;;  %v2316_v30 = vld [vmem:[#allocation10 + $0x20] sm:$0xff] }
0x1198   :  { %2118 = vadd.xlane.f32.xlu0 %v2117_v23  ;;  %v5771_v23 = vcombine.high %v2315_v1, %v2316_v30 }
0x119a   :  { %2535 = vmatprep.subr.bf16.mxu0 %v5771_v23 }
0x11e3   :  { %v2156_v19 = vpop.permute.xlu1 %2155  ;;  %v2136_v15 = vpop.permute.xlu0 %2135 }
0x11e4   :  { %v2138_v40 = vsel %vm2109_vm2, %v2136_v15, 0.0  ;;  %v2158_v48 = vsel %vm2109_vm2, %v2156_v19, 0.0  ;;  %v2345_v19 = vld [vmem:[#allocation10 + $0x3c0] sm:$0xff] }
0x11e5   :  { %2139 = vadd.xlane.f32.xlu0 %v2138_v40  ;;  %v2346_v15 = vld [vmem:[#allocation10 + $0x3e0] sm:$0xff]  ;;  %v5770_v40 = vcombine.low %v2315_v1, %v2316_v30 }
0x11e7   :  { %v2210_v20 = vpop.permute.xlu1 %2209  ;;  %v2250_v35 = vpop.permute.xlu0 %2249  ;;  %2536 = vmatpush1.bf16.msra.mxu0 %v5770_v40 }
0x11e8   :  { %v2212_v3 = vsel %vm2109_vm2, %v2210_v20, 0.0  ;;  %v2252_v43 = vsel %vm2109_vm2, %v2250_v35, 0.0  ;;  %v5801_v20 = vcombine.high %v2345_v19, %v2346_v15  ;;  %v2341_v35 = vld [vmem:[#allocation10 + $0x340] sm:$0xff] }
0x11e9   :  { %2213 = vadd.xlane.f32.xlu1 %v2212_v3  ;;  %2159 = vadd.xlane.f32.xlu0 %v2158_v48  ;;  %v2343_v3 = vld [vmem:[#allocation10 + $0x380] sm:$0xff] }
0x11ea   :  { %v2344_v48 = vld [vmem:[#allocation10 + $0x3a0] sm:$0xff]  ;;  %2537 = vmatprep.subr.bf16.mxu0 %v5801_v20 }
0x11eb   :  { %v2230_v21 = vpop.permute.xlu1 %2229 }
0x11ec   :  { %v2232_v39 = vsel %vm2109_vm2, %v2230_v21, 0.0  ;;  %v5800_v21 = vcombine.low %v2345_v19, %v2346_v15 }
0x11ed   :  { %2233 = vadd.xlane.f32.xlu1 %v2232_v39  ;;  %v5799_v39 = vcombine.high %v2343_v3, %v2344_v48 }
0x11ee   :  { %2538 = vmatpush2.bf16.msra.mxu0 %v5800_v21 }
0x11ef   :  { %v2176_v8 = vpop.permute.xlu1 %2175  ;;  %2539 = vmatprep.subr.bf16.mxu0 %v5799_v39 }
0x11f0   :  { %v2178_v37 = vsel %vm2109_vm2, %v2176_v8, 0.0  ;;  %v2342_v8 = vld [vmem:[#allocation10 + $0x360] sm:$0xff] }
0x11f1   :  { %2179 = vadd.xlane.f32.xlu0 %v2178_v37  ;;  %2253 = vadd.xlane.f32.xlu1 %v2252_v43  ;;  %v5798_v37 = vcombine.low %v2343_v3, %v2344_v48  ;;  %v5797_v43 = vcombine.high %v2341_v35, %v2342_v8  ;;  %v5796_v16 = vcombine.low %v2341_v35, %v2342_v8 }
0x11f3   :  { %2540 = vmatpush2.bf16.msra.mxu0 %v5798_v37 }
0x11f4   :  { %2541 = vmatprep.subr.bf16.mxu0 %v5797_v43 }
0x11f7   :  { %2542 = vmatpush2.bf16.msra.mxu0 %v5796_v16 }
0x11f8   :  { %2543 = vmatprep.subr.bf16.mxu0 %v5795_v22 }
0x11fb   :  { %2544 = vmatpush2.bf16.msra.mxu0 %v5794_v36 }
0x11fc   :  { %2545 = vmatprep.subr.bf16.mxu0 %v5793_v38 }
0x11ff   :  { %2546 = vmatpush2.bf16.msra.mxu0 %v5792_v54 }
0x1200   :  { %2547 = vmatprep.subr.bf16.mxu0 %v5791_v47 }
0x1203   :  { %2548 = vmatpush2.bf16.msra.mxu0 %v5790_v34  ;;  %v2279_v34 = vld [vmem:[#allocation2 + $0x1c] sm:$0x3] }
0x1204   :  { %2549 = vmatprep.subr.bf16.mxu0 %v5789_v60 }
0x1207   :  { %2550 = vmatpush2.bf16.msra.mxu0 %v5788_v62 }
0x1208   :  { %2551 = vmatprep.subr.bf16.mxu0 %v5787_v9 }
0x120b   :  { %2552 = vmatpush2.bf16.msra.mxu0 %v5786_v61  ;;  %v2270_v61 = vrot.slane %v2265_v53, %v7090_v12 }
0x121d   :  { %v2193_v63 = vpop.xlane.xlu0 %2192 }
0x121e   :  { %v2194_v4 = vmul.f32 0.03125, %v2193_v63 }
0x1220   :  { %v2195_v30 = vadd.f32 1e-05, %v2194_v4 }
0x1221   :  { %v2119_v44 = vpop.xlane.xlu0 %2118 }
0x1222   :  { %v2120_v19 = vmul.f32 0.03125, %v2119_v44  ;;  %6500 = vrsqrt.f32 %v2195_v30  ;;  %v2284_v44 = vrot.slane %v2279_v34, %v7090_v12 }
0x1224   :  { %v2121_v21 = vadd.f32 1e-05, %v2120_v19 }
0x122f   :  { %v6501_v16 = vpop.eup %6500 }
0x1230   :  { %v2197_v57 = vmul.f32 %v6501_v16, %v7521_v18 }
0x126e   :  { %v2140_v6 = vpop.xlane.xlu0 %2139 }
0x126f   :  { %v2141_v5 = vmul.f32 0.03125, %v2140_v6 }
0x1271   :  { %v2142_v15 = vadd.f32 1e-05, %v2141_v5 }
0x1272   :  { %v2214_v46 = vpop.xlane.xlu1 %2213  ;;  %v2160_v1 = vpop.xlane.xlu0 %2159 }
0x1273   :  { %v2215_v32 = vmul.f32 0.03125, %v2214_v46  ;;  %v2161_v23 = vmul.f32 0.03125, %v2160_v1  ;;  %6502 = vrsqrt.f32 %v2142_v15 }
0x1275   :  { %v2216_v40 = vadd.f32 1e-05, %v2215_v32  ;;  %v2162_v20 = vadd.f32 1e-05, %v2161_v23 }
0x1276   :  { %v2234_v3 = vpop.xlane.xlu1 %2233 }
0x1277   :  { %v2235_v48 = vmul.f32 0.03125, %v2234_v3  ;;  %6504 = vrsqrt.f32 %v2216_v40 }
0x1278   :  { %6506 = vrsqrt.f32 %v2162_v20 }
0x1279   :  { %v2236_v39 = vadd.f32 1e-05, %v2235_v48 }
0x127a   :  { %v2254_v35 = vpop.xlane.xlu1 %2253  ;;  %v2180_v8 = vpop.xlane.xlu0 %2179 }
0x127b   :  { %6508 = vrsqrt.f32 %v2236_v39  ;;  %v2255_v37 = vmul.f32 0.03125, %v2254_v35  ;;  %v2181_v43 = vmul.f32 0.03125, %v2180_v8  ;;  %v320_v8 = vsub.s32 3, %v7087_v42 }
0x127c   :  { %6510 = vrsqrt.f32 %v2121_v21 }
0x127d   :  { %v2256_v13 = vadd.f32 1e-05, %v2255_v37  ;;  %v2182_v31 = vadd.f32 1e-05, %v2181_v43  ;;  %v316_v37 = vsub.s32 2, %v7087_v42  ;;  %v6706_v43 = vld [vmem:[#allocation2 + $0x2] sm:$0xff] }
0x127f   :  { %6512 = vrsqrt.f32 %v2256_v13  ;;  %v321_v13 = vrot.slane %v6706_v43, %v320_v8 }
0x1280   :  { %6514 = vrsqrt.f32 %v2182_v31  ;;  %v6503_v22 = vpop.eup %6502  ;;  %v317_v31 = vrot.slane %v6706_v43, %v316_v37 }
0x1281   :  { %v2144_v54 = vmul.f32 %v6503_v22, %v7485_v51 }
0x1284   :  { %v6505_v45 = vpop.eup %6504 }
0x1285   :  { %v6507_v49 = vpop.eup %6506  ;;  %v2218_v50 = vmul.f32 %v6505_v45, %v7498_v41  ;;  %v489_v45 = vadd.f32 %v7102_v26, %v321_v13 }
0x1286   :  { %v2164_v58 = vmul.f32 %v6507_v49, %v7488_v52  ;;  %v2288_v52 = vrot.slane %v2279_v34, %v7331_v11 }
0x1287   :  { %v2262_v9 = vsel %vm212_vm3, %v2197_v57, %v2218_v50  ;;  %v2349_v57 = vld [vmem:[#allocation2 + $0x1e] sm:$0x3] }
0x1288   :  { %v6509_v36 = vpop.eup %6508 }
0x1289   :  { %v6511_v38 = vpop.eup %6510  ;;  %v2238_v47 = vmul.f32 %v6509_v36, %v7507_v2  ;;  %v487_v36 = vadd.f32 %v7100_v25, %v317_v31 }
0x128a   :  { %v2123_v17 = vmul.f32 %v6511_v38, %v7524_v10 }
0x128b   :  { %v2263_v18 = vsel %vm674_vm5, %v2262_v9, %v2238_v47 }
0x128c   :  { %v6513_v60 = vpop.eup %6512  ;;  %v2259_v51 = vsel %vm212_vm3, %v2123_v17, %v2144_v54  ;;  %v2358_v17 = vrot.slane %v2349_v57, %v7331_v11 }
0x128d   :  { %v6515_v62 = vpop.eup %6514  ;;  %v2258_v41 = vmul.f32 %v6513_v60, %v7495_v59  ;;  %v2260_v63 = vsel %vm674_vm5, %v2259_v51, %v2164_v58  ;;  %v2354_v58 = vrot.slane %v2349_v57, %v7090_v12 }
0x128e   :  { %v2184_v2 = vmul.f32 %v6515_v62, %v7514_v7 }
0x128f   :  { %v2264_v10 = vsel %vm882_vm10, %v2263_v18, %v2258_v41 }
0x1290   :  { %v2278_v6 = vmul.f32 %v2274_v24, %v2264_v10  ;;  %v2261_v4 = vsel %vm882_vm10, %v2260_v63, %v2184_v2 }
0x1291   :  { %v2277_v59 = vmul.f32 %v2270_v61, %v2261_v4 }
0x1292   :  { %v2292_v5 = vadd.f32 %v2288_v52, %v2278_v6 }
0x1293   :  { %v2291_v46 = vadd.f32 %v2284_v44, %v2277_v59 }
0x1294   :  { %v2294_v1 = vmin.f32 %v2292_v5, 20.0  ;;  %vm2306_vm4 = vcmp.gt.f32.partialorder %v2292_v5, 20.0 }
0x1295   :  { %v2293_v30 = vmin.f32 %v2291_v46, 20.0  ;;  %vm2305_vm12 = vcmp.gt.f32.partialorder %v2291_v46, 20.0 }
0x1296   :  { %v2297_v32 = vmul.f32 1.442695, %v2294_v1 }
0x1297   :  { %v2295_v7 = vmul.f32 1.442695, %v2293_v30 }
0x1298   :  { %6516 = vpow2.f32 %v2297_v32 }
0x1299   :  { %6518 = vpow2.f32 %v2295_v7 }
0x12a5   :  { %v6517_v23 = vpop.eup %6516 }
0x12a6   :  { %v6519_v19 = vpop.eup %6518  ;;  %v2300_v15 = vadd.f32 1.0, %v6517_v23 }
0x12a7   :  { %v2299_v40 = vadd.f32 1.0, %v6519_v19 }
0x12a8   :  { %6520 = vlog2.f32 %v2300_v15 }
0x12a9   :  { %6522 = vlog2.f32 %v2299_v40 }
0x12b5   :  { %v6521_v20 = vpop.eup %6520 }
0x12b6   :  { %v6523_v3 = vpop.eup %6522  ;;  %v2304_v48 = vmul.f32 0.6931472, %v6521_v20 }
0x12b7   :  { %v2302_v21 = vmul.f32 0.6931472, %v6523_v3 }
0x12b8   :  { %v2308_v39 = vsel %vm2306_vm4, %v2292_v5, %v2304_v48 }
0x12b9   :  { %6524 = vtanh.f32 %v2308_v39  ;;  %v2307_v35 = vsel %vm2305_vm12, %v2291_v46, %v2302_v21 }
0x12ba   :  { %6526 = vtanh.f32 %v2307_v35 }
0x12c6   :  { %v6525_v16 = vpop.eup %6524 }
0x12c7   :  { %v6527_v22 = vpop.eup %6526  ;;  %v2312_v49 = vmul.f32 %v6525_v16, %v2292_v5 }
0x12c8   :  { %v2311_v38 = vmul.f32 %v6527_v22, %v2291_v46 }
0x12c9   :  { %v2314_v50 = vadd.f32 %v2312_v49, %v489_v45 }
0x12ca   :  { %v2313_v53 = vadd.f32 %v2311_v38, %v487_v36 }
0x12cb   :  { %v2348_v54 = vpack.c.bf16 %v2314_v50, %v2314_v50 }
0x12cc   :  { %v2347_v47 = vpack.c.bf16 %v2313_v53, %v2313_v53 }
0x12cd   :  { %2553 = vmatprep.mubr.bf16.mxu0 %v2348_v54 }
0x12ce   :  { %2554 = vmatmul.mubr.bf16.vlgmr.msra.gmra.mxu0 %v2347_v47 }
0x138e   :  { %v2555_v34 = vpop.f32.mrf.mxu0 }
0x138f   :  { %v7561_v60 = vadd.f32 %v2555_v34, %v2354_v58 }
0x1390   :  { %v2557_v24 = vpop.f32.mrf.mxu0 }
0x1391   :  { %2596 = vrot.lane.b32.xlu1 %v7561_v60, %s6853_s18  ;;  %2576 = vrot.lane.b32.xlu0 %v7561_v60, %s6854_s19  ;;  %v2558_v26 = vadd.f32 %v2557_v24, %v2358_v17  ;;  %v2562_v5 = vsel %vm2109_vm2, %v7561_v60, 0.0 }
0x1392   :  { %v2559_v25 = vpop.f32.mrf.mxu0 }
0x1393   :  { %v2636_v6 = vsel %vm2109_vm2, %v2558_v26, 0.0 }
0x1394   :  { %v2560_v62 = vpop.f32.mrf.mxu0 }
0x1395   :  { %2650 = vrot.lane.b32.xlu1 %v2558_v26, %s6854_s19  ;;  %2690 = vrot.lane.b32.xlu0 %v2558_v26, %s6840_s14 }
0x1399   :  { %2670 = vrot.lane.b32.xlu1 %v2558_v26, %s6853_s18 }
0x139d   :  { %2616 = vrot.lane.b32.xlu1 %v7561_v60, %s6840_s14 }
0x1403   :  { %v2597_v9 = vpop.permute.xlu1 %2596  ;;  %v2577_v41 = vpop.permute.xlu0 %2576 }
0x1404   :  { %v2599_v61 = vsel %vm2109_vm2, %v2597_v9, 0.0  ;;  %v2579_v51 = vsel %vm2109_vm2, %v2577_v41, 0.0 }
0x1405   :  { %2600 = vadd.xlane.f32.xlu0 %v2599_v61  ;;  %2580 = vadd.xlane.f32.xlu1 %v2579_v51 }
0x1407   :  { %v2651_v2 = vpop.permute.xlu1 %2650  ;;  %v2691_v18 = vpop.permute.xlu0 %2690 }
0x1408   :  { %v2653_v52 = vsel %vm2109_vm2, %v2651_v2, 0.0  ;;  %v2693_v63 = vsel %vm2109_vm2, %v2691_v18, 0.0 }
0x1409   :  { %2654 = vadd.xlane.f32.xlu0 %v2653_v52  ;;  %2694 = vadd.xlane.f32.xlu1 %v2693_v63  ;;  %v2881_v63 = vld [vmem:[#allocation10 + $0x1c8] sm:$0xff] }
0x140b   :  { %v2671_v10 = vpop.permute.xlu1 %2670 }
0x140c   :  { %v2673_v44 = vsel %vm2109_vm2, %v2671_v10, 0.0  ;;  %v2882_v10 = vld [vmem:[#allocation10 + $0x1e8] sm:$0xff] }
0x140d   :  { %2674 = vadd.xlane.f32.xlu0 %v2673_v44  ;;  %2637 = vadd.xlane.f32.xlu1 %v2636_v6  ;;  %v5826_v44 = vcombine.high %v2881_v63, %v2882_v10  ;;  %v5825_v6 = vcombine.low %v2881_v63, %v2882_v10 }
0x140f   :  { %v2617_v4 = vpop.permute.xlu1 %2616  ;;  %3073 = vmatprep.subr.bf16.mxu1 %v5826_v44  ;;  %v2889_v44 = vld [vmem:[#allocation10 + $0x2c8] sm:$0xff] }
0x1410   :  { %v2619_v59 = vsel %vm2109_vm2, %v2617_v4, 0.0  ;;  %3074 = vmatpush1.bf16.msra.mxu1 %v5825_v6  ;;  %v2879_v4 = vld [vmem:[#allocation10 + $0x188] sm:$0xff] }
0x1411   :  { %2620 = vadd.xlane.f32.xlu0 %v2619_v59  ;;  %v2880_v59 = vld [vmem:[#allocation10 + $0x1a8] sm:$0xff] }
0x1412   :  { %v2890_v6 = vld [vmem:[#allocation10 + $0x2e8] sm:$0xff] }
0x1415   :  { %2563 = vadd.xlane.f32.xlu0 %v2562_v5  ;;  %v2877_v5 = vld [vmem:[#allocation10 + $0x148] sm:$0xff] }
0x148e   :  { %v2581_v46 = vpop.xlane.xlu1 %2580  ;;  %v2601_v1 = vpop.xlane.xlu0 %2600 }
0x148f   :  { %v2582_v30 = vmul.f32 0.03125, %v2581_v46  ;;  %v2602_v32 = vmul.f32 0.03125, %v2601_v1  ;;  %v5823_v46 = vcombine.low %v2879_v4, %v2880_v59  ;;  %v5824_v1 = vcombine.high %v2879_v4, %v2880_v59 }
0x1490   :  { %v5834_v59 = vcombine.high %v2889_v44, %v2890_v6 }
0x1491   :  { %v7583_v7 = vsub.f32 %v7561_v60, %v2582_v30  ;;  %v7586_v23 = vsub.f32 %v7561_v60, %v2602_v32  ;;  %v2878_v30 = vld [vmem:[#allocation10 + $0x168] sm:$0xff]  ;;  %3075 = vmatprep.subr.bf16.mxu1 %v5824_v1  ;;  %v5833_v1 = vcombine.low %v2889_v44, %v2890_v6 }
0x1492   :  { %v2695_v19 = vpop.xlane.xlu1 %2694  ;;  %v2655_v15 = vpop.xlane.xlu0 %2654  ;;  %v5822_v32 = vcombine.high %v2877_v5, %v2878_v30  ;;  %3076 = vmatpush1.bf16.msra.mxu1 %v5823_v46  ;;  %v2888_v46 = vld [vmem:[#allocation10 + $0x2a8] sm:$0xff] }
0x1493   :  { %v2584_v40 = vmul.f32 %v7583_v7, %v7583_v7  ;;  %v2604_v20 = vmul.f32 %v7586_v23, %v7586_v23  ;;  %v2696_v3 = vmul.f32 0.03125, %v2695_v19  ;;  %v2656_v48 = vmul.f32 0.03125, %v2655_v15  ;;  %v2875_v19 = vld [vmem:[#allocation10 + $0x108] sm:$0xff] }
0x1494   :  { %v2876_v15 = vld [vmem:[#allocation10 + $0x128] sm:$0xff]  ;;  %3077 = vmatprep.subr.bf16.mxu1 %v5822_v32 }
0x1495   :  { %v7592_v21 = vsub.f32 %v2558_v26, %v2696_v3  ;;  %v7594_v39 = vsub.f32 %v2558_v26, %v2656_v48  ;;  %2606 = vrot.lane.b32.xlu1 %v2604_v20, %s6853_s18  ;;  %2586 = vrot.lane.b32.xlu0 %v2584_v40, %s6854_s19  ;;  %v5821_v40 = vcombine.low %v2877_v5, %v2878_v30  ;;  %v2873_v3 = vld [vmem:[#allocation10 + $0xc8] sm:$0xff] }
0x1496   :  { %v2675_v35 = vpop.xlane.xlu0 %2674  ;;  %v2638_v36 = vpop.xlane.xlu1 %2637  ;;  %v5820_v20 = vcombine.high %v2875_v19, %v2876_v15  ;;  %v2874_v48 = vld [vmem:[#allocation10 + $0xe8] sm:$0xff] }
0x1497   :  { %v2658_v8 = vmul.f32 %v7594_v39, %v7594_v39  ;;  %v2676_v37 = vmul.f32 0.03125, %v2675_v35  ;;  %v2698_v43 = vmul.f32 %v7592_v21, %v7592_v21  ;;  %v2639_v38 = vmul.f32 0.03125, %v2638_v36  ;;  %3078 = vmatpush1.bf16.msra.mxu1 %v5821_v40  ;;  %v2887_v5 = vld [vmem:[#allocation10 + $0x288] sm:$0xff] }
0x1498   :  { %v5819_v35 = vcombine.low %v2875_v19, %v2876_v15  ;;  %3079 = vmatprep.subr.bf16.mxu1 %v5820_v20  ;;  %v5832_v30 = vcombine.high %v2887_v5, %v2888_v46  ;;  %v2885_v32 = vld [vmem:[#allocation10 + $0x248] sm:$0xff]  ;;  %v5831_v15 = vcombine.low %v2887_v5, %v2888_v46 }
0x1499   :  { %v7602_v13 = vsub.f32 %v2558_v26, %v2676_v37  ;;  %2660 = vrot.lane.b32.xlu1 %v2658_v8, %s6854_s19  ;;  %2700 = vrot.lane.b32.xlu0 %v2698_v43, %s6840_s14  ;;  %v7615_v53 = vsub.f32 %v2558_v26, %v2639_v38  ;;  %v5818_v8 = vcombine.high %v2873_v3, %v2874_v48  ;;  %v2871_v37 = vld [vmem:[#allocation10 + $0x88] sm:$0xff] }
0x149a   :  { %v2621_v31 = vpop.xlane.xlu0 %2620  ;;  %v2872_v43 = vld [vmem:[#allocation10 + $0xa8] sm:$0xff] }
0x149b   :  { %v2678_v16 = vmul.f32 %v7602_v13, %v7602_v13  ;;  %v2622_v22 = vmul.f32 0.03125, %v2621_v31  ;;  %v2641_v57 = vmul.f32 %v7615_v53, %v7615_v53  ;;  %3080 = vmatpush1.bf16.msra.mxu1 %v5819_v35  ;;  %v5817_v31 = vcombine.low %v2873_v3, %v2874_v48  ;;  %v2886_v19 = vld [vmem:[#allocation10 + $0x268] sm:$0xff] }
0x149c   :  { %3081 = vmatprep.subr.bf16.mxu1 %v5818_v8  ;;  %v5815_v36 = vcombine.low %v2871_v37, %v2872_v43  ;;  %v5830_v40 = vcombine.high %v2885_v32, %v2886_v19  ;;  %v2883_v20 = vld [vmem:[#allocation10 + $0x208] sm:$0xff]  ;;  %v5829_v48 = vcombine.low %v2885_v32, %v2886_v19 }
0x149d   :  { %v7609_v45 = vsub.f32 %v7561_v60, %v2622_v22  ;;  %2680 = vrot.lane.b32.xlu1 %v2678_v16, %s6853_s18  ;;  %v2642_v58 = vsel %vm2109_vm2, %v2641_v57, 0.0  ;;  %v5816_v16 = vcombine.high %v2871_v37, %v2872_v43  ;;  %v2869_v22 = vld [vmem:[#allocation10 + $0x48] sm:$0xff] }
0x149e   :  { %v2564_v50 = vpop.xlane.xlu0 %2563  ;;  %v2884_v3 = vld [vmem:[#allocation10 + $0x228] sm:$0xff] }
0x149f   :  { %v2624_v49 = vmul.f32 %v7609_v45, %v7609_v45  ;;  %v2565_v54 = vmul.f32 0.03125, %v2564_v50  ;;  %3082 = vmatpush1.bf16.msra.mxu1 %v5817_v31  ;;  %v2867_v50 = vld [vmem:[#allocation10 + $0x8] sm:$0xff]  ;;  %v5828_v35 = vcombine.high %v2883_v20, %v2884_v3  ;;  %v5827_v8 = vcombine.low %v2883_v20, %v2884_v3 }
0x14a0   :  { %3083 = vmatprep.subr.bf16.mxu1 %v5816_v16  ;;  %v2730_v32 = vld [vmem:[#allocation2 + $0x22] sm:$0x3] }
0x14a1   :  { %2626 = vrot.lane.b32.xlu1 %v2624_v49, %s6840_s14  ;;  %v7618_v47 = vsub.f32 %v7561_v60, %v2565_v54  ;;  %v2870_v49 = vld [vmem:[#allocation10 + $0x68] sm:$0xff] }
0x14a2   :  { %v5814_v38 = vcombine.high %v2869_v22, %v2870_v49  ;;  %v2868_v54 = vld [vmem:[#allocation10 + $0x28] sm:$0xff]  ;;  %v5813_v57 = vcombine.low %v2869_v22, %v2870_v49 }
0x14a3   :  { %v2567_v34 = vmul.f32 %v7618_v47, %v7618_v47  ;;  %3084 = vmatpush1.bf16.msra.mxu1 %v5815_v36 }
0x14a4   :  { %3085 = vmatprep.subr.bf16.mxu1 %v5814_v38 }
0x14a5   :  { %v2568_v17 = vsel %vm2109_vm2, %v2567_v34, 0.0  ;;  %v2897_v34 = vld [vmem:[#allocation10 + $0x3c8] sm:$0xff] }
0x14a7   :  { %3086 = vmatpush1.bf16.msra.mxu1 %v5813_v57 }
0x14b8   :  { %2643 = vadd.xlane.f32.xlu0 %v2642_v58  ;;  %v5812_v58 = vcombine.high %v2867_v50, %v2868_v54 }
0x14ba   :  { %3087 = vmatprep.subr.bf16.mxu1 %v5812_v58 }
0x14bc   :  { %2569 = vadd.xlane.f32.xlu0 %v2568_v17  ;;  %v2898_v17 = vld [vmem:[#allocation10 + $0x3e8] sm:$0xff] }
0x1507   :  { %v2607_v24 = vpop.permute.xlu1 %2606  ;;  %v2587_v25 = vpop.permute.xlu0 %2586 }
0x1508   :  { %v2589_v26 = vsel %vm2109_vm2, %v2587_v25, 0.0  ;;  %v2609_v9 = vsel %vm2109_vm2, %v2607_v24, 0.0  ;;  %v5811_v24 = vcombine.low %v2867_v50, %v2868_v54  ;;  %v5842_v25 = vcombine.high %v2897_v34, %v2898_v17 }
0x1509   :  { %2590 = vadd.xlane.f32.xlu0 %v2589_v26  ;;  %v2895_v26 = vld [vmem:[#allocation10 + $0x388] sm:$0xff] }
0x150a   :  { %3088 = vmatpush1.bf16.msra.mxu1 %v5811_v24 }
0x150b   :  { %v2661_v62 = vpop.permute.xlu1 %2660  ;;  %v2701_v51 = vpop.permute.xlu0 %2700  ;;  %3089 = vmatprep.subr.bf16.mxu1 %v5842_v25 }
0x150c   :  { %v2663_v60 = vsel %vm2109_vm2, %v2661_v62, 0.0  ;;  %v2703_v52 = vsel %vm2109_vm2, %v2701_v51, 0.0  ;;  %v2896_v62 = vld [vmem:[#allocation10 + $0x3a8] sm:$0xff] }
0x150d   :  { %2664 = vadd.xlane.f32.xlu1 %v2663_v60  ;;  %2610 = vadd.xlane.f32.xlu0 %v2609_v9  ;;  %v5841_v60 = vcombine.low %v2897_v34, %v2898_v17  ;;  %v5840_v9 = vcombine.high %v2895_v26, %v2896_v62  ;;  %v5839_v51 = vcombine.low %v2895_v26, %v2896_v62 }
0x150f   :  { %v2681_v41 = vpop.permute.xlu1 %2680  ;;  %3090 = vmatpush2.bf16.msra.mxu1 %v5841_v60 }
0x1510   :  { %v2683_v61 = vsel %vm2109_vm2, %v2681_v41, 0.0  ;;  %v2893_v41 = vld [vmem:[#allocation10 + $0x348] sm:$0xff]  ;;  %3091 = vmatprep.subr.bf16.mxu1 %v5840_v9 }
0x1511   :  { %2684 = vadd.xlane.f32.xlu1 %v2683_v61  ;;  %v2894_v61 = vld [vmem:[#allocation10 + $0x368] sm:$0xff] }
0x1512   :  { %v5837_v63 = vcombine.low %v2893_v41, %v2894_v61 }
0x1513   :  { %v2627_v2 = vpop.permute.xlu1 %2626  ;;  %3092 = vmatpush2.bf16.msra.mxu1 %v5839_v51 }
0x1514   :  { %v2629_v18 = vsel %vm2109_vm2, %v2627_v2, 0.0  ;;  %v5838_v2 = vcombine.high %v2893_v41, %v2894_v61 }
0x1515   :  { %2630 = vadd.xlane.f32.xlu0 %v2629_v18  ;;  %2704 = vadd.xlane.f32.xlu1 %v2703_v52  ;;  %v2891_v18 = vld [vmem:[#allocation10 + $0x308] sm:$0xff] }
0x1516   :  { %v2892_v52 = vld [vmem:[#allocation10 + $0x328] sm:$0xff]  ;;  %3093 = vmatprep.subr.bf16.mxu1 %v5838_v2 }
0x1517   :  { %v5836_v10 = vcombine.high %v2891_v18, %v2892_v52  ;;  %3094 = vmatpush2.bf16.msra.mxu1 %v5837_v63  ;;  %v5835_v4 = vcombine.low %v2891_v18, %v2892_v52 }
0x1519   :  { %3095 = vmatprep.subr.bf16.mxu1 %v5836_v10 }
0x151b   :  { %3096 = vmatpush2.bf16.msra.mxu1 %v5835_v4 }
0x151c   :  { %3097 = vmatprep.subr.bf16.mxu1 %v5834_v59  ;;  %v2716_v59 = vld [vmem:[#allocation2 + $0x20] sm:$0x3] }
0x151f   :  { %3098 = vmatpush2.bf16.msra.mxu1 %v5833_v1 }
0x1520   :  { %3099 = vmatprep.subr.bf16.mxu1 %v5832_v30 }
0x1523   :  { %3100 = vmatpush2.bf16.msra.mxu1 %v5831_v15 }
0x1524   :  { %3101 = vmatprep.subr.bf16.mxu1 %v5830_v40  ;;  %v2725_v40 = vrot.slane %v2716_v59, %v7331_v11 }
0x1527   :  { %3102 = vmatpush2.bf16.msra.mxu1 %v5829_v48  ;;  %v2721_v48 = vrot.slane %v2716_v59, %v7090_v12 }
0x1528   :  { %3103 = vmatprep.subr.bf16.mxu1 %v5828_v35 }
0x152b   :  { %3104 = vmatpush2.bf16.msra.mxu1 %v5827_v8  ;;  %v2735_v8 = vrot.slane %v2730_v32, %v7090_v12 }
0x1541   :  { %v2644_v37 = vpop.xlane.xlu0 %2643 }
0x1542   :  { %v2645_v16 = vmul.f32 0.03125, %v2644_v37 }
0x1544   :  { %v2646_v38 = vadd.f32 1e-05, %v2645_v16 }
0x1545   :  { %v2570_v43 = vpop.xlane.xlu0 %2569 }
0x1546   :  { %v2571_v57 = vmul.f32 0.03125, %v2570_v43  ;;  %6528 = vrsqrt.f32 %v2646_v38 }
0x1548   :  { %v2572_v26 = vadd.f32 1e-05, %v2571_v57 }
0x1553   :  { %v6529_v18 = vpop.eup %6528 }
0x1554   :  { %v2648_v1 = vmul.f32 %v6529_v18, %v7615_v53 }
0x1592   :  { %v2591_v31 = vpop.xlane.xlu0 %2590 }
0x1593   :  { %v2592_v22 = vmul.f32 0.03125, %v2591_v31 }
0x1595   :  { %v2593_v58 = vadd.f32 1e-05, %v2592_v22 }
0x1596   :  { %v2665_v49 = vpop.xlane.xlu1 %2664  ;;  %v2611_v36 = vpop.xlane.xlu0 %2610 }
0x1597   :  { %v2666_v50 = vmul.f32 0.03125, %v2665_v49  ;;  %v2612_v54 = vmul.f32 0.03125, %v2611_v36  ;;  %6530 = vrsqrt.f32 %v2593_v58 }
0x1599   :  { %v2667_v34 = vadd.f32 1e-05, %v2666_v50  ;;  %v2613_v17 = vadd.f32 1e-05, %v2612_v54 }
0x159a   :  { %v2685_v24 = vpop.xlane.xlu1 %2684 }
0x159b   :  { %v2686_v25 = vmul.f32 0.03125, %v2685_v24  ;;  %6532 = vrsqrt.f32 %v2667_v34 }
0x159c   :  { %6534 = vrsqrt.f32 %v2613_v17 }
0x159d   :  { %v2687_v62 = vadd.f32 1e-05, %v2686_v25 }
0x159e   :  { %v2705_v60 = vpop.xlane.xlu1 %2704  ;;  %v2631_v9 = vpop.xlane.xlu0 %2630 }
0x159f   :  { %6536 = vrsqrt.f32 %v2687_v62  ;;  %v2706_v41 = vmul.f32 0.03125, %v2705_v60  ;;  %v2632_v61 = vmul.f32 0.03125, %v2631_v9  ;;  %v2772_v62 = vld [vmem:[#allocation2 + $0x24] sm:$0x3] }
0x15a0   :  { %6538 = vrsqrt.f32 %v2572_v26  ;;  %v2781_v60 = vrot.slane %v2772_v62, %v7331_v11  ;;  %v2777_v9 = vrot.slane %v2772_v62, %v7090_v12 }
0x15a1   :  { %v2707_v51 = vadd.f32 1e-05, %v2706_v41  ;;  %v2633_v2 = vadd.f32 1e-05, %v2632_v61 }
0x15a2   :  { %v2859_v18 = vadd.f32 %v7453_v14, %v2777_v9 }
0x15a3   :  { %6540 = vrsqrt.f32 %v2707_v51  ;;  %v2861_v51 = vadd.f32 %v7458_v33, %v2781_v60 }
0x15a4   :  { %6542 = vrsqrt.f32 %v2633_v2  ;;  %v6531_v52 = vpop.eup %6530 }
0x15a5   :  { %v2595_v5 = vmul.f32 %v6531_v52, %v7583_v7 }
0x15a8   :  { %v6533_v63 = vpop.eup %6532 }
0x15a9   :  { %v6535_v10 = vpop.eup %6534  ;;  %v2669_v4 = vmul.f32 %v6533_v63, %v7594_v39 }
0x15aa   :  { %v2615_v30 = vmul.f32 %v6535_v10, %v7586_v23  ;;  %v2739_v23 = vrot.slane %v2730_v32, %v7331_v11 }
0x15ab   :  { %v2713_v3 = vsel %vm212_vm3, %v2648_v1, %v2669_v4  ;;  %v2901_v4 = vld [vmem:[#allocation2 + $0x26] sm:$0x3] }
0x15ac   :  { %v6537_v44 = vpop.eup %6536  ;;  %v2906_v59 = vrot.slane %v2901_v4, %v7090_v12  ;;  %v2910_v14 = vrot.slane %v2901_v4, %v7331_v11 }
0x15ad   :  { %v6539_v6 = vpop.eup %6538  ;;  %v2689_v46 = vmul.f32 %v6537_v44, %v7602_v13 }
0x15ae   :  { %v2574_v15 = vmul.f32 %v6539_v6, %v7618_v47 }
0x15af   :  { %v2714_v53 = vsel %vm674_vm5, %v2713_v3, %v2689_v46 }
0x15b0   :  { %v6541_v19 = vpop.eup %6540  ;;  %v2710_v7 = vsel %vm212_vm3, %v2574_v15, %v2595_v5 }
0x15b1   :  { %v6543_v20 = vpop.eup %6542  ;;  %v2709_v39 = vmul.f32 %v6541_v19, %v7592_v21  ;;  %v2711_v35 = vsel %vm674_vm5, %v2710_v7, %v2615_v30 }
0x15b2   :  { %v2635_v13 = vmul.f32 %v6543_v20, %v7609_v45 }
0x15b3   :  { %v2715_v47 = vsel %vm882_vm10, %v2714_v53, %v2709_v39 }
0x15b4   :  { %v2712_v37 = vsel %vm882_vm10, %v2711_v35, %v2635_v13  ;;  %v2729_v43 = vmul.f32 %v2725_v40, %v2715_v47 }
0x15b5   :  { %v2728_v21 = vmul.f32 %v2721_v48, %v2712_v37 }
0x15b6   :  { %v2743_v31 = vadd.f32 %v2739_v23, %v2729_v43 }
0x15b7   :  { %v2742_v16 = vadd.f32 %v2735_v8, %v2728_v21 }
0x15b8   :  { %v2745_v22 = vmin.f32 %v2743_v31, 20.0  ;;  %vm2757_vm13 = vcmp.gt.f32.partialorder %v2743_v31, 20.0 }
0x15b9   :  { %v2744_v49 = vmin.f32 %v2742_v16, 20.0  ;;  %vm2756_vm14 = vcmp.gt.f32.partialorder %v2742_v16, 20.0 }
0x15ba   :  { %v2748_v36 = vmul.f32 1.442695, %v2745_v22 }
0x15bb   :  { %v2746_v45 = vmul.f32 1.442695, %v2744_v49 }
0x15bc   :  { %6544 = vpow2.f32 %v2748_v36 }
0x15bd   :  { %6546 = vpow2.f32 %v2746_v45 }
0x15c9   :  { %v6545_v38 = vpop.eup %6544 }
0x15ca   :  { %v6547_v50 = vpop.eup %6546  ;;  %v2751_v54 = vadd.f32 1.0, %v6545_v38 }
0x15cb   :  { %v2750_v57 = vadd.f32 1.0, %v6547_v50 }
0x15cc   :  { %6548 = vlog2.f32 %v2751_v54 }
0x15cd   :  { %6550 = vlog2.f32 %v2750_v57 }
0x15d9   :  { %v6549_v58 = vpop.eup %6548 }
0x15da   :  { %v6551_v34 = vpop.eup %6550  ;;  %v2755_v17 = vmul.f32 0.6931472, %v6549_v58 }
0x15db   :  { %v2753_v24 = vmul.f32 0.6931472, %v6551_v34 }
0x15dc   :  { %v2759_v25 = vsel %vm2757_vm13, %v2743_v31, %v2755_v17 }
0x15dd   :  { %6552 = vtanh.f32 %v2759_v25  ;;  %v2758_v26 = vsel %vm2756_vm14, %v2742_v16, %v2753_v24  ;;  %vm4968_vm14 = vcmask 195584  }
0x15de   :  { %6554 = vtanh.f32 %v2758_v26 }
0x15ea   :  { %v6553_v41 = vpop.eup %6552 }
0x15eb   :  { %v6555_v61 = vpop.eup %6554  ;;  %v2763_v2 = vmul.f32 %v6553_v41, %v2743_v31 }
0x15ec   :  { %v2762_v52 = vmul.f32 %v6555_v61, %v2742_v16 }
0x15ed   :  { %v7654_v63 = vadd.f32 %v2861_v51, %v2763_v2 }
0x15ee   :  { %v7656_v10 = vadd.f32 %v2859_v18, %v2762_v52 }
0x15ef   :  { %v2900_v44 = vpack.c.bf16 %v7654_v63, %v7654_v63 }
0x15f0   :  { %v2899_v6 = vpack.c.bf16 %v7656_v10, %v7656_v10 }
0x15f1   :  { %3105 = vmatprep.mubr.bf16.mxu1 %v2900_v44 }
0x15f2   :  { %3106 = vmatmul.mubr.bf16.vlgmr.msra.gmra.mxu1 %v2899_v6 }
0x16b2   :  { %v3107_v33 = vpop.f32.mrf.mxu1 }
0x16b3   :  { %v7663_v5 = vadd.f32 %v3107_v33, %v2906_v59 }
0x16b4   :  { %v3109_v46 = vpop.f32.mrf.mxu1 }
0x16b5   :  { %3148 = vrot.lane.b32.xlu1 %v7663_v5, %s6853_s18  ;;  %3128 = vrot.lane.b32.xlu0 %v7663_v5, %s6854_s19  ;;  %v3110_v30 = vadd.f32 %v3109_v46, %v2910_v14  ;;  %v3114_v8 = vsel %vm2109_vm2, %v7663_v5, 0.0 }
0x16b6   :  { %v3111_v1 = vpop.f32.mrf.mxu1 }
0x16b7   :  { %v3188_v23 = vsel %vm2109_vm2, %v3110_v30, 0.0 }
0x16b8   :  { %v3112_v32 = vpop.f32.mrf.mxu1 }
0x16b9   :  { %3202 = vrot.lane.b32.xlu1 %v3110_v30, %s6854_s19  ;;  %3242 = vrot.lane.b32.xlu0 %v3110_v30, %s6840_s14 }
0x16bd   :  { %3222 = vrot.lane.b32.xlu1 %v3110_v30, %s6853_s18 }
0x16c1   :  { %3168 = vrot.lane.b32.xlu1 %v7663_v5, %s6840_s14 }
0x1727   :  { %v3149_v19 = vpop.permute.xlu1 %3148  ;;  %v3129_v15 = vpop.permute.xlu0 %3128 }
0x1728   :  { %v3151_v40 = vsel %vm2109_vm2, %v3149_v19, 0.0  ;;  %v3131_v20 = vsel %vm2109_vm2, %v3129_v15, 0.0 }
0x1729   :  { %3152 = vadd.xlane.f32.xlu0 %v3151_v40  ;;  %3132 = vadd.xlane.f32.xlu1 %v3131_v20 }
0x172b   :  { %v3203_v3 = vpop.permute.xlu1 %3202  ;;  %v3243_v39 = vpop.permute.xlu0 %3242 }
0x172c   :  { %v3205_v48 = vsel %vm2109_vm2, %v3203_v3, 0.0  ;;  %v3245_v7 = vsel %vm2109_vm2, %v3243_v39, 0.0 }
0x172d   :  { %3206 = vadd.xlane.f32.xlu0 %v3205_v48  ;;  %3246 = vadd.xlane.f32.xlu1 %v3245_v7  ;;  %v3332_v7 = vld [vmem:[#allocation10 + $0x1d0] sm:$0xff] }
0x172f   :  { %v3223_v13 = vpop.permute.xlu1 %3222 }
0x1730   :  { %v3225_v53 = vsel %vm2109_vm2, %v3223_v13, 0.0  ;;  %v3333_v13 = vld [vmem:[#allocation10 + $0x1f0] sm:$0xff] }
0x1731   :  { %3226 = vadd.xlane.f32.xlu0 %v3225_v53  ;;  %3189 = vadd.xlane.f32.xlu1 %v3188_v23  ;;  %v5858_v53 = vcombine.high %v3332_v7, %v3333_v13  ;;  %v5857_v23 = vcombine.low %v3332_v7, %v3333_v13 }
0x1733   :  { %v3169_v35 = vpop.permute.xlu1 %3168  ;;  %3524 = vmatprep.subr.bf16.mxu0 %v5858_v53  ;;  %v3340_v53 = vld [vmem:[#allocation10 + $0x2d0] sm:$0xff] }
0x1734   :  { %v3171_v47 = vsel %vm2109_vm2, %v3169_v35, 0.0  ;;  %v3330_v35 = vld [vmem:[#allocation10 + $0x190] sm:$0xff]  ;;  %3525 = vmatpush1.bf16.msra.mxu0 %v5857_v23 }
0x1735   :  { %3172 = vadd.xlane.f32.xlu0 %v3171_v47  ;;  %v3331_v47 = vld [vmem:[#allocation10 + $0x1b0] sm:$0xff] }
0x1736   :  { %v3341_v23 = vld [vmem:[#allocation10 + $0x2f0] sm:$0xff] }
0x1739   :  { %3115 = vadd.xlane.f32.xlu0 %v3114_v8  ;;  %v3328_v8 = vld [vmem:[#allocation10 + $0x150] sm:$0xff] }
0x17b2   :  { %v3133_v37 = vpop.xlane.xlu1 %3132  ;;  %v3153_v43 = vpop.xlane.xlu0 %3152 }
0x17b3   :  { %v3134_v21 = vmul.f32 0.03125, %v3133_v37  ;;  %v3154_v31 = vmul.f32 0.03125, %v3153_v43  ;;  %v5856_v37 = vcombine.high %v3330_v35, %v3331_v47  ;;  %v3329_v43 = vld [vmem:[#allocation10 + $0x170] sm:$0xff] }
0x17b5   :  { %v7685_v16 = vsub.f32 %v7663_v5, %v3134_v21  ;;  %v7688_v22 = vsub.f32 %v7663_v5, %v3154_v31  ;;  %v5855_v21 = vcombine.low %v3330_v35, %v3331_v47  ;;  %3526 = vmatprep.subr.bf16.mxu0 %v5856_v37  ;;  %v5854_v31 = vcombine.high %v3328_v8, %v3329_v43  ;;  %v3339_v37 = vld [vmem:[#allocation10 + $0x2b0] sm:$0xff] }
0x17b6   :  { %v3247_v49 = vpop.xlane.xlu1 %3246  ;;  %v3207_v36 = vpop.xlane.xlu0 %3206  ;;  %v5866_v47 = vcombine.high %v3340_v53, %v3341_v23 }
0x17b7   :  { %v3136_v45 = vmul.f32 %v7685_v16, %v7685_v16  ;;  %v3156_v38 = vmul.f32 %v7688_v22, %v7688_v22  ;;  %v3248_v50 = vmul.f32 0.03125, %v3247_v49  ;;  %v3208_v54 = vmul.f32 0.03125, %v3207_v36  ;;  %v3326_v49 = vld [vmem:[#allocation10 + $0x110] sm:$0xff]  ;;  %3527 = vmatpush1.bf16.msra.mxu0 %v5855_v21 }
0x17b8   :  { %v3327_v36 = vld [vmem:[#allocation10 + $0x130] sm:$0xff]  ;;  %3528 = vmatprep.subr.bf16.mxu0 %v5854_v31 }
0x17b9   :  { %v7694_v57 = vsub.f32 %v3110_v30, %v3248_v50  ;;  %v7696_v58 = vsub.f32 %v3110_v30, %v3208_v54  ;;  %3158 = vrot.lane.b32.xlu1 %v3156_v38, %s6853_s18  ;;  %3138 = vrot.lane.b32.xlu0 %v3136_v45, %s6854_s19  ;;  %v5853_v45 = vcombine.low %v3328_v8, %v3329_v43  ;;  %v3324_v50 = vld [vmem:[#allocation10 + $0xd0] sm:$0xff] }
0x17ba   :  { %v3227_v34 = vpop.xlane.xlu0 %3226  ;;  %v3190_v51 = vpop.xlane.xlu1 %3189  ;;  %v5852_v38 = vcombine.high %v3326_v49, %v3327_v36  ;;  %v3325_v54 = vld [vmem:[#allocation10 + $0xf0] sm:$0xff]  ;;  %v5865_v43 = vcombine.low %v3340_v53, %v3341_v23 }
0x17bb   :  { %v3210_v17 = vmul.f32 %v7696_v58, %v7696_v58  ;;  %v3228_v24 = vmul.f32 0.03125, %v3227_v34  ;;  %v3250_v25 = vmul.f32 %v7694_v57, %v7694_v57  ;;  %v3191_v2 = vmul.f32 0.03125, %v3190_v51  ;;  %3529 = vmatpush1.bf16.msra.mxu0 %v5853_v45  ;;  %v3338_v8 = vld [vmem:[#allocation10 + $0x290] sm:$0xff] }
0x17bc   :  { %v5851_v34 = vcombine.low %v3326_v49, %v3327_v36  ;;  %3530 = vmatprep.subr.bf16.mxu0 %v5852_v38  ;;  %v5864_v21 = vcombine.high %v3338_v8, %v3339_v37  ;;  %v3336_v31 = vld [vmem:[#allocation10 + $0x250] sm:$0xff]  ;;  %v5863_v36 = vcombine.low %v3338_v8, %v3339_v37 }
0x17bd   :  { %v7704_v26 = vsub.f32 %v3110_v30, %v3228_v24  ;;  %3212 = vrot.lane.b32.xlu1 %v3210_v17, %s6854_s19  ;;  %3252 = vrot.lane.b32.xlu0 %v3250_v25, %s6840_s14  ;;  %v7717_v52 = vsub.f32 %v3110_v30, %v3191_v2  ;;  %v5850_v17 = vcombine.high %v3324_v50, %v3325_v54  ;;  %v3322_v24 = vld [vmem:[#allocation10 + $0x90] sm:$0xff] }
0x17be   :  { %v3173_v62 = vpop.xlane.xlu0 %3172  ;;  %v3323_v25 = vld [vmem:[#allocation10 + $0xb0] sm:$0xff] }
0x17bf   :  { %v3230_v60 = vmul.f32 %v7704_v26, %v7704_v26  ;;  %v3174_v9 = vmul.f32 0.03125, %v3173_v62  ;;  %v3193_v4 = vmul.f32 %v7717_v52, %v7717_v52  ;;  %3531 = vmatpush1.bf16.msra.mxu0 %v5851_v34  ;;  %v5849_v62 = vcombine.low %v3324_v50, %v3325_v54  ;;  %v3337_v49 = vld [vmem:[#allocation10 + $0x270] sm:$0xff] }
0x17c0   :  { %3532 = vmatprep.subr.bf16.mxu0 %v5850_v17  ;;  %v5847_v51 = vcombine.low %v3322_v24, %v3323_v25  ;;  %v5862_v45 = vcombine.high %v3336_v31, %v3337_v49  ;;  %v3334_v38 = vld [vmem:[#allocation10 + $0x210] sm:$0xff]  ;;  %v5861_v54 = vcombine.low %v3336_v31, %v3337_v49 }
0x17c1   :  { %v7711_v41 = vsub.f32 %v7663_v5, %v3174_v9  ;;  %3232 = vrot.lane.b32.xlu1 %v3230_v60, %s6853_s18  ;;  %v3194_v59 = vsel %vm2109_vm2, %v3193_v4, 0.0  ;;  %v5848_v60 = vcombine.high %v3322_v24, %v3323_v25  ;;  %v3320_v9 = vld [vmem:[#allocation10 + $0x50] sm:$0xff] }
0x17c2   :  { %v3116_v18 = vpop.xlane.xlu0 %3115  ;;  %v3335_v50 = vld [vmem:[#allocation10 + $0x230] sm:$0xff] }
0x17c3   :  { %v3176_v61 = vmul.f32 %v7711_v41, %v7711_v41  ;;  %v3117_v44 = vmul.f32 0.03125, %v3116_v18  ;;  %3533 = vmatpush1.bf16.msra.mxu0 %v5849_v62  ;;  %v3318_v18 = vld [vmem:[#allocation10 + $0x10] sm:$0xff]  ;;  %v5860_v34 = vcombine.high %v3334_v38, %v3335_v50  ;;  %v5859_v17 = vcombine.low %v3334_v38, %v3335_v50 }
0x17c4   :  { %3534 = vmatprep.subr.bf16.mxu0 %v5848_v60  ;;  %v3282_v31 = vld [vmem:[#allocation2 + $0x2a] sm:$0x3] }
0x17c5   :  { %3178 = vrot.lane.b32.xlu1 %v3176_v61, %s6840_s14  ;;  %v7720_v6 = vsub.f32 %v7663_v5, %v3117_v44  ;;  %v3321_v61 = vld [vmem:[#allocation10 + $0x70] sm:$0xff] }
0x17c6   :  { %v5846_v2 = vcombine.high %v3320_v9, %v3321_v61  ;;  %v3319_v44 = vld [vmem:[#allocation10 + $0x30] sm:$0xff]  ;;  %v5845_v4 = vcombine.low %v3320_v9, %v3321_v61 }
0x17c7   :  { %v3119_v33 = vmul.f32 %v7720_v6, %v7720_v6  ;;  %3535 = vmatpush1.bf16.msra.mxu0 %v5847_v51 }
0x17c8   :  { %3536 = vmatprep.subr.bf16.mxu0 %v5846_v2 }
0x17c9   :  { %v3120_v14 = vsel %vm2109_vm2, %v3119_v33, 0.0  ;;  %v3348_v33 = vld [vmem:[#allocation10 + $0x3d0] sm:$0xff] }
0x17cb   :  { %3537 = vmatpush1.bf16.msra.mxu0 %v5845_v4 }
0x17dc   :  { %3195 = vadd.xlane.f32.xlu0 %v3194_v59  ;;  %v5844_v59 = vcombine.high %v3318_v18, %v3319_v44 }
0x17de   :  { %3538 = vmatprep.subr.bf16.mxu0 %v5844_v59 }
0x17e0   :  { %3121 = vadd.xlane.f32.xlu0 %v3120_v14  ;;  %v3349_v14 = vld [vmem:[#allocation10 + $0x3f0] sm:$0xff] }
0x182b   :  { %v3159_v46 = vpop.permute.xlu1 %3158  ;;  %v3139_v1 = vpop.permute.xlu0 %3138 }
0x182c   :  { %v3141_v30 = vsel %vm2109_vm2, %v3139_v1, 0.0  ;;  %v3161_v19 = vsel %vm2109_vm2, %v3159_v46, 0.0  ;;  %v5843_v46 = vcombine.low %v3318_v18, %v3319_v44  ;;  %v5874_v1 = vcombine.high %v3348_v33, %v3349_v14 }
0x182d   :  { %3142 = vadd.xlane.f32.xlu0 %v3141_v30  ;;  %v3346_v30 = vld [vmem:[#allocation10 + $0x390] sm:$0xff] }
0x182e   :  { %3539 = vmatpush1.bf16.msra.mxu0 %v5843_v46 }
0x182f   :  { %v3213_v32 = vpop.permute.xlu1 %3212  ;;  %v3253_v20 = vpop.permute.xlu0 %3252  ;;  %3540 = vmatprep.subr.bf16.mxu0 %v5874_v1 }
0x1830   :  { %v3215_v5 = vsel %vm2109_vm2, %v3213_v32, 0.0  ;;  %v3255_v48 = vsel %vm2109_vm2, %v3253_v20, 0.0  ;;  %v3347_v32 = vld [vmem:[#allocation10 + $0x3b0] sm:$0xff] }
0x1831   :  { %3216 = vadd.xlane.f32.xlu1 %v3215_v5  ;;  %3162 = vadd.xlane.f32.xlu0 %v3161_v19  ;;  %v5873_v5 = vcombine.low %v3348_v33, %v3349_v14  ;;  %v5872_v19 = vcombine.high %v3346_v30, %v3347_v32  ;;  %v5871_v20 = vcombine.low %v3346_v30, %v3347_v32 }
0x1833   :  { %v3233_v15 = vpop.permute.xlu1 %3232  ;;  %3541 = vmatpush2.bf16.msra.mxu0 %v5873_v5 }
0x1834   :  { %v3235_v40 = vsel %vm2109_vm2, %v3233_v15, 0.0  ;;  %v3344_v15 = vld [vmem:[#allocation10 + $0x350] sm:$0xff]  ;;  %3542 = vmatprep.subr.bf16.mxu0 %v5872_v19 }
0x1835   :  { %3236 = vadd.xlane.f32.xlu1 %v3235_v40  ;;  %v3345_v40 = vld [vmem:[#allocation10 + $0x370] sm:$0xff] }
0x1836   :  { %v5869_v7 = vcombine.low %v3344_v15, %v3345_v40 }
0x1837   :  { %v3179_v3 = vpop.permute.xlu1 %3178  ;;  %3543 = vmatpush2.bf16.msra.mxu0 %v5871_v20 }
0x1838   :  { %v3181_v39 = vsel %vm2109_vm2, %v3179_v3, 0.0  ;;  %v5870_v3 = vcombine.high %v3344_v15, %v3345_v40 }
0x1839   :  { %3182 = vadd.xlane.f32.xlu0 %v3181_v39  ;;  %3256 = vadd.xlane.f32.xlu1 %v3255_v48  ;;  %v3342_v39 = vld [vmem:[#allocation10 + $0x310] sm:$0xff] }
0x183a   :  { %v3343_v48 = vld [vmem:[#allocation10 + $0x330] sm:$0xff]  ;;  %3544 = vmatprep.subr.bf16.mxu0 %v5870_v3 }
0x183b   :  { %v5868_v13 = vcombine.high %v3342_v39, %v3343_v48  ;;  %3545 = vmatpush2.bf16.msra.mxu0 %v5869_v7  ;;  %v5867_v35 = vcombine.low %v3342_v39, %v3343_v48 }
0x183d   :  { %3546 = vmatprep.subr.bf16.mxu0 %v5868_v13 }
0x183f   :  { %3547 = vmatpush2.bf16.msra.mxu0 %v5867_v35 }
0x1840   :  { %3548 = vmatprep.subr.bf16.mxu0 %v5866_v47  ;;  %v3268_v47 = vld [vmem:[#allocation2 + $0x28] sm:$0x3] }
0x1843   :  { %3549 = vmatpush2.bf16.msra.mxu0 %v5865_v43 }
0x1844   :  { %3550 = vmatprep.subr.bf16.mxu0 %v5864_v21 }
0x1847   :  { %3551 = vmatpush2.bf16.msra.mxu0 %v5863_v36 }
0x1848   :  { %3552 = vmatprep.subr.bf16.mxu0 %v5862_v45  ;;  %v3277_v45 = vrot.slane %v3268_v47, %v7331_v11 }
0x184b   :  { %3553 = vmatpush2.bf16.msra.mxu0 %v5861_v54  ;;  %v3273_v54 = vrot.slane %v3268_v47, %v7090_v12 }
0x184c   :  { %3554 = vmatprep.subr.bf16.mxu0 %v5860_v34 }
0x184f   :  { %3555 = vmatpush2.bf16.msra.mxu0 %v5859_v17  ;;  %v3287_v17 = vrot.slane %v3282_v31, %v7090_v12 }
0x1865   :  { %v3196_v24 = vpop.xlane.xlu0 %3195 }
0x1866   :  { %v3197_v60 = vmul.f32 0.03125, %v3196_v24 }
0x1868   :  { %v3198_v2 = vadd.f32 1e-05, %v3197_v60 }
0x1869   :  { %v3122_v25 = vpop.xlane.xlu0 %3121 }
0x186a   :  { %v3123_v4 = vmul.f32 0.03125, %v3122_v25  ;;  %6556 = vrsqrt.f32 %v3198_v2 }
0x186c   :  { %v3124_v30 = vadd.f32 1e-05, %v3123_v4 }
0x1877   :  { %v6557_v39 = vpop.eup %6556 }
0x1878   :  { %v3200_v43 = vmul.f32 %v6557_v39, %v7717_v52 }
0x18b6   :  { %v3143_v62 = vpop.xlane.xlu0 %3142 }
0x18b7   :  { %v3144_v9 = vmul.f32 0.03125, %v3143_v62 }
0x18b9   :  { %v3145_v59 = vadd.f32 1e-05, %v3144_v9 }
0x18ba   :  { %v3217_v61 = vpop.xlane.xlu1 %3216  ;;  %v3163_v51 = vpop.xlane.xlu0 %3162 }
0x18bb   :  { %v3218_v18 = vmul.f32 0.03125, %v3217_v61  ;;  %v3164_v44 = vmul.f32 0.03125, %v3163_v51  ;;  %6558 = vrsqrt.f32 %v3145_v59 }
0x18bd   :  { %v3219_v33 = vadd.f32 1e-05, %v3218_v18  ;;  %v3165_v14 = vadd.f32 1e-05, %v3164_v44 }
0x18be   :  { %v3237_v46 = vpop.xlane.xlu1 %3236 }
0x18bf   :  { %v3238_v1 = vmul.f32 0.03125, %v3237_v46  ;;  %6560 = vrsqrt.f32 %v3219_v33 }
0x18c0   :  { %6562 = vrsqrt.f32 %v3165_v14 }
0x18c1   :  { %v3239_v32 = vadd.f32 1e-05, %v3238_v1 }
0x18c2   :  { %v3257_v5 = vpop.xlane.xlu1 %3256  ;;  %v3183_v19 = vpop.xlane.xlu0 %3182 }
0x18c3   :  { %6564 = vrsqrt.f32 %v3239_v32  ;;  %v3258_v15 = vmul.f32 0.03125, %v3257_v5  ;;  %v3184_v40 = vmul.f32 0.03125, %v3183_v19  ;;  %v328_v32 = vsub.s32 5, %v7087_v42  ;;  %v6707_v19 = vld [vmem:[#allocation2 + $0x2] sm:$0xff] }
0x18c4   :  { %6566 = vrsqrt.f32 %v3124_v30  ;;  %v324_v5 = vsub.s32 4, %v7087_v42 }
0x18c5   :  { %v3259_v20 = vadd.f32 1e-05, %v3258_v15  ;;  %v3185_v3 = vadd.f32 1e-05, %v3184_v40  ;;  %v329_v15 = vrot.slane %v6707_v19, %v328_v32 }
0x18c6   :  { %v325_v40 = vrot.slane %v6707_v19, %v324_v5 }
0x18c7   :  { %6568 = vrsqrt.f32 %v3259_v20  ;;  %v560_v39 = vadd.f32 %v6982_v56, %v329_v15 }
0x18c8   :  { %6570 = vrsqrt.f32 %v3185_v3  ;;  %v6559_v48 = vpop.eup %6558 }
0x18c9   :  { %v3147_v8 = vmul.f32 %v6559_v48, %v7685_v16 }
0x18cc   :  { %v6561_v7 = vpop.eup %6560 }
0x18cd   :  { %v6563_v13 = vpop.eup %6562  ;;  %v3221_v35 = vmul.f32 %v6561_v7, %v7696_v58  ;;  %v558_v7 = vadd.f32 %v6980_v55, %v325_v40 }
0x18ce   :  { %v3167_v21 = vmul.f32 %v6563_v13, %v7688_v22  ;;  %v3291_v22 = vrot.slane %v3282_v31, %v7331_v11 }
0x18cf   :  { %v3265_v50 = vsel %vm212_vm3, %v3200_v43, %v3221_v35 }
0x18d0   :  { %v6565_v53 = vpop.eup %6564 }
0x18d1   :  { %v6567_v23 = vpop.eup %6566  ;;  %v3241_v37 = vmul.f32 %v6565_v53, %v7704_v26 }
0x18d2   :  { %v3126_v36 = vmul.f32 %v6567_v23, %v7720_v6 }
0x18d3   :  { %v3266_v52 = vsel %vm674_vm5, %v3265_v50, %v3241_v37 }
0x18d4   :  { %v6569_v49 = vpop.eup %6568  ;;  %v3262_v16 = vsel %vm212_vm3, %v3126_v36, %v3147_v8  ;;  %v3352_v8 = vld [vmem:[#allocation2 + $0x2c] sm:$0x3] }
0x18d5   :  { %v6571_v38 = vpop.eup %6570  ;;  %v3261_v58 = vmul.f32 %v6569_v49, %v7694_v57  ;;  %v3263_v34 = vsel %vm674_vm5, %v3262_v16, %v3167_v21  ;;  %v3357_v37 = vrot.slane %v3352_v8, %v7090_v12  ;;  %v3361_v55 = vrot.slane %v3352_v8, %v7331_v11 }
0x18d6   :  { %v3187_v26 = vmul.f32 %v6571_v38, %v7711_v41 }
0x18d7   :  { %v3267_v6 = vsel %vm882_vm10, %v3266_v52, %v3261_v58 }
0x18d8   :  { %v3281_v24 = vmul.f32 %v3277_v45, %v3267_v6  ;;  %v3264_v25 = vsel %vm882_vm10, %v3263_v34, %v3187_v26 }
0x18d9   :  { %v3280_v57 = vmul.f32 %v3273_v54, %v3264_v25 }
0x18da   :  { %v3295_v62 = vadd.f32 %v3291_v22, %v3281_v24 }
0x18db   :  { %v3294_v60 = vadd.f32 %v3287_v17, %v3280_v57 }
0x18dc   :  { %v3297_v9 = vmin.f32 %v3295_v62, 20.0  ;;  %vm3309_vm15 = vcmp.gt.f32.partialorder %v3295_v62, 20.0 }
0x18dd   :  { %v3296_v61 = vmin.f32 %v3294_v60, 20.0  ;;  %vm3308_vm4 = vcmp.gt.f32.partialorder %v3294_v60, 20.0 }
0x18de   :  { %v3300_v51 = vmul.f32 1.442695, %v3297_v9 }
0x18df   :  { %v3298_v41 = vmul.f32 1.442695, %v3296_v61 }
0x18e0   :  { %6572 = vpow2.f32 %v3300_v51 }
0x18e1   :  { %6574 = vpow2.f32 %v3298_v41 }
0x18ed   :  { %v6573_v2 = vpop.eup %6572 }
0x18ee   :  { %v6575_v18 = vpop.eup %6574  ;;  %v3303_v44 = vadd.f32 1.0, %v6573_v2 }
0x18ef   :  { %v3302_v4 = vadd.f32 1.0, %v6575_v18 }
0x18f0   :  { %6576 = vlog2.f32 %v3303_v44 }
0x18f1   :  { %6578 = vlog2.f32 %v3302_v4 }
0x18fd   :  { %v6577_v59 = vpop.eup %6576 }
0x18fe   :  { %v6579_v33 = vpop.eup %6578  ;;  %v3307_v14 = vmul.f32 0.6931472, %v6577_v59 }
0x18ff   :  { %v3305_v46 = vmul.f32 0.6931472, %v6579_v33 }
0x1900   :  { %v3311_v1 = vsel %vm3309_vm15, %v3295_v62, %v3307_v14  ;;  %vm4970_vm15 = vcmask 228352  }
0x1901   :  { %6580 = vtanh.f32 %v3311_v1  ;;  %v3310_v30 = vsel %vm3308_vm4, %v3294_v60, %v3305_v46 }
0x1902   :  { %6582 = vtanh.f32 %v3310_v30 }
0x190e   :  { %v6581_v20 = vpop.eup %6580 }
0x190f   :  { %v6583_v3 = vpop.eup %6582  ;;  %v3315_v48 = vmul.f32 %v6581_v20, %v3295_v62 }
0x1910   :  { %v3314_v13 = vmul.f32 %v6583_v3, %v3294_v60 }
0x1911   :  { %v3317_v53 = vadd.f32 %v3315_v48, %v560_v39 }
0x1912   :  { %v3316_v23 = vadd.f32 %v3314_v13, %v558_v7 }
0x1913   :  { %v3351_v35 = vpack.c.bf16 %v3317_v53, %v3317_v53 }
0x1914   :  { %v3350_v47 = vpack.c.bf16 %v3316_v23, %v3316_v23 }
0x1915   :  { %3556 = vmatprep.mubr.bf16.mxu0 %v3351_v35 }
0x1916   :  { %3557 = vmatmul.mubr.bf16.vlgmr.msra.gmra.mxu0 %v3350_v47 }
0x19d6   :  { %v3558_v43 = vpop.f32.mrf.mxu0 }
0x19d7   :  { %v3559_v21 = vadd.f32 %v3558_v43, %v3357_v37 }
0x19d8   :  { %v3560_v31 = vpop.f32.mrf.mxu0 }
0x19d9   :  { %3599 = vrot.lane.b32.xlu0 %v3559_v21, %s6853_s18  ;;  %3579 = vrot.lane.b32.xlu1 %v3559_v21, %s6854_s19  ;;  %v7761_v36 = vadd.f32 %v3560_v31, %v3361_v55  ;;  %v3565_v45 = vsel %vm2109_vm2, %v3559_v21, 0.0 }
0x19da   :  { %v3562_v56 = vpop.f32.mrf.mxu0 }
0x19db   :  { %v3639_v38 = vsel %vm2109_vm2, %v7761_v36, 0.0 }
0x19dc   :  { %v3563_v49 = vpop.f32.mrf.mxu0 }
0x19dd   :  { %3619 = vrot.lane.b32.xlu0 %v3559_v21, %s6840_s14 }
0x19e1   :  { %3673 = vrot.lane.b32.xlu0 %v7761_v36, %s6853_s18 }
0x19e5   :  { %3693 = vrot.lane.b32.xlu0 %v7761_v36, %s6840_s14 }
0x19fd   :  { %3566 = vadd.xlane.f32.xlu1 %v3565_v45 }
0x1a0e   :  { %3653 = vrot.lane.b32.xlu1 %v7761_v36, %s6854_s19 }
0x1a32   :  { %3640 = vadd.xlane.f32.xlu1 %v3639_v38 }
0x1a4b   :  { %v3600_v50 = vpop.permute.xlu0 %3599  ;;  %v3580_v58 = vpop.permute.xlu1 %3579 }
0x1a4c   :  { %v3582_v54 = vsel %vm2109_vm2, %v3580_v58, 0.0  ;;  %v3602_v26 = vsel %vm2109_vm2, %v3600_v50, 0.0 }
0x1a4d   :  { %3583 = vadd.xlane.f32.xlu0 %v3582_v54 }
0x1a4f   :  { %v3620_v16 = vpop.permute.xlu0 %3619 }
0x1a50   :  { %v3622_v52 = vsel %vm2109_vm2, %v3620_v16, 0.0 }
0x1a51   :  { %3603 = vadd.xlane.f32.xlu0 %v3602_v26  ;;  %3623 = vadd.xlane.f32.xlu1 %v3622_v52 }
0x1a53   :  { %v3674_v25 = vpop.permute.xlu0 %3673 }
0x1a54   :  { %v3676_v57 = vsel %vm2109_vm2, %v3674_v25, 0.0  ;;  %v4463_v25 = vld [vmem:[#allocation10 + $0x3dc] sm:$0xf] }
0x1a57   :  { %v3694_v18 = vpop.permute.xlu0 %3693 }
0x1a58   :  { %v3696_v56 = vsel %vm2109_vm2, %v3694_v18, 0.0  ;;  %v4448_v18 = vld [vmem:[#allocation10 + $0x1fc] sm:$0xf] }
0x1a86   :  { %v3567_v22 = vpop.xlane.xlu1 %3566 }
0x1a87   :  { %v3568_v34 = vmul.f32 0.03125, %v3567_v22 }
0x1a89   :  { %v7775_v17 = vsub.f32 %v3559_v21, %v3568_v34 }
0x1a8a   :  { %v3654_v6 = vpop.permute.xlu1 %3653 }
0x1a8b   :  { %v3656_v24 = vsel %vm2109_vm2, %v3654_v6, 0.0  ;;  %v3570_v62 = vmul.f32 %v7775_v17, %v7775_v17 }
0x1a8c   :  { %3657 = vadd.xlane.f32.xlu0 %v3656_v24  ;;  %v3800_v24 = vld [vmem:[#allocation10 + $0x3f8] sm:$0xf] }
0x1a8d   :  { %v3571_v60 = vsel %vm2109_vm2, %v3570_v62, 0.0  ;;  %v4464_v62 = vld [vmem:[#allocation10 + $0x3fc] sm:$0xf] }
0x1a90   :  { %3677 = vadd.xlane.f32.xlu0 %v3676_v57 }
0x1a94   :  { %3572 = vadd.xlane.f32.xlu0 %v3571_v60  ;;  %v3783_v60 = vld [vmem:[#allocation10 + $0x1d8] sm:$0xf] }
0x1abb   :  { %v3641_v9 = vpop.xlane.xlu1 %3640 }
0x1abc   :  { %v3642_v61 = vmul.f32 0.03125, %v3641_v9  ;;  %v3784_v9 = vld [vmem:[#allocation10 + $0x1f8] sm:$0xf] }
0x1abe   :  { %v7783_v51 = vsub.f32 %v7761_v36, %v3642_v61  ;;  %v5921_v61 = vcombine.low %v4463_v25, %v4464_v62  ;;  %v4441_v25 = vld [vmem:[#allocation10 + $0x11c] sm:$0xf]  ;;  %v3791_v62 = vld [vmem:[#allocation10 + $0x2d8] sm:$0xf] }
0x1ac0   :  { %v3644_v41 = vmul.f32 %v7783_v51, %v7783_v51  ;;  %6041 = vmatprep.subr.bf16.mxu0 %v5921_v61  ;;  %v4456_v61 = vld [vmem:[#allocation10 + $0x2fc] sm:$0xf] }
0x1ac2   :  { %v3645_v2 = vsel %vm2109_vm2, %v3644_v41, 0.0  ;;  %v5883_v41 = vcombine.low %v3783_v60, %v3784_v9  ;;  %v3792_v60 = vld [vmem:[#allocation10 + $0x2f8] sm:$0xf]  ;;  %v4455_v9 = vld [vmem:[#allocation10 + $0x2dc] sm:$0xf] }
0x1ac3   :  { %3646 = vadd.xlane.f32.xlu1 %v3645_v2  ;;  %v4447_v2 = vld [vmem:[#allocation10 + $0x1dc] sm:$0xf] }
0x1ad6   :  { %v3584_v44 = vpop.xlane.xlu0 %3583 }
0x1ad7   :  { %v3585_v4 = vmul.f32 0.03125, %v3584_v44  ;;  %v3797_v44 = vld [vmem:[#allocation10 + $0x398] sm:$0xf] }
0x1ad9   :  { %v7788_v59 = vsub.f32 %v3559_v21, %v3585_v4  ;;  %v5913_v4 = vcombine.low %v4447_v2, %v4448_v18  ;;  %v5887_v18 = vcombine.low %v3791_v62, %v3792_v60  ;;  %v3769_v60 = vld [vmem:[#allocation10 + $0x18] sm:$0xf] }
0x1ada   :  { %v3604_v33 = vpop.xlane.xlu0 %3603  ;;  %v3624_v14 = vpop.xlane.xlu1 %3623 }
0x1adb   :  { %v3587_v46 = vmul.f32 %v7788_v59, %v7788_v59  ;;  %v3605_v1 = vmul.f32 0.03125, %v3604_v33  ;;  %v3625_v30 = vmul.f32 0.03125, %v3624_v14  ;;  %v3798_v33 = vld [vmem:[#allocation10 + $0x3b8] sm:$0xf]  ;;  %v4461_v14 = vld [vmem:[#allocation10 + $0x39c] sm:$0xf]  ;;  %6042 = vmatpush3.bf16.msra.mxu0 %v5913_v4 }
0x1adc   :  { %v3776_v4 = vld [vmem:[#allocation10 + $0xf8] sm:$0xf] }
0x1add   :  { %v7792_v32 = vsub.f32 %v3559_v21, %v3605_v1  ;;  %v7794_v5 = vsub.f32 %v3559_v21, %v3625_v30  ;;  %3589 = vrot.lane.b32.xlu0 %v3587_v46, %s6854_s19  ;;  %v4462_v46 = vld [vmem:[#allocation10 + $0x3bc] sm:$0xf]  ;;  %v5890_v1 = vcombine.low %v3797_v44, %v3798_v33  ;;  %v3775_v44 = vld [vmem:[#allocation10 + $0xd8] sm:$0xf] }
0x1ade   :  { %v5920_v30 = vcombine.low %v4461_v14, %v4462_v46  ;;  %v4439_v33 = vld [vmem:[#allocation10 + $0xdc] sm:$0xf]  ;;  %v5917_v14 = vcombine.low %v4455_v9, %v4456_v61  ;;  %v3770_v9 = vld [vmem:[#allocation10 + $0x38] sm:$0xf] }
0x1adf   :  { %v3607_v19 = vmul.f32 %v7792_v32, %v7792_v32  ;;  %v3627_v15 = vmul.f32 %v7794_v5, %v7794_v5  ;;  %v4440_v46 = vld [vmem:[#allocation10 + $0xfc] sm:$0xf] }
0x1ae0   :  { %6043 = vmatprep.subr.bf16.mxu0 %v5920_v30  ;;  %v3790_v30 = vld [vmem:[#allocation10 + $0x2b8] sm:$0xf] }
0x1ae1   :  { %3609 = vrot.lane.b32.xlu1 %v3607_v19, %s6853_s18  ;;  %3629 = vrot.lane.b32.xlu0 %v3627_v15, %s6840_s14  ;;  %v3781_v19 = vld [vmem:[#allocation10 + $0x198] sm:$0xf] }
0x1ae2   :  { %v3782_v15 = vld [vmem:[#allocation10 + $0x1b8] sm:$0xf] }
0x1b15   :  { %v3658_v40 = vpop.xlane.xlu0 %3657 }
0x1b16   :  { %v3659_v20 = vmul.f32 0.03125, %v3658_v40  ;;  %v4445_v40 = vld [vmem:[#allocation10 + $0x19c] sm:$0xf] }
0x1b18   :  { %v7804_v3 = vsub.f32 %v7761_v36, %v3659_v20  ;;  %v5882_v20 = vcombine.low %v3781_v19, %v3782_v15  ;;  %v4453_v19 = vld [vmem:[#allocation10 + $0x29c] sm:$0xf] }
0x1b19   :  { %v3678_v39 = vpop.xlane.xlu0 %3677  ;;  %v4454_v15 = vld [vmem:[#allocation10 + $0x2bc] sm:$0xf] }
0x1b1a   :  { %v3661_v48 = vmul.f32 %v7804_v3, %v7804_v3  ;;  %v3679_v7 = vmul.f32 0.03125, %v3678_v39  ;;  %v4446_v39 = vld [vmem:[#allocation10 + $0x1bc] sm:$0xf] }
0x1b1c   :  { %v7809_v13 = vsub.f32 %v7761_v36, %v3679_v7  ;;  %3663 = vrot.lane.b32.xlu0 %v3661_v48, %s6854_s19  ;;  %v3795_v48 = vld [vmem:[#allocation10 + $0x358] sm:$0xf] }
0x1b1d   :  { %v7815_v23 = vpop.xlane.xlu0 %3572  ;;  %v3796_v7 = vld [vmem:[#allocation10 + $0x378] sm:$0xf] }
0x1b1e   :  { %v3681_v53 = vmul.f32 %v7809_v13, %v7809_v13 }
0x1b20   :  { %3683 = vrot.lane.b32.xlu1 %v3681_v53, %s6853_s18  ;;  %v5912_v53 = vcombine.low %v4445_v40, %v4446_v39  ;;  %v5879_v40 = vcombine.low %v3775_v44, %v3776_v4  ;;  %v3574_v4 = vmul.f32 0.03125, %v7815_v23 }
0x1b22   :  { %6044 = vmatpush3.bf16.msra.mxu0 %v5912_v53  ;;  %v4437_v53 = vld [vmem:[#allocation10 + $0x9c] sm:$0xf] }
0x1b4c   :  { %v7817_v35 = vpop.xlane.xlu1 %3646 }
0x1b4f   :  { %v3590_v47 = vpop.permute.xlu0 %3589 }
0x1b50   :  { %v3592_v8 = vsel %vm2109_vm2, %v3590_v47, 0.0  ;;  %v5889_v47 = vcombine.low %v3795_v48, %v3796_v7  ;;  %v3773_v48 = vld [vmem:[#allocation10 + $0x98] sm:$0xf] }
0x1b51   :  { %3593 = vadd.xlane.f32.xlu1 %v3592_v8  ;;  %v4459_v8 = vld [vmem:[#allocation10 + $0x35c] sm:$0xf]  ;;  %v3774_v7 = vld [vmem:[#allocation10 + $0xb8] sm:$0xf] }
0x1b53   :  { %v3610_v37 = vpop.permute.xlu1 %3609  ;;  %v3630_v21 = vpop.permute.xlu0 %3629 }
0x1b54   :  { %v3612_v43 = vsel %vm2109_vm2, %v3610_v37, 0.0  ;;  %v3632_v31 = vsel %vm2109_vm2, %v3630_v21, 0.0  ;;  %v4460_v37 = vld [vmem:[#allocation10 + $0x37c] sm:$0xf] }
0x1b55   :  { %3613 = vadd.xlane.f32.xlu0 %v3612_v43  ;;  %v3779_v43 = vld [vmem:[#allocation10 + $0x158] sm:$0xf]  ;;  %v5919_v21 = vcombine.low %v4459_v8, %v4460_v37  ;;  %v4438_v8 = vld [vmem:[#allocation10 + $0xbc] sm:$0xf] }
0x1b56   :  { %v3787_v37 = vld [vmem:[#allocation10 + $0x258] sm:$0xf] }
0x1b57   :  { %6045 = vmatprep.subr.bf16.mxu0 %v5919_v21  ;;  %v4451_v21 = vld [vmem:[#allocation10 + $0x25c] sm:$0xf] }
0x1b59   :  { %3633 = vadd.xlane.f32.xlu0 %v3632_v31  ;;  %v3780_v31 = vld [vmem:[#allocation10 + $0x178] sm:$0xf] }
0x1b5d   :  { %3697 = vadd.xlane.f32.xlu0 %v3696_v56  ;;  %v4443_v56 = vld [vmem:[#allocation10 + $0x15c] sm:$0xf] }
0x1b8e   :  { %v3664_v55 = vpop.permute.xlu0 %3663 }
0x1b8f   :  { %v3666_v16 = vsel %vm2109_vm2, %v3664_v55, 0.0  ;;  %v4444_v55 = vld [vmem:[#allocation10 + $0x17c] sm:$0xf] }
0x1b92   :  { %v3684_v26 = vpop.permute.xlu1 %3683 }
0x1b93   :  { %v3686_v52 = vsel %vm2109_vm2, %v3684_v26, 0.0  ;;  %v5911_v26 = vcombine.low %v4443_v56, %v4444_v55  ;;  %v5878_v56 = vcombine.low %v3773_v48, %v3774_v7  ;;  %v5908_v55 = vcombine.low %v4437_v53, %v4438_v8 }
0x1b95   :  { %6046 = vmatpush3.bf16.msra.mxu0 %v5911_v26 }
0x1bda   :  { %v7835_v22 = vpop.xlane.xlu1 %3593 }
0x1bde   :  { %v7823_v49 = vpop.xlane.xlu0 %3613 }
0x1be2   :  { %v7825_v45 = vpop.xlane.xlu0 %3633 }
0x1be6   :  { %v3698_v38 = vpop.xlane.xlu0 %3697 }
0x1be7   :  { %v3699_v50 = vmul.f32 0.03125, %v3698_v38  ;;  %v5881_v38 = vcombine.low %v3779_v43, %v3780_v31  ;;  %v3788_v43 = vld [vmem:[#allocation10 + $0x278] sm:$0xf]  ;;  %v4452_v31 = vld [vmem:[#allocation10 + $0x27c] sm:$0xf] }
0x1be8   :  { %v5915_v26 = vcombine.low %v4451_v21, %v4452_v31 }
0x1be9   :  { %v7828_v58 = vsub.f32 %v7761_v36, %v3699_v50  ;;  %v3799_v36 = vld [vmem:[#allocation10 + $0x3d8] sm:$0xf] }
0x1bea   :  { %v5891_v57 = vcombine.low %v3799_v36, %v3800_v24  ;;  %v3793_v50 = vld [vmem:[#allocation10 + $0x318] sm:$0xf] }
0x1beb   :  { %v3701_v54 = vmul.f32 %v7828_v58, %v7828_v58  ;;  %v3778_v36 = vld [vmem:[#allocation10 + $0x138] sm:$0xf] }
0x1bec   :  { %6010 = vmatprep.subr.bf16.mxu1 %v5891_v57  ;;  %v4442_v57 = vld [vmem:[#allocation10 + $0x13c] sm:$0xf] }
0x1bed   :  { %3703 = vrot.lane.b32.xlu1 %v3701_v54, %s6840_s14  ;;  %6011 = vmatpush3.bf16.msra.mxu1 %v5883_v41  ;;  %v3794_v54 = vld [vmem:[#allocation10 + $0x338] sm:$0xf]  ;;  %v5910_v2 = vcombine.low %v4441_v25, %v4442_v57 }
0x1bee   :  { %6012 = vmatprep.subr.bf16.mxu1 %v5890_v1  ;;  %v3789_v1 = vld [vmem:[#allocation10 + $0x298] sm:$0xf] }
0x1bef   :  { %v5886_v39 = vcombine.low %v3789_v1, %v3790_v30  ;;  %v3575_v1 = vadd.f32 1e-05, %v3574_v4 }
0x1bf1   :  { %6013 = vmatpush3.bf16.msra.mxu1 %v5882_v20  ;;  %v5909_v20 = vcombine.low %v4439_v33, %v4440_v46  ;;  %v3595_v33 = vmul.f32 0.03125, %v7835_v22  ;;  %v3635_v46 = vmul.f32 0.03125, %v7825_v45  ;;  %6584 = vrsqrt.f32 %v3575_v1 }
0x1bf2   :  { %6014 = vmatprep.subr.bf16.mxu1 %v5889_v47  ;;  %v5916_v47 = vcombine.low %v4453_v19, %v4454_v15 }
0x1bf3   :  { %v3596_v30 = vadd.f32 1e-05, %v3595_v33  ;;  %v3636_v15 = vadd.f32 1e-05, %v3635_v46 }
0x1bf5   :  { %6015 = vmatpush3.bf16.msra.mxu1 %v5881_v38  ;;  %v5885_v38 = vcombine.low %v3787_v37, %v3788_v43  ;;  %6586 = vrsqrt.f32 %v3596_v30  ;;  %v3719_v37 = vld [vmem:[#allocation2 + $0x2e] sm:$0x3]  ;;  %v3648_v43 = vmul.f32 0.03125, %v7817_v35 }
0x1c11   :  { %3667 = vadd.xlane.f32.xlu1 %v3666_v16  ;;  %v4457_v16 = vld [vmem:[#allocation10 + $0x31c] sm:$0xf] }
0x1c15   :  { %3687 = vadd.xlane.f32.xlu1 %v3686_v52  ;;  %v5888_v52 = vcombine.low %v3793_v50, %v3794_v54  ;;  %v3771_v50 = vld [vmem:[#allocation10 + $0x58] sm:$0xf] }
0x1c16   :  { %v3772_v54 = vld [vmem:[#allocation10 + $0x78] sm:$0xf] }
0x1c17   :  { %6016 = vmatprep.subr.bf16.mxu1 %v5888_v52  ;;  %v4436_v52 = vld [vmem:[#allocation10 + $0x7c] sm:$0xf]  ;;  %v5877_v25 = vcombine.low %v3771_v50, %v3772_v54  ;;  %v3649_v50 = vadd.f32 1e-05, %v3648_v43 }
0x1c5f   :  { %v3704_v34 = vpop.permute.xlu1 %3703 }
0x1c60   :  { %v3706_v6 = vsel %vm2109_vm2, %v3704_v34, 0.0  ;;  %v4458_v34 = vld [vmem:[#allocation10 + $0x33c] sm:$0xf] }
0x1c61   :  { %3707 = vadd.xlane.f32.xlu1 %v3706_v6  ;;  %v3777_v6 = vld [vmem:[#allocation10 + $0x118] sm:$0xf]  ;;  %v5918_v24 = vcombine.low %v4457_v16, %v4458_v34  ;;  %v4435_v16 = vld [vmem:[#allocation10 + $0x5c] sm:$0xf] }
0x1c62   :  { %v5880_v41 = vcombine.low %v3777_v6, %v3778_v36  ;;  %v3785_v34 = vld [vmem:[#allocation10 + $0x218] sm:$0xf]  ;;  %v4449_v36 = vld [vmem:[#allocation10 + $0x21c] sm:$0xf]  ;;  %v5907_v57 = vcombine.low %v4435_v16, %v4436_v52 }
0x1c63   :  { %6047 = vmatprep.subr.bf16.mxu0 %v5918_v24  ;;  %v3786_v6 = vld [vmem:[#allocation10 + $0x238] sm:$0xf]  ;;  %v4450_v24 = vld [vmem:[#allocation10 + $0x23c] sm:$0xf] }
0x1c64   :  { %6017 = vmatpush3.bf16.msra.mxu1 %v5880_v41  ;;  %6048 = vmatpush3.bf16.msra.mxu0 %v5910_v2  ;;  %v5884_v62 = vcombine.low %v3785_v34, %v3786_v6  ;;  %v5914_v61 = vcombine.low %v4449_v36, %v4450_v24  ;;  %v4433_v41 = vld [vmem:[#allocation10 + $0x1c] sm:$0xf] }
0x1c65   :  { %6018 = vmatprep.subr.bf16.mxu1 %v5887_v18  ;;  %6049 = vmatprep.subr.bf16.mxu0 %v5917_v14  ;;  %v4434_v2 = vld [vmem:[#allocation10 + $0x3c] sm:$0xf]  ;;  %v5876_v18 = vcombine.low %v3769_v60, %v3770_v9  ;;  %v3615_v14 = vmul.f32 0.03125, %v7823_v49  ;;  %v3728_v60 = vrot.slane %v3719_v37, %v7331_v11 }
0x1c66   :  { %v5906_v44 = vcombine.low %v4433_v41, %v4434_v2 }
0x1c67   :  { %v3616_v19 = vadd.f32 1e-05, %v3615_v14 }
0x1c68   :  { %6019 = vmatpush3.bf16.msra.mxu1 %v5879_v40  ;;  %6050 = vmatpush3.bf16.msra.mxu0 %v5909_v20  ;;  %v6585_v20 = vpop.eup %6584 }
0x1c69   :  { %6020 = vmatprep.subr.bf16.mxu1 %v5886_v39  ;;  %6051 = vmatprep.subr.bf16.mxu0 %v5916_v47  ;;  %6588 = vrsqrt.f32 %v3616_v19  ;;  %v6587_v39 = vpop.eup %6586  ;;  %v3577_v45 = vmul.f32 %v6585_v20, %v7775_v17 }
0x1c6a   :  { %6590 = vrsqrt.f32 %v3636_v15  ;;  %v3598_v22 = vmul.f32 %v6587_v39, %v7788_v59  ;;  %v3733_v59 = vld [vmem:[#allocation2 + $0x30] sm:$0x3] }
0x1c6b   :  { %v3738_v17 = vrot.slane %v3733_v59, %v7090_v12  ;;  %v3742_v2 = vrot.slane %v3733_v59, %v7331_v11 }
0x1c6c   :  { %6021 = vmatpush3.bf16.msra.mxu1 %v5878_v56  ;;  %6052 = vmatpush3.bf16.msra.mxu0 %v5908_v55  ;;  %v3713_v21 = vsel %vm212_vm3, %v3577_v45, %v3598_v22  ;;  %v3724_v55 = vrot.slane %v3719_v37, %v7090_v12 }
0x1c6d   :  { %6022 = vmatprep.subr.bf16.mxu1 %v5885_v38  ;;  %6053 = vmatprep.subr.bf16.mxu0 %v5915_v26 }
0x1c70   :  { %6023 = vmatpush3.bf16.msra.mxu1 %v5877_v25  ;;  %6054 = vmatpush3.bf16.msra.mxu0 %v5907_v57 }
0x1c71   :  { %6024 = vmatprep.subr.bf16.mxu1 %v5884_v62  ;;  %6055 = vmatprep.subr.bf16.mxu0 %v5914_v61 }
0x1c74   :  { %6025 = vmatpush3.bf16.msra.mxu1 %v5876_v18  ;;  %6056 = vmatpush3.bf16.msra.mxu0 %v5906_v44 }
0x1c75   :  { %6220 = vmatprep.subr.bf16.mxu1 %v6849_v0  ;;  %6260 = vmatprep.subr.bf16.mxu0 %v6849_v0 }
0x1c76   :  { %v6589_v48 = vpop.eup %6588 }
0x1c77   :  { %v6591_v7 = vpop.eup %6590  ;;  %v3618_v49 = vmul.f32 %v6589_v48, %v7792_v32 }
0x1c78   :  { %v3638_v47 = vmul.f32 %v6591_v7, %v7794_v5 }
0x1c79   :  { %v3714_v31 = vsel %vm674_vm5, %v3713_v21, %v3618_v49 }
0x1c7a   :  { %v3715_v32 = vsel %vm882_vm10, %v3714_v31, %v3638_v47  ;;  %v5875_v47 = vld [vmem:[#allocation2 + $0x32] ss:$0 sm:$0xff] }
0x1c7b   :  { %v3731_v5 = vmul.f32 %v3724_v55, %v3715_v32 }
0x1c7d   :  { %v3745_v26 = vadd.f32 %v3738_v17, %v3731_v5 }
0x1c7f   :  { %v3747_v52 = vmin.f32 %v3745_v26, 20.0  ;;  %vm3759_vm2 = vcmp.gt.f32.partialorder %v3745_v26, 20.0 }
0x1c81   :  { %v3749_v34 = vmul.f32 1.442695, %v3747_v52 }
0x1c9a   :  { %v3668_v40 = vpop.xlane.xlu1 %3667 }
0x1c9b   :  { %v3669_v53 = vmul.f32 0.03125, %v3668_v40 }
0x1c9d   :  { %v3670_v56 = vadd.f32 1e-05, %v3669_v53 }
0x1c9e   :  { %v3688_v23 = vpop.xlane.xlu1 %3687 }
0x1c9f   :  { %v3689_v8 = vmul.f32 0.03125, %v3688_v23  ;;  %6592 = vrsqrt.f32 %v3670_v56 }
0x1ca1   :  { %v3690_v38 = vadd.f32 1e-05, %v3689_v8 }
0x1ca3   :  { %6594 = vrsqrt.f32 %v3690_v38 }
0x1ca4   :  { %6596 = vrsqrt.f32 %v3649_v50 }
0x1cac   :  { %v6593_v6 = vpop.eup %6592 }
0x1cad   :  { %v3672_v25 = vmul.f32 %v6593_v6, %v7804_v3 }
0x1cb0   :  { %v6595_v36 = vpop.eup %6594 }
0x1cb1   :  { %v6597_v24 = vpop.eup %6596  ;;  %v3692_v57 = vmul.f32 %v6595_v36, %v7809_v13 }
0x1cb2   :  { %v3651_v12 = vmul.f32 %v6597_v24, %v7783_v51 }
0x1cb4   :  { %v3716_v9 = vsel %vm212_vm3, %v3651_v12, %v3672_v25 }
0x1cb5   :  { %v3717_v41 = vsel %vm674_vm5, %v3716_v9, %v3692_v57 }
0x1cea   :  { %v3708_v54 = vpop.xlane.xlu1 %3707 }
0x1ceb   :  { %v3709_v35 = vmul.f32 0.03125, %v3708_v54 }
0x1ced   :  { %v3710_v16 = vadd.f32 1e-05, %v3709_v35 }
0x1cef   :  { %6598 = vrsqrt.f32 %v3710_v16 }
0x1cf0   :  { %6600 = vpow2.f32 %v3749_v34 }
0x1cfc   :  { %v6599_v62 = vpop.eup %6598 }
0x1cfd   :  { %v3712_v61 = vmul.f32 %v6599_v62, %v7828_v58  ;;  %v6601_v33 = vpop.eup %6600 }
0x1cfe   :  { %v3753_v51 = vadd.f32 1.0, %v6601_v33 }
0x1cff   :  { %v3718_v18 = vsel %vm882_vm10, %v3717_v41, %v3712_v61 }
0x1d00   :  { %v3732_v44 = vmul.f32 %v3728_v60, %v3718_v18 }
0x1d02   :  { %v3746_v3 = vadd.f32 %v3742_v2, %v3732_v44 }
0x1d04   :  { %v3748_v4 = vmin.f32 %v3746_v3, 20.0  ;;  %vm3760_vm12 = vcmp.gt.f32.partialorder %v3746_v3, 20.0 }
0x1d06   :  { %v3751_v13 = vmul.f32 1.442695, %v3748_v4 }
0x1d08   :  { %6602 = vpow2.f32 %v3751_v13 }
0x1d09   :  { %6604 = vlog2.f32 %v3753_v51 }
0x1d15   :  { %v6603_v14 = vpop.eup %6602 }
0x1d16   :  { %v3754_v46 = vadd.f32 1.0, %v6603_v14  ;;  %v6605_v1 = vpop.eup %6604 }
0x1d17   :  { %v3756_v30 = vmul.f32 0.6931472, %v6605_v1 }
0x1d18   :  { %6606 = vlog2.f32 %v3754_v46 }
0x1d19   :  { %v3761_v58 = vsel %vm3759_vm2, %v3745_v26, %v3756_v30 }
0x1d1a   :  { %6608 = vtanh.f32 %v3761_v58 }
0x1d25   :  { %v6607_v19 = vpop.eup %6606 }
0x1d26   :  { %v3758_v11 = vmul.f32 0.6931472, %v6607_v19 }
0x1d27   :  { %v6609_v40 = vpop.eup %6608 }
0x1d28   :  { %v3762_v15 = vsel %vm3760_vm12, %v3746_v3, %v3758_v11  ;;  %v3765_v20 = vmul.f32 %v6609_v40, %v3745_v26 }
0x1d29   :  { %6610 = vtanh.f32 %v3762_v15 }
0x1d2a   :  { %v3767_v7 = vadd.f32 %v3765_v20, %v7656_v10 }
0x1d2c   :  { %v3801_v49 = vpack.c.bf16 %v3767_v7, %v3767_v7 }
0x1d36   :  { %v6611_v39 = vpop.eup %6610 }
0x1d37   :  { %v3766_v48 = vmul.f32 %v6611_v39, %v3746_v3 }
0x1d39   :  { %v3768_v23 = vadd.f32 %v3766_v48, %v7654_v63 }
0x1d3b   :  { %v3802_v22 = vpack.c.bf16 %v3768_v23, %v3768_v23 }
0x1d3d   :  { %3938 = vmatprep.mubr.bf16.mxu1 %v3802_v22  ;;  %4600 = vmatprep.mubr.bf16.mxu0 %v3802_v22 }
0x1d3e   :  { %3939 = vmatmul.mubr.bf16.vlgmr.msra.gmra.mxu1 %v3801_v49  ;;  %4601 = vmatmul.mubr.bf16.vlgmr.msra.gmra.mxu0 %v3801_v49 }
0x1d3f   :  { %6236 = vmatprep.mubr.msk.bf16.mxu1 %vm6850_vm0, %v6849_v0  ;;  %6268 = vmatprep.mubr.msk.bf16.mxu0 %vm6850_vm0, %v6849_v0 }
0x1dfe   :  { %v6026_v53 = vpop.f32.mrf.mxu1  ;;  %v6057_v45 = vpop.f32.mrf.mxu0 }
0x1e00   :  { %v6027_v8 = vpop.f32.mrf.mxu1  ;;  %v6058_v37 = vpop.f32.mrf.mxu0 }
0x1e01   :  { %v6028_v10 = vadd.f32 %v6027_v8, %v6026_v53  ;;  %v7869_v43 = vadd.f32 %v6058_v37, %v6057_v45 }
0x1e02   :  { %v6029_v63 = vpop.f32.mrf.mxu1  ;;  %v6060_v21 = vpop.f32.mrf.mxu0 }
0x1e03   :  { %v7871_v31 = vadd.f32 %v6028_v10, %v5875_v47 }
0x1e04   :  { %v6030_v56 = vpop.f32.mrf.mxu1  ;;  %v6061_v55 = vpop.f32.mrf.mxu0 }
0x1e05   :  { %3960 = vrot.lane.b32.xlu0 %v7871_v31, %s6852_s17  ;;  %v3946_v38 = vsel %vm718_vm6, %v7871_v31, 0.0 }
0x1e09   :  { %3980 = vrot.lane.b32.xlu0 %v7871_v31, %s6854_s19 }
0x1e0d   :  { %4000 = vrot.lane.b32.xlu0 %v7871_v31, %s6851_s0 }
0x1e11   :  { %4020 = vrot.lane.b32.xlu0 %v7871_v31, %s6853_s18 }
0x1e15   :  { %4040 = vrot.lane.b32.xlu0 %v7871_v31, %s6855_s3 }
0x1e19   :  { %4060 = vrot.lane.b32.xlu0 %v7871_v31, %s6840_s14 }
0x1e1d   :  { %4080 = vrot.lane.b32.xlu0 %v7871_v31, %s6856_s20 }
0x1e3c   :  { %3947 = vadd.xlane.f32.xlu0 %v3946_v38 }
0x1e77   :  { %v3961_v59 = vpop.permute.xlu0 %3960 }
0x1e78   :  { %v3963_v32 = vsel %vm718_vm6, %v3961_v59, 0.0 }
0x1e79   :  { %3964 = vadd.xlane.f32.xlu0 %v3963_v32 }
0x1e7b   :  { %v3981_v50 = vpop.permute.xlu0 %3980 }
0x1e7c   :  { %v3983_v17 = vsel %vm718_vm6, %v3981_v50, 0.0 }
0x1e7d   :  { %3984 = vadd.xlane.f32.xlu0 %v3983_v17 }
0x1e7f   :  { %v4001_v5 = vpop.permute.xlu0 %4000 }
0x1e80   :  { %v4003_v54 = vsel %vm718_vm6, %v4001_v5, 0.0  ;;  %v6384_v5 = vld [vmem:[#allocation9 + $0x160] ss:$24 sps:$4 sm:$0xff]  }
0x1e81   :  { %4004 = vadd.xlane.f32.xlu0 %v4003_v54  ;;  %6221 = vmatpush3.bf16.msra.mxu1 %v6384_v5  ;;  %v6385_v54 = vld [vmem:[#allocation9 + $0x130] ss:$24 sps:$4 sm:$0xff]   ;;  %v5893_v5 = vld [vmem:[#allocation2 + $0x34] ss:$0 sm:$0xff] }
0x1e82   :  { %6222 = vmatprep.subr.bf16.mxu1 %v6849_v0 }
0x1e83   :  { %v4021_v35 = vpop.permute.xlu0 %4020 }
0x1e84   :  { %v4023_v16 = vsel %vm718_vm6, %v4021_v35, 0.0  ;;  %v6386_v35 = vld [vmem:[#allocation9 + $0x100] ss:$24 sps:$4 sm:$0xff]  }
0x1e85   :  { %4024 = vadd.xlane.f32.xlu0 %v4023_v16  ;;  %6223 = vmatpush3.bf16.msra.mxu1 %v6385_v54  ;;  %v6387_v16 = vld [vmem:[#allocation9 + $0xd0] ss:$24 sps:$4 sm:$0xff]  }
0x1e86   :  { %6224 = vmatprep.subr.bf16.mxu1 %v6849_v0 }
0x1e87   :  { %v4041_v26 = vpop.permute.xlu0 %4040 }
0x1e88   :  { %v4043_v52 = vsel %vm718_vm6, %v4041_v26, 0.0  ;;  %v6388_v26 = vld [vmem:[#allocation9 + $0xa0] ss:$24 sps:$4 sm:$0xff]  }
0x1e89   :  { %4044 = vadd.xlane.f32.xlu0 %v4043_v52  ;;  %6225 = vmatpush3.bf16.msra.mxu1 %v6386_v35  ;;  %v6389_v52 = vld [vmem:[#allocation9 + $0x70] ss:$24 sps:$4 sm:$0xff]  }
0x1e8a   :  { %6226 = vmatprep.subr.bf16.mxu1 %v6849_v0 }
0x1e8b   :  { %v4061_v34 = vpop.permute.xlu0 %4060 }
0x1e8c   :  { %v4063_v6 = vsel %vm718_vm6, %v4061_v34, 0.0  ;;  %v6390_v34 = vld [vmem:[#allocation9 + $0x40] ss:$24 sps:$4 sm:$0xff]  }
0x1e8d   :  { %4064 = vadd.xlane.f32.xlu0 %v4063_v6  ;;  %6227 = vmatpush3.bf16.msra.mxu1 %v6387_v16  ;;  %v6391_v6 = vld [vmem:[#allocation9 + $0x10] ss:$24 sps:$4 sm:$0xff]  }
0x1e8e   :  { %6228 = vmatprep.subr.bf16.mxu1 %v6849_v0 }
0x1e8f   :  { %v4081_v36 = vpop.permute.xlu0 %4080 }
0x1e90   :  { %v4083_v60 = vsel %vm718_vm6, %v4081_v36, 0.0 }
0x1e91   :  { %6229 = vmatpush3.bf16.msra.mxu1 %v6388_v26 }
0x1e92   :  { %6230 = vmatprep.subr.bf16.mxu1 %v6849_v0 }
0x1e95   :  { %6231 = vmatpush3.bf16.msra.mxu1 %v6389_v52 }
0x1e96   :  { %6232 = vmatprep.subr.bf16.mxu1 %v6849_v0 }
0x1e99   :  { %6233 = vmatpush3.bf16.msra.mxu1 %v6390_v34 }
0x1e9a   :  { %6234 = vmatprep.subr.bf16.mxu1 %v6849_v0 }
0x1e9d   :  { %6235 = vmatpush3.bf16.msra.mxu1 %v6391_v6 }
0x1e9e   :  { %6240 = vmatprep.subr.bf16.mxu1 %v6849_v0 }
0x1ec5   :  { %v3948_v24 = vpop.xlane.xlu0 %3947 }
0x1ec6   :  { %v3949_v25 = vmul.f32 0.0625, %v3948_v24 }
0x1ec8   :  { %v7896_v57 = vsub.f32 %v7871_v31, %v3949_v25 }
0x1eca   :  { %v3951_v12 = vmul.f32 %v7896_v57, %v7896_v57 }
0x1ecc   :  { %v3952_v62 = vsel %vm718_vm6, %v3951_v12, 0.0 }
0x1ecd   :  { %3953 = vadd.xlane.f32.xlu0 %v3952_v62 }
0x1ed1   :  { %4084 = vadd.xlane.f32.xlu0 %v4083_v60 }
0x1f02   :  { %v3965_v9 = vpop.xlane.xlu0 %3964 }
0x1f03   :  { %v3966_v61 = vmul.f32 0.0625, %v3965_v9 }
0x1f05   :  { %v7903_v41 = vsub.f32 %v7871_v31, %v3966_v61 }
0x1f06   :  { %v3985_v2 = vpop.xlane.xlu0 %3984 }
0x1f07   :  { %v3968_v18 = vmul.f32 %v7903_v41, %v7903_v41  ;;  %v3986_v44 = vmul.f32 0.0625, %v3985_v2 }
0x1f09   :  { %v7908_v3 = vsub.f32 %v7871_v31, %v3986_v44  ;;  %3970 = vrot.lane.b32.xlu1 %v3968_v18, %s6852_s17 }
0x1f0a   :  { %v4005_v4 = vpop.xlane.xlu0 %4004 }
0x1f0b   :  { %v3988_v33 = vmul.f32 %v7908_v3, %v7908_v3  ;;  %v4006_v13 = vmul.f32 0.0625, %v4005_v4 }
0x1f0d   :  { %v7914_v51 = vsub.f32 %v7871_v31, %v4006_v13  ;;  %3990 = vrot.lane.b32.xlu1 %v3988_v33, %s6854_s19 }
0x1f0e   :  { %v4025_v14 = vpop.xlane.xlu0 %4024 }
0x1f0f   :  { %v4008_v46 = vmul.f32 %v7914_v51, %v7914_v51  ;;  %v4026_v1 = vmul.f32 0.0625, %v4025_v14 }
0x1f11   :  { %v7920_v30 = vsub.f32 %v7871_v31, %v4026_v1  ;;  %4010 = vrot.lane.b32.xlu1 %v4008_v46, %s6851_s0 }
0x1f12   :  { %v4045_v58 = vpop.xlane.xlu0 %4044 }
0x1f13   :  { %v4028_v19 = vmul.f32 %v7920_v30, %v7920_v30  ;;  %v4046_v11 = vmul.f32 0.0625, %v4045_v58 }
0x1f15   :  { %v7926_v15 = vsub.f32 %v7871_v31, %v4046_v11  ;;  %4030 = vrot.lane.b32.xlu1 %v4028_v19, %s6853_s18 }
0x1f16   :  { %v4065_v40 = vpop.xlane.xlu0 %4064 }
0x1f17   :  { %v4048_v20 = vmul.f32 %v7926_v15, %v7926_v15  ;;  %v4066_v39 = vmul.f32 0.0625, %v4065_v40 }
0x1f19   :  { %v7932_v48 = vsub.f32 %v7871_v31, %v4066_v39  ;;  %4050 = vrot.lane.b32.xlu1 %v4048_v20, %s6855_s3 }
0x1f1b   :  { %v4068_v7 = vmul.f32 %v7932_v48, %v7932_v48 }
0x1f1d   :  { %4070 = vrot.lane.b32.xlu1 %v4068_v7, %s6840_s14 }
0x1f56   :  { %v3954_v23 = vpop.xlane.xlu0 %3953 }
0x1f57   :  { %v3955_v60 = vmul.f32 0.0625, %v3954_v23 }
0x1f59   :  { %v3956_v44 = vadd.f32 1e-05, %v3955_v60 }
0x1f5a   :  { %v4085_v22 = vpop.xlane.xlu0 %4084 }
0x1f5b   :  { %v4086_v49 = vmul.f32 0.0625, %v4085_v22  ;;  %6612 = vrsqrt.f32 %v3956_v44 }
0x1f5d   :  { %v7939_v53 = vsub.f32 %v7871_v31, %v4086_v49 }
0x1f5f   :  { %v4088_v45 = vmul.f32 %v7939_v53, %v7939_v53 }
0x1f61   :  { %4090 = vrot.lane.b32.xlu1 %v4088_v45, %s6856_s20 }
0x1f68   :  { %v6613_v7 = vpop.eup %6612 }
0x1f7b   :  { %v3971_v47 = vpop.permute.xlu1 %3970 }
0x1f7c   :  { %v3973_v10 = vsel %vm718_vm6, %v3971_v47, 0.0 }
0x1f7f   :  { %v3991_v8 = vpop.permute.xlu1 %3990 }
0x1f80   :  { %v3993_v63 = vsel %vm718_vm6, %v3991_v8, 0.0 }
0x1f83   :  { %v4011_v37 = vpop.permute.xlu1 %4010 }
0x1f84   :  { %v4013_v56 = vsel %vm718_vm6, %v4011_v37, 0.0 }
0x1f85   :  { %3974 = vadd.xlane.f32.xlu1 %v3973_v10 }
0x1f87   :  { %v4031_v21 = vpop.permute.xlu1 %4030 }
0x1f88   :  { %v4033_v55 = vsel %vm718_vm6, %v4031_v21, 0.0 }
0x1f89   :  { %3994 = vadd.xlane.f32.xlu1 %v3993_v63  ;;  %v3958_v63 = vmul.f32 %v6613_v7, %v7896_v57 }
0x1f8b   :  { %v4051_v31 = vpop.permute.xlu1 %4050 }
0x1f8c   :  { %v4053_v38 = vsel %vm718_vm6, %v4051_v31, 0.0 }
0x1f8d   :  { %4014 = vadd.xlane.f32.xlu1 %v4013_v56 }
0x1f8f   :  { %v4071_v59 = vpop.permute.xlu1 %4070 }
0x1f90   :  { %v4073_v32 = vsel %vm718_vm6, %v4071_v59, 0.0 }
0x1f91   :  { %4034 = vadd.xlane.f32.xlu1 %v4033_v55 }
0x1f95   :  { %4054 = vadd.xlane.f32.xlu1 %v4053_v38 }
0x1f99   :  { %4074 = vadd.xlane.f32.xlu1 %v4073_v32 }
0x1fd3   :  { %v4091_v50 = vpop.permute.xlu1 %4090 }
0x1fd4   :  { %v4093_v17 = vsel %vm718_vm6, %v4091_v50, 0.0 }
0x1fd5   :  { %4094 = vadd.xlane.f32.xlu1 %v4093_v17 }
0x200e   :  { %v3975_v36 = vpop.xlane.xlu1 %3974 }
0x200f   :  { %v3976_v9 = vmul.f32 0.0625, %v3975_v36  ;;  %v7975_v36 = vld [vmem:[#allocation2 + $0x2] sm:$0xff] }
0x2011   :  { %v3977_v33 = vadd.f32 1e-05, %v3976_v9 }
0x2012   :  { %v3995_v24 = vpop.xlane.xlu1 %3994 }
0x2013   :  { %v3996_v61 = vmul.f32 0.0625, %v3995_v24  ;;  %6614 = vrsqrt.f32 %v3977_v33 }
0x2015   :  { %v3997_v14 = vadd.f32 1e-05, %v3996_v61  ;;  %v5894_v61 = vld [vmem:[#allocation2 + $0x35] ss:$0 sm:$0xff] }
0x2016   :  { %v4015_v25 = vpop.xlane.xlu1 %4014 }
0x2017   :  { %v4016_v2 = vmul.f32 0.0625, %v4015_v25  ;;  %6616 = vrsqrt.f32 %v3997_v14 }
0x2019   :  { %v4017_v1 = vadd.f32 1e-05, %v4016_v2 }
0x201a   :  { %v4035_v12 = vpop.xlane.xlu1 %4034 }
0x201b   :  { %v4036_v4 = vmul.f32 0.0625, %v4035_v12  ;;  %6618 = vrsqrt.f32 %v4017_v1 }
0x201d   :  { %v4037_v58 = vadd.f32 1e-05, %v4036_v4 }
0x201e   :  { %v4055_v62 = vpop.xlane.xlu1 %4054 }
0x201f   :  { %v4056_v13 = vmul.f32 0.0625, %v4055_v62  ;;  %6620 = vrsqrt.f32 %v4037_v58 }
0x2020   :  { %v6615_v23 = vpop.eup %6614 }
0x2021   :  { %v4057_v19 = vadd.f32 1e-05, %v4056_v13  ;;  %v3979_v47 = vmul.f32 %v6615_v23, %v7903_v41 }
0x2022   :  { %v4075_v18 = vpop.xlane.xlu1 %4074 }
0x2023   :  { %v4076_v46 = vmul.f32 0.0625, %v4075_v18  ;;  %6622 = vrsqrt.f32 %v4057_v19  ;;  %v4100_v31 = vsel %vm874_vm7, %v3958_v63, %v3979_v47 }
0x2024   :  { %v6617_v22 = vpop.eup %6616 }
0x2025   :  { %v4077_v11 = vadd.f32 1e-05, %v4076_v46  ;;  %v3999_v37 = vmul.f32 %v6617_v22, %v7908_v3 }
0x2027   :  { %6624 = vrsqrt.f32 %v4077_v11  ;;  %v4101_v38 = vsel %vm212_vm3, %v4100_v31, %v3999_v37 }
0x2028   :  { %v6619_v49 = vpop.eup %6618 }
0x2029   :  { %v4019_v21 = vmul.f32 %v6619_v49, %v7914_v51  ;;  %v5892_v51 = vld [vmem:[#allocation2 + $0x33] ss:$0 sm:$0xff] }
0x202b   :  { %v4102_v41 = vsel %vm877_vm8, %v4101_v38, %v4019_v21 }
0x202c   :  { %v6621_v45 = vpop.eup %6620 }
0x202d   :  { %v4039_v56 = vmul.f32 %v6621_v45, %v7920_v30 }
0x202f   :  { %v4103_v3 = vsel %vm674_vm5, %v4102_v41, %v4039_v56 }
0x2030   :  { %v6623_v8 = vpop.eup %6622 }
0x2031   :  { %v4059_v55 = vmul.f32 %v6623_v8, %v7926_v15 }
0x2033   :  { %v4104_v50 = vsel %vm880_vm9, %v4103_v3, %v4059_v55 }
0x2034   :  { %v6625_v10 = vpop.eup %6624 }
0x2035   :  { %v4079_v59 = vmul.f32 %v6625_v10, %v7932_v48 }
0x2037   :  { %v4105_v30 = vsel %vm882_vm10, %v4104_v50, %v4079_v59 }
0x205e   :  { %v4095_v40 = vpop.xlane.xlu1 %4094 }
0x205f   :  { %v4096_v20 = vmul.f32 0.0625, %v4095_v40 }
0x2061   :  { %v4097_v39 = vadd.f32 1e-05, %v4096_v20 }
0x2063   :  { %6626 = vrsqrt.f32 %v4097_v39 }
0x2070   :  { %v6627_v32 = vpop.eup %6626 }
0x2071   :  { %v4099_v57 = vmul.f32 %v6627_v32, %v7939_v53  ;;  %v332_v53 = vsub.s32 6, %v7087_v42 }
0x2073   :  { %v4106_v17 = vsel %vm884_vm11, %v4105_v30, %v4099_v57  ;;  %v333_v24 = vrot.slane %v7975_v36, %v332_v53 }
0x2074   :  { %v4114_v15 = vmul.f32 %v5892_v51, %v4106_v17 }
0x2075   :  { %v629_v12 = vadd.f32 %v7104_v28, %v333_v24 }
0x2076   :  { %v4122_v54 = vadd.f32 %v5893_v5, %v4114_v15 }
0x2078   :  { %v4123_v35 = vmin.f32 %v4122_v54, 20.0  ;;  %vm4129_vm13 = vcmp.gt.f32.partialorder %v4122_v54, 20.0 }
0x207a   :  { %v4124_v16 = vmul.f32 1.442695, %v4123_v35 }
0x207c   :  { %6628 = vpow2.f32 %v4124_v16 }
0x2089   :  { %v6629_v48 = vpop.eup %6628 }
0x208a   :  { %v4126_v26 = vadd.f32 1.0, %v6629_v48 }
0x208c   :  { %6630 = vlog2.f32 %v4126_v26 }
0x2099   :  { %v6631_v52 = vpop.eup %6630 }
0x209a   :  { %v4128_v34 = vmul.f32 0.6931472, %v6631_v52 }
0x209c   :  { %v4130_v6 = vsel %vm4129_vm13, %v4122_v54, %v4128_v34 }
0x209d   :  { %6632 = vtanh.f32 %v4130_v6 }
0x20aa   :  { %v6633_v25 = vpop.eup %6632 }
0x20ab   :  { %v4132_v62 = vmul.f32 %v6633_v25, %v4122_v54 }
0x20ad   :  { %v4133_v60 = vadd.f32 %v4132_v62, %v629_v12 }
0x20af   :  { %v4150_v9 = vpack.c.bf16 %v4133_v60, %v4133_v60 }
0x20b1   :  { %6237 = vmatmul.mubr.bf16.vlgmr.msra.gmra.mxu1 %v4150_v9 }
0x20b2   :  { %6256 = vmatprep.mubr.msk.bf16.mxu1 %vm6850_vm0, %v6849_v0 }
0x2171   :  { %v4240_v2 = vpop.f32.mrf.mxu1 }
0x2172   :  { %v7981_v18 = vadd.f32 %v5894_v61, %v4240_v2 }
0x2173   :  { %v6238_v44 = vpop.f32.mrf.mxu1 }
0x2174   :  { %4260 = vrot.lane.b32.xlu0 %v7981_v18, %s6852_s17  ;;  %v4246_v28 = vsel %vm718_vm6, %v7981_v18, 0.0 }
0x2175   :  { %v4243_v4 = vpop.f32.mrf.mxu1 }
0x2177   :  { %v6239_v33 = vpop.f32.mrf.mxu1 }
0x2178   :  { %4280 = vrot.lane.b32.xlu0 %v7981_v18, %s6854_s19 }
0x217c   :  { %4300 = vrot.lane.b32.xlu0 %v7981_v18, %s6851_s0 }
0x2180   :  { %4320 = vrot.lane.b32.xlu0 %v7981_v18, %s6853_s18 }
0x2184   :  { %4340 = vrot.lane.b32.xlu0 %v7981_v18, %s6855_s3 }
0x2188   :  { %4360 = vrot.lane.b32.xlu0 %v7981_v18, %s6840_s14 }
0x218c   :  { %4380 = vrot.lane.b32.xlu0 %v7981_v18, %s6856_s20 }
0x21ab   :  { %4247 = vadd.xlane.f32.xlu0 %v4246_v28 }
0x21e6   :  { %v4261_v13 = vpop.permute.xlu0 %4260 }
0x21e7   :  { %v4263_v14 = vsel %vm718_vm6, %v4261_v13, 0.0 }
0x21e8   :  { %4264 = vadd.xlane.f32.xlu1 %v4263_v14 }
0x21ea   :  { %v4281_v46 = vpop.permute.xlu0 %4280 }
0x21eb   :  { %v4283_v1 = vsel %vm718_vm6, %v4281_v46, 0.0 }
0x21ec   :  { %4284 = vadd.xlane.f32.xlu1 %v4283_v1 }
0x21ee   :  { %v4301_v58 = vpop.permute.xlu0 %4300 }
0x21ef   :  { %v4303_v19 = vsel %vm718_vm6, %v4301_v58, 0.0  ;;  %v6392_v58 = vld [vmem:[#allocation9 + $0x164] ss:$24 sps:$4 sm:$0xff]  }
0x21f0   :  { %4304 = vadd.xlane.f32.xlu1 %v4303_v19  ;;  %6241 = vmatpush3.bf16.msra.mxu1 %v6392_v58  ;;  %v6393_v19 = vld [vmem:[#allocation9 + $0x134] ss:$24 sps:$4 sm:$0xff]  }
0x21f1   :  { %6242 = vmatprep.subr.bf16.mxu1 %v6849_v0 }
0x21f2   :  { %v4321_v11 = vpop.permute.xlu0 %4320 }
0x21f3   :  { %v4323_v40 = vsel %vm718_vm6, %v4321_v11, 0.0  ;;  %v6394_v11 = vld [vmem:[#allocation9 + $0x104] ss:$24 sps:$4 sm:$0xff]  }
0x21f4   :  { %4324 = vadd.xlane.f32.xlu1 %v4323_v40  ;;  %6243 = vmatpush3.bf16.msra.mxu1 %v6393_v19  ;;  %v6395_v40 = vld [vmem:[#allocation9 + $0xd4] ss:$24 sps:$4 sm:$0xff]  }
0x21f5   :  { %6244 = vmatprep.subr.bf16.mxu1 %v6849_v0 }
0x21f6   :  { %v4341_v20 = vpop.permute.xlu0 %4340 }
0x21f7   :  { %v4343_v39 = vsel %vm718_vm6, %v4341_v20, 0.0  ;;  %v6396_v20 = vld [vmem:[#allocation9 + $0xa4] ss:$24 sps:$4 sm:$0xff]  }
0x21f8   :  { %4344 = vadd.xlane.f32.xlu1 %v4343_v39  ;;  %6245 = vmatpush3.bf16.msra.mxu1 %v6394_v11  ;;  %v6397_v39 = vld [vmem:[#allocation9 + $0x74] ss:$24 sps:$4 sm:$0xff]  }
0x21f9   :  { %6246 = vmatprep.subr.bf16.mxu1 %v6849_v0 }
0x21fa   :  { %v4361_v7 = vpop.permute.xlu0 %4360 }
0x21fb   :  { %v4363_v23 = vsel %vm718_vm6, %v4361_v7, 0.0  ;;  %v6398_v7 = vld [vmem:[#allocation9 + $0x44] ss:$24 sps:$4 sm:$0xff]  }
0x21fc   :  { %4364 = vadd.xlane.f32.xlu1 %v4363_v23  ;;  %6247 = vmatpush3.bf16.msra.mxu1 %v6395_v40  ;;  %v6399_v23 = vld [vmem:[#allocation9 + $0x14] ss:$24 sps:$4 sm:$0xff]  }
0x21fd   :  { %6248 = vmatprep.subr.bf16.mxu1 %v6849_v0 }
0x21fe   :  { %v4381_v22 = vpop.permute.xlu0 %4380 }
0x21ff   :  { %v4383_v49 = vsel %vm718_vm6, %v4381_v22, 0.0  ;;  %v4727_v22 = vld [vmem:[#allocation7 + $0xd8] sm:$0xf] }
0x2200   :  { %4384 = vadd.xlane.f32.xlu1 %v4383_v49  ;;  %6249 = vmatpush3.bf16.msra.mxu1 %v6396_v20  ;;  %v4728_v49 = vld [vmem:[#allocation7 + $0xf8] sm:$0xf] }
0x2201   :  { %6250 = vmatprep.subr.bf16.mxu1 %v6849_v0 }
0x2204   :  { %6251 = vmatpush3.bf16.msra.mxu1 %v6397_v39 }
0x2205   :  { %6252 = vmatprep.subr.bf16.mxu1 %v6849_v0 }
0x2208   :  { %6253 = vmatpush3.bf16.msra.mxu1 %v6398_v7 }
0x2209   :  { %6254 = vmatprep.subr.bf16.mxu1 %v6849_v0 }
0x220c   :  { %6255 = vmatpush3.bf16.msra.mxu1 %v6399_v23  ;;  %v5903_v23 = vld [vmem:[#allocation2 + $0x36] ss:$0 sm:$0xff] }
0x220d   :  { %6295 = vmatprep.subr.mxu1 %v6849_v0 }
0x2234   :  { %v4248_v45 = vpop.xlane.xlu0 %4247 }
0x2235   :  { %v4249_v47 = vmul.f32 0.0625, %v4248_v45  ;;  %v4725_v45 = vld [vmem:[#allocation7 + $0x98] sm:$0xf] }
0x2237   :  { %v8007_v8 = vsub.f32 %v7981_v18, %v4249_v47  ;;  %v5935_v47 = vcombine.low %v4727_v22, %v4728_v49  ;;  %v5904_v49 = vld [vmem:[#allocation2 + $0x37] ss:$0 sm:$0xff] }
0x2239   :  { %v4251_v37 = vmul.f32 %v8007_v8, %v8007_v8  ;;  %6261 = vmatpush3.bf16.msra.mxu0 %v5935_v47 }
0x223a   :  { %6262 = vmatprep.subr.bf16.mxu0 %v6849_v0 }
0x223b   :  { %v4252_v10 = vsel %vm718_vm6, %v4251_v37, 0.0  ;;  %v4726_v37 = vld [vmem:[#allocation7 + $0xb8] sm:$0xf] }
0x223c   :  { %4253 = vadd.xlane.f32.xlu0 %v4252_v10  ;;  %v5934_v10 = vcombine.low %v4725_v45, %v4726_v37 }
0x223e   :  { %6263 = vmatpush3.bf16.msra.mxu0 %v5934_v10 }
0x223f   :  { %6264 = vmatprep.subr.bf16.mxu0 %v6849_v0 }
0x2271   :  { %v4265_v63 = vpop.xlane.xlu1 %4264 }
0x2272   :  { %v4266_v21 = vmul.f32 0.0625, %v4265_v63  ;;  %v4723_v63 = vld [vmem:[#allocation7 + $0x58] sm:$0xf] }
0x2274   :  { %v8013_v56 = vsub.f32 %v7981_v18, %v4266_v21  ;;  %v4724_v21 = vld [vmem:[#allocation7 + $0x78] sm:$0xf] }
0x2275   :  { %v4285_v31 = vpop.xlane.xlu1 %4284 }
0x2276   :  { %v4268_v55 = vmul.f32 %v8013_v56, %v8013_v56  ;;  %v4286_v38 = vmul.f32 0.0625, %v4285_v31  ;;  %v5933_v31 = vcombine.low %v4723_v63, %v4724_v21 }
0x2278   :  { %v8018_v59 = vsub.f32 %v7981_v18, %v4286_v38  ;;  %4270 = vrot.lane.b32.xlu0 %v4268_v55, %s6852_s17  ;;  %6265 = vmatpush3.bf16.msra.mxu0 %v5933_v31 }
0x2279   :  { %v4305_v41 = vpop.xlane.xlu1 %4304  ;;  %6266 = vmatprep.subr.bf16.mxu0 %v6849_v0 }
0x227a   :  { %v4288_v32 = vmul.f32 %v8018_v59, %v8018_v59  ;;  %v4306_v3 = vmul.f32 0.0625, %v4305_v41 }
0x227c   :  { %v8024_v50 = vsub.f32 %v7981_v18, %v4306_v3  ;;  %4290 = vrot.lane.b32.xlu0 %v4288_v32, %s6854_s19 }
0x227d   :  { %v4325_v57 = vpop.xlane.xlu1 %4324 }
0x227e   :  { %v4308_v51 = vmul.f32 %v8024_v50, %v8024_v50  ;;  %v4326_v30 = vmul.f32 0.0625, %v4325_v57 }
0x2280   :  { %v8030_v17 = vsub.f32 %v7981_v18, %v4326_v30  ;;  %4310 = vrot.lane.b32.xlu0 %v4308_v51, %s6851_s0 }
0x2281   :  { %v4345_v5 = vpop.xlane.xlu1 %4344 }
0x2282   :  { %v4328_v15 = vmul.f32 %v8030_v17, %v8030_v17  ;;  %v4346_v54 = vmul.f32 0.0625, %v4345_v5 }
0x2284   :  { %v8036_v35 = vsub.f32 %v7981_v18, %v4346_v54  ;;  %4330 = vrot.lane.b32.xlu0 %v4328_v15, %s6853_s18 }
0x2285   :  { %v4365_v16 = vpop.xlane.xlu1 %4364 }
0x2286   :  { %v4348_v48 = vmul.f32 %v8036_v35, %v8036_v35  ;;  %v4366_v26 = vmul.f32 0.0625, %v4365_v16 }
0x2288   :  { %v8042_v52 = vsub.f32 %v7981_v18, %v4366_v26  ;;  %4350 = vrot.lane.b32.xlu0 %v4348_v48, %s6855_s3 }
0x2289   :  { %v4385_v34 = vpop.xlane.xlu1 %4384 }
0x228a   :  { %v4386_v6 = vmul.f32 0.0625, %v4385_v34  ;;  %v4368_v53 = vmul.f32 %v8042_v52, %v8042_v52 }
0x228c   :  { %v8048_v24 = vsub.f32 %v7981_v18, %v4386_v6  ;;  %4370 = vrot.lane.b32.xlu0 %v4368_v53, %s6840_s14  ;;  %s6858_s14 = smov 124  }
0x228e   :  { %v4388_v25 = vmul.f32 %v8048_v24, %v8048_v24 }
0x2290   :  { %4390 = vrot.lane.b32.xlu0 %v4388_v25, %s6856_s20 }
0x22c5   :  { %v8054_v12 = vpop.xlane.xlu0 %4253 }
0x22c6   :  { %v4255_v32 = vmul.f32 0.0625, %v8054_v12 }
0x22c8   :  { %v4256_v5 = vadd.f32 1e-05, %v4255_v32 }
0x22ca   :  { %6634 = vrsqrt.f32 %v4256_v5  ;;  %v5922_v5 = vld [vmem:[#allocation2 + $0x39] ss:$0 sm:$0xff] }
0x22ea   :  { %v4271_v62 = vpop.permute.xlu0 %4270 }
0x22eb   :  { %v4273_v60 = vsel %vm718_vm6, %v4271_v62, 0.0 }
0x22ec   :  { %4274 = vadd.xlane.f32.xlu1 %v4273_v60 }
0x22ee   :  { %v4291_v9 = vpop.permute.xlu0 %4290 }
0x22ef   :  { %v4293_v61 = vsel %vm718_vm6, %v4291_v9, 0.0 }
0x22f0   :  { %4294 = vadd.xlane.f32.xlu1 %v4293_v61 }
0x22f2   :  { %v4311_v2 = vpop.permute.xlu0 %4310 }
0x22f3   :  { %v4313_v18 = vsel %vm718_vm6, %v4311_v2, 0.0  ;;  %v6635_v2 = vpop.eup %6634 }
0x22f4   :  { %4314 = vadd.xlane.f32.xlu1 %v4313_v18 }
0x22f6   :  { %v4331_v44 = vpop.permute.xlu0 %4330 }
0x22f7   :  { %v4333_v4 = vsel %vm718_vm6, %v4331_v44, 0.0 }
0x22f8   :  { %4334 = vadd.xlane.f32.xlu1 %v4333_v4 }
0x22fa   :  { %v4351_v33 = vpop.permute.xlu0 %4350 }
0x22fb   :  { %v4353_v28 = vsel %vm718_vm6, %v4351_v33, 0.0 }
0x22fc   :  { %4354 = vadd.xlane.f32.xlu1 %v4353_v28 }
0x22fe   :  { %v4371_v13 = vpop.permute.xlu0 %4370 }
0x22ff   :  { %v4373_v14 = vsel %vm718_vm6, %v4371_v13, 0.0 }
0x2300   :  { %4374 = vadd.xlane.f32.xlu1 %v4373_v14 }
0x2302   :  { %v4391_v46 = vpop.permute.xlu0 %4390 }
0x2303   :  { %v4393_v1 = vsel %vm718_vm6, %v4391_v46, 0.0  ;;  %v4258_v46 = vmul.f32 %v6635_v2, %v8007_v8 }
0x2304   :  { %4394 = vadd.xlane.f32.xlu1 %v4393_v1 }
0x2375   :  { %v4275_v55 = vpop.xlane.xlu1 %4274 }
0x2376   :  { %v4276_v3 = vmul.f32 0.0625, %v4275_v55 }
0x2378   :  { %v4277_v54 = vadd.f32 1e-05, %v4276_v3 }
0x2379   :  { %v4295_v38 = vpop.xlane.xlu1 %4294 }
0x237a   :  { %v4296_v57 = vmul.f32 0.0625, %v4295_v38  ;;  %6636 = vrsqrt.f32 %v4277_v54 }
0x237c   :  { %v4297_v16 = vadd.f32 1e-05, %v4296_v57  ;;  %v4721_v57 = vld [vmem:[#allocation7 + $0x18] sm:$0xf] }
0x237d   :  { %v4315_v41 = vpop.xlane.xlu1 %4314 }
0x237e   :  { %v4316_v30 = vmul.f32 0.0625, %v4315_v41  ;;  %6638 = vrsqrt.f32 %v4297_v16 }
0x2380   :  { %v4317_v26 = vadd.f32 1e-05, %v4316_v30 }
0x2381   :  { %v4335_v51 = vpop.xlane.xlu1 %4334 }
0x2382   :  { %v4336_v15 = vmul.f32 0.0625, %v4335_v51  ;;  %6640 = vrsqrt.f32 %v4317_v26  ;;  %v4722_v51 = vld [vmem:[#allocation7 + $0x38] sm:$0xf] }
0x2383   :  { %v5932_v30 = vcombine.low %v4721_v57, %v4722_v51 }
0x2384   :  { %v4337_v6 = vadd.f32 1e-05, %v4336_v15 }
0x2385   :  { %v4355_v48 = vpop.xlane.xlu1 %4354  ;;  %6267 = vmatpush3.bf16.msra.mxu0 %v5932_v30 }
0x2386   :  { %v4356_v34 = vmul.f32 0.0625, %v4355_v48  ;;  %6642 = vrsqrt.f32 %v4337_v6  ;;  %6272 = vmatprep.subr.mxu0 %v6849_v0 }
0x2387   :  { %v6637_v18 = vpop.eup %6636 }
0x2388   :  { %v4357_v53 = vadd.f32 1e-05, %v4356_v34  ;;  %v4279_v28 = vmul.f32 %v6637_v18, %v8013_v56  ;;  %v5931_v34 = vld [vmem:[#allocation2 + $0x3a] ss:$0 sm:$0xff] }
0x2389   :  { %v4375_v25 = vpop.xlane.xlu1 %4374 }
0x238a   :  { %v4376_v62 = vmul.f32 0.0625, %v4375_v25  ;;  %6644 = vrsqrt.f32 %v4357_v53  ;;  %v4400_v11 = vsel %vm874_vm7, %v4258_v46, %v4279_v28 }
0x238b   :  { %v6639_v44 = vpop.eup %6638 }
0x238c   :  { %v4377_v12 = vadd.f32 1e-05, %v4376_v62  ;;  %v4299_v14 = vmul.f32 %v6639_v44, %v8018_v59 }
0x238d   :  { %v4395_v60 = vpop.xlane.xlu1 %4394 }
0x238e   :  { %6646 = vrsqrt.f32 %v4377_v12  ;;  %v4396_v9 = vmul.f32 0.0625, %v4395_v60  ;;  %v4401_v20 = vsel %vm212_vm3, %v4400_v11, %v4299_v14 }
0x238f   :  { %v6641_v4 = vpop.eup %6640 }
0x2390   :  { %v4397_v61 = vadd.f32 1e-05, %v4396_v9  ;;  %v4319_v1 = vmul.f32 %v6641_v4, %v8024_v50 }
0x2392   :  { %6648 = vrsqrt.f32 %v4397_v61  ;;  %v4402_v56 = vsel %vm877_vm8, %v4401_v20, %v4319_v1  ;;  %vm4804_vm8 = vcmask 25600  }
0x2393   :  { %v6643_v33 = vpop.eup %6642 }
0x2394   :  { %v4339_v19 = vmul.f32 %v6643_v33, %v8030_v17 }
0x2396   :  { %v4403_v59 = vsel %vm674_vm5, %v4402_v56, %v4339_v19 }
0x2397   :  { %v6645_v13 = vpop.eup %6644 }
0x2398   :  { %v4359_v40 = vmul.f32 %v6645_v13, %v8036_v35 }
0x239a   :  { %v4404_v8 = vsel %vm880_vm9, %v4403_v59, %v4359_v40  ;;  %vm4960_vm9 = vcmask 31744  }
0x239b   :  { %v6647_v58 = vpop.eup %6646 }
0x239c   :  { %v4379_v39 = vmul.f32 %v6647_v58, %v8042_v52 }
0x239e   :  { %v4405_v17 = vsel %vm882_vm10, %v4404_v8, %v4379_v39  ;;  %vm4963_vm10 = vcmask 97280  }
0x239f   :  { %v6649_v7 = vpop.eup %6648 }
0x23a0   :  { %v4399_v50 = vmul.f32 %v6649_v7, %v8048_v24  ;;  %v5905_v24 = vld [vmem:[#allocation2 + $0x38] ss:$0 sm:$0xff] }
0x23a1   :  { %v4603_v38 = vadd.f32 %v7869_v43, %v5905_v24 }
0x23a2   :  { %v4406_v22 = vsel %vm884_vm11, %v4405_v17, %v4399_v50  ;;  %vm4966_vm11 = vcmask 162816  }
0x23a3   :  { %v4414_v35 = vmul.f32 %v5903_v23, %v4406_v22 }
0x23a5   :  { %v4422_v45 = vadd.f32 %v5904_v49, %v4414_v35 }
0x23a7   :  { %v4423_v47 = vmin.f32 %v4422_v45, 20.0  ;;  %vm4429_vm6 = vcmp.gt.f32.partialorder %v4422_v45, 20.0 }
0x23a9   :  { %v4424_v37 = vmul.f32 1.442695, %v4423_v47 }
0x23ab   :  { %6650 = vpow2.f32 %v4424_v37 }
0x23b8   :  { %v6651_v52 = vpop.eup %6650 }
0x23b9   :  { %v4426_v10 = vadd.f32 1.0, %v6651_v52 }
0x23bb   :  { %6652 = vlog2.f32 %v4426_v10 }
0x23c8   :  { %v6653_v63 = vpop.eup %6652 }
0x23c9   :  { %v4428_v21 = vmul.f32 0.6931472, %v6653_v63 }
0x23cb   :  { %v4430_v31 = vsel %vm4429_vm6, %v4422_v45, %v4428_v21 }
0x23cc   :  { %6654 = vtanh.f32 %v4430_v31 }
0x23d9   :  { %v6655_v55 = vpop.eup %6654 }
0x23da   :  { %v4432_v41 = vmul.f32 %v6655_v55, %v4422_v45 }
0x23dc   :  { %v4608_v32 = vadd.f32 %v4603_v38, %v4432_v41 }
0x23de   :  { %v4625_v3 = vpack.c.bf16 %v4608_v32, %v4608_v32 }
0x23e0   :  { %6257 = vmatmul.mubr.bf16.vlgmr.msra.gmra.mxu1 %v4625_v3 }
0x23e1   :  { %6303 = vmatprep.mubr.msk.f32.mxu1 %vm6850_vm0, %v6849_v0 }
0x24a0   :  { %v4715_v15 = vpop.f32.mrf.mxu1 }
0x24a1   :  { %v4716_v54 = vadd.f32 %v5922_v5, %v4715_v15 }
0x24a2   :  { %v6258_v16 = vpop.f32.mrf.mxu1 }
0x24a3   :  { %v8094_v48 = vpack.c.bf16 %v4716_v54, %v4716_v54 }
0x24a4   :  { %v4718_v43 = vpop.f32.mrf.mxu1 }
0x24a5   :  { %6269 = vmatmul.mubr.msk.bf16.vlgmr.msra.gmra.mxu0 %vm674_vm5, %v8094_v48 }
0x24a6   :  { %v6259_v26 = vpop.f32.mrf.mxu1  ;;  %6280 = vmatprep.mubr.msk.f32.mxu0 %vm6850_vm0, %v6849_v0 }
0x2565   :  { %v4798_v6 = vpop.f32.mrf.mxu0 }
0x2566   :  { %v8100_v53 = vadd.f32 %v5931_v34, %v4798_v6 }
0x2567   :  { %v6270_v25 = vpop.f32.mrf.mxu0 }
0x2568   :  { %4820 = vrot.lane.b32.xlu1 %v8100_v53, %s6858_s14  ;;  %v4805_v62 = vsel %vm4804_vm8, %v8100_v53, 0.0 }
0x2569   :  { %4806 = vadd.xlane.f32.xlu0 %v4805_v62  ;;  %v4801_v12 = vpop.f32.mrf.mxu0 }
0x256b   :  { %v6271_v60 = vpop.f32.mrf.mxu0 }
0x256c   :  { %4840 = vrot.lane.b32.xlu1 %v8100_v53, %s6859_s21 }
0x2570   :  { %4860 = vrot.lane.b32.xlu1 %v8100_v53, %s6860_s22 }
0x2574   :  { %4880 = vrot.lane.b32.xlu1 %v8100_v53, %s6852_s17 }
0x2578   :  { %4900 = vrot.lane.b32.xlu1 %v8100_v53, %s6861_s23 }
0x257c   :  { %4920 = vrot.lane.b32.xlu1 %v8100_v53, %s6862_s5 }
0x2580   :  { %4940 = vrot.lane.b32.xlu1 %v8100_v53, %s6863_s24 }
0x25da   :  { %v4821_v9 = vpop.permute.xlu1 %4820 }
0x25db   :  { %v4823_v61 = vsel %vm4804_vm8, %v4821_v9, 0.0 }
0x25dc   :  { %4824 = vadd.xlane.f32.xlu1 %v4823_v61 }
0x25de   :  { %v4841_v2 = vpop.permute.xlu1 %4840 }
0x25df   :  { %v4843_v18 = vsel %vm4804_vm8, %v4841_v2, 0.0 }
0x25e0   :  { %4844 = vadd.xlane.f32.xlu1 %v4843_v18 }
0x25e2   :  { %v4861_v44 = vpop.permute.xlu1 %4860 }
0x25e3   :  { %v4863_v4 = vsel %vm4804_vm8, %v4861_v44, 0.0  ;;  %v5002_v44 = vld [vmem:[#allocation6 + $0x80] sm:$0xff] }
0x25e4   :  { %4864 = vadd.xlane.f32.xlu1 %v4863_v4  ;;  %v5001_v4 = vld [vmem:[#allocation6 + $0x58] sm:$0xff]  ;;  %6273 = vmatpush3.msra.mxu0 %v5002_v44 }
0x25e5   :  { %6274 = vmatprep.subr.mxu0 %v6849_v0 }
0x25e6   :  { %v4881_v33 = vpop.permute.xlu1 %4880  ;;  %6275 = vmatpush3.msra.mxu0 %v5001_v4 }
0x25e7   :  { %v4883_v28 = vsel %vm4804_vm8, %v4881_v33, 0.0  ;;  %v5000_v33 = vld [vmem:[#allocation6 + $0x30] sm:$0xff]  ;;  %6276 = vmatprep.subr.mxu0 %v6849_v0 }
0x25e8   :  { %4884 = vadd.xlane.f32.xlu1 %v4883_v28  ;;  %v4999_v28 = vld [vmem:[#allocation6 + $0x8] sm:$0xff]  ;;  %6277 = vmatpush3.msra.mxu0 %v5000_v33 }
0x25e9   :  { %6278 = vmatprep.subr.mxu0 %v6849_v0 }
0x25ea   :  { %v4901_v13 = vpop.permute.xlu1 %4900  ;;  %6279 = vmatpush3.msra.mxu0 %v4999_v28 }
0x25eb   :  { %v4903_v14 = vsel %vm4804_vm8, %v4901_v13, 0.0  ;;  %6283 = vmatprep.subr.bf16.mxu0 %v6849_v0 }
0x25ec   :  { %4904 = vadd.xlane.f32.xlu1 %v4903_v14 }
0x25ee   :  { %v4921_v46 = vpop.permute.xlu1 %4920 }
0x25ef   :  { %v4923_v1 = vsel %vm4804_vm8, %v4921_v46, 0.0 }
0x25f0   :  { %4924 = vadd.xlane.f32.xlu1 %v4923_v1 }
0x25f2   :  { %v4807_v58 = vpop.xlane.xlu0 %4806  ;;  %v4941_v39 = vpop.permute.xlu1 %4940 }
0x25f3   :  { %v4809_v19 = vmul.f32 0.25, %v4807_v58  ;;  %v4943_v56 = vsel %vm4804_vm8, %v4941_v39, 0.0 }
0x25f5   :  { %v8125_v11 = vsub.f32 %v8100_v53, %v4809_v19 }
0x25f7   :  { %v4811_v40 = vmul.f32 %v8125_v11, %v8125_v11 }
0x25f9   :  { %v4812_v20 = vsel %vm4804_vm8, %v4811_v40, 0.0 }
0x25fa   :  { %4813 = vadd.xlane.f32.xlu1 %v4812_v20 }
0x25fe   :  { %4944 = vadd.xlane.f32.xlu1 %v4943_v56 }
0x2665   :  { %v4825_v7 = vpop.xlane.xlu1 %4824 }
0x2666   :  { %v4826_v59 = vmul.f32 0.25, %v4825_v7 }
0x2668   :  { %v8132_v8 = vsub.f32 %v8100_v53, %v4826_v59 }
0x2669   :  { %v4845_v50 = vpop.xlane.xlu1 %4844 }
0x266a   :  { %v4828_v23 = vmul.f32 %v8132_v8, %v8132_v8  ;;  %v4846_v17 = vmul.f32 0.25, %v4845_v50 }
0x266c   :  { %v8137_v22 = vsub.f32 %v8100_v53, %v4846_v17  ;;  %4830 = vrot.lane.b32.xlu0 %v4828_v23, %s6858_s14 }
0x266d   :  { %v4865_v49 = vpop.xlane.xlu1 %4864 }
0x266e   :  { %v4848_v35 = vmul.f32 %v8137_v22, %v8137_v22  ;;  %v4866_v45 = vmul.f32 0.25, %v4865_v49 }
0x2670   :  { %v8143_v47 = vsub.f32 %v8100_v53, %v4866_v45  ;;  %4850 = vrot.lane.b32.xlu0 %v4848_v35, %s6859_s21 }
0x2671   :  { %v4885_v37 = vpop.xlane.xlu1 %4884 }
0x2672   :  { %v4868_v52 = vmul.f32 %v8143_v47, %v8143_v47  ;;  %v4886_v10 = vmul.f32 0.25, %v4885_v37 }
0x2674   :  { %v8149_v63 = vsub.f32 %v8100_v53, %v4886_v10  ;;  %4870 = vrot.lane.b32.xlu0 %v4868_v52, %s6860_s22 }
0x2675   :  { %v4905_v21 = vpop.xlane.xlu1 %4904 }
0x2676   :  { %v4888_v31 = vmul.f32 %v8149_v63, %v8149_v63  ;;  %v4906_v24 = vmul.f32 0.25, %v4905_v21 }
0x2678   :  { %v8155_v55 = vsub.f32 %v8100_v53, %v4906_v24  ;;  %4890 = vrot.lane.b32.xlu0 %v4888_v31, %s6852_s17 }
0x2679   :  { %v4925_v38 = vpop.xlane.xlu1 %4924 }
0x267a   :  { %v4908_v41 = vmul.f32 %v8155_v55, %v8155_v55  ;;  %v4926_v32 = vmul.f32 0.25, %v4925_v38 }
0x267c   :  { %v8161_v3 = vsub.f32 %v8100_v53, %v4926_v32  ;;  %4910 = vrot.lane.b32.xlu0 %v4908_v41, %s6861_s23 }
0x267e   :  { %v4928_v57 = vmul.f32 %v8161_v3, %v8161_v3 }
0x2680   :  { %4930 = vrot.lane.b32.xlu0 %v4928_v57, %s6862_s5 }
0x2683   :  { %v4814_v51 = vpop.xlane.xlu1 %4813 }
0x2684   :  { %v4815_v19 = vmul.f32 0.25, %v4814_v51 }
0x2686   :  { %v4816_v7 = vadd.f32 1e-05, %v4815_v19 }
0x2687   :  { %v4945_v30 = vpop.xlane.xlu1 %4944 }
0x2688   :  { %v4946_v5 = vmul.f32 0.25, %v4945_v30  ;;  %6656 = vrsqrt.f32 %v4816_v7 }
0x268a   :  { %v8168_v15 = vsub.f32 %v8100_v53, %v4946_v5 }
0x268c   :  { %v4948_v54 = vmul.f32 %v8168_v15, %v8168_v15 }
0x268e   :  { %4950 = vrot.lane.b32.xlu0 %v4948_v54, %s6863_s24 }
0x2695   :  { %v6657_v24 = vpop.eup %6656 }
0x26de   :  { %v4831_v16 = vpop.permute.xlu0 %4830 }
0x26df   :  { %v4833_v43 = vsel %vm4804_vm8, %v4831_v16, 0.0  ;;  %v4818_v16 = vmul.f32 %v6657_v24, %v8125_v11 }
0x26e0   :  { %4834 = vadd.xlane.f32.xlu0 %v4833_v43 }
0x26e2   :  { %v4851_v26 = vpop.permute.xlu0 %4850 }
0x26e3   :  { %v4853_v34 = vsel %vm4804_vm8, %v4851_v26, 0.0 }
0x26e4   :  { %4854 = vadd.xlane.f32.xlu0 %v4853_v34 }
0x26e6   :  { %v4871_v6 = vpop.permute.xlu0 %4870 }
0x26e7   :  { %v4873_v25 = vsel %vm4804_vm8, %v4871_v6, 0.0 }
0x26e8   :  { %4874 = vadd.xlane.f32.xlu0 %v4873_v25 }
0x26ea   :  { %v4891_v62 = vpop.permute.xlu0 %4890 }
0x26eb   :  { %v4893_v53 = vsel %vm4804_vm8, %v4891_v62, 0.0 }
0x26ec   :  { %4894 = vadd.xlane.f32.xlu0 %v4893_v53  ;;  %v5937_v53 = vld [vmem:[#allocation2 + $0x3b] ss:$0 sm:$0xff] }
0x26ee   :  { %v4911_v12 = vpop.permute.xlu0 %4910 }
0x26ef   :  { %v4913_v60 = vsel %vm4804_vm8, %v4911_v12, 0.0 }
0x26f0   :  { %4914 = vadd.xlane.f32.xlu0 %v4913_v60  ;;  %v5938_v60 = vld [vmem:[#allocation2 + $0x3c] ss:$0 sm:$0xff] }
0x26f2   :  { %v4931_v9 = vpop.permute.xlu0 %4930 }
0x26f3   :  { %v4933_v61 = vsel %vm4804_vm8, %v4931_v9, 0.0 }
0x26f4   :  { %4934 = vadd.xlane.f32.xlu0 %v4933_v61 }
0x2700   :  { %v4951_v2 = vpop.permute.xlu0 %4950 }
0x2701   :  { %v4953_v18 = vsel %vm4804_vm8, %v4951_v2, 0.0 }
0x2702   :  { %4954 = vadd.xlane.f32.xlu0 %v4953_v18 }
0x2769   :  { %v4835_v13 = vpop.xlane.xlu0 %4834 }
0x276a   :  { %v4836_v40 = vmul.f32 0.25, %v4835_v13 }
0x276c   :  { %v4837_v50 = vadd.f32 1e-05, %v4836_v40 }
0x276d   :  { %v4855_v14 = vpop.xlane.xlu0 %4854 }
0x276e   :  { %v4856_v20 = vmul.f32 0.25, %v4855_v14  ;;  %6658 = vrsqrt.f32 %v4837_v50  ;;  %v5276_v14 = vld [vmem:[#allocation7 + $0xdc] sm:$0xf] }
0x276f   :  { %v5271_v50 = vld [vmem:[#allocation7 + $0x3c] sm:$0xf] }
0x2770   :  { %v4857_v17 = vadd.f32 1e-05, %v4856_v20 }
0x2771   :  { %v4875_v46 = vpop.xlane.xlu0 %4874 }
0x2772   :  { %v4876_v39 = vmul.f32 0.25, %v4875_v46  ;;  %6660 = vrsqrt.f32 %v4857_v17  ;;  %v5277_v46 = vld [vmem:[#allocation7 + $0xfc] sm:$0xf]  ;;  %v5939_v17 = vld [vmem:[#allocation2 + $0x3d] ss:$0 sm:$0xff] }
0x2773   :  { %v5947_v40 = vcombine.low %v5276_v14, %v5277_v46 }
0x2774   :  { %v4877_v35 = vadd.f32 1e-05, %v4876_v39  ;;  %v5274_v39 = vld [vmem:[#allocation7 + $0x9c] sm:$0xf] }
0x2775   :  { %v4895_v1 = vpop.xlane.xlu0 %4894 }
0x2776   :  { %v4896_v59 = vmul.f32 0.25, %v4895_v1  ;;  %6662 = vrsqrt.f32 %v4877_v35 }
0x2778   :  { %v4897_v45 = vadd.f32 1e-05, %v4896_v59 }
0x2779   :  { %v4915_v58 = vpop.xlane.xlu0 %4914 }
0x277a   :  { %v4916_v23 = vmul.f32 0.25, %v4915_v58  ;;  %6664 = vrsqrt.f32 %v4897_v45 }
0x277b   :  { %v6659_v38 = vpop.eup %6658 }
0x277c   :  { %v4917_v37 = vadd.f32 1e-05, %v4916_v23  ;;  %v4839_v51 = vmul.f32 %v6659_v38, %v8132_v8 }
0x277d   :  { %v4935_v56 = vpop.xlane.xlu0 %4934 }
0x277e   :  { %v4936_v49 = vmul.f32 0.25, %v4935_v56  ;;  %6666 = vrsqrt.f32 %v4917_v37  ;;  %v4961_v34 = vsel %vm4960_vm9, %v4818_v16, %v4839_v51  ;;  %v5275_v56 = vld [vmem:[#allocation7 + $0xbc] sm:$0xf] }
0x277f   :  { %v6661_v41 = vpop.eup %6660  ;;  %v5946_v7 = vcombine.low %v5274_v39, %v5275_v56 }
0x2780   :  { %v4937_v52 = vadd.f32 1e-05, %v4936_v49  ;;  %v4859_v5 = vmul.f32 %v6661_v41, %v8137_v22 }
0x2782   :  { %6668 = vrsqrt.f32 %v4937_v52  ;;  %v4962_v25 = vsel %vm117_vm1, %v4961_v34, %v4859_v5 }
0x2783   :  { %v6663_v32 = vpop.eup %6662 }
0x2784   :  { %v4879_v43 = vmul.f32 %v6663_v32, %v8143_v47 }
0x2786   :  { %v4964_v62 = vsel %vm4963_vm10, %v4962_v25, %v4879_v43 }
0x2787   :  { %v6665_v57 = vpop.eup %6664 }
0x2788   :  { %v4899_v26 = vmul.f32 %v6665_v57, %v8149_v63 }
0x278a   :  { %v4965_v11 = vsel %vm874_vm7, %v4964_v62, %v4899_v26 }
0x278b   :  { %v4955_v10 = vpop.xlane.xlu0 %4954  ;;  %v6667_v30 = vpop.eup %6666 }
0x278c   :  { %v4956_v21 = vmul.f32 0.25, %v4955_v10  ;;  %v4919_v6 = vmul.f32 %v6667_v30, %v8155_v55 }
0x278e   :  { %v4957_v31 = vadd.f32 1e-05, %v4956_v21  ;;  %v4967_v47 = vsel %vm4966_vm11, %v4965_v11, %v4919_v6 }
0x278f   :  { %v6669_v54 = vpop.eup %6668 }
0x2790   :  { %6670 = vrsqrt.f32 %v4957_v31  ;;  %v4939_v8 = vmul.f32 %v6669_v54, %v8161_v3 }
0x2792   :  { %v4969_v12 = vsel %vm4968_vm14, %v4967_v47, %v4939_v8 }
0x279d   :  { %v6671_v22 = vpop.eup %6670 }
0x279e   :  { %v4959_v63 = vmul.f32 %v6671_v22, %v8168_v15  ;;  %v336_v15 = vsub.s32 7, %v7087_v42  ;;  %v5272_v42 = vld [vmem:[#allocation7 + $0x5c] sm:$0xf] }
0x27a0   :  { %v4971_v55 = vsel %vm4970_vm15, %v4969_v12, %v4959_v63  ;;  %v337_v13 = vrot.slane %v7975_v36, %v336_v15  ;;  %v5273_v36 = vld [vmem:[#allocation7 + $0x7c] sm:$0xf] }
0x27a1   :  { %v4979_v9 = vmul.f32 %v5937_v53, %v4971_v55  ;;  %v5945_v59 = vcombine.low %v5272_v42, %v5273_v36 }
0x27a2   :  { %v631_v58 = vadd.f32 %v7106_v29, %v337_v13  ;;  %v5270_v29 = vld [vmem:[#allocation7 + $0x1c] sm:$0xf] }
0x27a3   :  { %v4987_v61 = vadd.f32 %v5938_v60, %v4979_v9  ;;  %v5944_v23 = vcombine.low %v5270_v29, %v5271_v50 }
0x27a5   :  { %v4988_v3 = vmin.f32 %v4987_v61, 20.0  ;;  %vm4994_vm4 = vcmp.gt.f32.partialorder %v4987_v61, 20.0 }
0x27a7   :  { %v4989_v2 = vmul.f32 1.442695, %v4988_v3 }
0x27a9   :  { %6672 = vpow2.f32 %v4989_v2 }
0x27b6   :  { %v6673_v18 = vpop.eup %6672 }
0x27b7   :  { %v4991_v44 = vadd.f32 1.0, %v6673_v18 }
0x27b9   :  { %6674 = vlog2.f32 %v4991_v44 }
0x27c6   :  { %v6675_v4 = vpop.eup %6674 }
0x27c7   :  { %v4993_v33 = vmul.f32 0.6931472, %v6675_v4 }
0x27c9   :  { %v4995_v28 = vsel %vm4994_vm4, %v4987_v61, %v4993_v33 }
0x27ca   :  { %6676 = vtanh.f32 %v4995_v28 }
0x27d7   :  { %v6677_v1 = vpop.eup %6676 }
0x27d8   :  { %v4997_v19 = vmul.f32 %v6677_v1, %v4987_v61 }
0x27da   :  { %v4998_v20 = vadd.f32 %v4997_v19, %v631_v58 }
0x27dc   :  { %6281 = vmatmul.mubr.msk.f32.vlgmr.msra.gmra.mxu0 %vm212_vm3, %v4998_v20 }
0x27dd   :  { %6284 = vmatpush3.bf16.msra.mxu0 %v5947_v40  ;;  %6291 = vmatprep.mubr.msk.bf16.mxu0 %vm6850_vm0, %v6849_v0 }
0x27de   :  { %6285 = vmatprep.subr.bf16.mxu0 %v6849_v0 }
0x27e1   :  { %6286 = vmatpush3.bf16.msra.mxu0 %v5946_v7 }
0x27e2   :  { %6287 = vmatprep.subr.bf16.mxu0 %v6849_v0 }
0x27e5   :  { %6288 = vmatpush3.bf16.msra.mxu0 %v5945_v59 }
0x27e6   :  { %6289 = vmatprep.subr.bf16.mxu0 %v6849_v0 }
0x27e9   :  { %6290 = vmatpush3.bf16.msra.mxu0 %v5944_v23 }
0x27ea   :  { %6318 = vmatprep.subr.mxu0 %v6849_v0 }
0x27ec   :  { %6292 = vmatmul.mubr.msk.bf16.vlgmr.msra.gmra.mxu0 %vm674_vm5, %v8094_v48 }
0x27ed   :  { %6322 = vmatprep.mubr.msk.f32.mxu0 %vm6850_vm0, %v6849_v0 }
0x289c   :  { %v5079_v49 = vpop.f32.mrf.mxu0 }
0x289d   :  { %v8213_v35 = vadd.f32 %v5939_v17, %v5079_v49 }
0x289e   :  { %v6282_v45 = vpop.f32.mrf.mxu0 }
0x289f   :  { %5097 = vrot.lane.b32.xlu1 %v8213_v35, %s6858_s14  ;;  %v5083_v21 = vsel %vm4804_vm8, %v8213_v35, 0.0 }
0x28a3   :  { %5117 = vrot.lane.b32.xlu1 %v8213_v35, %s6859_s21 }
0x28a7   :  { %5137 = vrot.lane.b32.xlu1 %v8213_v35, %s6860_s22 }
0x28ab   :  { %5157 = vrot.lane.b32.xlu1 %v8213_v35, %s6852_s17 }
0x28ac   :  { %v8223_v48 = vpop.f32.mrf.mxu0 }
0x28ae   :  { %v6293_v37 = vpop.f32.mrf.mxu0 }
0x28af   :  { %5177 = vrot.lane.b32.xlu1 %v8213_v35, %s6861_s23 }
0x28b0   :  { %v5346_v52 = vpop.f32.mrf.mxu0 }
0x28b2   :  { %v6294_v10 = vpop.f32.mrf.mxu0 }
0x28b3   :  { %5197 = vrot.lane.b32.xlu1 %v8213_v35, %s6862_s5 }
0x28b7   :  { %5217 = vrot.lane.b32.xlu1 %v8213_v35, %s6863_s24 }
0x28db   :  { %5084 = vadd.xlane.f32.xlu1 %v5083_v21 }
0x2911   :  { %v5098_v31 = vpop.permute.xlu1 %5097 }
0x2912   :  { %v5100_v24 = vsel %vm4804_vm8, %v5098_v31, 0.0 }
0x2913   :  { %5101 = vadd.xlane.f32.xlu1 %v5100_v24  ;;  %v5353_v24 = vld [vmem:[#allocation6 + $0x88] sm:$0xff] }
0x2914   :  { %6296 = vmatpush3.msra.mxu1 %v5353_v24 }
0x2915   :  { %v5118_v38 = vpop.permute.xlu1 %5117  ;;  %6297 = vmatprep.subr.mxu1 %v6849_v0 }
0x2916   :  { %v5120_v41 = vsel %vm4804_vm8, %v5118_v38, 0.0  ;;  %v5352_v38 = vld [vmem:[#allocation6 + $0x60] sm:$0xff] }
0x2917   :  { %5121 = vadd.xlane.f32.xlu1 %v5120_v41  ;;  %v5351_v41 = vld [vmem:[#allocation6 + $0x38] sm:$0xff]  ;;  %6298 = vmatpush3.msra.mxu1 %v5352_v38  ;;  %v5943_v38 = vld [vmem:[#allocation2 + $0x40] ss:$0 sm:$0xff] }
0x2918   :  { %6299 = vmatprep.subr.mxu1 %v6849_v0 }
0x2919   :  { %v5138_v32 = vpop.permute.xlu1 %5137  ;;  %6300 = vmatpush3.msra.mxu1 %v5351_v41  ;;  %v5344_v41 = vadd.f32 %v5943_v38, %v8223_v48  ;;  %v5434_v48 = vld [vmem:[#allocation6 + $0x18] sm:$0xff] }
0x291a   :  { %v5140_v57 = vsel %vm4804_vm8, %v5138_v32, 0.0  ;;  %v5350_v32 = vld [vmem:[#allocation6 + $0x10] sm:$0xff]  ;;  %6301 = vmatprep.subr.mxu1 %v6849_v0 }
0x291b   :  { %5141 = vadd.xlane.f32.xlu1 %v5140_v57  ;;  %6302 = vmatpush3.msra.mxu1 %v5350_v32 }
0x291c   :  { %6306 = vmatprep.subr.mxu1 %v6849_v0 }
0x291d   :  { %v5158_v51 = vpop.permute.xlu1 %5157 }
0x291e   :  { %v5160_v30 = vsel %vm4804_vm8, %v5158_v51, 0.0 }
0x291f   :  { %5161 = vadd.xlane.f32.xlu1 %v5160_v30 }
0x2921   :  { %v5178_v5 = vpop.permute.xlu1 %5177 }
0x2922   :  { %v5180_v54 = vsel %vm4804_vm8, %v5178_v5, 0.0 }
0x2923   :  { %5181 = vadd.xlane.f32.xlu1 %v5180_v54 }
0x2925   :  { %v5198_v16 = vpop.permute.xlu1 %5197 }
0x2926   :  { %v5200_v43 = vsel %vm4804_vm8, %v5198_v16, 0.0 }
0x2927   :  { %5201 = vadd.xlane.f32.xlu1 %v5200_v43 }
0x2929   :  { %v5218_v26 = vpop.permute.xlu1 %5217 }
0x292a   :  { %v5220_v22 = vsel %vm4804_vm8, %v5218_v26, 0.0 }
0x2964   :  { %v5085_v34 = vpop.xlane.xlu1 %5084 }
0x2965   :  { %v5086_v6 = vmul.f32 0.25, %v5085_v34 }
0x2967   :  { %v8240_v25 = vsub.f32 %v8213_v35, %v5086_v6 }
0x2969   :  { %v5088_v8 = vmul.f32 %v8240_v25, %v8240_v25 }
0x296b   :  { %v5089_v62 = vsel %vm4804_vm8, %v5088_v8, 0.0 }
0x296c   :  { %5090 = vadd.xlane.f32.xlu1 %v5089_v62 }
0x2970   :  { %5221 = vadd.xlane.f32.xlu1 %v5220_v22 }
0x299c   :  { %v5102_v11 = vpop.xlane.xlu1 %5101 }
0x299d   :  { %v5103_v47 = vmul.f32 0.25, %v5102_v11 }
0x299f   :  { %v8247_v53 = vsub.f32 %v8213_v35, %v5103_v47 }
0x29a0   :  { %v5122_v63 = vpop.xlane.xlu1 %5121 }
0x29a1   :  { %v5105_v12 = vmul.f32 %v8247_v53, %v8247_v53  ;;  %v5123_v55 = vmul.f32 0.25, %v5122_v63 }
0x29a3   :  { %v8252_v60 = vsub.f32 %v8213_v35, %v5123_v55  ;;  %5107 = vrot.lane.b32.xlu0 %v5105_v12, %s6858_s14 }
0x29a4   :  { %v5142_v9 = vpop.xlane.xlu1 %5141 }
0x29a5   :  { %v5125_v61 = vmul.f32 %v8252_v60, %v8252_v60  ;;  %v5143_v3 = vmul.f32 0.25, %v5142_v9 }
0x29a7   :  { %v8258_v2 = vsub.f32 %v8213_v35, %v5143_v3  ;;  %5127 = vrot.lane.b32.xlu0 %v5125_v61, %s6859_s21 }
0x29a8   :  { %v5162_v18 = vpop.xlane.xlu1 %5161 }
0x29a9   :  { %v5145_v44 = vmul.f32 %v8258_v2, %v8258_v2  ;;  %v5163_v4 = vmul.f32 0.25, %v5162_v18 }
0x29ab   :  { %v8264_v33 = vsub.f32 %v8213_v35, %v5163_v4  ;;  %5147 = vrot.lane.b32.xlu0 %v5145_v44, %s6860_s22 }
0x29ac   :  { %v5182_v28 = vpop.xlane.xlu1 %5181 }
0x29ad   :  { %v5165_v15 = vmul.f32 %v8264_v33, %v8264_v33  ;;  %v5183_v13 = vmul.f32 0.25, %v5182_v28 }
0x29af   :  { %v8270_v14 = vsub.f32 %v8213_v35, %v5183_v13  ;;  %5167 = vrot.lane.b32.xlu0 %v5165_v15, %s6852_s17 }
0x29b0   :  { %v5202_v46 = vpop.xlane.xlu1 %5201 }
0x29b1   :  { %v5185_v1 = vmul.f32 %v8270_v14, %v8270_v14  ;;  %v5203_v58 = vmul.f32 0.25, %v5202_v46 }
0x29b3   :  { %v8276_v19 = vsub.f32 %v8213_v35, %v5203_v58  ;;  %5187 = vrot.lane.b32.xlu0 %v5185_v1, %s6861_s23 }
0x29b5   :  { %v5205_v40 = vmul.f32 %v8276_v19, %v8276_v19 }
0x29b7   :  { %5207 = vrot.lane.b32.xlu0 %v5205_v40, %s6862_s5 }
0x29f5   :  { %v5091_v20 = vpop.xlane.xlu1 %5090 }
0x29f6   :  { %v5092_v16 = vmul.f32 0.25, %v5091_v20 }
0x29f8   :  { %v5093_v8 = vadd.f32 1e-05, %v5092_v16 }
0x29f9   :  { %v5222_v39 = vpop.xlane.xlu1 %5221 }
0x29fa   :  { %v5223_v56 = vmul.f32 0.25, %v5222_v39  ;;  %6678 = vrsqrt.f32 %v5093_v8 }
0x29fc   :  { %v8283_v7 = vsub.f32 %v8213_v35, %v5223_v56 }
0x29fe   :  { %v5225_v42 = vmul.f32 %v8283_v7, %v8283_v7 }
0x2a00   :  { %5227 = vrot.lane.b32.xlu0 %v5225_v42, %s6863_s24 }
0x2a07   :  { %v6679_v4 = vpop.eup %6678 }
0x2a08   :  { %v5095_v39 = vmul.f32 %v6679_v4, %v8240_v25  ;;  %v5941_v25 = vld [vmem:[#allocation2 + $0x3e] ss:$0 sm:$0xff] }
0x2a15   :  { %v5108_v36 = vpop.permute.xlu0 %5107 }
0x2a16   :  { %v5110_v50 = vsel %vm4804_vm8, %v5108_v36, 0.0 }
0x2a19   :  { %v5128_v59 = vpop.permute.xlu0 %5127 }
0x2a1a   :  { %v5130_v23 = vsel %vm4804_vm8, %v5128_v59, 0.0 }
0x2a1d   :  { %v5148_v29 = vpop.permute.xlu0 %5147 }
0x2a1e   :  { %v5150_v49 = vsel %vm4804_vm8, %v5148_v29, 0.0 }
0x2a1f   :  { %5111 = vadd.xlane.f32.xlu0 %v5110_v50 }
0x2a21   :  { %v5168_v17 = vpop.permute.xlu0 %5167 }
0x2a22   :  { %v5170_v45 = vsel %vm4804_vm8, %v5168_v17, 0.0 }
0x2a23   :  { %5131 = vadd.xlane.f32.xlu0 %v5130_v23 }
0x2a25   :  { %v5188_v35 = vpop.permute.xlu0 %5187 }
0x2a26   :  { %v5190_v37 = vsel %vm4804_vm8, %v5188_v35, 0.0  ;;  %v5942_v35 = vld [vmem:[#allocation2 + $0x3f] ss:$0 sm:$0xff] }
0x2a27   :  { %5151 = vadd.xlane.f32.xlu0 %v5150_v49 }
0x2a29   :  { %v5208_v52 = vpop.permute.xlu0 %5207 }
0x2a2a   :  { %v5210_v10 = vsel %vm4804_vm8, %v5208_v52, 0.0 }
0x2a2b   :  { %5171 = vadd.xlane.f32.xlu0 %v5170_v45 }
0x2a2f   :  { %5191 = vadd.xlane.f32.xlu0 %v5190_v37 }
0x2a33   :  { %5211 = vadd.xlane.f32.xlu0 %v5210_v10 }
0x2a72   :  { %v5228_v21 = vpop.permute.xlu0 %5227 }
0x2a73   :  { %v5230_v31 = vsel %vm4804_vm8, %v5228_v21, 0.0 }
0x2a74   :  { %5231 = vadd.xlane.f32.xlu0 %v5230_v31 }
0x2aa8   :  { %v5112_v57 = vpop.xlane.xlu0 %5111 }
0x2aa9   :  { %v5113_v43 = vmul.f32 0.25, %v5112_v57 }
0x2aab   :  { %v5114_v22 = vadd.f32 1e-05, %v5113_v43 }
0x2aac   :  { %v5132_v51 = vpop.xlane.xlu0 %5131 }
0x2aad   :  { %v5133_v26 = vmul.f32 0.25, %v5132_v51  ;;  %6680 = vrsqrt.f32 %v5114_v22  ;;  %v5436_v51 = vld [vmem:[#allocation4 + $0x48] sm:$0xff] }
0x2aaf   :  { %v5134_v47 = vadd.f32 1e-05, %v5133_v26 }
0x2ab0   :  { %v5152_v30 = vpop.xlane.xlu0 %5151 }
0x2ab1   :  { %v5153_v34 = vmul.f32 0.25, %v5152_v30  ;;  %6682 = vrsqrt.f32 %v5134_v47  ;;  %v5435_v30 = vld [vmem:[#allocation6 + $0x40] sm:$0xff] }
0x2ab3   :  { %v5154_v12 = vadd.f32 1e-05, %v5153_v34 }
0x2ab4   :  { %v5172_v5 = vpop.xlane.xlu0 %5171 }
0x2ab5   :  { %v5173_v62 = vmul.f32 0.25, %v5172_v5  ;;  %6684 = vrsqrt.f32 %v5154_v12  ;;  %v5949_v5 = vld [vmem:[#allocation2 + $0x41] ss:$0 sm:$0xff] }
0x2ab7   :  { %v5174_v55 = vadd.f32 1e-05, %v5173_v62  ;;  %v5953_v62 = vld [vmem:[#allocation2 + $0x42] ss:$0 sm:$0xff] }
0x2ab8   :  { %v5192_v54 = vpop.xlane.xlu0 %5191 }
0x2ab9   :  { %v5193_v11 = vmul.f32 0.25, %v5192_v54  ;;  %6686 = vrsqrt.f32 %v5174_v55 }
0x2aba   :  { %v6681_v28 = vpop.eup %6680 }
0x2abb   :  { %v5194_v9 = vadd.f32 1e-05, %v5193_v11  ;;  %v5116_v1 = vmul.f32 %v6681_v28, %v8247_v53 }
0x2abc   :  { %v5212_v6 = vpop.xlane.xlu0 %5211 }
0x2abd   :  { %v5213_v63 = vmul.f32 0.25, %v5212_v6  ;;  %6688 = vrsqrt.f32 %v5194_v9  ;;  %v5237_v36 = vsel %vm4960_vm9, %v5095_v39, %v5116_v1  ;;  %v5602_v6 = vld [vmem:[#allocation6 + $0x48] sm:$0xf] }
0x2abe   :  { %v6683_v15 = vpop.eup %6682 }
0x2abf   :  { %v5214_v61 = vadd.f32 1e-05, %v5213_v63  ;;  %v5136_v40 = vmul.f32 %v6683_v15, %v8252_v60 }
0x2ac1   :  { %6690 = vrsqrt.f32 %v5214_v61  ;;  %v5238_v29 = vsel %vm117_vm1, %v5237_v36, %v5136_v40 }
0x2ac2   :  { %v6685_v13 = vpop.eup %6684 }
0x2ac3   :  { %v5156_v56 = vmul.f32 %v6685_v13, %v8258_v2 }
0x2ac5   :  { %v5239_v53 = vsel %vm4963_vm10, %v5238_v29, %v5156_v56 }
0x2ac6   :  { %v6687_v46 = vpop.eup %6686 }
0x2ac7   :  { %v5176_v42 = vmul.f32 %v6687_v46, %v8264_v33 }
0x2ac9   :  { %v5240_v60 = vsel %vm874_vm7, %v5239_v53, %v5176_v42 }
0x2aca   :  { %v6689_v58 = vpop.eup %6688 }
0x2acb   :  { %v5196_v59 = vmul.f32 %v6689_v58, %v8270_v14 }
0x2acd   :  { %v5241_v17 = vsel %vm4966_vm11, %v5240_v60, %v5196_v59 }
0x2ace   :  { %v6691_v20 = vpop.eup %6690 }
0x2acf   :  { %v5216_v50 = vmul.f32 %v6691_v20, %v8276_v19 }
0x2ad1   :  { %v5242_v33 = vsel %vm4968_vm14, %v5241_v17, %v5216_v50 }
0x2afd   :  { %v5232_v3 = vpop.xlane.xlu0 %5231 }
0x2afe   :  { %v5233_v18 = vmul.f32 0.25, %v5232_v3 }
0x2b00   :  { %v5234_v44 = vadd.f32 1e-05, %v5233_v18 }
0x2b02   :  { %6692 = vrsqrt.f32 %v5234_v44 }
0x2b0f   :  { %v6693_v23 = vpop.eup %6692 }
0x2b10   :  { %v5236_v2 = vmul.f32 %v6693_v23, %v8283_v7 }
0x2b12   :  { %v5243_v49 = vsel %vm4970_vm15, %v5242_v33, %v5236_v2 }
0x2b13   :  { %v5251_v14 = vmul.f32 %v5941_v25, %v5243_v49 }
0x2b15   :  { %v5259_v45 = vadd.f32 %v5942_v35, %v5251_v14 }
0x2b17   :  { %v5260_v37 = vmin.f32 %v5259_v45, 20.0  ;;  %vm5266_vm5 = vcmp.gt.f32.partialorder %v5259_v45, 20.0 }
0x2b19   :  { %v5261_v52 = vmul.f32 1.442695, %v5260_v37 }
0x2b1b   :  { %6694 = vpow2.f32 %v5261_v52 }
0x2b28   :  { %v6695_v19 = vpop.eup %6694 }
0x2b29   :  { %v5263_v10 = vadd.f32 1.0, %v6695_v19 }
0x2b2b   :  { %6696 = vlog2.f32 %v5263_v10 }
0x2b38   :  { %v6697_v21 = vpop.eup %6696 }
0x2b39   :  { %v5265_v31 = vmul.f32 0.6931472, %v6697_v21 }
0x2b3b   :  { %v5267_v24 = vsel %vm5266_vm5, %v5259_v45, %v5265_v31 }
0x2b3c   :  { %6698 = vtanh.f32 %v5267_v24 }
0x2b49   :  { %v6699_v7 = vpop.eup %6698 }
0x2b4a   :  { %v5269_v32 = vmul.f32 %v6699_v7, %v5259_v45 }
0x2b4c   :  { %v5349_v57 = vadd.f32 %v5344_v41, %v5269_v32 }
0x2b4e   :  { %6304 = vmatmul.mubr.msk.f32.vlgmr.msra.gmra.mxu1 %vm212_vm3, %v5349_v57  ;;  %vm5613_vm3 = vcmask 1043456  }
0x2b4f   :  { %6307 = vmatpush3.msra.mxu1 %v5436_v51  ;;  %6308 = vmatprep.mubr.msk.f32.mxu1 %vm6850_vm0, %v6849_v0 }
0x2b50   :  { %6311 = vmatprep.subr.mxu1 %v6849_v0  ;;  %6319 = vmatpush3.msk.msra.mxu0 %vm5613_vm3, %v5602_v6 }
0x2b51   :  { %6320 = vmatprep.subr.mxu0 %v6849_v0 }
0x2b52   :  { %6309 = vmatmul.mubr.msk.f32.vlgmr.msra.gmra.mxu1 %vm117_vm1, %v6950_v27  ;;  %v5601_v27 = vld [vmem:[#allocation6 + $0x20] sm:$0xff]  ;;  %vm5687_vm1 = vcmask 1024  }
0x2b53   :  { %6312 = vmatpush3.msra.mxu1 %v5435_v30  ;;  %6315 = vmatprep.mubr.msk.f32.mxu1 %vm6850_vm0, %v6849_v0 }
0x2b54   :  { %6313 = vmatprep.subr.mxu1 %v6849_v0  ;;  %6321 = vmatpush3.msra.mxu0 %v5601_v27  ;;  %v5954_v0 = vld [vmem:[#allocation2 + $0x43] ss:$0 sm:$0xff] }
0x2b55   :  { %6314 = vmatpush3.msra.mxu1 %v5434_v48 }
0x2c0e   :  { %v5430_v54 = vpop.f32.mrf.mxu1 }
0x2c0f   :  { %v5431_v16 = vadd.f32 %v5949_v5, %v5430_v54 }
0x2c10   :  { %v6305_v43 = vpop.f32.mrf.mxu1 }
0x2c11   :  { %6316 = vmatmul.mubr.msk.f32.vlgmr.msra.gmra.mxu1 %vm874_vm7, %v5431_v16 }
0x2c12   :  { %v5506_v26 = vpop.f32.mrf.mxu1 }
0x2c14   :  { %v6310_v34 = vpop.f32.mrf.mxu1 }
0x2cd1   :  { %v5579_v8 = vpop.f32.mrf.mxu1 }
0x2cd2   :  { %v5580_v22 = vadd.f32 %v5579_v8, %v5506_v26 }
0x2cd3   :  { %v6317_v11 = vpop.f32.mrf.mxu1 }
0x2cd4   :  { %v5590_v47 = vadd.f32 %v5953_v62, %v5580_v22 }
0x2cd6   :  { %v5591_v63 = vmin.f32 %v5590_v47, 20.0  ;;  %vm5597_vm0 = vcmp.gt.f32.partialorder %v5590_v47, 20.0 }
0x2cd8   :  { %v5592_v12 = vmul.f32 1.442695, %v5591_v63 }
0x2cda   :  { %6700 = vpow2.f32 %v5592_v12 }
0x2ce7   :  { %v6701_v55 = vpop.eup %6700 }
0x2ce8   :  { %v5594_v9 = vadd.f32 1.0, %v6701_v55 }
0x2cea   :  { %6702 = vlog2.f32 %v5594_v9 }
0x2cf7   :  { %v6703_v61 = vpop.eup %6702 }
0x2cf8   :  { %v5596_v3 = vmul.f32 0.6931472, %v6703_v61 }
0x2cfa   :  { %v5598_v18 = vsel %vm5597_vm0, %v5590_v47, %v5596_v3 }
0x2cfb   :  { %6704 = vtanh.f32 %v5598_v18 }
0x2d08   :  { %v6705_v44 = vpop.eup %6704 }
0x2d09   :  { %v5600_v4 = vmul.f32 %v6705_v44, %v5590_v47 }
0x2d0b   :  { %6323 = vmatmul.mubr.msk.f32.vlgmr.msra.gmra.mxu0 %vm4963_vm10, %v5600_v4 }
0x2dcb   :  { %v5683_v28 = vpop.f32.mrf.mxu0 }
0x2dcc   :  { %v5684_v15 = vadd.f32 %v5954_v0, %v5683_v28 }
0x2dcd   :  { %v6324_v13 = vpop.f32.mrf.mxu0 }
0x2dce   :  { %5688 = vst.msk [vmem:[%s8338_s8] sm:$0x3] %vm5687_vm1, %v5684_v15 }
0x2dcf   :  { %5693 = vsyncpa [#allocation3], 1 }
0x2dd0   :  { %5694 = vsyncpa [#allocation5], 1 }
0x2dd1   :  { %5695 = vsyncpa [#allocation8], 1 }
0x2dd2   :  { %5696 = vsyncpa [#allocation11], 1 }

</bundles_post_ra>
